<compile_context>
chip_gen: v6e
topology: v6e:2x2x1
jax: 0.10.0
libtpu: 0.0.40
codegen_flags: <defaults>
</compile_context>

<pallas_src>
import jax
import jax.numpy as jnp
from jax.experimental import pallas as pl
from jax.experimental.pallas import tpu as pltpu


def multiemb_kernel(
    # per-batch-tile data
    lens_ref,                        # [TB, 4] int32: tok_len, ast_len, cfg_len, pad
    tok_feat_ref,                    # [TB, S,  H] bf16
    ast_feat_ref,                    # [TB, NA, H] bf16
    cfg_feat_ref,                    # [TB, NC, H] bf16
    desc_anchor_ref, desc_neg_ref,   # [TB, H] bf16
    # attention parameters (weights pre-transposed to [in, out]); resident
    w_tok_ref, b_tok_ref, ws_tok_ref,    # [H,H] bf16, [1,H] f32, [1,H] f32
    w_ast_ref, b_ast_ref, ws_ast_ref,
    w_cfg_ref, b_cfg_ref, ws_cfg_ref,
    # modal fusion, split into three [H,H] f32 blocks (tok / ast / cfg) + bias
    w_fuse_tok_ref, w_fuse_ast_ref, w_fuse_cfg_ref, b_fuse_ref,
    # scalar config in SMEM: [bs_tok, bs_ast, bs_cfg, margin]
    scalars_ref,
    # output: per-sample hinge, broadcast across 128 lanes  [TB, 128]
    hinge_ref,
):
    f32 = jnp.float32
    neg_inf = jnp.float32(-1e30)

    lens = lens_ref[...]                                   # [TB, 4] int32
    TB = lens.shape[0]

    def prefix_mask(n, length_col):
        # length_col: [TB, 1] int32 -> bool [TB, n]
        idx = jax.lax.broadcasted_iota(jnp.int32, (TB, n), 1)
        return idx < length_col

    def scores(feat, w_ref, b_ref, ws_ref, bs):
        # feat: [TB, S, H] bf16 -> attention scores [TB, S] f32
        tb, s_len, h_dim = feat.shape
        # native bf16 MXU matmul, f32 accumulate (M = TB*S fills the MXU).
        h = jnp.tanh(
            jnp.dot(feat.reshape(tb * s_len, h_dim), w_ref[...],
                    preferred_element_type=f32) + b_ref[...]
        )                                                   # [TB*S, H] f32
        s = jnp.sum(h * ws_ref[...], axis=-1, keepdims=True) + bs
        return s.reshape(tb, s_len)

    def pool(weights, feat):
        # weights [TB, S] f32, feat [TB, S, H] bf16 -> [TB, H] f32.
        # VPU multiply + cheap sublane reduce; avoids TB degenerate (M=1)
        # MXU matmuls that waste >99% of the array.
        return jnp.sum(weights[:, :, None] * feat.astype(f32), axis=1)

    def softmax_pool(feat, mask, w_ref, b_ref, ws_ref, bs):
        s = scores(feat, w_ref, b_ref, ws_ref, bs)
        s = jnp.where(mask, s, neg_inf)
        e = jnp.where(mask, jnp.exp(s - jnp.max(s, axis=1, keepdims=True)), 0.0)
        # Guarded denominator (harness guarantees >=1 valid position, but be
        # robust); approx reciprocal runs on the EUP slot.
        denom = jnp.maximum(jnp.sum(e, axis=1, keepdims=True), jnp.float32(1e-30))
        w = e * pl.reciprocal(denom, approx=True)
        return pool(w, feat)

    # ---- Token attention: masked softmax pooling --------------------------
    tok_feat = tok_feat_ref[...]
    tok_mask = prefix_mask(tok_feat.shape[1], lens[:, 0:1])
    tok_pool = softmax_pool(tok_feat, tok_mask,
                            w_tok_ref, b_tok_ref, ws_tok_ref, scalars_ref[0])

    # ---- AST attention: masked softmax pooling -----------------------------
    ast_feat = ast_feat_ref[...]
    ast_mask = prefix_mask(ast_feat.shape[1], lens[:, 1:2])
    ast_pool = softmax_pool(ast_feat, ast_mask,
                            w_ast_ref, b_ast_ref, ws_ast_ref, scalars_ref[1])

    # ---- CFG attention: masked sigmoid pooling (no normalization) ----------
    cfg_feat = cfg_feat_ref[...]
    cfg_mask = prefix_mask(cfg_feat.shape[1], lens[:, 2:3])
    cfg_s = scores(cfg_feat, w_cfg_ref, b_cfg_ref, ws_cfg_ref, scalars_ref[2])
    cfg_w = jnp.where(cfg_mask, jax.nn.sigmoid(cfg_s), 0.0)
    cfg_pool = pool(cfg_w, cfg_feat)

    # ---- Modal fusion: three accumulated [TB,H]x[H,H] matmuls (no concat) --
    code = jnp.tanh(
        jnp.dot(tok_pool, w_fuse_tok_ref[...], preferred_element_type=f32)
        + jnp.dot(ast_pool, w_fuse_ast_ref[...], preferred_element_type=f32)
        + jnp.dot(cfg_pool, w_fuse_cfg_ref[...], preferred_element_type=f32)
        + b_fuse_ref[...]
    )                                                       # [TB, H] f32

    # ---- Description encodings (tanh of final hidden states, f32 math) -----
    d_a = jnp.tanh(desc_anchor_ref[...].astype(f32))
    d_n = jnp.tanh(desc_neg_ref[...].astype(f32))

    # ---- Cosine similarity + margin ranking hinge (per sample) -------------
    eps_sq = jnp.float32(1e-16)                             # (1e-8)^2

    def cos_sim(a, b):
        num = jnp.sum(a * b, axis=1, keepdims=True)
        den_sq = (jnp.sum(a * a, axis=1, keepdims=True)
                  * jnp.sum(b * b, axis=1, keepdims=True))
        return num * jax.lax.rsqrt(jnp.maximum(den_sq, eps_sq))  # [TB, 1]

    margin = scalars_ref[3]
    hinge = jnp.maximum(margin - cos_sim(code, d_a) + cos_sim(code, d_n),
                        jnp.float32(1e-6))                  # [TB, 1]
    # Lane-dense per-sample output; reduced (mean over B) outside the kernel.
    hinge_ref[...] = jnp.broadcast_to(hinge, hinge_ref.shape).astype(f32)


def multiembeder_forward(tok_feat, tok_len, ast_feat, ast_len,
                         cfg_feat, cfg_len, desc_anchor_hid, desc_neg_hid,
                         params, margin, *, batch_tile=32):
    B, S, H = tok_feat.shape
    NA = ast_feat.shape[1]
    NC = cfg_feat.shape[1]
    TB = min(batch_tile, B)
    assert B % TB == 0, "batch must be a multiple of the batch tile"
    nb = B // TB

    bf16, f32 = jnp.bfloat16, jnp.float32

    # Feature tensors travel HBM->VMEM in bf16 (halves DMA traffic on this
    # memory-bound kernel); masks are replaced by int32 lengths.
    tok_feat = tok_feat.astype(bf16)
    ast_feat = ast_feat.astype(bf16)
    cfg_feat = cfg_feat.astype(bf16)
    desc_anchor_hid = desc_anchor_hid.astype(bf16)
    desc_neg_hid = desc_neg_hid.astype(bf16)
    w_tok = params["w_tok"].astype(bf16)
    w_ast = params["w_ast"].astype(bf16)
    w_cfg = params["w_cfg"].astype(bf16)

    # Split the fusion weight [3H, H] into three per-modality blocks
    # (concat order in the reference model is [tok, ast, cfg]).
    w_fuse = params["w_fuse"].astype(f32)
    w_fuse_tok = w_fuse[:H]
    w_fuse_ast = w_fuse[H:2 * H]
    w_fuse_cfg = w_fuse[2 * H:]

    # Per-sample valid lengths -> one tiny int32 array (masks built in-kernel).
    lens = jnp.stack(
        [tok_len.astype(jnp.int32), ast_len.astype(jnp.int32),
         cfg_len.astype(jnp.int32), jnp.zeros((B,), jnp.int32)], axis=1)  # [B,4]

    # Scalar biases + margin -> one tiny SMEM array.
    scalars = jnp.stack([params["bs_tok"], params["bs_ast"], params["bs_cfg"],
                         jnp.asarray(margin, f32)]).astype(f32)

    feat3 = lambda n: pl.BlockSpec((TB, n, H), lambda b: (b, 0, 0))
    vec2 = pl.BlockSpec((TB, H), lambda b: (b, 0))
    lens_spec = pl.BlockSpec((TB, 4), lambda b: (b, 0))
    w_hh = pl.BlockSpec((H, H), lambda b: (0, 0))      # resident weights
    w_1h = pl.BlockSpec((1, H), lambda b: (0, 0))
    smem = pl.BlockSpec(memory_space=pltpu.MemorySpace.SMEM)

    in_specs = [
        lens_spec,                   # per-sample valid lengths
        feat3(S), feat3(NA), feat3(NC),
        vec2, vec2,                  # desc anchor / neg hidden states
        w_hh, w_1h, w_1h,            # tok attention
        w_hh, w_1h, w_1h,            # ast attention
        w_hh, w_1h, w_1h,            # cfg attention
        w_hh, w_hh, w_hh, w_1h,      # modal fusion (split) + bias
        smem,                        # [bs_tok, bs_ast, bs_cfg, margin]
    ]

    hinges = pl.pallas_call(
        multiemb_kernel,
        out_shape=jax.ShapeDtypeStruct((B, 128), jnp.float32),
        grid=(nb,),
        in_specs=in_specs,
        out_specs=pl.BlockSpec((TB, 128), lambda b: (b, 0)),
        compiler_params=pltpu.CompilerParams(
            dimension_semantics=("parallel",),
            # 48 MiB keeps headroom on v7x's 64 MiB physical VMEM; v5e/v6e
            # (128 MiB) could go higher if TB is raised further.
            vmem_limit_bytes=48 * 1024 * 1024,
        ),
    )(lens, tok_feat, ast_feat, cfg_feat, desc_anchor_hid, desc_neg_hid,
      w_tok, params["b_tok"], params["ws_tok"],
      w_ast, params["b_ast"], params["ws_ast"],
      w_cfg, params["b_cfg"], params["ws_cfg"],
      w_fuse_tok, w_fuse_ast, w_fuse_cfg, params["b_fuse"],
      scalars)

    # Final mean over the batch (tiny; done in plain JAX).
    return jnp.mean(hinges[:, 0])


def make_params(key, n_hidden):
    ks = jax.random.split(key, 7)
    H = n_hidden

    def lin(k, fan_in, fan_out):
        # nn.Linear weight [out, in]; store transposed [in, out] for x @ W_T.
        scale = 1.0 / jnp.sqrt(fan_in)
        kw, kb = jax.random.split(k)
        w = jax.random.uniform(kw, (fan_in, fan_out), jnp.float32, -scale, scale)
        b = jax.random.uniform(kb, (fan_out,), jnp.float32, -scale, scale)
        return w, b

    p = {}
    w, b = lin(ks[0], H, H); p["w_tok"], p["b_tok"] = w, b.reshape(1, H)
    w, b = lin(ks[1], H, 1); p["ws_tok"], p["bs_tok"] = w.reshape(1, H), b.reshape(())
    w, b = lin(ks[2], H, H); p["w_ast"], p["b_ast"] = w, b.reshape(1, H)
    w, b = lin(ks[3], H, 1); p["ws_ast"], p["bs_ast"] = w.reshape(1, H), b.reshape(())
    w, b = lin(ks[4], H, H); p["w_cfg"], p["b_cfg"] = w, b.reshape(1, H)
    w, b = lin(ks[5], H, 1); p["ws_cfg"], p["bs_cfg"] = w.reshape(1, H), b.reshape(())
    w, b = lin(ks[6], 3 * H, H); p["w_fuse"], p["b_fuse"] = w, b.reshape(1, H)
    return p


def reference_forward(tok_feat, tok_len, ast_feat, ast_len,
                      cfg_feat, cfg_len, d_a_hid, d_n_hid, p, margin):
    def mask_from_len(n, ln):
        return (jnp.arange(n)[None, :] < ln[:, None]).astype(jnp.float32)

    def pool(feat, mask, w, b, ws, bs, mode):
        B, S, H = feat.shape
        h = jnp.tanh(feat.reshape(-1, H) @ w + b)
        s = (jnp.sum(h * ws, axis=-1) + bs).reshape(B, S)
        if mode == "softmax":
            s = jnp.where(mask > 0, s, -1e30)
            e = jnp.exp(s - jnp.max(s, axis=1, keepdims=True)) * mask
            wgt = e / jnp.sum(e, axis=1, keepdims=True)
        else:
            wgt = jax.nn.sigmoid(s) * mask
        return jnp.sum(wgt[:, :, None] * feat, axis=1)

    tok_mask = mask_from_len(tok_feat.shape[1], tok_len)
    ast_mask = mask_from_len(ast_feat.shape[1], ast_len)
    cfg_mask = mask_from_len(cfg_feat.shape[1], cfg_len)
    tok = pool(tok_feat, tok_mask, p["w_tok"], p["b_tok"], p["ws_tok"], p["bs_tok"], "softmax")
    ast = pool(ast_feat, ast_mask, p["w_ast"], p["b_ast"], p["ws_ast"], p["bs_ast"], "softmax")
    cfg = pool(cfg_feat, cfg_mask, p["w_cfg"], p["b_cfg"], p["ws_cfg"], p["bs_cfg"], "sigmoid")
    code = jnp.tanh(jnp.concatenate([tok, ast, cfg], axis=1) @ p["w_fuse"] + p["b_fuse"])
    d_a, d_n = jnp.tanh(d_a_hid), jnp.tanh(d_n_hid)

    def cos(a, b):
        return jnp.sum(a * b, 1) / jnp.maximum(
            jnp.linalg.norm(a, axis=1) * jnp.linalg.norm(b, axis=1), 1e-8)

    return jnp.mean(jnp.maximum(margin - cos(code, d_a) + cos(code, d_n), 1e-6))


if __name__ == "__main__":
    # Lane/MXU/bf16-friendly sizes: H multiple of 128, seq/node dims multiples
    # of 16, batch tile 32 (2 grid steps so the pipeline is exercised).
    B, S, NA, NC, H = 64, 16, 16, 16, 128
    margin = 0.6

    key = jax.random.PRNGKey(0)
    k_feat, k_len, k_param = jax.random.split(key, 3)
    kf = jax.random.split(k_feat, 5)
    kl = jax.random.split(k_len, 3)

    tok_feat = jax.random.normal(kf[0], (B, S, H), jnp.float32)
    ast_feat = jax.random.normal(kf[1], (B, NA, H), jnp.float32)
    cfg_feat = jax.random.normal(kf[2], (B, NC, H), jnp.float32)
    desc_anchor_hid = jax.random.normal(kf[3], (B, H), jnp.float32)
    desc_neg_hid = jax.random.normal(kf[4], (B, H), jnp.float32)

    # Variable valid lengths (>= 1 per sample, so no fully-masked rows).
    tok_len = jax.random.randint(kl[0], (B,), 1, S + 1)
    ast_len = jax.random.randint(kl[1], (B,), 1, NA + 1)
    cfg_len = jax.random.randint(kl[2], (B,), 1, NC + 1)

    params = make_params(k_param, H)

    loss = multiembeder_forward(tok_feat, tok_len, ast_feat, ast_len,
                                cfg_feat, cfg_len, desc_anchor_hid,
                                desc_neg_hid, params, margin, batch_tile=32)
    loss = jax.block_until_ready(loss)

    # Reference computed on the same bf16-rounded features / attention weights
    # the kernel sees, so the only deviations are MXU default-precision fusion
    # math, approx reciprocal and accumulation order.
    rnd = lambda x: x.astype(jnp.bfloat16).astype(jnp.float32)
    p_ref = dict(params)
    p_ref["w_tok"] = rnd(params["w_tok"])
    p_ref["w_ast"] = rnd(params["w_ast"])
    p_ref["w_cfg"] = rnd(params["w_cfg"])
    ref = reference_forward(rnd(tok_feat), tok_len, rnd(ast_feat), ast_len,
                            rnd(cfg_feat), cfg_len, rnd(desc_anchor_hid),
                            rnd(desc_neg_hid), p_ref, margin)

    assert jnp.allclose(loss, ref, atol=5e-3, rtol=5e-3), (loss, ref)
    print("KERNEL_OK")
</pallas_src>

<mosaic_0001>
module attributes {stable_mosaic.version = 11 : i64} {
  func.func @multiemb_kernel(%arg0: i32, %arg1: memref<32x4xi32, #tpu.memory_space<vmem>>, %arg2: memref<32x16x128xbf16, #tpu.memory_space<vmem>>, %arg3: memref<32x16x128xbf16, #tpu.memory_space<vmem>>, %arg4: memref<32x16x128xbf16, #tpu.memory_space<vmem>>, %arg5: memref<32x128xbf16, #tpu.memory_space<vmem>>, %arg6: memref<32x128xbf16, #tpu.memory_space<vmem>>, %arg7: memref<128x128xbf16, #tpu.memory_space<vmem>>, %arg8: memref<1x128xf32, #tpu.memory_space<vmem>>, %arg9: memref<1x128xf32, #tpu.memory_space<vmem>>, %arg10: memref<128x128xbf16, #tpu.memory_space<vmem>>, %arg11: memref<1x128xf32, #tpu.memory_space<vmem>>, %arg12: memref<1x128xf32, #tpu.memory_space<vmem>>, %arg13: memref<128x128xbf16, #tpu.memory_space<vmem>>, %arg14: memref<1x128xf32, #tpu.memory_space<vmem>>, %arg15: memref<1x128xf32, #tpu.memory_space<vmem>>, %arg16: memref<128x128xf32, #tpu.memory_space<vmem>>, %arg17: memref<128x128xf32, #tpu.memory_space<vmem>>, %arg18: memref<128x128xf32, #tpu.memory_space<vmem>>, %arg19: memref<1x128xf32, #tpu.memory_space<vmem>>, %arg20: memref<4xf32, #tpu.memory_space<smem>>, %arg21: memref<32x128xf32, #tpu.memory_space<vmem>>) attributes {dimension_semantics = [#tpu.dimension_semantics<parallel>], iteration_bounds = array<i64: 2>, scalar_prefetch = 0 : i64, scratch_operands = 0 : i64, tpu.core_type = #tpu.core_type<tc>, window_params = [{transform_indices = @transform_0, window_bounds = array<i64: 32, 4>}, {transform_indices = @transform_1, window_bounds = array<i64: 32, 16, 128>}, {transform_indices = @transform_2, window_bounds = array<i64: 32, 16, 128>}, {transform_indices = @transform_3, window_bounds = array<i64: 32, 16, 128>}, {transform_indices = @transform_4, window_bounds = array<i64: 32, 128>}, {transform_indices = @transform_5, window_bounds = array<i64: 32, 128>}, {pipeline_mode = #tpu.pipeline_mode<synchronous>, transform_indices = @transform_6, window_bounds = array<i64: 128, 128>}, {pipeline_mode = #tpu.pipeline_mode<synchronous>, transform_indices = @transform_7, window_bounds = array<i64: 1, 128>}, {pipeline_mode = #tpu.pipeline_mode<synchronous>, transform_indices = @transform_8, window_bounds = array<i64: 1, 128>}, {pipeline_mode = #tpu.pipeline_mode<synchronous>, transform_indices = @transform_9, window_bounds = array<i64: 128, 128>}, {pipeline_mode = #tpu.pipeline_mode<synchronous>, transform_indices = @transform_10, window_bounds = array<i64: 1, 128>}, {pipeline_mode = #tpu.pipeline_mode<synchronous>, transform_indices = @transform_11, window_bounds = array<i64: 1, 128>}, {pipeline_mode = #tpu.pipeline_mode<synchronous>, transform_indices = @transform_12, window_bounds = array<i64: 128, 128>}, {pipeline_mode = #tpu.pipeline_mode<synchronous>, transform_indices = @transform_13, window_bounds = array<i64: 1, 128>}, {pipeline_mode = #tpu.pipeline_mode<synchronous>, transform_indices = @transform_14, window_bounds = array<i64: 1, 128>}, {pipeline_mode = #tpu.pipeline_mode<synchronous>, transform_indices = @transform_15, window_bounds = array<i64: 128, 128>}, {pipeline_mode = #tpu.pipeline_mode<synchronous>, transform_indices = @transform_16, window_bounds = array<i64: 128, 128>}, {pipeline_mode = #tpu.pipeline_mode<synchronous>, transform_indices = @transform_17, window_bounds = array<i64: 128, 128>}, {pipeline_mode = #tpu.pipeline_mode<synchronous>, transform_indices = @transform_18, window_bounds = array<i64: 1, 128>}, {transform_indices = @transform_19, window_bounds = array<i64: 4>}, {transform_indices = @transform_20, window_bounds = array<i64: 32, 128>}]} {
    %c0 = arith.constant 0 : index
    %c0_0 = arith.constant 0 : index
    %0 = vector.load %arg1[%c0, %c0_0] : memref<32x4xi32, #tpu.memory_space<vmem>>, vector<32x4xi32>
    %c0_1 = arith.constant 0 : index
    %c0_2 = arith.constant 0 : index
    %c0_3 = arith.constant 0 : index
    %1 = vector.load %arg2[%c0_1, %c0_2, %c0_3] : memref<32x16x128xbf16, #tpu.memory_space<vmem>>, vector<32x16x128xbf16>
    %2 = vector.extract_strided_slice %0 {offsets = [0, 0], sizes = [32, 1], strides = [1, 1]} : vector<32x4xi32> to vector<32x1xi32>
    %3 = tpu.iota {dimensions = array<i32: 1>} : vector<32x16xi32>
    %4 = vector.broadcast %2 : vector<32x1xi32> to vector<32x16xi32>
    %5 = arith.cmpi slt, %3, %4 : vector<32x16xi32>
    %c0_4 = arith.constant 0 : index
    %6 = memref.load %arg20[%c0_4] : memref<4xf32, #tpu.memory_space<smem>>
    %7 = vector.shape_cast %1 : vector<32x16x128xbf16> to vector<512x128xbf16>
    %c0_5 = arith.constant 0 : index
    %c0_6 = arith.constant 0 : index
    %8 = vector.load %arg7[%c0_5, %c0_6] : memref<128x128xbf16, #tpu.memory_space<vmem>>, vector<128x128xbf16>
    %cst = arith.constant dense<0.000000e+00> : vector<512x128xf32>
    %9 = tpu.matmul %7, %8, %cst {dimension_numbers = #tpu.dot_dimension_numbers<[1], [0], [0], [1], [0, 0, 1, 1], [], []>} : vector<512x128xbf16>, vector<128x128xbf16>, vector<512x128xf32> -> vector<512x128xf32>
    %c0_7 = arith.constant 0 : index
    %c0_8 = arith.constant 0 : index
    %10 = vector.load %arg8[%c0_7, %c0_8] : memref<1x128xf32, #tpu.memory_space<vmem>>, vector<1x128xf32>
    %11 = vector.broadcast %10 : vector<1x128xf32> to vector<512x128xf32>
    %12 = arith.addf %9, %11 : vector<512x128xf32>
    %13 = math.tanh %12 : vector<512x128xf32>
    %c0_9 = arith.constant 0 : index
    %c0_10 = arith.constant 0 : index
    %14 = vector.load %arg9[%c0_9, %c0_10] : memref<1x128xf32, #tpu.memory_space<vmem>>, vector<1x128xf32>
    %15 = vector.broadcast %14 : vector<1x128xf32> to vector<512x128xf32>
    %16 = arith.mulf %13, %15 : vector<512x128xf32>
    %cst_11 = arith.constant dense<0.000000e+00> : vector<512xf32>
    %17 = vector.multi_reduction <add>, %16, %cst_11 [1] : vector<512x128xf32> to vector<512xf32>
    %18 = vector.shape_cast %17 : vector<512xf32> to vector<512x1xf32>
    %19 = vector.broadcast %6 : f32 to vector<512x1xf32>
    %20 = arith.addf %18, %19 : vector<512x1xf32>
    %21 = vector.shape_cast %20 : vector<512x1xf32> to vector<32x16xf32>
    %cst_12 = arith.constant -1.000000e+30 : f32
    %22 = vector.broadcast %cst_12 : f32 to vector<32x16xf32>
    %23 = arith.select %5, %21, %22 : vector<32x16xi1>, vector<32x16xf32>
    %cst_13 = arith.constant dense<0xFF800000> : vector<32xf32>
    %24 = vector.multi_reduction <maximumf>, %23, %cst_13 [1] : vector<32x16xf32> to vector<32xf32>
    %25 = vector.shape_cast %24 : vector<32xf32> to vector<32x1xf32>
    %26 = vector.broadcast %25 : vector<32x1xf32> to vector<32x16xf32>
    %27 = arith.subf %23, %26 : vector<32x16xf32>
    %28 = math.exp %27 : vector<32x16xf32>
    %cst_14 = arith.constant 0.000000e+00 : f32
    %29 = vector.broadcast %cst_14 : f32 to vector<32x16xf32>
    %30 = arith.select %5, %28, %29 : vector<32x16xi1>, vector<32x16xf32>
    %cst_15 = arith.constant dense<0.000000e+00> : vector<32xf32>
    %31 = vector.multi_reduction <add>, %30, %cst_15 [1] : vector<32x16xf32> to vector<32xf32>
    %32 = vector.shape_cast %31 : vector<32xf32> to vector<32x1xf32>
    %cst_16 = arith.constant 1.000000e-30 : f32
    %33 = vector.broadcast %cst_16 : f32 to vector<32x1xf32>
    %34 = arith.maximumf %32, %33 : vector<32x1xf32>
    %35 = tpu.reciprocal %34 {approx = true} : vector<32x1xf32> -> vector<32x1xf32>
    %36 = vector.broadcast %35 : vector<32x1xf32> to vector<32x16xf32>
    %37 = arith.mulf %30, %36 : vector<32x16xf32>
    %38 = vector.shape_cast %37 : vector<32x16xf32> to vector<32x16x1xf32>
    %39 = arith.extf %1 : vector<32x16x128xbf16> to vector<32x16x128xf32>
    %40 = vector.broadcast %38 : vector<32x16x1xf32> to vector<32x16x128xf32>
    %41 = arith.mulf %40, %39 : vector<32x16x128xf32>
    %cst_17 = arith.constant dense<0.000000e+00> : vector<32x128xf32>
    %42 = vector.multi_reduction <add>, %41, %cst_17 [1] : vector<32x16x128xf32> to vector<32x128xf32>
    %c0_18 = arith.constant 0 : index
    %c0_19 = arith.constant 0 : index
    %c0_20 = arith.constant 0 : index
    %43 = vector.load %arg3[%c0_18, %c0_19, %c0_20] : memref<32x16x128xbf16, #tpu.memory_space<vmem>>, vector<32x16x128xbf16>
    %44 = vector.extract_strided_slice %0 {offsets = [0, 1], sizes = [32, 1], strides = [1, 1]} : vector<32x4xi32> to vector<32x1xi32>
    %45 = tpu.iota {dimensions = array<i32: 1>} : vector<32x16xi32>
    %46 = vector.broadcast %44 : vector<32x1xi32> to vector<32x16xi32>
    %47 = arith.cmpi slt, %45, %46 : vector<32x16xi32>
    %c1 = arith.constant 1 : index
    %48 = memref.load %arg20[%c1] : memref<4xf32, #tpu.memory_space<smem>>
    %49 = vector.shape_cast %43 : vector<32x16x128xbf16> to vector<512x128xbf16>
    %c0_21 = arith.constant 0 : index
    %c0_22 = arith.constant 0 : index
    %50 = vector.load %arg10[%c0_21, %c0_22] : memref<128x128xbf16, #tpu.memory_space<vmem>>, vector<128x128xbf16>
    %cst_23 = arith.constant dense<0.000000e+00> : vector<512x128xf32>
    %51 = tpu.matmul %49, %50, %cst_23 {dimension_numbers = #tpu.dot_dimension_numbers<[1], [0], [0], [1], [0, 0, 1, 1], [], []>} : vector<512x128xbf16>, vector<128x128xbf16>, vector<512x128xf32> -> vector<512x128xf32>
    %c0_24 = arith.constant 0 : index
    %c0_25 = arith.constant 0 : index
    %52 = vector.load %arg11[%c0_24, %c0_25] : memref<1x128xf32, #tpu.memory_space<vmem>>, vector<1x128xf32>
    %53 = vector.broadcast %52 : vector<1x128xf32> to vector<512x128xf32>
    %54 = arith.addf %51, %53 : vector<512x128xf32>
    %55 = math.tanh %54 : vector<512x128xf32>
    %c0_26 = arith.constant 0 : index
    %c0_27 = arith.constant 0 : index
    %56 = vector.load %arg12[%c0_26, %c0_27] : memref<1x128xf32, #tpu.memory_space<vmem>>, vector<1x128xf32>
    %57 = vector.broadcast %56 : vector<1x128xf32> to vector<512x128xf32>
    %58 = arith.mulf %55, %57 : vector<512x128xf32>
    %cst_28 = arith.constant dense<0.000000e+00> : vector<512xf32>
    %59 = vector.multi_reduction <add>, %58, %cst_28 [1] : vector<512x128xf32> to vector<512xf32>
    %60 = vector.shape_cast %59 : vector<512xf32> to vector<512x1xf32>
    %61 = vector.broadcast %48 : f32 to vector<512x1xf32>
    %62 = arith.addf %60, %61 : vector<512x1xf32>
    %63 = vector.shape_cast %62 : vector<512x1xf32> to vector<32x16xf32>
    %cst_29 = arith.constant -1.000000e+30 : f32
    %64 = vector.broadcast %cst_29 : f32 to vector<32x16xf32>
    %65 = arith.select %47, %63, %64 : vector<32x16xi1>, vector<32x16xf32>
    %cst_30 = arith.constant dense<0xFF800000> : vector<32xf32>
    %66 = vector.multi_reduction <maximumf>, %65, %cst_30 [1] : vector<32x16xf32> to vector<32xf32>
    %67 = vector.shape_cast %66 : vector<32xf32> to vector<32x1xf32>
    %68 = vector.broadcast %67 : vector<32x1xf32> to vector<32x16xf32>
    %69 = arith.subf %65, %68 : vector<32x16xf32>
    %70 = math.exp %69 : vector<32x16xf32>
    %cst_31 = arith.constant 0.000000e+00 : f32
    %71 = vector.broadcast %cst_31 : f32 to vector<32x16xf32>
    %72 = arith.select %47, %70, %71 : vector<32x16xi1>, vector<32x16xf32>
    %cst_32 = arith.constant dense<0.000000e+00> : vector<32xf32>
    %73 = vector.multi_reduction <add>, %72, %cst_32 [1] : vector<32x16xf32> to vector<32xf32>
    %74 = vector.shape_cast %73 : vector<32xf32> to vector<32x1xf32>
    %cst_33 = arith.constant 1.000000e-30 : f32
    %75 = vector.broadcast %cst_33 : f32 to vector<32x1xf32>
    %76 = arith.maximumf %74, %75 : vector<32x1xf32>
    %77 = tpu.reciprocal %76 {approx = true} : vector<32x1xf32> -> vector<32x1xf32>
    %78 = vector.broadcast %77 : vector<32x1xf32> to vector<32x16xf32>
    %79 = arith.mulf %72, %78 : vector<32x16xf32>
    %80 = vector.shape_cast %79 : vector<32x16xf32> to vector<32x16x1xf32>
    %81 = arith.extf %43 : vector<32x16x128xbf16> to vector<32x16x128xf32>
    %82 = vector.broadcast %80 : vector<32x16x1xf32> to vector<32x16x128xf32>
    %83 = arith.mulf %82, %81 : vector<32x16x128xf32>
    %cst_34 = arith.constant dense<0.000000e+00> : vector<32x128xf32>
    %84 = vector.multi_reduction <add>, %83, %cst_34 [1] : vector<32x16x128xf32> to vector<32x128xf32>
    %c0_35 = arith.constant 0 : index
    %c0_36 = arith.constant 0 : index
    %c0_37 = arith.constant 0 : index
    %85 = vector.load %arg4[%c0_35, %c0_36, %c0_37] : memref<32x16x128xbf16, #tpu.memory_space<vmem>>, vector<32x16x128xbf16>
    %86 = vector.extract_strided_slice %0 {offsets = [0, 2], sizes = [32, 1], strides = [1, 1]} : vector<32x4xi32> to vector<32x1xi32>
    %87 = tpu.iota {dimensions = array<i32: 1>} : vector<32x16xi32>
    %88 = vector.broadcast %86 : vector<32x1xi32> to vector<32x16xi32>
    %89 = arith.cmpi slt, %87, %88 : vector<32x16xi32>
    %c2 = arith.constant 2 : index
    %90 = memref.load %arg20[%c2] : memref<4xf32, #tpu.memory_space<smem>>
    %91 = vector.shape_cast %85 : vector<32x16x128xbf16> to vector<512x128xbf16>
    %c0_38 = arith.constant 0 : index
    %c0_39 = arith.constant 0 : index
    %92 = vector.load %arg13[%c0_38, %c0_39] : memref<128x128xbf16, #tpu.memory_space<vmem>>, vector<128x128xbf16>
    %cst_40 = arith.constant dense<0.000000e+00> : vector<512x128xf32>
    %93 = tpu.matmul %91, %92, %cst_40 {dimension_numbers = #tpu.dot_dimension_numbers<[1], [0], [0], [1], [0, 0, 1, 1], [], []>} : vector<512x128xbf16>, vector<128x128xbf16>, vector<512x128xf32> -> vector<512x128xf32>
    %c0_41 = arith.constant 0 : index
    %c0_42 = arith.constant 0 : index
    %94 = vector.load %arg14[%c0_41, %c0_42] : memref<1x128xf32, #tpu.memory_space<vmem>>, vector<1x128xf32>
    %95 = vector.broadcast %94 : vector<1x128xf32> to vector<512x128xf32>
    %96 = arith.addf %93, %95 : vector<512x128xf32>
    %97 = math.tanh %96 : vector<512x128xf32>
    %c0_43 = arith.constant 0 : index
    %c0_44 = arith.constant 0 : index
    %98 = vector.load %arg15[%c0_43, %c0_44] : memref<1x128xf32, #tpu.memory_space<vmem>>, vector<1x128xf32>
    %99 = vector.broadcast %98 : vector<1x128xf32> to vector<512x128xf32>
    %100 = arith.mulf %97, %99 : vector<512x128xf32>
    %cst_45 = arith.constant dense<0.000000e+00> : vector<512xf32>
    %101 = vector.multi_reduction <add>, %100, %cst_45 [1] : vector<512x128xf32> to vector<512xf32>
    %102 = vector.shape_cast %101 : vector<512xf32> to vector<512x1xf32>
    %103 = vector.broadcast %90 : f32 to vector<512x1xf32>
    %104 = arith.addf %102, %103 : vector<512x1xf32>
    %105 = vector.shape_cast %104 : vector<512x1xf32> to vector<32x16xf32>
    %106 = arith.negf %105 : vector<32x16xf32>
    %107 = math.exp %106 : vector<32x16xf32>
    %cst_46 = arith.constant 1.000000e+00 : f32
    %108 = vector.broadcast %cst_46 : f32 to vector<32x16xf32>
    %109 = arith.addf %108, %107 : vector<32x16xf32>
    %110 = arith.divf %108, %109 : vector<32x16xf32>
    %cst_47 = arith.constant 0.000000e+00 : f32
    %111 = vector.broadcast %cst_47 : f32 to vector<32x16xf32>
    %112 = arith.select %89, %110, %111 : vector<32x16xi1>, vector<32x16xf32>
    %113 = vector.shape_cast %112 : vector<32x16xf32> to vector<32x16x1xf32>
    %114 = arith.extf %85 : vector<32x16x128xbf16> to vector<32x16x128xf32>
    %115 = vector.broadcast %113 : vector<32x16x1xf32> to vector<32x16x128xf32>
    %116 = arith.mulf %115, %114 : vector<32x16x128xf32>
    %cst_48 = arith.constant dense<0.000000e+00> : vector<32x128xf32>
    %117 = vector.multi_reduction <add>, %116, %cst_48 [1] : vector<32x16x128xf32> to vector<32x128xf32>
    %c0_49 = arith.constant 0 : index
    %c0_50 = arith.constant 0 : index
    %118 = vector.load %arg16[%c0_49, %c0_50] : memref<128x128xf32, #tpu.memory_space<vmem>>, vector<128x128xf32>
    %cst_51 = arith.constant dense<0.000000e+00> : vector<32x128xf32>
    %119 = tpu.matmul %42, %118, %cst_51 {dimension_numbers = #tpu.dot_dimension_numbers<[1], [0], [0], [1], [0, 0, 1, 1], [], []>} : vector<32x128xf32>, vector<128x128xf32>, vector<32x128xf32> -> vector<32x128xf32>
    %c0_52 = arith.constant 0 : index
    %c0_53 = arith.constant 0 : index
    %120 = vector.load %arg17[%c0_52, %c0_53] : memref<128x128xf32, #tpu.memory_space<vmem>>, vector<128x128xf32>
    %cst_54 = arith.constant dense<0.000000e+00> : vector<32x128xf32>
    %121 = tpu.matmul %84, %120, %cst_54 {dimension_numbers = #tpu.dot_dimension_numbers<[1], [0], [0], [1], [0, 0, 1, 1], [], []>} : vector<32x128xf32>, vector<128x128xf32>, vector<32x128xf32> -> vector<32x128xf32>
    %122 = arith.addf %119, %121 : vector<32x128xf32>
    %c0_55 = arith.constant 0 : index
    %c0_56 = arith.constant 0 : index
    %123 = vector.load %arg18[%c0_55, %c0_56] : memref<128x128xf32, #tpu.memory_space<vmem>>, vector<128x128xf32>
    %cst_57 = arith.constant dense<0.000000e+00> : vector<32x128xf32>
    %124 = tpu.matmul %117, %123, %cst_57 {dimension_numbers = #tpu.dot_dimension_numbers<[1], [0], [0], [1], [0, 0, 1, 1], [], []>} : vector<32x128xf32>, vector<128x128xf32>, vector<32x128xf32> -> vector<32x128xf32>
    %125 = arith.addf %122, %124 : vector<32x128xf32>
    %c0_58 = arith.constant 0 : index
    %c0_59 = arith.constant 0 : index
    %126 = vector.load %arg19[%c0_58, %c0_59] : memref<1x128xf32, #tpu.memory_space<vmem>>, vector<1x128xf32>
    %127 = vector.broadcast %126 : vector<1x128xf32> to vector<32x128xf32>
    %128 = arith.addf %125, %127 : vector<32x128xf32>
    %129 = math.tanh %128 : vector<32x128xf32>
    %c0_60 = arith.constant 0 : index
    %c0_61 = arith.constant 0 : index
    %130 = vector.load %arg5[%c0_60, %c0_61] : memref<32x128xbf16, #tpu.memory_space<vmem>>, vector<32x128xbf16>
    %131 = arith.extf %130 : vector<32x128xbf16> to vector<32x128xf32>
    %132 = math.tanh %131 : vector<32x128xf32>
    %c0_62 = arith.constant 0 : index
    %c0_63 = arith.constant 0 : index
    %133 = vector.load %arg6[%c0_62, %c0_63] : memref<32x128xbf16, #tpu.memory_space<vmem>>, vector<32x128xbf16>
    %134 = arith.extf %133 : vector<32x128xbf16> to vector<32x128xf32>
    %135 = math.tanh %134 : vector<32x128xf32>
    %c3 = arith.constant 3 : index
    %136 = memref.load %arg20[%c3] : memref<4xf32, #tpu.memory_space<smem>>
    %137 = arith.mulf %129, %132 : vector<32x128xf32>
    %cst_64 = arith.constant dense<0.000000e+00> : vector<32xf32>
    %138 = vector.multi_reduction <add>, %137, %cst_64 [1] : vector<32x128xf32> to vector<32xf32>
    %139 = vector.shape_cast %138 : vector<32xf32> to vector<32x1xf32>
    %140 = arith.mulf %129, %129 : vector<32x128xf32>
    %cst_65 = arith.constant dense<0.000000e+00> : vector<32xf32>
    %141 = vector.multi_reduction <add>, %140, %cst_65 [1] : vector<32x128xf32> to vector<32xf32>
    %142 = vector.shape_cast %141 : vector<32xf32> to vector<32x1xf32>
    %143 = arith.mulf %132, %132 : vector<32x128xf32>
    %cst_66 = arith.constant dense<0.000000e+00> : vector<32xf32>
    %144 = vector.multi_reduction <add>, %143, %cst_66 [1] : vector<32x128xf32> to vector<32xf32>
    %145 = vector.shape_cast %144 : vector<32xf32> to vector<32x1xf32>
    %146 = arith.mulf %142, %145 : vector<32x1xf32>
    %cst_67 = arith.constant 1.000000e-16 : f32
    %147 = vector.broadcast %cst_67 : f32 to vector<32x1xf32>
    %148 = arith.maximumf %146, %147 : vector<32x1xf32>
    %149 = math.rsqrt %148 : vector<32x1xf32>
    %150 = arith.mulf %139, %149 : vector<32x1xf32>
    %151 = vector.broadcast %136 : f32 to vector<32x1xf32>
    %152 = arith.subf %151, %150 : vector<32x1xf32>
    %153 = arith.mulf %129, %135 : vector<32x128xf32>
    %cst_68 = arith.constant dense<0.000000e+00> : vector<32xf32>
    %154 = vector.multi_reduction <add>, %153, %cst_68 [1] : vector<32x128xf32> to vector<32xf32>
    %155 = vector.shape_cast %154 : vector<32xf32> to vector<32x1xf32>
    %156 = arith.mulf %129, %129 : vector<32x128xf32>
    %cst_69 = arith.constant dense<0.000000e+00> : vector<32xf32>
    %157 = vector.multi_reduction <add>, %156, %cst_69 [1] : vector<32x128xf32> to vector<32xf32>
    %158 = vector.shape_cast %157 : vector<32xf32> to vector<32x1xf32>
    %159 = arith.mulf %135, %135 : vector<32x128xf32>
    %cst_70 = arith.constant dense<0.000000e+00> : vector<32xf32>
    %160 = vector.multi_reduction <add>, %159, %cst_70 [1] : vector<32x128xf32> to vector<32xf32>
    %161 = vector.shape_cast %160 : vector<32xf32> to vector<32x1xf32>
    %162 = arith.mulf %158, %161 : vector<32x1xf32>
    %cst_71 = arith.constant 1.000000e-16 : f32
    %163 = vector.broadcast %cst_71 : f32 to vector<32x1xf32>
    %164 = arith.maximumf %162, %163 : vector<32x1xf32>
    %165 = math.rsqrt %164 : vector<32x1xf32>
    %166 = arith.mulf %155, %165 : vector<32x1xf32>
    %167 = arith.addf %152, %166 : vector<32x1xf32>
    %cst_72 = arith.constant 9.99999997E-7 : f32
    %168 = vector.broadcast %cst_72 : f32 to vector<32x1xf32>
    %169 = arith.maximumf %167, %168 : vector<32x1xf32>
    %170 = vector.shape_cast %169 : vector<32x1xf32> to vector<32x1xf32>
    %171 = vector.broadcast %170 : vector<32x1xf32> to vector<32x128xf32>
    %c0_73 = arith.constant 0 : index
    %c0_74 = arith.constant 0 : index
    %172 = vector.load %arg21[%c0_73, %c0_74] : memref<32x128xf32, #tpu.memory_space<vmem>>, vector<32x128xf32>
    tpu.vector_store %arg21[%c0_73, %c0_74], %171 {strides = array<i32>} : memref<32x128xf32, #tpu.memory_space<vmem>>, vector<32x128xf32>,
    return
  }
  func.func @transform_0(%arg0: i32) -> (i32, i32) {
    %c0_i32 = arith.constant 0 : i32
    %c0_i32_0 = arith.constant 0 : i32
    return %arg0, %c0_i32 : i32, i32
  }
  func.func @transform_1(%arg0: i32) -> (i32, i32, i32) {
    %c0_i32 = arith.constant 0 : i32
    %c0_i32_0 = arith.constant 0 : i32
    %c0_i32_1 = arith.constant 0 : i32
    return %arg0, %c0_i32, %c0_i32_0 : i32, i32, i32
  }
  func.func @transform_2(%arg0: i32) -> (i32, i32, i32) {
    %c0_i32 = arith.constant 0 : i32
    %c0_i32_0 = arith.constant 0 : i32
    %c0_i32_1 = arith.constant 0 : i32
    return %arg0, %c0_i32, %c0_i32_0 : i32, i32, i32
  }
  func.func @transform_3(%arg0: i32) -> (i32, i32, i32) {
    %c0_i32 = arith.constant 0 : i32
    %c0_i32_0 = arith.constant 0 : i32
    %c0_i32_1 = arith.constant 0 : i32
    return %arg0, %c0_i32, %c0_i32_0 : i32, i32, i32
  }
  func.func @transform_4(%arg0: i32) -> (i32, i32) {
    %c0_i32 = arith.constant 0 : i32
    %c0_i32_0 = arith.constant 0 : i32
    return %arg0, %c0_i32 : i32, i32
  }
  func.func @transform_5(%arg0: i32) -> (i32, i32) {
    %c0_i32 = arith.constant 0 : i32
    %c0_i32_0 = arith.constant 0 : i32
    return %arg0, %c0_i32 : i32, i32
  }
  func.func @transform_6(%arg0: i32) -> (i32, i32) {
    %c0_i32 = arith.constant 0 : i32
    %c0_i32_0 = arith.constant 0 : i32
    %c0_i32_1 = arith.constant 0 : i32
    return %c0_i32, %c0_i32_0 : i32, i32
  }
  func.func @transform_7(%arg0: i32) -> (i32, i32) {
    %c0_i32 = arith.constant 0 : i32
    %c0_i32_0 = arith.constant 0 : i32
    %c0_i32_1 = arith.constant 0 : i32
    return %c0_i32, %c0_i32_0 : i32, i32
  }
  func.func @transform_8(%arg0: i32) -> (i32, i32) {
    %c0_i32 = arith.constant 0 : i32
    %c0_i32_0 = arith.constant 0 : i32
    %c0_i32_1 = arith.constant 0 : i32
    return %c0_i32, %c0_i32_0 : i32, i32
  }
  func.func @transform_9(%arg0: i32) -> (i32, i32) {
    %c0_i32 = arith.constant 0 : i32
    %c0_i32_0 = arith.constant 0 : i32
    %c0_i32_1 = arith.constant 0 : i32
    return %c0_i32, %c0_i32_0 : i32, i32
  }
  func.func @transform_10(%arg0: i32) -> (i32, i32) {
    %c0_i32 = arith.constant 0 : i32
    %c0_i32_0 = arith.constant 0 : i32
    %c0_i32_1 = arith.constant 0 : i32
    return %c0_i32, %c0_i32_0 : i32, i32
  }
  func.func @transform_11(%arg0: i32) -> (i32, i32) {
    %c0_i32 = arith.constant 0 : i32
    %c0_i32_0 = arith.constant 0 : i32
    %c0_i32_1 = arith.constant 0 : i32
    return %c0_i32, %c0_i32_0 : i32, i32
  }
  func.func @transform_12(%arg0: i32) -> (i32, i32) {
    %c0_i32 = arith.constant 0 : i32
    %c0_i32_0 = arith.constant 0 : i32
    %c0_i32_1 = arith.constant 0 : i32
    return %c0_i32, %c0_i32_0 : i32, i32
  }
  func.func @transform_13(%arg0: i32) -> (i32, i32) {
    %c0_i32 = arith.constant 0 : i32
    %c0_i32_0 = arith.constant 0 : i32
    %c0_i32_1 = arith.constant 0 : i32
    return %c0_i32, %c0_i32_0 : i32, i32
  }
  func.func @transform_14(%arg0: i32) -> (i32, i32) {
    %c0_i32 = arith.constant 0 : i32
    %c0_i32_0 = arith.constant 0 : i32
    %c0_i32_1 = arith.constant 0 : i32
    return %c0_i32, %c0_i32_0 : i32, i32
  }
  func.func @transform_15(%arg0: i32) -> (i32, i32) {
    %c0_i32 = arith.constant 0 : i32
    %c0_i32_0 = arith.constant 0 : i32
    %c0_i32_1 = arith.constant 0 : i32
    return %c0_i32, %c0_i32_0 : i32, i32
  }
  func.func @transform_16(%arg0: i32) -> (i32, i32) {
    %c0_i32 = arith.constant 0 : i32
    %c0_i32_0 = arith.constant 0 : i32
    %c0_i32_1 = arith.constant 0 : i32
    return %c0_i32, %c0_i32_0 : i32, i32
  }
  func.func @transform_17(%arg0: i32) -> (i32, i32) {
    %c0_i32 = arith.constant 0 : i32
    %c0_i32_0 = arith.constant 0 : i32
    %c0_i32_1 = arith.constant 0 : i32
    return %c0_i32, %c0_i32_0 : i32, i32
  }
  func.func @transform_18(%arg0: i32) -> (i32, i32) {
    %c0_i32 = arith.constant 0 : i32
    %c0_i32_0 = arith.constant 0 : i32
    %c0_i32_1 = arith.constant 0 : i32
    return %c0_i32, %c0_i32_0 : i32, i32
  }
  func.func @transform_19(%arg0: i32) -> i32 {
    %c0_i32 = arith.constant 0 : i32
    %c0_i32_0 = arith.constant 0 : i32
    return %c0_i32 : i32
  }
  func.func @transform_20(%arg0: i32) -> (i32, i32) {
    %c0_i32 = arith.constant 0 : i32
    %c0_i32_0 = arith.constant 0 : i32
    return %arg0, %c0_i32 : i32, i32
  }
}

</mosaic_0001>

<bundles_post_ra>
// kernel: tpu_custom_call.1
= control target key start
LH: loop header
LB: loop body
LE: loop exit
PB: predicated region body
PF: predicated region fallthrough
CT: control target
= control target key end

     0   :  { %s15679_s0 = inlined_call_operand.vmem [shape: s32[64,4], index: 0, kind: input, shape index: {}]   ;;  %s15680_s1 = inlined_call_operand.hbm [shape: bf16[64,16,128], index: 1, kind: input, shape index: {}]   ;;  %s15681_s2 = inlined_call_operand.hbm [shape: bf16[64,16,128], index: 2, kind: input, shape index: {}]   ;;  %s15682_s3 = inlined_call_operand.hbm [shape: bf16[64,16,128], index: 3, kind: input, shape index: {}]   ;;  %s15683_s4 = inlined_call_operand.hbm [shape: bf16[64,128], index: 4, kind: input, shape index: {}]   ;;  %s15684_s5 = inlined_call_operand.hbm [shape: bf16[64,128], index: 5, kind: input, shape index: {}]   ;;  %s15685_s6 = inlined_call_operand.vmem [shape: bf16[128,128], index: 6, kind: input, shape index: {}]   ;;  %s15686_s7 = inlined_call_operand.vmem [shape: f32[1,128], index: 7, kind: input, shape index: {}]   ;;  %s15687_s8 = inlined_call_operand.vmem [shape: f32[1,128], index: 8, kind: input, shape index: {}]   ;;  %s15688_s9 = inlined_call_operand.hbm [shape: bf16[128,128], index: 9, kind: input, shape index: {}]   ;;  %s15689_s10 = inlined_call_operand.vmem [shape: f32[1,128], index: 10, kind: input, shape index: {}]   ;;  %s15690_s11 = inlined_call_operand.vmem [shape: f32[1,128], index: 11, kind: input, shape index: {}]   ;;  %s15691_s12 = inlined_call_operand.hbm [shape: bf16[128,128], index: 12, kind: input, shape index: {}]   ;;  %s15692_s13 = inlined_call_operand.vmem [shape: f32[1,128], index: 13, kind: input, shape index: {}]   ;;  %s15693_s14 = inlined_call_operand.vmem [shape: f32[1,128], index: 14, kind: input, shape index: {}]   ;;  %s15694_s15 = inlined_call_operand.hbm [shape: f32[128,128], index: 15, kind: input, shape index: {}]   ;;  %s15695_s16 = inlined_call_operand.hbm [shape: f32[128,128], index: 16, kind: input, shape index: {}]   ;;  %s15696_s17 = inlined_call_operand.hbm [shape: f32[128,128], index: 17, kind: input, shape index: {}]   ;;  %s15697_s18 = inlined_call_operand.vmem [shape: f32[1,128], index: 18, kind: input, shape index: {}]   ;;  %s15698_s19 = inlined_call_operand.vmem [shape: f32[4], index: 19, kind: input, shape index: {}]   ;;  %s15699_s20 = inlined_call_operand.hbm [shape: f32[64,128], index: 20, kind: output, shape index: {}]  }
   0x1   :  { %15830 = sst [smem:[#allocation113_spill]] %s15679_s0 }
   0x2   :  { %15831 = sst [smem:[#allocation114_spill]] %s15680_s1 }
   0x3   :  { %15832 = sst [smem:[#allocation115_spill]] %s15681_s2 }
   0x4   :  { %15833 = sst [smem:[#allocation116_spill]] %s15682_s3 }
   0x5   :  { %15834 = sst [smem:[#allocation117_spill]] %s15683_s4 }
   0x6   :  { %15835 = sst [smem:[#allocation118_spill]] %s15685_s6 }
   0x7   :  { %15836 = sst [smem:[#allocation119_spill]] %s15686_s7 }
   0x8   :  { %15837 = sst [smem:[#allocation120_spill]] %s15687_s8 }
   0x9   :  { %15838 = sst [smem:[#allocation121_spill]] %s15688_s9 }
   0xa   :  { %15839 = sst [smem:[#allocation122_spill]] %s15689_s10 }
   0xb   :  { %15840 = sst [smem:[#allocation123_spill]] %s15690_s11 }
   0xc   :  { %15841 = sst [smem:[#allocation124_spill]] %s15691_s12 }
   0xd   :  { %15842 = sst [smem:[#allocation125_spill]] %s15692_s13 }
   0xe   :  { %15843 = sst [smem:[#allocation126_spill]] %s15693_s14 }
   0xf   :  { %15844 = sst [smem:[#allocation127_spill]] %s15694_s15 }
  0x10   :  { %15845 = sst [smem:[#allocation128_spill]] %s15695_s16 }
  0x11   :  { %15846 = sst [smem:[#allocation129_spill]] %s15697_s18 }
  0x12   :  { %15847 = sst [smem:[#allocation130_spill]] %s15699_s20 }
  0x13   :  { %25 = vsyncpa [#allocation3], 0 }
  0x14   :  { %27 = vsyncpa [#allocation3 + $0x1], 0 }
  0x15   :  { %28 = vsyncpa [#allocation7], 0 }
  0x16   :  { %30 = vsyncpa [#allocation7 + $0x1], 0 }
  0x17   :  { %31 = vsyncpa [#allocation10], 0 }
  0x18   :  { %33 = vsyncpa [#allocation10 + $0x1], 0 }
  0x19   :  { %34 = vsyncpa [#allocation13], 0 }
  0x1a   :  { %35 = vsyncpa [#allocation16], 0 }
  0x1b   :  { %36 = vsyncpa [#allocation19], 0 }
  0x1c   :  { %37 = vsyncpa [#allocation5], 0 }
  0x1d   :  { %38 = vsyncpa [#allocation4], 0 }
  0x1e   :  { %40 = vsyncpa [#allocation4 + $0x1], 0  ;;  %s10960_s1 = smov 0   ;;  %s10962_s22 = smov 0  }
  0x1f   :  { %s10964_s23 = smov 0   ;;  %s10966_s24 = smov 0  }
  0x20 LB: > { %15848 = sst [smem:[#allocation30_spill]] %s10820_s1  ;;  %s10834_s2 = smov [#allocation12]   ;;  %s10832_s24 = sphi %s10966_s24, %s16485_s24   ;;  %s10828_s23 = sphi %s10964_s23, %s16488_s23   ;;  %s10824_s22 = sphi %s10962_s22, %s16487_s22   ;;  %s10820_s1 = sphi %s10960_s1, %s16486_s1  }
  0x21   : > { %15849 = sst [smem:[#allocation31_spill]] %s10824_s22  ;;  %s548_s25 = sshll.u32 %s10834_s2, 4  ;;  %s549_s25 = int_to_ptr.vmem [resolvable:$true] %s548_s25 }
  0x22   : > { %15850 = sst [smem:[#allocation32_spill]] %s10828_s23  ;;  %s10981_s3 = sadd.s32 4294967295, %s10832_s24  }
  0x23   : > { %15851 = sst [smem:[#allocation33_spill]] %s10981_s3  ;;  %p8478_p0 = scmp.ge.s32.totalorder %s10832_s24, 1 }
  0x24   : > { %p15724_p1 = scmp.eq.s32.totalorder %s10981_s3, 0  ;;  %p527_p2 = scmp.lt.s32.totalorder %s10832_s24, 3 }
  0x25   : > { %s10835_s27 = smov [#allocation15]   ;;  %s10470_s30 = scalar_lea.vmem %s549_s25, 1024 }
  0x26   : > { %p10986_p3 = pnand %p8478_p0, %p527_p2  ;;  %s586_s28 = sshll.u32 %s10835_s27, 4  ;;  %s587_s28 = int_to_ptr.vmem [resolvable:$true] %s586_s28 }
  0x27   : > { %p10471_p8 = scmp.ne.s32.totalorder %s549_s25, %s10470_s30  ;;  %p10478_p11 = scmp.lt.s32.totalorder %s549_s25, %s549_s25 }
  0x28   : > { %s15852_s26 = scalar_select %p10986_p3, 1, 0 }
  0x29   : > { %p9315_p5 = pneg %p10986_p3  ;;  %p10479_p12 = scmp.lt.s32.totalorder %s10470_s30, %s10470_s30 }
  0x2a   : > { %15853 = sst [smem:[#allocation34_spill]] %s15852_s26 }
  0x2b   : > { %p10995_p6 = pnand %p9315_p5, %p15724_p1  ;;  %p10480_p13 = por %p10479_p12, %p10478_p11 }
  0x2d   : > { %s15854_s4 = scalar_select %p10995_p6, 1, 0 }
  0x2e   : > { %p11001_p7 = pneg %p10995_p6 }
  0x30   : > { %s15855_s29 = scalar_select %p11001_p7, 1, 0 }
  0x31   : > { %p10473_p9 = pnand %p10471_p8, %p11001_p7 }
  0x33   : > { %p10474_p10 = pneg %p10473_p9 }
  0x35   : > { %p10481_p0 = pnand %p10480_p13, %p10474_p10 }
  0x37   : > { %10484 = shalt.err (!%p10481_p0)
}
  0x38   : > { %s15705_s0 = smov 64   ;;  %s15707_s21 = smov 4  }
  0x39   : > { %s15856_s9 = sld [smem:[#allocation121_spill]]  ;;  %s10496_s20 = scalar_lea.vmem %s587_s28, 2048 }
  0x3a   : > { %p10497_p2 = scmp.ne.s32.totalorder %s587_s28, %s10496_s20  ;;  %p10504_p9 = scmp.lt.s32.totalorder %s587_s28, %s587_s28 }
  0x3b   : > { %p10505_p10 = scmp.lt.s32.totalorder %s10496_s20, %s10496_s20 }
  0x3c   : > { %p10499_p5 = pnand %p10497_p2, %p11001_p7 }
  0x3d   : > { %p10506_p11 = por %p10505_p10, %p10504_p9 }
  0x3e   : > { %p10500_p8 = pneg %p10499_p5 }
  0x3f   : > { %9318 = dma.hbm_to_vmem [thread:$0]  (!%p10995_p6), %s15856_s9, 1024, %s549_s25, [#allocation13], %s15705_s0, %s15705_s0, %s15707_s21  }
  0x40   : > { %p10507_p12 = pnand %p10506_p11, %p10500_p8 }
  0x42   : > { %10510 = shalt.err (!%p10507_p12)
}
  0x43   : > { %s15709_s30 = smov 128   ;;  %s15711_s25 = smov 8  }
  0x44   : > { %s15857_s15 = sld [smem:[#allocation127_spill]]  ;;  %s8477_s27 = sadd.s32 4294967294, %s10832_s24  }
  0x45   : > { %s11027_s0 = sadd.s32 1, %s10832_s24   ;;  %s79_s9 = sadd.s32 1, %s10828_s23 }
  0x46   : > { %15858 = sst [smem:[#allocation35_spill]] %s11027_s0  ;;  %s76_s21 = ssub.s32 %s10832_s24, %s11027_s0 }
  0x47   : > { %p77_p13 = scmp.eq.s32.totalorder %s76_s21, 0  ;;  %p86_p0 = scmp.ne.s32.totalorder %s10828_s23, %s10824_s22 }
  0x48   : > { %p87_p2 = scmp.eq.s32.totalorder %s10832_s24, 0  ;;  %p92_p5 = scmp.ne.s32.totalorder %s10824_s22, %s10820_s1 }
  0x49   : > { %s11038_s18 = scalar_select %p77_p13, %s10828_s23, %s79_s9  }
  0x4a   : > { %9324 = dma.hbm_to_vmem [thread:$0]  (!%p10995_p6), %s15857_s15, 2048, %s587_s28, [#allocation16], %s15709_s30, %s15709_s30, %s15711_s25  }
  0x4b   : > { %15859 = sst [smem:[#allocation36_spill]] %s11038_s18  ;;  %p88_p8 = por %p87_p2, %p86_p0 }
  0x4c   : > { %p11042_p9 = por %p15724_p1, %p92_p5  ;;  %p514_p10 = scmp.eq.s32.totalorder %s10981_s3, 1 }
  0x4d   : > { %p520_p11 = scmp.eq.s32.totalorder %s8477_s27, 1  ;;  %p9360_p12 = scmp.lt.s32.totalorder %s10832_s24, 2 }
  0x4e   : > { %s15860_s20 = scalar_select %p11042_p9, 1, 0 }
  0x4f   : > { %s11049_s28 = sand.u32 1, %s10828_s23   ;;  %p11051_p4 = por %p514_p10, %p86_p0 }
  0x50   : > { %15861 = sst [smem:[#allocation37_spill]] %s15860_s20  ;;  %p11055_p13 = por %p520_p11, %p92_p5 }
  0x51   : > { %s15862_s21 = scalar_select %p11051_p4, 1, 0 }
  0x52   : > { %s15864_s9 = scalar_select %p11055_p13, 1, 0 }
  0x53   : > { %15863 = sst [smem:[#allocation38_spill]] %s15862_s21  ;;  %s11060_s2 = sshll.u32 %s11049_s28, 8 }
  0x54   : > { %15865 = sst [smem:[#allocation39_spill]] %s15864_s9  ;;  %s11063_s30 = sshll.u32 %s10832_s24, 12 }
  0x55   : > { %p11065_p2 = pnand %p9360_p12, %p88_p8  ;;  %s15725_s25 = sand.u32 1, %s10832_s24  }
  0x56   : > { %s15867_s23 = sld [smem:[#allocation115_spill]]  ;;  %s675_s9 = scalar_lea.vmem [#allocation6], %s11060_s2 }
  0x57   : > { %s683_s21 = sshll.u32 %s675_s9, 4  ;;  %s11082_s13 = scalar_lea.sflag [#allocation7], %s15725_s25  ;;  %s11077_s21 = int_to_ptr.vmem [resolvable:$true] %s683_s21 }
  0x58   : > { %p11088_p5 = pneg %p11065_p2 }
  0x5c   : > { %s15868_s0 = smov %s15867_s23  ;;  %s11074_s1 = scalar_lea.hbm %s15867_s23, %s11063_s30 }
  0x5d   : > { %s10511_s11 = scalar_lea.hbm %s11074_s1, 4096  ;;  %s10516_s23 = scalar_lea.hbm %s15868_s0, 8192 }
  0x5e   : > { %p10512_p0 = scmp.ne.s32.totalorder %s11074_s1, %s10511_s11  ;;  %p10517_p11 = scmp.lt.s32.totalorder %s11074_s1, %s15868_s0 }
  0x5f   : > { %p10518_p12 = scmp.lt.s32.totalorder %s10516_s23, %s10511_s11 }
  0x60   : > { %p10514_p8 = pnand %p11088_p5, %p10512_p0 }
  0x61   : > { %p10519_p1 = por %p10518_p12, %p10517_p11 }
  0x62   : > { %p10515_p10 = pneg %p10514_p8 }
  0x64   : > { %p10520_p13 = pnand %p10519_p1, %p10515_p10 }
  0x66   : > { %10523 = shalt.err (!%p10520_p13)
}
  0x67   : > { %s10524_s25 = scalar_lea.vmem %s11077_s21, 4096  ;;  %s10840_s10 = smov [#allocation6]  }
  0x68   : > { %p10525_p4 = scmp.ne.s32.totalorder %s11077_s21, %s10524_s25  ;;  %s10529_s15 = sshll.u32 %s10840_s10, 4  ;;  %s10530_s15 = int_to_ptr.vmem [resolvable:$false] %s10529_s15 }
  0x69   : > { %s10531_s18 = scalar_lea.vmem %s10530_s15, 8192  ;;  %p10532_p9 = scmp.lt.s32.totalorder %s11077_s21, %s10530_s15 }
  0x6a   : > { %p10527_p0 = pnand %p10525_p4, %p11088_p5  ;;  %p10533_p3 = scmp.lt.s32.totalorder %s10531_s18, %s10524_s25 }
  0x6c   : > { %p10528_p8 = pneg %p10527_p0  ;;  %p10534_p6 = por %p10533_p3, %p10532_p9 }
  0x6e   : > { %p10535_p7 = pnand %p10534_p6, %p10528_p8 }
  0x70   : > { %10538 = shalt.err (!%p10535_p7)
}
  0x71   : > { %s15870_s11 = smov 4   ;;  %s15871_s14 = smov 64  }
  0x72   : > { %9340 = dma.hbm_to_vmem [thread:$0]  (!%p11065_p2), %s11074_s1, 4096, %s11077_s21, %s11082_s13, %s15871_s14, %s15871_s14, %s15870_s11  }
  0x73   : > { %s15741_s10 = sshll.u32 %s10832_s24, 8  ;;  %s15872_s9 = sld [smem:[#allocation117_spill]] }
  0x74   : > { %s15873_s18 = sshll.u32 %s11049_s28, 4  ;;  %s15874_s6 = sand.u32 1, %s10832_s24  }
  0x75   : > { %s719_s0 = scalar_lea.vmem [#allocation9], %s15873_s18  ;;  %s11128_s3 = scalar_lea.sflag [#allocation10], %s15874_s6 }
  0x76   : > { %s726_s7 = sshll.u32 %s719_s0, 4  ;;  %s11124_s7 = int_to_ptr.vmem [resolvable:$true] %s726_s7 }
  0x79   : > { %s11120_s15 = scalar_lea.hbm %s15872_s9, %s15741_s10  ;;  %s10544_s25 = scalar_lea.hbm %s15872_s9, 512 }
  0x7a   : > { %s10539_s20 = scalar_lea.hbm %s11120_s15, 256  ;;  %p10545_p6 = scmp.lt.s32.totalorder %s11120_s15, %s15872_s9 }
  0x7b   : > { %p10540_p1 = scmp.ne.s32.totalorder %s11120_s15, %s10539_s20  ;;  %p10546_p7 = scmp.lt.s32.totalorder %s10544_s25, %s10539_s20 }
  0x7d   : > { %p10542_p3 = pnand %p10540_p1, %p11088_p5  ;;  %p10547_p9 = por %p10546_p7, %p10545_p6 }
  0x7f   : > { %p10543_p4 = pneg %p10542_p3 }
  0x81   : > { %p10548_p13 = pnand %p10547_p9, %p10543_p4 }
  0x83   : > { %10551 = shalt.err (!%p10548_p13)
}
  0x84   : > { %s10552_s6 = scalar_lea.vmem %s11124_s7, 256  ;;  %s10841_s0 = smov [#allocation9]  }
  0x85   : > { %p10553_p10 = scmp.ne.s32.totalorder %s11124_s7, %s10552_s6  ;;  %s10557_s18 = sshll.u32 %s10841_s0, 4  ;;  %s10558_s18 = int_to_ptr.vmem [resolvable:$false] %s10557_s18 }
  0x86   : > { %s10559_s1 = scalar_lea.vmem %s10558_s18, 512  ;;  %p10560_p0 = scmp.lt.s32.totalorder %s11124_s7, %s10558_s18 }
  0x87   : > { %p10555_p11 = pnand %p10553_p10, %p11088_p5  ;;  %p10561_p8 = scmp.lt.s32.totalorder %s10559_s1, %s10552_s6 }
  0x89   : > { %p10556_p12 = pneg %p10555_p11  ;;  %p10562_p1 = por %p10561_p8, %p10560_p0 }
  0x8b   : > { %p10563_p3 = pnand %p10562_p1, %p10556_p12 }
  0x8d   : > { %10566 = shalt.err (!%p10563_p3)
}
  0x8e   : > { %9346 = dma.hbm_to_vmem [thread:$0]  (!%p11065_p2), %s11120_s15, 256, %s11124_s7, %s11128_s3, %s15871_s14, %s15871_s14, %s15870_s11  }
  0x8f   : > { %s15875_s20 = sshll.u32 %s10832_s24, 8  ;;  %s15876_s23 = sshll.u32 %s11049_s28, 4 }
  0x90   : > { %s11159_s25 = scalar_lea.hbm %s15684_s5, %s15875_s20  ;;  %s11163_s6 = scalar_lea.vmem [#allocation11], %s15876_s23 }
  0x91   : > { %s10842_s18 = smov [#allocation14]   ;;  %s10843_s9 = smov [#allocation17]  }
  0x92   : > { %s567_s1 = sshll.u32 %s10842_s18, 4  ;;  %s599_s22 = sshll.u32 %s10843_s9, 4  ;;  %s568_s1 = int_to_ptr.vmem [resolvable:$true] %s567_s1  ;;  %s600_s22 = int_to_ptr.vmem [resolvable:$true] %s599_s22 }
  0x93   : > { %s10578_s26 = scalar_lea.vmem %s568_s1, 1024  ;;  %p15877_p6 = scmp.ne.s32.totalorder %s15855_s29, 0 }
  0x94   : > { %p10579_p4 = scmp.ne.s32.totalorder %s568_s1, %s10578_s26  ;;  %p10586_p13 = scmp.lt.s32.totalorder %s568_s1, %s568_s1 }
  0x95   : > { %p10587_p10 = scmp.lt.s32.totalorder %s10578_s26, %s10578_s26 }
  0x96   : > { %p10581_p7 = pnand %p10579_p4, %p15877_p6 }
  0x97   : > { %p10588_p11 = por %p10587_p10, %p10586_p13 }
  0x98   : > { %p10582_p9 = pneg %p10581_p7 }
  0x9a   : > { %p10589_p12 = pnand %p10588_p11, %p10582_p9 }
  0x9c   : > { %10592 = shalt.err (!%p10589_p12)
}
  0x9d   : > { %p15878_p0 = scmp.ne.s32.totalorder %s15854_s4, 0  ;;  %s15879_s12 = sld [smem:[#allocation124_spill]] }
  0x9e   : > { %s10604_s9 = scalar_lea.vmem %s600_s22, 2048  ;;  %p10612_p4 = scmp.lt.s32.totalorder %s600_s22, %s600_s22 }
  0x9f   : > { %p10605_p8 = scmp.ne.s32.totalorder %s600_s22, %s10604_s9  ;;  %p10613_p7 = scmp.lt.s32.totalorder %s10604_s9, %s10604_s9 }
  0xa1   : > { %p10607_p1 = pnand %p10605_p8, %p15877_p6  ;;  %p10614_p9 = por %p10613_p7, %p10612_p4 }
  0xa3   : > { %9321 = dma.hbm_to_vmem [thread:$0]  (!%p15878_p0), %s15879_s12, 1024, %s568_s1, [#allocation13], %s15871_s14, %s15871_s14, %s15870_s11  }
  0xa4   : > { %p10608_p3 = pneg %p10607_p1 }
  0xa6   : > { %p10615_p13 = pnand %p10614_p9, %p10608_p3 }
  0xa8   : > { %10618 = shalt.err (!%p10615_p13)
}
  0xa9   : > { %s15880_s26 = smov 8   ;;  %s15881_s20 = smov 128  }
  0xaa   : > { %s15882_s16 = sld [smem:[#allocation128_spill]]  ;;  %s10844_s23 = smov [#allocation18]  }
  0xab   : > { %s612_s18 = sshll.u32 %s10844_s23, 4  ;;  %s629_s15 = sshll.u32 %s15698_s19, 4  ;;  %s613_s18 = int_to_ptr.vmem [resolvable:$true] %s612_s18  ;;  %s630_s15 = int_to_ptr.vmem [resolvable:$true] %s629_s15 }
  0xac   : > { %s10630_s9 = scalar_lea.vmem %s613_s18, 2048  ;;  %p10638_p8 = scmp.lt.s32.totalorder %s613_s18, %s613_s18 }
  0xad   : > { %p10631_p10 = scmp.ne.s32.totalorder %s613_s18, %s10630_s9  ;;  %p10639_p1 = scmp.lt.s32.totalorder %s10630_s9, %s10630_s9 }
  0xaf   : > { %p10633_p11 = pnand %p10631_p10, %p15877_p6  ;;  %p10640_p3 = por %p10639_p1, %p10638_p8 }
  0xb0   : > { %9327 = dma.hbm_to_vmem [thread:$0]  (!%p15878_p0), %s15882_s16, 2048, %s600_s22, [#allocation16], %s15881_s20, %s15881_s20, %s15880_s26  }
  0xb1   : > { %p10634_p12 = pneg %p10633_p11 }
  0xb3   : > { %p10641_p4 = pnand %p10640_p3, %p10634_p12 }
  0xb5   : > { %10644 = shalt.err (!%p10641_p4)
}
  0xb6   : > { %9330 = dma.hbm_to_vmem [thread:$0]  (!%p15878_p0), %s15696_s17, 2048, %s613_s18, [#allocation19], %s15881_s20, %s15881_s20, %s15880_s26  }
  0xb7   : > { %s10645_s21 = scalar_lea.vmem %s630_s15, 16  ;;  %p10653_p10 = scmp.lt.s32.totalorder %s630_s15, %s630_s15 }
  0xb8   : > { %p10646_p7 = scmp.ne.s32.totalorder %s630_s15, %s10645_s21  ;;  %p10654_p11 = scmp.lt.s32.totalorder %s10645_s21, %s10645_s21 }
  0xba   : > { %p10648_p9 = pnand %p10646_p7, %p15877_p6  ;;  %p10655_p8 = por %p10654_p11, %p10653_p10 }
  0xbc   : > { %p10649_p13 = pneg %p10648_p9 }
  0xbe   : > { %p10656_p12 = pnand %p10655_p8, %p10649_p13 }
  0xc0   : > { %10659 = shalt.err (!%p10656_p12)
}
  0xc1   : > { %s10845_s23 = smov [#allocation20]   ;;  %s15883_s18 = sld [smem:[#allocation114_spill]] }
  0xc2   : > { %9333 = dma.vmem_to_smem (!%p15878_p0), %s630_s15, 16, %s10845_s23, [#allocation5]  }
  0xc3   : > { %s653_s1 = scalar_lea.vmem [#allocation2], %s11060_s2  ;;  %s15884_s22 = sld [smem:[#allocation116_spill]] }
  0xc4   : > { %s661_s7 = sshll.u32 %s653_s1, 4  ;;  %s650_s0 = scalar_lea.sflag [#allocation3], %s11049_s28  ;;  %s11210_s7 = int_to_ptr.vmem [resolvable:$true] %s661_s7 }
  0xc7   : > { %s11207_s29 = scalar_lea.hbm %s15883_s18, %s11063_s30  ;;  %s10665_s26 = scalar_lea.hbm %s15883_s18, 8192 }
  0xc8   : > { %s10660_s12 = scalar_lea.hbm %s11207_s29, 4096  ;;  %p10666_p3 = scmp.lt.s32.totalorder %s11207_s29, %s15883_s18 }
  0xc9   : > { %s15885_s10 = smov %s15884_s22  ;;  %s11216_s21 = scalar_lea.hbm %s15884_s22, %s11063_s30 }
  0xca   : > { %p10661_p6 = scmp.ne.s32.totalorder %s11207_s29, %s10660_s12  ;;  %p10667_p4 = scmp.lt.s32.totalorder %s10665_s26, %s10660_s12 }
  0xcc   : > { %p10663_p0 = pnand %p10661_p6, %p11088_p5  ;;  %p10668_p7 = por %p10667_p4, %p10666_p3 }
  0xce   : > { %p10664_p1 = pneg %p10663_p0 }
  0xd0   : > { %p10669_p9 = pnand %p10668_p7, %p10664_p1 }
  0xd2   : > { %10672 = shalt.err (!%p10669_p9)
}
  0xd3   : > { %s10673_s30 = scalar_lea.vmem %s11210_s7, 4096  ;;  %s10846_s28 = smov [#allocation2]  }
  0xd4   : > { %p10674_p13 = scmp.ne.s32.totalorder %s11210_s7, %s10673_s30  ;;  %s10678_s1 = sshll.u32 %s10846_s28, 4  ;;  %s10679_s1 = int_to_ptr.vmem [resolvable:$false] %s10678_s1 }
  0xd5   : > { %s10680_s9 = scalar_lea.vmem %s10679_s1, 8192  ;;  %p10681_p8 = scmp.lt.s32.totalorder %s11210_s7, %s10679_s1 }
  0xd6   : > { %p10676_p10 = pnand %p10674_p13, %p11088_p5  ;;  %p10682_p12 = scmp.lt.s32.totalorder %s10680_s9, %s10673_s30 }
  0xd8   : > { %p10677_p11 = pneg %p10676_p10  ;;  %p10683_p6 = por %p10682_p12, %p10681_p8 }
  0xda   : > { %p10684_p0 = pnand %p10683_p6, %p10677_p11 }
  0xdc   : > { %10687 = shalt.err (!%p10684_p0)
}
  0xdd   : > { %9337 = dma.hbm_to_vmem [thread:$0]  (!%p11065_p2), %s11207_s29, 4096, %s11210_s7, %s650_s0, %s15871_s14, %s15871_s14, %s15870_s11  }
  0xde   : > { %s15886_s12 = sshll.u32 %s11163_s6, 4  ;;  %s697_s16 = scalar_lea.vmem [#allocation8], %s11060_s2  ;;  %s11244_s12 = int_to_ptr.vmem [resolvable:$true] %s15886_s12 }
  0xdf   : > { %s705_s4 = sshll.u32 %s697_s16, 4  ;;  %s10688_s22 = scalar_lea.hbm %s11216_s21, 4096  ;;  %s706_s4 = int_to_ptr.vmem [resolvable:$true] %s705_s4 }
  0xe0   : > { %p10689_p1 = scmp.ne.s32.totalorder %s11216_s21, %s10688_s22  ;;  %s10693_s26 = scalar_lea.hbm %s15885_s10, 8192 }
  0xe1   : > { %p10694_p7 = scmp.lt.s32.totalorder %s11216_s21, %s15885_s10  ;;  %p10695_p9 = scmp.lt.s32.totalorder %s10693_s26, %s10688_s22 }
  0xe2   : > { %p10691_p3 = pnand %p10689_p1, %p11088_p5 }
  0xe3   : > { %p10696_p13 = por %p10695_p9, %p10694_p7 }
  0xe4   : > { %p10692_p4 = pneg %p10691_p3 }
  0xe6   : > { %p10697_p10 = pnand %p10696_p13, %p10692_p4 }
  0xe8   : > { %10700 = shalt.err (!%p10697_p10)
}
  0xe9   : > { %s10701_s2 = scalar_lea.vmem %s706_s4, 4096  ;;  %s10847_s6 = smov [#allocation8]  }
  0xea   : > { %p10702_p11 = scmp.ne.s32.totalorder %s706_s4, %s10701_s2  ;;  %s10706_s0 = sshll.u32 %s10847_s6, 4  ;;  %s10707_s0 = int_to_ptr.vmem [resolvable:$false] %s10706_s0 }
  0xeb   : > { %s10708_s29 = scalar_lea.vmem %s10707_s0, 8192  ;;  %p10709_p6 = scmp.lt.s32.totalorder %s706_s4, %s10707_s0 }
  0xec   : > { %p10704_p8 = pnand %p10702_p11, %p11088_p5  ;;  %p10710_p0 = scmp.lt.s32.totalorder %s10708_s29, %s10701_s2 }
  0xee   : > { %p10705_p12 = pneg %p10704_p8  ;;  %p10711_p1 = por %p10710_p0, %p10709_p6 }
  0xf0   : > { %p10712_p3 = pnand %p10711_p1, %p10705_p12 }
  0xf2   : > { %10715 = shalt.err (!%p10712_p3)
}
  0xf3   : > { %9343 = dma.hbm_to_vmem [thread:$0]  (!%p11065_p2), %s11216_s21, 4096, %s706_s4, %s11082_s13, %s15871_s14, %s15871_s14, %s15870_s11  }
  0xf4   : > { %s10716_s7 = scalar_lea.hbm %s11159_s25, 256  ;;  %s10721_s9 = scalar_lea.hbm %s15684_s5, 512 }
  0xf5   : > { %p10717_p4 = scmp.ne.s32.totalorder %s11159_s25, %s10716_s7  ;;  %p10722_p13 = scmp.lt.s32.totalorder %s11159_s25, %s15684_s5 }
  0xf6   : > { %p10723_p10 = scmp.lt.s32.totalorder %s10721_s9, %s10716_s7 }
  0xf7   : > { %p10719_p7 = pnand %p10717_p4, %p11088_p5 }
  0xf8   : > { %p10724_p11 = por %p10723_p10, %p10722_p13 }
  0xf9   : > { %p10720_p9 = pneg %p10719_p7 }
  0xfb   : > { %p10725_p8 = pnand %p10724_p11, %p10720_p9 }
  0xfd   : > { %10728 = shalt.err (!%p10725_p8)
}
  0xfe   : > { %s10729_s13 = scalar_lea.vmem %s11244_s12, 256  ;;  %s10848_s21 = smov [#allocation11]  }
  0xff   : > { %p10730_p12 = scmp.ne.s32.totalorder %s11244_s12, %s10729_s13  ;;  %s10734_s4 = sshll.u32 %s10848_s21, 4  ;;  %s10735_s4 = int_to_ptr.vmem [resolvable:$false] %s10734_s4 }
 0x100   : > { %s10736_s15 = scalar_lea.vmem %s10735_s4, 512  ;;  %p10737_p1 = scmp.lt.s32.totalorder %s11244_s12, %s10735_s4 }
 0x101   : > { %p10732_p6 = pnand %p10730_p12, %p11088_p5  ;;  %p10738_p3 = scmp.lt.s32.totalorder %s10736_s15, %s10729_s13 }
 0x103   : > { %p10733_p0 = pneg %p10732_p6  ;;  %p10739_p4 = por %p10738_p3, %p10737_p1 }
 0x105   : > { %p10740_p7 = pnand %p10739_p4, %p10733_p0 }
 0x107   : > { %10743 = shalt.err (!%p10740_p7)
}
 0x108   : > { %9349 = dma.hbm_to_vmem [thread:$0]  (!%p11065_p2), %s11159_s25, 256, %s11244_s12, %s11128_s3, %s15871_s14, %s15871_s14, %s15870_s11  }
 0x109   : > { %s15887_s8 = sld [smem:[#allocation34_spill]] }
 0x10f   : > { %p15888_p5 = scmp.ne.s32.totalorder %s15887_s8, 0 }
 0x111   : > { %759 = sbr.rel (%p15888_p5) target bundleno = 2197 (0x895), region = 100 }
 0x116   : > { %s15889_s23 = sld [smem:[#allocation31_spill]] }
 0x117   : > { %s15890_s26 = sld [smem:[#allocation37_spill]] }
 0x11c   : > { %s11294_s20 = sand.u32 1, %s15889_s23  }
 0x11d   : > { %s8505_s30 = sshll.u32 %s11294_s20, 8  ;;  %s762_s2 = scalar_lea.sflag [#allocation3], %s11294_s20 }
 0x11e   : > { %s11298_s6 = scalar_lea.vmem [#allocation2], %s8505_s30  ;;  %p15891_p9 = scmp.ne.s32.totalorder %s15890_s26, 0 }
 0x120   : > { %10787 = dma.done.wait (%p15891_p9), %s762_s2, 4096  }
 0x121   : > { %10789 = vsyncadd (%p15891_p9), %s762_s2, 4294963200  ;;  %s15892_s27 = sld [smem:[#allocation33_spill]]  ;;  %s11305_s14 = scalar_lea.vmem [#allocation6], %s8505_s30 }
 0x127   : > { %s770_s3 = sand.u32 1, %s15892_s27  }
 0x128   : > { %s771_s11 = scalar_lea.sflag [#allocation7], %s770_s3 }
 0x129   : > { %10791 = dma.done.wait (%p15891_p9), %s771_s11, 8192  }
 0x12a   : > { %10793 = vsyncadd (%p15891_p9), %s771_s11, 4294959104  ;;  %s8508_s25 = sshll.u32 %s11294_s20, 4  ;;  %s11312_s12 = scalar_lea.vmem [#allocation8], %s8505_s30 }
 0x12b   : > { %s789_s0 = scalar_lea.sflag [#allocation10], %s770_s3  ;;  %s11314_s29 = scalar_lea.vmem [#allocation9], %s8508_s25 }
 0x12c   : > { %10795 = dma.done.wait (%p15891_p9), %s789_s0, 512  }
 0x12d   : > { %10797 = vsyncadd (%p15891_p9), %s789_s0, 4294966784  ;;  %s11320_s7 = scalar_lea.vmem [#allocation11], %s8508_s25  ;;  %p15893_p2 = scmp.eq.s32.totalorder %s15892_s27, 0 }
 0x12f   : > { %10799 = dma.done.wait (%p15893_p2), [#allocation13], 2048   ;;  %p15894_p13 = pmov %p15893_p2 }
 0x130   : > { %p15895_p10 = pmov %p15893_p2 }
 0x131   : > { %10801 = vsyncadd (%p15894_p13), [#allocation13], 4294965248 }
 0x132   : > { %10803 = dma.done.wait (%p15895_p10), [#allocation16], 4096   ;;  %p15896_p11 = pmov %p15893_p2 }
 0x133   : > { %p15897_p8 = pmov %p15893_p2 }
 0x134   : > { %10805 = vsyncadd (%p15896_p11), [#allocation16], 4294963200 }
 0x135   : > { %10807 = dma.done.wait (%p15897_p8), [#allocation19], 2048   ;;  %p15898_p12 = pmov %p15893_p2 }
 0x136   : > { %p15899_p6 = pmov %p15893_p2 }
 0x137   : > { %10809 = vsyncadd (%p15898_p12), [#allocation19], 4294965248 }
 0x138   : > { %10811 = dma.done.wait (%p15899_p6), [#allocation5], 16   ;;  %p15900_p0 = pmov %p15893_p2 }
 0x13a   : > { %10813 = vsyncadd (%p15900_p0), [#allocation5], 4294967280 }
 0x13b   : > { %830 = sfence }
 0x13c   : > { %s15901_s9 = sld [smem:[#allocation118_spill]]  ;;  %v9422_v1 = vld [vmem:[#allocation12 + $0x38] sm:$0xff]   ;;  %v10849_v2 = vmov 0   ;;  %v9424_v4 = vld [vmem:[#allocation12 + $0x30] sm:$0xff]   ;;  %v9426_v6 = vld [vmem:[#allocation12 + $0x28] sm:$0xff]   ;;  %s8517_s26 = sshll.u32 %s15892_s27, 2 }
 0x13d   : > { %9416 = vset.pattern.permute.xlu1 %v10849_v2  ;;  %9415 = vset.pattern.permute.xlu0 %v10849_v2  ;;  %v9428_v8 = vld [vmem:[#allocation12 + $0x20] sm:$0xff]   ;;  %v9430_v10 = vld [vmem:[#allocation12 + $0x18] sm:$0xff]   ;;  %v9432_v14 = vld [vmem:[#allocation12 + $0x10] sm:$0xff]   ;;  %p909_p1 = scmp.lt.s32.totalorder %s8517_s26, 7  ;;  %s15902_s22 = sld [smem:[#allocation113_spill]]  ;;  %vm1961_vm0 = vcmask 130112  }
 0x13e   : > { %9005 = vmatprep.subr.bf16.mxu1 %v9422_v1  ;;  %v925_v12 = vld [vmem:[%s11298_s6] sm:$0xff]   ;;  %v9434_v16 = vld [vmem:[#allocation12 + $0x8] sm:$0xff]   ;;  %v929_v21 = vld [vmem:[%s11298_s6 + $0x10] sm:$0xff]   ;;  %s15903_s15 = sld [smem:[#allocation119_spill]]  ;;  %vm2242_vm1 = vcmask 1041409   ;;  %vm2244_vm2 = vcmask 1042434  }
 0x13f   : > { %9006 = vmatpush3.bf16.msra.mxu1 %v9422_v1  ;;  %v3042_v13 = vld [vmem:[%s11305_s14] sm:$0xff]   ;;  %8941 = vmatprep.mubr.bf16.mxu0 %v925_v12  ;;  %s16490_s26 = smov (!%p909_p1, %s8517_s26), 7  ;;  %v927_v19 = vld [vmem:[%s11298_s6 + $0x8] sm:$0xff]   ;;  %v3046_v22 = vld [vmem:[%s11305_s14 + $0x10] sm:$0xff]   ;;  %s15905_s3 = sld [smem:[#allocation120_spill]]  ;;  %vm2246_vm3 = vcmask 1043459  }
 0x140   : > { %9007 = vmatprep.subr.bf16.mxu1 %v9424_v4  ;;  %9021 = vmatprep.mubr.bf16.mxu1 %v3042_v13  ;;  %v9436_v18 = vld [vmem:[#allocation12] sm:$0xff]   ;;  %s8518_s28 = sshll.u32 %s16490_s26, 3  ;;  %v3044_v20 = vld [vmem:[%s11305_s14 + $0x8] sm:$0xff]   ;;  %v931_v25 = vld [vmem:[%s11298_s6 + $0x18] sm:$0xff]   ;;  %s15904_s26 = sld [smem:[#allocation122_spill]]  ;;  %vm2248_vm4 = vcmask 1044484  }
 0x141   : > { %v3048_v27 = vld [vmem:[%s11305_s14 + $0x18] sm:$0xff]   ;;  %v933_v28 = vld [vmem:[%s11298_s6 + $0x20] sm:$0xff]   ;;  %v935_v31 = vld [vmem:[%s11298_s6 + $0x28] sm:$0xff]   ;;  %s15906_s0 = sld [smem:[#allocation123_spill]]  ;;  %vm2250_vm5 = vcmask 1045509   ;;  %vm15758_vm6 = vcmask 1046534  }
 0x142   : > { %v9421_v0 = vld [vmem:[%s15901_s9 + $0x38] sm:$0xff]   ;;  %v9423_v3 = vld [vmem:[%s15901_s9 + $0x30] sm:$0xff]   ;;  %v9425_v5 = vld [vmem:[%s15901_s9 + $0x28] sm:$0xff]   ;;  %vm2254_vm7 = vcmask 1047559   ;;  %vm2285_vm9 = vcmask 130048   ;;  %s16478_s25 = sld [smem:[#allocation38_spill]] }
 0x143   : > { %8925 = vmatprep.subr.bf16.mxu0 %v9421_v0  ;;  %9008 = vmatpush3.bf16.msra.mxu1 %v9424_v4  ;;  %v9427_v7 = vld [vmem:[%s15901_s9 + $0x20] sm:$0xff]   ;;  %v9429_v9 = vld [vmem:[%s15901_s9 + $0x18] sm:$0xff]   ;;  %v9431_v11 = vld [vmem:[%s15901_s9 + $0x10] sm:$0xff]   ;;  %s11371_s13 = scalar_lea.vmem %s15902_s22, %s8518_s28  ;;  %s11645_s28 = sld [smem:[#allocation20]] }
 0x144   : > { %8926 = vmatpush3.bf16.msra.mxu0 %v9421_v0  ;;  %9009 = vmatprep.subr.bf16.mxu1 %v9426_v6  ;;  %v9433_v15 = vld [vmem:[%s15901_s9 + $0x8] sm:$0xff]   ;;  %v9435_v17 = vld [vmem:[%s15901_s9] sm:$0xff]   ;;  %v923_v23 = vld [vmem:[%s11371_s13 + $0x10] sm:$0xff]  ;;  %s11664_s22 = sld [smem:[#allocation20 + $0x1]]  ;;  %s8726_s1 = sshll.u32 %s15892_s27, 9 }
 0x145   : > { %8927 = vmatprep.subr.bf16.mxu0 %v9423_v3  ;;  %998 = vperm.xlu1 %9416, %v923_v23   ;;  %v921_v24 = vld [vmem:[%s11371_s13] sm:$0xff]  ;;  %v924_v26 = vld [vmem:[%s11371_s13 + $0x18] sm:$0xff]  ;;  %v922_v29 = vld [vmem:[%s11371_s13 + $0x8] sm:$0xff]  ;;  %s16479_s4 = sld [smem:[#allocation130_spill]]  ;;  %s8233_s23 = scalar_lea.sflag [#allocation4], %s11294_s20 }
 0x146   : > { %992 = vperm.xlu0 %9415, %v921_v24   ;;  %v3050_v30 = vld [vmem:[%s11305_s14 + $0x20] sm:$0xff]   ;;  %v3052_v32 = vld [vmem:[%s11305_s14 + $0x28] sm:$0xff]   ;;  %v937_v33 = vld [vmem:[%s11298_s6 + $0x30] sm:$0xff]   ;;  %s10852_s27 = smov [#allocation21]  }
 0x147   : > { %9010 = vmatpush3.bf16.msra.mxu1 %v9426_v6  ;;  %v3054_v34 = vld [vmem:[%s11305_s14 + $0x30] sm:$0xff]   ;;  %v939_v35 = vld [vmem:[%s11298_s6 + $0x38] sm:$0xff]   ;;  %v941_v37 = vld [vmem:[%s11298_s6 + $0x40] sm:$0xff]  }
 0x148   : > { %8928 = vmatpush3.bf16.msra.mxu0 %v9423_v3  ;;  %9011 = vmatprep.subr.bf16.mxu1 %v9428_v8  ;;  %v3056_v36 = vld [vmem:[%s11305_s14 + $0x38] sm:$0xff]   ;;  %v3058_v38 = vld [vmem:[%s11305_s14 + $0x40] sm:$0xff]   ;;  %v943_v39 = vld [vmem:[%s11298_s6 + $0x48] sm:$0xff]   ;;  %p16480_p4 = scmp.ne.s32.totalorder %s16478_s25, 0 }
 0x149   : > { %8929 = vmatprep.subr.bf16.mxu0 %v9425_v5  ;;  %1001 = vperm.xlu1 %9416, %v924_v26   ;;  %v3060_v40 = vld [vmem:[%s11305_s14 + $0x48] sm:$0xff]   ;;  %v945_v41 = vld [vmem:[%s11298_s6 + $0x50] sm:$0xff]   ;;  %v947_v43 = vld [vmem:[%s11298_s6 + $0x58] sm:$0xff]  }
 0x14a   : > { %995 = vperm.xlu0 %9415, %v922_v29   ;;  %v3062_v42 = vld [vmem:[%s11305_s14 + $0x50] sm:$0xff]   ;;  %v3064_v44 = vld [vmem:[%s11305_s14 + $0x58] sm:$0xff]   ;;  %v949_v45 = vld [vmem:[%s11298_s6 + $0x60] sm:$0xff]  }
 0x14b   : > { %9012 = vmatpush3.bf16.msra.mxu1 %v9428_v8  ;;  %v3066_v46 = vld [vmem:[%s11305_s14 + $0x60] sm:$0xff]   ;;  %v951_v47 = vld [vmem:[%s11298_s6 + $0x68] sm:$0xff]   ;;  %v953_v49 = vld [vmem:[%s11298_s6 + $0x70] sm:$0xff]   ;;  %s15636_s8 = scalar_lea.hbm %s16479_s4, %s8726_s1 }
 0x14c   : > { %8930 = vmatpush3.bf16.msra.mxu0 %v9425_v5  ;;  %9013 = vmatprep.subr.bf16.mxu1 %v9430_v10  ;;  %v3068_v48 = vld [vmem:[%s11305_s14 + $0x68] sm:$0xff]   ;;  %v3070_v50 = vld [vmem:[%s11305_s14 + $0x70] sm:$0xff]   ;;  %v955_v51 = vld [vmem:[%s11298_s6 + $0x78] sm:$0xff]  }
 0x14d   : > { %8931 = vmatprep.subr.bf16.mxu0 %v9427_v7  ;;  %v3072_v52 = vld [vmem:[%s11305_s14 + $0x78] sm:$0xff]   ;;  %v957_v53 = vld [vmem:[%s11298_s6 + $0x80] sm:$0xff]   ;;  %v959_v55 = vld [vmem:[%s11298_s6 + $0x88] sm:$0xff]  }
 0x14e   : > { %v3074_v54 = vld [vmem:[%s11305_s14 + $0x80] sm:$0xff]   ;;  %v3076_v56 = vld [vmem:[%s11305_s14 + $0x88] sm:$0xff]   ;;  %v961_v57 = vld [vmem:[%s11298_s6 + $0x90] sm:$0xff]  }
 0x14f   : > { %9014 = vmatpush3.bf16.msra.mxu1 %v9430_v10  ;;  %v3078_v58 = vld [vmem:[%s11305_s14 + $0x90] sm:$0xff]   ;;  %v963_v59 = vld [vmem:[%s11298_s6 + $0x98] sm:$0xff]   ;;  %v965_v61 = vld [vmem:[%s11298_s6 + $0xa0] sm:$0xff]  }
 0x150   : > { %8932 = vmatpush3.bf16.msra.mxu0 %v9427_v7  ;;  %9015 = vmatprep.subr.bf16.mxu1 %v9432_v14  ;;  %v3080_v60 = vld [vmem:[%s11305_s14 + $0x98] sm:$0xff]   ;;  %v3082_v62 = vld [vmem:[%s11305_s14 + $0xa0] sm:$0xff]   ;;  %v967_v63 = vld [vmem:[%s11298_s6 + $0xa8] sm:$0xff]  }
 0x151   : > { %8933 = vmatprep.subr.bf16.mxu0 %v9429_v9  ;;  %v3084_v0 = vld [vmem:[%s11305_s14 + $0xa8] sm:$0xff]   ;;  %v969_v1 = vld [vmem:[%s11298_s6 + $0xb0] sm:$0xff]   ;;  %v971_v3 = vld [vmem:[%s11298_s6 + $0xb8] sm:$0xff]  }
 0x152   : > { %v3086_v2 = vld [vmem:[%s11305_s14 + $0xb0] sm:$0xff]   ;;  %v3088_v4 = vld [vmem:[%s11305_s14 + $0xb8] sm:$0xff]   ;;  %v973_v5 = vld [vmem:[%s11298_s6 + $0xc0] sm:$0xff]  }
 0x153   : > { %9016 = vmatpush3.bf16.msra.mxu1 %v9432_v14  ;;  %v3090_v6 = vld [vmem:[%s11305_s14 + $0xc0] sm:$0xff]   ;;  %v975_v7 = vld [vmem:[%s11298_s6 + $0xc8] sm:$0xff]   ;;  %v3094_v10 = vld [vmem:[%s11305_s14 + $0xd0] sm:$0xff]  }
 0x154   : > { %8934 = vmatpush3.bf16.msra.mxu0 %v9429_v9  ;;  %9017 = vmatprep.subr.bf16.mxu1 %v9434_v16  ;;  %v3092_v8 = vld [vmem:[%s11305_s14 + $0xc8] sm:$0xff]   ;;  %v977_v9 = vld [vmem:[%s11298_s6 + $0xd0] sm:$0xff]   ;;  %v3096_v12 = vld [vmem:[%s11305_s14 + $0xd8] sm:$0xff]  }
 0x155   : > { %8935 = vmatprep.subr.bf16.mxu0 %v9431_v11  ;;  %v981_v13 = vld [vmem:[%s11298_s6 + $0xe0] sm:$0xff]   ;;  %v9503_v23 = vld [vmem:[#allocation14 + $0x28] sm:$0xff]   ;;  %v9506_v26 = vld [vmem:[#allocation14 + $0x10] sm:$0xff]  }
 0x156   : > { %v3098_v14 = vld [vmem:[%s11305_s14 + $0xe0] sm:$0xff]  }
 0x157   : > { %9018 = vmatpush3.bf16.msra.mxu1 %v9434_v16  ;;  %v3100_v16 = vld [vmem:[%s11305_s14 + $0xe8] sm:$0xff]   ;;  %v9504_v24 = vld [vmem:[#allocation14 + $0x20] sm:$0xff]  }
 0x158   : > { %8936 = vmatpush3.bf16.msra.mxu0 %v9431_v11  ;;  %9019 = vmatprep.subr.bf16.mxu1 %v9436_v18  ;;  %v979_v11 = vld [vmem:[%s11298_s6 + $0xd8] sm:$0xff]   ;;  %v5147_v29 = vld [vmem:[%s11312_s12] sm:$0xff]  }
 0x159   : > { %8937 = vmatprep.subr.bf16.mxu0 %v9433_v15 }
 0x15b   : > { %9020 = vmatpush3.bf16.msra.mxu1 %v9436_v18  ;;  %v3102_v18 = vld [vmem:[%s11305_s14 + $0xf0] sm:$0xff]  }
 0x15c   : > { %8938 = vmatpush3.bf16.msra.mxu0 %v9433_v15  ;;  %v983_v15 = vld [vmem:[%s11298_s6 + $0xe8] sm:$0xff]  }
 0x15d   : > { %8939 = vmatprep.subr.bf16.mxu0 %v9435_v17 }
 0x15e   : > { %9022 = vmatmul.mubr.bf16.vlgmr.msra.gmra.mxu1 %v3044_v20  ;;  %v3104_v20 = vld [vmem:[%s11305_s14 + $0xf8] sm:$0xff]  }
 0x15f   : > { %9025 = vmatprep.mubr.bf16.mxu1 %v3046_v22  ;;  %v9502_v22 = vld [vmem:[#allocation14 + $0x30] sm:$0xff]  }
 0x160   : > { %8940 = vmatpush3.bf16.msra.mxu0 %v9435_v17  ;;  %v985_v17 = vld [vmem:[%s11298_s6 + $0xf0] sm:$0xff]  }
 0x163   : > { %8942 = vmatmul.mubr.bf16.vlgmr.msra.gmra.mxu0 %v927_v19  ;;  %v987_v19 = vld [vmem:[%s11298_s6 + $0xf8] sm:$0xff]  }
 0x164   : > { %8945 = vmatprep.mubr.bf16.mxu0 %v929_v21  ;;  %v9501_v21 = vld [vmem:[#allocation14 + $0x38] sm:$0xff]  }
 0x165   : > { %9085 = vmatprep.subr.bf16.mxu0 %v9501_v21 }
 0x166   : > { %9026 = vmatmul.mubr.bf16.gmra.mxu1 %v3048_v27  ;;  %9086 = vmatpush3.bf16.msra.mxu0 %v9501_v21  ;;  %v9507_v27 = vld [vmem:[#allocation14 + $0x8] sm:$0xff]  }
 0x167   : > { %9029 = vmatprep.mubr.bf16.mxu1 %v3050_v30  ;;  %9087 = vmatprep.subr.bf16.mxu0 %v9502_v22  ;;  %v5149_v30 = vld [vmem:[%s11312_s12 + $0x8] sm:$0xff]  }
 0x16a   : > { %9088 = vmatpush3.bf16.msra.mxu0 %v9502_v22 }
 0x16b   : > { %8946 = vmatmul.mubr.bf16.gmra.mxu0 %v931_v25  ;;  %9089 = vmatprep.subr.bf16.mxu0 %v9503_v23  ;;  %v9505_v25 = vld [vmem:[#allocation14 + $0x18] sm:$0xff]  }
 0x16c   : > { %8949 = vmatprep.mubr.bf16.mxu0 %v933_v28  ;;  %v9508_v28 = vld [vmem:[#allocation14] sm:$0xff]  }
 0x16e   : > { %9030 = vmatmul.mubr.bf16.gmra.mxu1 %v3052_v32  ;;  %9090 = vmatpush3.bf16.msra.mxu0 %v9503_v23  ;;  %v5153_v32 = vld [vmem:[%s11312_s12 + $0x18] sm:$0xff]  }
 0x16f   : > { %9033 = vmatprep.mubr.bf16.mxu1 %v3054_v34  ;;  %9091 = vmatprep.subr.bf16.mxu0 %v9504_v24  ;;  %v5157_v34 = vld [vmem:[%s11312_s12 + $0x28] sm:$0xff]  }
 0x172   : > { %9092 = vmatpush3.bf16.msra.mxu0 %v9504_v24 }
 0x173   : > { %8950 = vmatmul.mubr.bf16.gmra.mxu0 %v935_v31  ;;  %9093 = vmatprep.subr.bf16.mxu0 %v9505_v25  ;;  %v5151_v31 = vld [vmem:[%s11312_s12 + $0x10] sm:$0xff]  }
 0x174   : > { %8953 = vmatprep.mubr.bf16.mxu0 %v937_v33  ;;  %v5155_v33 = vld [vmem:[%s11312_s12 + $0x20] sm:$0xff]  }
 0x176   : > { %9034 = vmatmul.mubr.bf16.gmra.mxu1 %v3056_v36  ;;  %9094 = vmatpush3.bf16.msra.mxu0 %v9505_v25  ;;  %v5161_v36 = vld [vmem:[%s11312_s12 + $0x38] sm:$0xff]  }
 0x177   : > { %9037 = vmatprep.mubr.bf16.mxu1 %v3058_v38  ;;  %9095 = vmatprep.subr.bf16.mxu0 %v9506_v26  ;;  %v5165_v38 = vld [vmem:[%s11312_s12 + $0x48] sm:$0xff]  }
 0x17a   : > { %9096 = vmatpush3.bf16.msra.mxu0 %v9506_v26 }
 0x17b   : > { %8954 = vmatmul.mubr.bf16.gmra.mxu0 %v939_v35  ;;  %9097 = vmatprep.subr.bf16.mxu0 %v9507_v27  ;;  %v5159_v35 = vld [vmem:[%s11312_s12 + $0x30] sm:$0xff]  }
 0x17c   : > { %8957 = vmatprep.mubr.bf16.mxu0 %v941_v37  ;;  %v5163_v37 = vld [vmem:[%s11312_s12 + $0x40] sm:$0xff]  }
 0x17e   : > { %9038 = vmatmul.mubr.bf16.gmra.mxu1 %v3060_v40  ;;  %9098 = vmatpush3.bf16.msra.mxu0 %v9507_v27  ;;  %v11454_v40 = vld [vmem:[%s15904_s26] ss:$0 sm:$0xff] }
 0x17f   : > { %9041 = vmatprep.mubr.bf16.mxu1 %v3062_v42  ;;  %9099 = vmatprep.subr.bf16.mxu0 %v9508_v28 }
 0x182   : > { %9100 = vmatpush3.bf16.msra.mxu0 %v9508_v28 }
 0x183   : > { %8958 = vmatmul.mubr.bf16.gmra.mxu0 %v943_v39  ;;  %v11449_v39 = vld [vmem:[%s15903_s15] ss:$0 sm:$0xff] }
 0x184   : > { %8961 = vmatprep.mubr.bf16.mxu0 %v945_v41 }
 0x186   : > { %9042 = vmatmul.mubr.bf16.gmra.mxu1 %v3064_v44 }
 0x187   : > { %9045 = vmatprep.mubr.bf16.mxu1 %v3066_v46 }
 0x18b   : > { %8962 = vmatmul.mubr.bf16.gmra.mxu0 %v947_v43 }
 0x18c   : > { %8965 = vmatprep.mubr.bf16.mxu0 %v949_v45 }
 0x18e   : > { %9046 = vmatmul.mubr.bf16.gmra.mxu1 %v3068_v48 }
 0x18f   : > { %9049 = vmatprep.mubr.bf16.mxu1 %v3070_v50 }
 0x193   : > { %8966 = vmatmul.mubr.bf16.gmra.mxu0 %v951_v47 }
 0x194   : > { %8969 = vmatprep.mubr.bf16.mxu0 %v953_v49 }
 0x196   : > { %9050 = vmatmul.mubr.bf16.gmra.mxu1 %v3072_v52 }
 0x197   : > { %9053 = vmatprep.mubr.bf16.mxu1 %v3074_v54 }
 0x19b   : > { %8970 = vmatmul.mubr.bf16.gmra.mxu0 %v955_v51 }
 0x19c   : > { %8973 = vmatprep.mubr.bf16.mxu0 %v957_v53 }
 0x19e   : > { %9054 = vmatmul.mubr.bf16.gmra.mxu1 %v3076_v56 }
 0x19f   : > { %9057 = vmatprep.mubr.bf16.mxu1 %v3078_v58 }
 0x1a3   : > { %8974 = vmatmul.mubr.bf16.gmra.mxu0 %v959_v55 }
 0x1a4   : > { %8977 = vmatprep.mubr.bf16.mxu0 %v961_v57 }
 0x1a6   : > { %9058 = vmatmul.mubr.bf16.gmra.mxu1 %v3080_v60 }
 0x1a7   : > { %9061 = vmatprep.mubr.bf16.mxu1 %v3082_v62 }
 0x1ab   : > { %8978 = vmatmul.mubr.bf16.gmra.mxu0 %v963_v59 }
 0x1ac   : > { %8981 = vmatprep.mubr.bf16.mxu0 %v965_v61  ;;  %v11468_v61 = vld [vmem:[%s15905_s3] ss:$0 sm:$0xff] }
 0x1ae   : > { %9062 = vmatmul.mubr.bf16.gmra.mxu1 %v3084_v0 }
 0x1af   : > { %9065 = vmatprep.mubr.bf16.mxu1 %v3086_v2 }
 0x1b3   : > { %8982 = vmatmul.mubr.bf16.gmra.mxu0 %v967_v63  ;;  %v11473_v63 = vld [vmem:[%s15906_s0] ss:$0 sm:$0xff] }
 0x1b4   : > { %8985 = vmatprep.mubr.bf16.mxu0 %v969_v1 }
 0x1b6   : > { %9066 = vmatmul.mubr.bf16.gmra.mxu1 %v3088_v4 }
 0x1b7   : > { %9069 = vmatprep.mubr.bf16.mxu1 %v3090_v6 }
 0x1bb   : > { %8986 = vmatmul.mubr.bf16.gmra.mxu0 %v971_v3 }
 0x1bc   : > { %8989 = vmatprep.mubr.bf16.mxu0 %v973_v5 }
 0x1be   : > { %9070 = vmatmul.mubr.bf16.gmra.mxu1 %v3092_v8 }
 0x1bf   : > { %9073 = vmatprep.mubr.bf16.mxu1 %v3094_v10 }
 0x1c3   : > { %8990 = vmatmul.mubr.bf16.gmra.mxu0 %v975_v7 }
 0x1c4   : > { %8993 = vmatprep.mubr.bf16.mxu0 %v977_v9 }
 0x1c6   : > { %9074 = vmatmul.mubr.bf16.gmra.mxu1 %v3096_v12 }
 0x1c7   : > { %9077 = vmatprep.mubr.bf16.mxu1 %v3098_v14 }
 0x1cb   : > { %8994 = vmatmul.mubr.bf16.gmra.mxu0 %v979_v11 }
 0x1cc   : > { %8997 = vmatprep.mubr.bf16.mxu0 %v981_v13 }
 0x1ce   : > { %9078 = vmatmul.mubr.bf16.gmra.mxu1 %v3100_v16 }
 0x1cf   : > { %9081 = vmatprep.mubr.bf16.mxu1 %v3102_v18 }
 0x1d3   : > { %8998 = vmatmul.mubr.bf16.gmra.mxu0 %v983_v15 }
 0x1d4   : > { %9001 = vmatprep.mubr.bf16.mxu0 %v985_v17 }
 0x1d6   : > { %9082 = vmatmul.mubr.bf16.gmra.mxu1 %v3104_v20 }
 0x1db   : > { %9002 = vmatmul.mubr.bf16.gmra.mxu0 %v987_v19 }
 0x1dc   : > { %9101 = vmatprep.mubr.bf16.mxu0 %v5147_v29 }
 0x1e3   : > { %9102 = vmatmul.mubr.bf16.vlgmr.msra.gmra.mxu0 %v5149_v30 }
 0x1e4   : > { %9105 = vmatprep.mubr.bf16.mxu0 %v5151_v31 }
 0x1eb   : > { %9106 = vmatmul.mubr.bf16.gmra.mxu0 %v5153_v32 }
 0x1ec   : > { %9109 = vmatprep.mubr.bf16.mxu0 %v5155_v33 }
 0x1f3   : > { %9110 = vmatmul.mubr.bf16.gmra.mxu0 %v5157_v34 }
 0x1f4   : > { %9113 = vmatprep.mubr.bf16.mxu0 %v5159_v35 }
 0x1fb   : > { %9114 = vmatmul.mubr.bf16.gmra.mxu0 %v5161_v36 }
 0x1fc   : > { %9117 = vmatprep.mubr.bf16.mxu0 %v5163_v37 }
 0x203   : > { %9118 = vmatmul.mubr.bf16.gmra.mxu0 %v5165_v38 }
 0x21e   : > { %v9023_v43 = vpop.f32.mrf.mxu1 }
 0x21f   : > { %v3429_v44 = vadd.f32 %v9023_v43, %v11454_v40 }
 0x220   : > { %v3420_v46 = vpop.f32.mrf.mxu1 }
 0x221   : > { %v3421_v53 = vadd.f32 %v11454_v40, %v3420_v46 }
 0x222   : > { %v9024_v49 = vpop.f32.mrf.mxu1 }
 0x223   : > { %v8943_v41 = vpop.f32.mrf.mxu0  ;;  %v3432_v1 = vadd.f32 %v9024_v49, %v11454_v40 }
 0x224   : > { %v1314_v42 = vadd.f32 %v8943_v41, %v11449_v39  ;;  %v3423_v52 = vpop.f32.mrf.mxu1 }
 0x225   : > { %v1305_v45 = vpop.f32.mrf.mxu0  ;;  %v3424_v54 = vadd.f32 %v11454_v40, %v3423_v52 }
 0x226   : > { %9637 = vtanh.f32 %v1314_v42  ;;  %v1306_v47 = vadd.f32 %v11449_v39, %v1305_v45  ;;  %v9027_v58 = vpop.f32.mrf.mxu1 }
 0x227   : > { %9639 = vtanh.f32 %v3429_v44  ;;  %v8944_v48 = vpop.f32.mrf.mxu0  ;;  %v3445_v59 = vadd.f32 %v9027_v58, %v11454_v40 }
 0x228   : > { %9641 = vtanh.f32 %v1306_v47  ;;  %v1317_v57 = vadd.f32 %v8944_v48, %v11449_v39  ;;  %v3436_v4 = vpop.f32.mrf.mxu1 }
 0x229   : > { %v1308_v50 = vpop.f32.mrf.mxu0  ;;  %v3437_v12 = vadd.f32 %v11454_v40, %v3436_v4 }
 0x22a   : > { %v1309_v51 = vadd.f32 %v11449_v39, %v1308_v50  ;;  %v9028_v11 = vpop.f32.mrf.mxu1 }
 0x22b   : > { %v8947_v55 = vpop.f32.mrf.mxu0  ;;  %v3448_v15 = vadd.f32 %v9028_v11, %v11454_v40 }
 0x22c   : > { %9643 = vtanh.f32 %v1309_v51  ;;  %v1330_v56 = vadd.f32 %v8947_v55, %v11449_v39  ;;  %v3439_v21 = vpop.f32.mrf.mxu1 }
 0x22d   : > { %9645 = vtanh.f32 %v3424_v54  ;;  %v1321_v60 = vpop.f32.mrf.mxu0  ;;  %v3440_v31 = vadd.f32 %v11454_v40, %v3439_v21 }
 0x22e   : > { %9647 = vtanh.f32 %v3421_v53  ;;  %v1322_v5 = vadd.f32 %v11449_v39, %v1321_v60  ;;  %v9031_v24 = vpop.f32.mrf.mxu1 }
 0x22f   : > { %9649 = vtanh.f32 %v1330_v56  ;;  %v8948_v3 = vpop.f32.mrf.mxu0  ;;  %v3461_v26 = vadd.f32 %v9031_v24, %v11454_v40 }
 0x230   : > { %9651 = vtanh.f32 %v1317_v57  ;;  %v1333_v8 = vadd.f32 %v8948_v3, %v11449_v39  ;;  %v3452_v36 = vpop.f32.mrf.mxu1 }
 0x231   : > { %9653 = vtanh.f32 %v3445_v59  ;;  %v1324_v10 = vpop.f32.mrf.mxu0  ;;  %v3453_v46 = vadd.f32 %v11454_v40, %v3452_v36  ;;  %v5167_v36 = vld [vmem:[%s11312_s12 + $0x50] sm:$0xff]  }
 0x232   : > { %9655 = vtanh.f32 %v3432_v1  ;;  %v1325_v23 = vadd.f32 %v11449_v39, %v1324_v10  ;;  %v9032_v45 = vpop.f32.mrf.mxu1  ;;  %9121 = vmatprep.mubr.bf16.mxu0 %v5167_v36 }
 0x233   : > { %v9638_v62 = vpop.eup %9637  ;;  %9657 = vtanh.f32 %v1322_v5  ;;  %v8951_v16 = vpop.f32.mrf.mxu0  ;;  %v3464_v49 = vadd.f32 %v9032_v45, %v11454_v40 }
 0x234   : > { %v9640_v0 = vpop.eup %9639  ;;  %v1633_v2 = vmul.f32 %v9638_v62, %v11468_v61  ;;  %9659 = vtanh.f32 %v1333_v8  ;;  %v1346_v18 = vadd.f32 %v8951_v16, %v11449_v39  ;;  %v3455_v55 = vpop.f32.mrf.mxu1 }
 0x235   : > { %v3748_v6 = vmul.f32 %v9640_v0, %v11473_v63  ;;  %v9642_v7 = vpop.eup %9641  ;;  %9661 = vtanh.f32 %v3437_v12  ;;  %v1337_v30 = vpop.f32.mrf.mxu0  ;;  %v3456_v3 = vadd.f32 %v11454_v40, %v3455_v55 }
 0x236   : > { %1699 = vadd.xlane.f32.xlu0 %v1633_v2  ;;  %v1631_v19 = vmul.f32 %v9642_v7, %v11468_v61  ;;  %9663 = vtanh.f32 %v3448_v15  ;;  %v1338_v37 = vadd.f32 %v11449_v39, %v1337_v30  ;;  %v9035_v58 = vpop.f32.mrf.mxu1 }
 0x237   : > { %9665 = vtanh.f32 %v1346_v18  ;;  %v8952_v35 = vpop.f32.mrf.mxu0  ;;  %v3477_v60 = vadd.f32 %v9035_v58, %v11454_v40 }
 0x238   : > { %9667 = vtanh.f32 %v1325_v23  ;;  %v1349_v41 = vadd.f32 %v8952_v35, %v11449_v39  ;;  %v3468_v8 = vpop.f32.mrf.mxu1 }
 0x239   : > { %v9644_v9 = vpop.eup %9643  ;;  %9669 = vtanh.f32 %v3461_v26  ;;  %v1340_v44 = vpop.f32.mrf.mxu0  ;;  %v3469_v16 = vadd.f32 %v11454_v40, %v3468_v8 }
 0x23a   : > { %3814 = vadd.xlane.f32.xlu0 %v3748_v6  ;;  %v1632_v13 = vmul.f32 %v9644_v9, %v11468_v61  ;;  %v9646_v14 = vpop.eup %9645  ;;  %9671 = vtanh.f32 %v3440_v31  ;;  %v1341_v57 = vadd.f32 %v11449_v39, %v1340_v44  ;;  %v9036_v15 = vpop.f32.mrf.mxu1 }
 0x23b   : > { %v9648_v17 = vpop.eup %9647  ;;  %v3747_v22 = vmul.f32 %v9646_v14, %v11473_v63  ;;  %9673 = vtanh.f32 %v1338_v37  ;;  %v8955_v50 = vpop.f32.mrf.mxu0 }
 0x23c   : > { %1697 = vadd.xlane.f32.xlu1 %v1632_v13  ;;  %v9650_v20 = vpop.eup %9649  ;;  %v3746_v27 = vmul.f32 %v9648_v17, %v11473_v63  ;;  %9675 = vtanh.f32 %v1349_v41  ;;  %v1362_v52 = vadd.f32 %v8955_v50, %v11449_v39  ;;  %v5169_v41 = vld [vmem:[%s11312_s12 + $0x58] sm:$0xff]  }
 0x23d   : > { %v9652_v25 = vpop.eup %9651  ;;  %v1637_v28 = vmul.f32 %v9650_v20, %v11468_v61  ;;  %9677 = vtanh.f32 %v3453_v46  ;;  %v1353_v2 = vpop.f32.mrf.mxu0  ;;  %9122 = vmatmul.mubr.bf16.gmra.mxu0 %v5169_v41 }
 0x23e   : > { %1695 = vadd.xlane.f32.xlu0 %v1631_v19  ;;  %v9654_v29 = vpop.eup %9653  ;;  %v1634_v32 = vmul.f32 %v9652_v25, %v11468_v61  ;;  %9679 = vtanh.f32 %v3464_v49  ;;  %v1354_v9 = vadd.f32 %v11449_v39, %v1353_v2  ;;  %v3480_v19 = vadd.f32 %v9036_v15, %v11454_v40  ;;  %v3471_v25 = vpop.f32.mrf.mxu1  ;;  %v5177_v15 = vld [vmem:[%s11312_s12 + $0x78] sm:$0xff]  }
 0x23f   : > { %v3752_v33 = vmul.f32 %v9654_v29, %v11473_v63  ;;  %v9656_v34 = vpop.eup %9655  ;;  %9681 = vtanh.f32 %v1362_v52  ;;  %v8956_v7 = vpop.f32.mrf.mxu0  ;;  %v3472_v35 = vadd.f32 %v11454_v40, %v3471_v25 }
 0x240   : > { %3812 = vadd.xlane.f32.xlu1 %v3747_v22  ;;  %v9658_v38 = vpop.eup %9657  ;;  %v3749_v42 = vmul.f32 %v9656_v34, %v11473_v63  ;;  %9683 = vtanh.f32 %v1341_v57  ;;  %v1365_v11 = vadd.f32 %v8956_v7, %v11449_v39  ;;  %v5171_v57 = vld [vmem:[%s11312_s12 + $0x60] sm:$0xff]  }
 0x241   : > { %v9660_v43 = vpop.eup %9659  ;;  %v1635_v47 = vmul.f32 %v9658_v38, %v11468_v61  ;;  %9685 = vtanh.f32 %v3477_v60  ;;  %v1356_v14 = vpop.f32.mrf.mxu0  ;;  %9125 = vmatprep.mubr.bf16.mxu0 %v5171_v57 }
 0x242   : > { %3810 = vadd.xlane.f32.xlu0 %v3746_v27  ;;  %v9662_v48 = vpop.eup %9661  ;;  %v1638_v53 = vmul.f32 %v9660_v43, %v11468_v61  ;;  %9687 = vtanh.f32 %v3456_v3  ;;  %v1357_v27 = vadd.f32 %v11449_v39, %v1356_v14 }
 0x243   : > { %v9664_v51 = vpop.eup %9663  ;;  %v3750_v56 = vmul.f32 %v9662_v48, %v11473_v63  ;;  %9689 = vtanh.f32 %v1354_v9  ;;  %v8959_v20 = vpop.f32.mrf.mxu0 }
 0x244   : > { %1707 = vadd.xlane.f32.xlu1 %v1637_v28  ;;  %v9666_v54 = vpop.eup %9665  ;;  %v3753_v62 = vmul.f32 %v9664_v51, %v11473_v63  ;;  %9691 = vtanh.f32 %v1365_v11  ;;  %v1378_v22 = vadd.f32 %v8959_v20, %v11449_v39  ;;  %v9039_v28 = vpop.f32.mrf.mxu1 }
 0x245   : > { %v9668_v59 = vpop.eup %9667  ;;  %v1641_v0 = vmul.f32 %v9666_v54, %v11468_v61  ;;  %9693 = vtanh.f32 %v3469_v16  ;;  %v3493_v30 = vadd.f32 %v9039_v28, %v11454_v40  ;;  %v1369_v34 = vpop.f32.mrf.mxu0 }
 0x246   : > { %1701 = vadd.xlane.f32.xlu0 %v1634_v32  ;;  %v9670_v1 = vpop.eup %9669  ;;  %v1636_v4 = vmul.f32 %v9668_v59, %v11468_v61  ;;  %9695 = vtanh.f32 %v3480_v19  ;;  %v3484_v44 = vpop.f32.mrf.mxu1  ;;  %v1370_v45 = vadd.f32 %v11449_v39, %v1369_v34 }
 0x247   : > { %v3756_v5 = vmul.f32 %v9670_v1, %v11473_v63  ;;  %v9672_v6 = vpop.eup %9671  ;;  %9697 = vtanh.f32 %v1378_v22  ;;  %v8960_v43 = vpop.f32.mrf.mxu0  ;;  %v3485_v52 = vadd.f32 %v11454_v40, %v3484_v44 }
 0x248   : > { %3822 = vadd.xlane.f32.xlu1 %v3752_v33  ;;  %v9674_v10 = vpop.eup %9673  ;;  %v3751_v12 = vmul.f32 %v9672_v6, %v11473_v63  ;;  %9699 = vtanh.f32 %v1357_v27  ;;  %v9040_v51 = vpop.f32.mrf.mxu1 }
 0x249   : > { %v9676_v13 = vpop.eup %9675  ;;  %v1639_v17 = vmul.f32 %v9674_v10, %v11468_v61  ;;  %9701 = vtanh.f32 %v3493_v30  ;;  %v1372_v50 = vpop.f32.mrf.mxu0  ;;  %v3496_v55 = vadd.f32 %v9040_v51, %v11454_v40 }
 0x24a   : > { %3816 = vadd.xlane.f32.xlu0 %v3749_v42  ;;  %v9678_v18 = vpop.eup %9677  ;;  %v1642_v23 = vmul.f32 %v9676_v13, %v11468_v61  ;;  %9703 = vtanh.f32 %v3472_v35  ;;  %v3487_v1 = vpop.f32.mrf.mxu1  ;;  %v1373_v3 = vadd.f32 %v11449_v39, %v1372_v50  ;;  %v5181_v35 = vld [vmem:[%s11312_s12 + $0x88] sm:$0xff]  }
 0x24b   : > { %v9680_v21 = vpop.eup %9679  ;;  %v3754_v26 = vmul.f32 %v9678_v18, %v11473_v63  ;;  %9705 = vtanh.f32 %v1370_v45  ;;  %v3488_v11 = vadd.f32 %v11454_v40, %v3487_v1 }
 0x24c   : > { %1703 = vadd.xlane.f32.xlu1 %v1635_v47  ;;  %v9682_v24 = vpop.eup %9681  ;;  %v3757_v31 = vmul.f32 %v9680_v21, %v11473_v63  ;;  %v1381_v47 = vadd.f32 %v8960_v43, %v11449_v39 }
 0x24d   : > { %v9684_v29 = vpop.eup %9683  ;;  %v1645_v32 = vmul.f32 %v9682_v24, %v11468_v61 }
 0x24e   : > { %1709 = vadd.xlane.f32.xlu0 %v1638_v53  ;;  %v9686_v33 = vpop.eup %9685  ;;  %v1640_v37 = vmul.f32 %v9684_v29, %v11468_v61  ;;  %9707 = vtanh.f32 %v1381_v47 }
 0x24f   : > { %v3760_v38 = vmul.f32 %v9686_v33, %v11473_v63  ;;  %v9688_v42 = vpop.eup %9687  ;;  %9709 = vtanh.f32 %v3485_v52  ;;  %v5183_v52 = vld [vmem:[%s11312_s12 + $0x90] sm:$0xff]  }
 0x250   : > { %3818 = vadd.xlane.f32.xlu1 %v3750_v56  ;;  %v9690_v46 = vpop.eup %9689  ;;  %v3755_v48 = vmul.f32 %v9688_v42, %v11473_v63  ;;  %v8963_v56 = vpop.f32.mrf.mxu0  ;;  %9711 = vtanh.f32 %v3496_v55  ;;  %v5185_v55 = vld [vmem:[%s11312_s12 + $0x98] sm:$0xff]  }
 0x251   : > { %v9692_v49 = vpop.eup %9691  ;;  %v1643_v53 = vmul.f32 %v9690_v46, %v11468_v61  ;;  %v1394_v59 = vadd.f32 %v8963_v56, %v11449_v39 }
 0x252   : > { %3824 = vadd.xlane.f32.xlu0 %v3753_v62  ;;  %v9694_v54 = vpop.eup %9693  ;;  %v1646_v60 = vmul.f32 %v9692_v49, %v11468_v61  ;;  %v5173_v62 = vld [vmem:[%s11312_s12 + $0x68] sm:$0xff]   ;;  %v1385_v10 = vpop.f32.mrf.mxu0 }
 0x253   : > { %v9696_v58 = vpop.eup %9695  ;;  %v3758_v2 = vmul.f32 %v9694_v54, %v11473_v63  ;;  %9126 = vmatmul.mubr.bf16.gmra.mxu0 %v5173_v62  ;;  %9713 = vtanh.f32 %v1394_v59  ;;  %v1386_v19 = vadd.f32 %v11449_v39, %v1385_v10 }
 0x254   : > { %1715 = vadd.xlane.f32.xlu1 %v1641_v0  ;;  %v9698_v0 = vpop.eup %9697  ;;  %v3761_v7 = vmul.f32 %v9696_v58, %v11473_v63  ;;  %9715 = vtanh.f32 %v1373_v3 }
 0x255   : > { %v1649_v8 = vmul.f32 %v9698_v0, %v11468_v61 }
 0x256   : > { %1705 = vadd.xlane.f32.xlu0 %v1636_v4  ;;  %v9043_v4 = vpop.f32.mrf.mxu1 }
 0x257   : > { %v3509_v6 = vadd.f32 %v9043_v4, %v11454_v40 }
 0x258   : > { %3830 = vadd.xlane.f32.xlu1 %v3756_v5  ;;  %v9700_v5 = vpop.eup %9699  ;;  %v3500_v18 = vpop.f32.mrf.mxu1 }
 0x259   : > { %v9702_v9 = vpop.eup %9701  ;;  %9717 = vtanh.f32 %v3509_v6  ;;  %v1644_v13 = vmul.f32 %v9700_v5, %v11468_v61 }
 0x25a   : > { %3820 = vadd.xlane.f32.xlu0 %v3751_v12  ;;  %v5175_v12 = vld [vmem:[%s11312_s12 + $0x70] sm:$0xff]   ;;  %v3764_v14 = vmul.f32 %v9702_v9, %v11473_v63  ;;  %v9704_v16 = vpop.eup %9703  ;;  %9719 = vtanh.f32 %v3488_v11  ;;  %v9044_v25 = vpop.f32.mrf.mxu1 }
 0x25b   : > { %9129 = vmatprep.mubr.bf16.mxu0 %v5175_v12  ;;  %v9706_v20 = vpop.eup %9705  ;;  %v3759_v22 = vmul.f32 %v9704_v16, %v11473_v63  ;;  %9721 = vtanh.f32 %v1386_v19  ;;  %v3512_v29 = vadd.f32 %v9044_v25, %v11454_v40  ;;  %v5189_v12 = vld [vmem:[%s11312_s12 + $0xa8] sm:$0xff]  }
 0x25c   : > { %1711 = vadd.xlane.f32.xlu1 %v1639_v17  ;;  %v8964_v17 = vpop.f32.mrf.mxu0  ;;  %9130 = vmatmul.mubr.bf16.gmra.mxu0 %v5177_v15  ;;  %v1647_v27 = vmul.f32 %v9706_v20, %v11468_v61 }
 0x25d   : > { %v1397_v21 = vadd.f32 %v8964_v17, %v11449_v39 }
 0x25e   : > { %1717 = vadd.xlane.f32.xlu0 %v1642_v23  ;;  %v9708_v23 = vpop.eup %9707  ;;  %v1388_v24 = vpop.f32.mrf.mxu0 }
 0x25f   : > { %v9710_v28 = vpop.eup %9709  ;;  %9723 = vtanh.f32 %v1397_v21  ;;  %v1650_v34 = vmul.f32 %v9708_v23, %v11468_v61  ;;  %v1389_v41 = vadd.f32 %v11449_v39, %v1388_v24 }
 0x260   : > { %3826 = vadd.xlane.f32.xlu1 %v3754_v26  ;;  %v3501_v26 = vadd.f32 %v11454_v40, %v3500_v18  ;;  %v8967_v30 = vpop.f32.mrf.mxu0 }
 0x261   : > { %v1410_v33 = vadd.f32 %v8967_v30, %v11449_v39 }
 0x262   : > { %3832 = vadd.xlane.f32.xlu0 %v3757_v31  ;;  %v5179_v31 = vld [vmem:[%s11312_s12 + $0x80] sm:$0xff]   ;;  %9725 = vtanh.f32 %v3501_v26  ;;  %v1401_v42 = vpop.f32.mrf.mxu0  ;;  %v5191_v26 = vld [vmem:[%s11312_s12 + $0xb0] sm:$0xff]  }
 0x263   : > { %9133 = vmatprep.mubr.bf16.mxu0 %v5179_v31  ;;  %9727 = vtanh.f32 %v3512_v29  ;;  %v1402_v57 = vadd.f32 %v11449_v39, %v1401_v42  ;;  %v5193_v29 = vld [vmem:[%s11312_s12 + $0xb8] sm:$0xff]  }
 0x264   : > { %1723 = vadd.xlane.f32.xlu1 %v1645_v32  ;;  %v9712_v32 = vpop.eup %9711  ;;  %9134 = vmatmul.mubr.bf16.gmra.mxu0 %v5181_v35  ;;  %9729 = vtanh.f32 %v1410_v33  ;;  %v8968_v50 = vpop.f32.mrf.mxu0 }
 0x265   : > { %v9714_v36 = vpop.eup %9713  ;;  %v3765_v46 = vmul.f32 %v9712_v32, %v11473_v63  ;;  %9731 = vtanh.f32 %v1389_v41  ;;  %9137 = vmatprep.mubr.bf16.mxu0 %v5183_v52  ;;  %v1413_v62 = vadd.f32 %v8968_v50, %v11449_v39  ;;  %v5197_v52 = vld [vmem:[%s11312_s12 + $0xc8] sm:$0xff]  }
 0x266   : > { %1713 = vadd.xlane.f32.xlu0 %v1640_v37  ;;  %v3503_v37 = vpop.f32.mrf.mxu1  ;;  %v9716_v44 = vpop.eup %9715  ;;  %v1653_v47 = vmul.f32 %v9714_v36, %v11468_v61 }
 0x267   : > { %v3504_v49 = vadd.f32 %v11454_v40, %v3503_v37  ;;  %v1404_v59 = vpop.f32.mrf.mxu0 }
 0x268   : > { %3838 = vadd.xlane.f32.xlu1 %v3760_v38  ;;  %v3762_v38 = vmul.f32 %v9710_v28, %v11473_v63  ;;  %v9047_v43 = vpop.f32.mrf.mxu1  ;;  %v1405_v17 = vadd.f32 %v11449_v39, %v1404_v59 }
 0x269   : > { %v3525_v45 = vadd.f32 %v9047_v43, %v11454_v40 }
 0x26a   : > { %3828 = vadd.xlane.f32.xlu0 %v3755_v48  ;;  %v9718_v48 = vpop.eup %9717  ;;  %v3516_v51 = vpop.f32.mrf.mxu1 }
 0x26b   : > { %9733 = vtanh.f32 %v3525_v45  ;;  %v3768_v54 = vmul.f32 %v9718_v48, %v11473_v63  ;;  %v9720_v56 = vpop.eup %9719  ;;  %v3517_v3 = vadd.f32 %v11454_v40, %v3516_v51  ;;  %v5195_v48 = vld [vmem:[%s11312_s12 + $0xc0] sm:$0xff]  }
 0x26c   : > { %1719 = vadd.xlane.f32.xlu1 %v1643_v53  ;;  %v1648_v53 = vmul.f32 %v9716_v44, %v11468_v61  ;;  %v9722_v58 = vpop.eup %9721  ;;  %9138 = vmatmul.mubr.bf16.gmra.mxu0 %v5185_v55  ;;  %9735 = vtanh.f32 %v3504_v49  ;;  %v3763_v0 = vmul.f32 %v9720_v56, %v11473_v63 }
 0x26d   : > { %v9724_v1 = vpop.eup %9723  ;;  %9737 = vtanh.f32 %v1402_v57  ;;  %v1651_v4 = vmul.f32 %v9722_v58, %v11468_v61 }
 0x26e   : > { %1725 = vadd.xlane.f32.xlu0 %v1646_v60  ;;  %v9048_v60 = vpop.f32.mrf.mxu1  ;;  %9739 = vtanh.f32 %v1413_v62  ;;  %v1654_v11 = vmul.f32 %v9724_v1, %v11468_v61 }
 0x26f   : > { %v9726_v5 = vpop.eup %9725  ;;  %v3528_v6 = vadd.f32 %v9048_v60, %v11454_v40  ;;  %9741 = vtanh.f32 %v3517_v3 }
 0x270   : > { %3834 = vadd.xlane.f32.xlu1 %v3758_v2  ;;  %v8971_v2 = vpop.f32.mrf.mxu0  ;;  %v9728_v9 = vpop.eup %9727  ;;  %v3766_v16 = vmul.f32 %v9726_v5, %v11473_v63 }
 0x271   : > { %v1426_v10 = vadd.f32 %v8971_v2, %v11449_v39  ;;  %9743 = vtanh.f32 %v3528_v6  ;;  %v3769_v20 = vmul.f32 %v9728_v9, %v11473_v63 }
 0x272   : > { %3840 = vadd.xlane.f32.xlu0 %v3761_v7  ;;  %v3519_v7 = vpop.f32.mrf.mxu1 }
 0x273   : > { %9745 = vtanh.f32 %v1426_v10  ;;  %v3520_v25 = vadd.f32 %v11454_v40, %v3519_v7 }
 0x274   : > { %1731 = vadd.xlane.f32.xlu1 %v1649_v8  ;;  %v5187_v8 = vld [vmem:[%s11312_s12 + $0xa0] sm:$0xff]   ;;  %v9051_v15 = vpop.f32.mrf.mxu1  ;;  %9747 = vtanh.f32 %v1405_v17 }
 0x275   : > { %9141 = vmatprep.mubr.bf16.mxu0 %v5187_v8  ;;  %v3541_v19 = vadd.f32 %v9051_v15, %v11454_v40 }
 0x276   : > { %1721 = vadd.xlane.f32.xlu0 %v1644_v13  ;;  %v9730_v13 = vpop.eup %9729  ;;  %9142 = vmatmul.mubr.bf16.gmra.mxu0 %v5189_v12  ;;  %v3532_v24 = vpop.f32.mrf.mxu1 }
 0x277   : > { %v9732_v18 = vpop.eup %9731  ;;  %v1657_v21 = vmul.f32 %v9730_v13, %v11468_v61  ;;  %9749 = vtanh.f32 %v3541_v19  ;;  %9145 = vmatprep.mubr.bf16.mxu0 %v5191_v26  ;;  %v3533_v42 = vadd.f32 %v11454_v40, %v3532_v24 }
 0x278   : > { %3846 = vadd.xlane.f32.xlu1 %v3764_v14  ;;  %v1417_v14 = vpop.f32.mrf.mxu0  ;;  %v9052_v32 = vpop.f32.mrf.mxu1  ;;  %9751 = vtanh.f32 %v3520_v25 }
 0x279   : > { %v1418_v33 = vadd.f32 %v11449_v39, %v1417_v14  ;;  %v3544_v45 = vadd.f32 %v9052_v32, %v11454_v40 }
 0x27a   : > { %3836 = vadd.xlane.f32.xlu0 %v3759_v22  ;;  %v9734_v22 = vpop.eup %9733  ;;  %v8972_v23 = vpop.f32.mrf.mxu0 }
 0x27b   : > { %v3772_v28 = vmul.f32 %v9734_v22, %v11473_v63  ;;  %v9736_v30 = vpop.eup %9735  ;;  %v1429_v36 = vadd.f32 %v8972_v23, %v11449_v39  ;;  %v3535_v41 = vpop.f32.mrf.mxu1  ;;  %9753 = vtanh.f32 %v1418_v33 }
 0x27c   : > { %1727 = vadd.xlane.f32.xlu1 %v1647_v27  ;;  %v1652_v27 = vmul.f32 %v9732_v18, %v11468_v61  ;;  %v1420_v31 = vpop.f32.mrf.mxu0  ;;  %v3767_v37 = vmul.f32 %v9736_v30, %v11473_v63  ;;  %v3536_v3 = vadd.f32 %v11454_v40, %v3535_v41 }
 0x27d   : > { %9755 = vtanh.f32 %v1429_v36  ;;  %v1421_v55 = vadd.f32 %v11449_v39, %v1420_v31  ;;  %v11619_v36 = vpop.permute.xlu0 %992 }
 0x27e   : > { %1733 = vadd.xlane.f32.xlu0 %v1650_v34  ;;  %v9738_v34 = vpop.eup %9737  ;;  %v8975_v35 = vpop.f32.mrf.mxu0  ;;  %9146 = vmatmul.mubr.bf16.gmra.mxu0 %v5193_v29  ;;  %9757 = vtanh.f32 %v3533_v42  ;;  %15907 = vst [vmem:[#allocation40_spill] sm:$0xff] %v11619_v36 }
 0x27f   : > { %v1655_v43 = vmul.f32 %v9738_v34, %v11468_v61  ;;  %v1442_v50 = vadd.f32 %v8975_v35, %v11449_v39  ;;  %9149 = vmatprep.mubr.bf16.mxu0 %v5195_v48  ;;  %9759 = vtanh.f32 %v3544_v45  ;;  %v5199_v48 = vld [vmem:[%s11312_s12 + $0xd0] sm:$0xff]  }
 0x280   : > { %3842 = vadd.xlane.f32.xlu1 %v3762_v38  ;;  %v9740_v38 = vpop.eup %9739 }
 0x281   : > { %v9742_v44 = vpop.eup %9741  ;;  %v1658_v51 = vmul.f32 %v9740_v38, %v11468_v61  ;;  %9761 = vtanh.f32 %v1442_v50 }
 0x282   : > { %3848 = vadd.xlane.f32.xlu0 %v3765_v46  ;;  %v1433_v46 = vpop.f32.mrf.mxu0  ;;  %v9744_v49 = vpop.eup %9743  ;;  %9763 = vtanh.f32 %v1421_v55 }
 0x283   : > { %v3773_v60 = vmul.f32 %v9744_v49, %v11473_v63  ;;  %v1434_v8 = vadd.f32 %v11449_v39, %v1433_v46 }
 0x284   : > { %1739 = vadd.xlane.f32.xlu1 %v1653_v47  ;;  %v9055_v47 = vpop.f32.mrf.mxu1  ;;  %v8976_v56 = vpop.f32.mrf.mxu0 }
 0x285   : > { %v3557_v59 = vadd.f32 %v9055_v47, %v11454_v40 }
 0x286   : > { %1729 = vadd.xlane.f32.xlu0 %v1648_v53  ;;  %v9746_v53 = vpop.eup %9745  ;;  %v3548_v57 = vpop.f32.mrf.mxu1  ;;  %9150 = vmatmul.mubr.bf16.gmra.mxu0 %v5197_v52 }
 0x287   : > { %v9748_v58 = vpop.eup %9747  ;;  %v1661_v62 = vmul.f32 %v9746_v53, %v11468_v61  ;;  %v1436_v1 = vpop.f32.mrf.mxu0  ;;  %9765 = vtanh.f32 %v3557_v59  ;;  %9153 = vmatprep.mubr.bf16.mxu0 %v5199_v48 }
 0x288   : > { %3854 = vadd.xlane.f32.xlu1 %v3768_v54  ;;  %v3770_v54 = vmul.f32 %v9742_v44, %v11473_v63  ;;  %v9056_v2 = vpop.f32.mrf.mxu1  ;;  %9767 = vtanh.f32 %v3536_v3  ;;  %v11634_v53 = vpop.permute.xlu0 %995 }
 0x289   : > { %v8979_v7 = vpop.f32.mrf.mxu0  ;;  %9769 = vtanh.f32 %v1434_v8  ;;  %v3560_v25 = vadd.f32 %v9056_v2, %v11454_v40  ;;  %15908 = vst [vmem:[#allocation41_spill] sm:$0xff] %v11634_v53 }
 0x28a   : > { %3844 = vadd.xlane.f32.xlu0 %v3763_v0  ;;  %v9750_v0 = vpop.eup %9749  ;;  %v3551_v10 = vpop.f32.mrf.mxu1  ;;  %v1458_v29 = vadd.f32 %v8979_v7, %v11449_v39 }
 0x28b   : > { %v3776_v5 = vmul.f32 %v9750_v0, %v11473_v63  ;;  %v9752_v6 = vpop.eup %9751  ;;  %v1449_v14 = vpop.f32.mrf.mxu0 }
 0x28c   : > { %1735 = vadd.xlane.f32.xlu1 %v1651_v4  ;;  %v1656_v4 = vmul.f32 %v9748_v58, %v11468_v61  ;;  %v9754_v9 = vpop.eup %9753  ;;  %v3771_v12 = vmul.f32 %v9752_v6, %v11473_v63  ;;  %v9059_v15 = vpop.f32.mrf.mxu1  ;;  %v1450_v55 = vadd.f32 %v11449_v39, %v1449_v14 }
 0x28d   : > { %v9756_v13 = vpop.eup %9755  ;;  %v1659_v17 = vmul.f32 %v9754_v9, %v11468_v61  ;;  %v8980_v23 = vpop.f32.mrf.mxu0  ;;  %v3573_v35 = vadd.f32 %v9059_v15, %v11454_v40 }
 0x28e   : > { %1741 = vadd.xlane.f32.xlu0 %v1654_v11  ;;  %v1445_v11 = vadd.f32 %v8976_v56, %v11449_v39  ;;  %v9758_v18 = vpop.eup %9757  ;;  %v3564_v24 = vpop.f32.mrf.mxu1  ;;  %v1461_v38 = vadd.f32 %v8980_v23, %v11449_v39 }
 0x28f   : > { %v9760_v19 = vpop.eup %9759  ;;  %v3774_v26 = vmul.f32 %v9758_v18, %v11473_v63  ;;  %v1452_v33 = vpop.f32.mrf.mxu0  ;;  %v3565_v2 = vadd.f32 %v11454_v40, %v3564_v24 }
 0x290   : > { %3850 = vadd.xlane.f32.xlu1 %v3766_v16  ;;  %v3549_v16 = vadd.f32 %v11454_v40, %v3548_v57  ;;  %9771 = vtanh.f32 %v1445_v11  ;;  %v9762_v22 = vpop.eup %9761  ;;  %v3777_v30 = vmul.f32 %v9760_v19, %v11473_v63  ;;  %v9060_v34 = vpop.f32.mrf.mxu1  ;;  %v11674_v19 = vld [vmem:[%s15903_s15] ss:$0 sm:$0xff] }
 0x291   : > { %v1665_v31 = vmul.f32 %v9762_v22, %v11468_v61  ;;  %v3576_v49 = vadd.f32 %v9060_v34, %v11454_v40 }
 0x292   : > { %3856 = vadd.xlane.f32.xlu0 %v3769_v20  ;;  %v1437_v20 = vadd.f32 %v11449_v39, %v1436_v1  ;;  %9773 = vtanh.f32 %v3549_v16  ;;  %v3567_v44 = vpop.f32.mrf.mxu1 }
 0x294   : > { %1747 = vadd.xlane.f32.xlu1 %v1657_v21  ;;  %v1662_v21 = vmul.f32 %v9756_v13, %v11468_v61  ;;  %9775 = vtanh.f32 %v1437_v20  ;;  %v11628_v47 = vpop.f32.mrf.mxu1 }
 0x295   : > { %9777 = vtanh.f32 %v3560_v25 }
 0x296   : > { %1737 = vadd.xlane.f32.xlu0 %v1652_v27  ;;  %v3552_v27 = vadd.f32 %v11454_v40, %v3551_v10  ;;  %v11640_v59 = vpop.f32.mrf.mxu1 }
 0x298   : > { %3862 = vadd.xlane.f32.xlu1 %v3772_v28  ;;  %v9764_v28 = vpop.eup %9763  ;;  %9779 = vtanh.f32 %v3552_v27  ;;  %v9064_v8 = vpop.f32.mrf.mxu1  ;;  %v10850_v27 = vmov 1  }
 0x299   : > { %v9766_v32 = vpop.eup %9765  ;;  %9781 = vtanh.f32 %v1458_v29  ;;  %v1660_v41 = vmul.f32 %v9764_v28, %v11468_v61  ;;  %9418 = vset.pattern.permute.xlu0 %v10850_v27  ;;  %v11685_v29 = vstv %s11645_s28  ;;  %9417 = vset.pattern.permute.xlu1 %v10850_v27  ;;  %s15926_s28 = sld [smem:[#allocation125_spill]] }
 0x29a   : > { %3852 = vadd.xlane.f32.xlu0 %v3767_v37  ;;  %v11621_v37 = vpop.f32.mrf.mxu0  ;;  %v3780_v42 = vmul.f32 %v9766_v32, %v11473_v63  ;;  %9783 = vtanh.f32 %v3573_v35  ;;  %v3583_v25 = vpop.f32.mrf.mxu1 }
 0x29b   : > { %9785 = vtanh.f32 %v1461_v38  ;;  %v1474_v20 = vadd.f32 %v11674_v19, %v11621_v37  ;;  %v11704_v38 = vld [vmem:[%s15905_s3] ss:$0 sm:$0xff] }
 0x29c   : > { %1743 = vadd.xlane.f32.xlu1 %v1655_v43  ;;  %v9768_v43 = vpop.eup %9767  ;;  %v11626_v46 = vpop.f32.mrf.mxu0  ;;  %9787 = vtanh.f32 %v3576_v49 }
 0x29d   : > { %v9770_v45 = vpop.eup %9769  ;;  %v3775_v50 = vmul.f32 %v9768_v43, %v11473_v63  ;;  %9789 = vtanh.f32 %v1450_v55 }
 0x29e   : > { %1749 = vadd.xlane.f32.xlu0 %v1658_v51  ;;  %v5201_v51 = vld [vmem:[%s11312_s12 + $0xd8] sm:$0xff]   ;;  %v9772_v52 = vpop.eup %9771  ;;  %v1663_v56 = vmul.f32 %v9770_v45, %v11468_v61  ;;  %v8984_v58 = vpop.f32.mrf.mxu0 }
 0x29f   : > { %v9774_v57 = vpop.eup %9773  ;;  %9154 = vmatmul.mubr.bf16.gmra.mxu0 %v5201_v51  ;;  %v1666_v0 = vmul.f32 %v9772_v52, %v11468_v61 }
 0x2a0   : > { %3858 = vadd.xlane.f32.xlu1 %v3770_v54  ;;  %v11636_v54 = vpop.permute.xlu1 %998  ;;  %v3778_v3 = vmul.f32 %v9774_v57, %v11473_v63  ;;  %v1466_v57 = vadd.f32 %v11674_v19, %v11626_v46 }
 0x2a1   : > { %15909 = vst [vmem:[#allocation42_spill] sm:$0xff] %v11636_v54  ;;  %v9776_v1 = vpop.eup %9775  ;;  %v10353_v54 = vld [vmem:[%s11371_s13 + $0x8] sm:$0xff] }
 0x2a2   : > { %3864 = vadd.xlane.f32.xlu0 %v3773_v60  ;;  %v989_v60 = vlaneseq  ;;  %v9778_v6 = vpop.eup %9777  ;;  %v1664_v40 = vmul.f32 %v9776_v1, %v11468_v61 }
 0x2a3   : > { %v3781_v16 = vmul.f32 %v9778_v6, %v11473_v63 }
 0x2a4   : > { %1755 = vadd.xlane.f32.xlu1 %v1661_v62  ;;  %v1453_v62 = vadd.f32 %v11449_v39, %v1452_v33  ;;  %v11651_v10 = vand.u32 127, %v989_v60  ;;  %v11656_v13 = vpop.permute.xlu1 %1001  ;;  %v11669_v18 = vshrl.u32 %v989_v60, 7 }
 0x2a5   : > { %v9780_v9 = vpop.eup %9779  ;;  %15911 = vst [vmem:[#allocation44_spill] sm:$0xff] %v11656_v13 }
 0x2a6   : > { %1745 = vadd.xlane.f32.xlu0 %v1656_v4  ;;  %v1477_v4 = vadd.f32 %v8984_v58, %v11449_v39  ;;  %15910 = vst [vmem:[#allocation43_spill] sm:$0xff] %v11651_v10  ;;  %9791 = vtanh.f32 %v1453_v62  ;;  %v11661_v39 = vld [vmem:[%s15904_s26] ss:$0 sm:$0xff]  ;;  %v1956_v15 = vadd.s32 4294967288, %v11651_v10  ;;  %15912 = vst [vmem:[#allocation45_spill] sm:$0xff] %v11669_v18  ;;  %v3779_v23 = vmul.f32 %v9780_v9, %v11473_v63 }
 0x2a7   : > { %9793 = vtanh.f32 %v3565_v2  ;;  %v3568_v14 = vadd.f32 %v11661_v39, %v3567_v44  ;;  %v11695_v63 = vsub.s32 %v11651_v10, %v11669_v18  ;;  %v3589_v33 = vadd.f32 %v11661_v39, %v11628_v47  ;;  %v5203_v62 = vld [vmem:[%s11312_s12 + $0xe0] sm:$0xff]  }
 0x2a8   : > { %3870 = vadd.xlane.f32.xlu1 %v3776_v5  ;;  %v1468_v5 = vpop.f32.mrf.mxu0  ;;  %9795 = vtanh.f32 %v1477_v4  ;;  %v11714_v47 = vstv %s11664_s22  ;;  %v3584_v60 = vadd.f32 %v11661_v39, %v3583_v25  ;;  %v5205_v4 = vld [vmem:[%s11312_s12 + $0xe8] sm:$0xff]   ;;  %9157 = vmatprep.mubr.bf16.mxu0 %v5203_v62  ;;  %s15941_s22 = sld [smem:[#allocation126_spill]]  ;;  %vm1003_vm8 = vcmp.lt.s32.totalorder %v11651_v10, %v11619_v36 }
 0x2a9   : > { %9797 = vtanh.f32 %v3568_v14  ;;  %v1469_v37 = vadd.f32 %v11674_v19, %v1468_v5  ;;  %9158 = vmatmul.mubr.bf16.gmra.mxu0 %v5205_v4  ;;  %vm1004_vm10 = vcmp.lt.s32.totalorder %v11651_v10, %v11634_v53 }
 0x2aa   : > { %3860 = vadd.xlane.f32.xlu0 %v3771_v12  ;;  %v11654_v11 = vpop.f32.mrf.mxu0  ;;  %v9782_v12 = vpop.eup %9781 }
 0x2ab   : > { %v9784_v22 = vpop.eup %9783  ;;  %v1669_v24 = vmul.f32 %v9782_v12, %v11468_v61  ;;  %v11691_v61 = vpop.f32.mrf.mxu1 }
 0x2ac   : > { %1751 = vadd.xlane.f32.xlu1 %v1659_v17  ;;  %v3592_v17 = vadd.f32 %v11661_v39, %v9064_v8  ;;  %v9786_v28 = vpop.eup %9785 }
 0x2ad   : > { %v9788_v45 = vpop.eup %9787  ;;  %v11719_v52 = vpop.f32.mrf.mxu1 }
 0x2ae   : > { %1757 = vadd.xlane.f32.xlu0 %v1662_v21  ;;  %9799 = vtanh.f32 %v3592_v17  ;;  %v3581_v17 = vadd.f32 %v11661_v39, %v11640_v59  ;;  %s15942_s21 = smov %s15941_s22 }
 0x2af   : > { %9801 = vtanh.f32 %v1474_v20 }
 0x2b0   : > { %3866 = vadd.xlane.f32.xlu1 %v3774_v26  ;;  %v11682_v26 = vpop.f32.mrf.mxu0  ;;  %9803 = vtanh.f32 %v3589_v33 }
 0x2b1   : > { %9805 = vtanh.f32 %v1469_v37 }
 0x2b2   : > { %3872 = vadd.xlane.f32.xlu0 %v3777_v30  ;;  %v8988_v44 = vpop.f32.mrf.mxu0  ;;  %9807 = vtanh.f32 %v1466_v57 }
 0x2b3   : > { %v1493_v46 = vadd.f32 %v11674_v19, %v8988_v44  ;;  %9809 = vtanh.f32 %v3584_v60  ;;  %v1490_v44 = vadd.f32 %v11674_v19, %v11654_v11 }
 0x2b4   : > { %1763 = vadd.xlane.f32.xlu1 %v1665_v31  ;;  %v11688_v31 = vsub.s32 %v1956_v15, %v11669_v18  ;;  %v11721_v55 = vpop.f32.mrf.mxu0  ;;  %v9068_v15 = vpop.f32.mrf.mxu1 }
 0x2b5   : > { %9811 = vtanh.f32 %v1493_v46  ;;  %v3608_v59 = vadd.f32 %v11661_v39, %v9068_v15 }
 0x2b6   : > { %1753 = vadd.xlane.f32.xlu0 %v1660_v41  ;;  %v1670_v41 = vmul.f32 %v11704_v38, %v9786_v28  ;;  %9813 = vtanh.f32 %v3581_v17 }
 0x2b7   : > { %9815 = vtanh.f32 %v3608_v59 }
 0x2b8   : > { %3878 = vadd.xlane.f32.xlu1 %v3780_v42  ;;  %v11710_v42 = vld [vmem:[%s15906_s0] ss:$0 sm:$0xff]  ;;  %9817 = vtanh.f32 %v1490_v44 }
 0x2b9   : > { %v3784_v43 = vmul.f32 %v11710_v42, %v9784_v22  ;;  %v3785_v2 = vmul.f32 %v11710_v42, %v9788_v45 }
 0x2ba   : > { %3868 = vadd.xlane.f32.xlu0 %v3775_v50 }
 0x2bc   : > { %1759 = vadd.xlane.f32.xlu1 %v1663_v56  ;;  %v9790_v56 = vpop.eup %9789 }
 0x2bd   : > { %v9792_v5 = vpop.eup %9791  ;;  %v1667_v14 = vmul.f32 %v11704_v38, %v9790_v56 }
 0x2be   : > { %1765 = vadd.xlane.f32.xlu0 %v1666_v0  ;;  %v9794_v8 = vpop.eup %9793 }
 0x2bf   : > { %v11649_v7 = vpop.xlane.xlu0 %1699  ;;  %v3782_v27 = vmul.f32 %v11710_v42, %v9794_v8 }
 0x2c0   : > { %3874 = vadd.xlane.f32.xlu1 %v3778_v3  ;;  %v11730_v3 = vpop.f32.mrf.mxu0  ;;  %v1826_v9 = vadd.f32 %v11685_v29, %v11649_v7 }
 0x2c2   : > { %1761 = vadd.xlane.f32.xlu0 %v1664_v40 }
 0x2c3   : > { %v11678_v21 = vpop.xlane.xlu0 %3814 }
 0x2c4   : > { %3880 = vadd.xlane.f32.xlu1 %v3781_v16  ;;  %v9796_v16 = vpop.eup %9795 }
 0x2c5   : > { %v1698_v30 = vpop.xlane.xlu1 %1697  ;;  %v9798_v28 = vpop.eup %9797 }
 0x2c6   : > { %v1825_v32 = vadd.f32 %v11685_v29, %v1698_v30  ;;  %3876 = vadd.xlane.f32.xlu0 %v3779_v23  ;;  %v1668_v23 = vmul.f32 %v11704_v38, %v9792_v5  ;;  %v1966_v30 = vrot.slane %v1826_v9, %v11695_v63  ;;  %v9800_v37 = vpop.eup %9799  ;;  %v3783_v57 = vmul.f32 %v11710_v42, %v9798_v28 }
 0x2c7   : > { %v1696_v34 = vpop.xlane.xlu0 %1695  ;;  %v3789_v62 = vmul.f32 %v11710_v42, %v9800_v37 }
 0x2c8   : > { %v1824_v35 = vadd.f32 %v11685_v29, %v1696_v34  ;;  %1771 = vadd.xlane.f32.xlu1 %v1669_v24  ;;  %v1960_v49 = vrot.slane %v1825_v32, %v11688_v31  ;;  %v11744_v24 = vpop.f32.mrf.mxu0  ;;  %v3941_v32 = vadd.f32 %v11714_v47, %v11678_v21  ;;  %v1674_v34 = vmul.f32 %v11704_v38, %v9796_v16 }
 0x2c9   : > { %v3813_v48 = vpop.xlane.xlu1 %3812  ;;  %v1482_v16 = vadd.f32 %v11674_v19, %v11682_v26 }
 0x2ca   : > { %v1955_v50 = vrot.slane %v1824_v35, %v11695_v63  ;;  %v3940_v51 = vadd.f32 %v11714_v47, %v3813_v48  ;;  %1773 = vadd.xlane.f32.xlu0 %v1670_v41  ;;  %v3599_v35 = vpop.f32.mrf.mxu1  ;;  %v4079_v11 = vrot.slane %v3941_v32, %v11695_v63 }
 0x2cb   : > { %v3811_v58 = vpop.xlane.xlu0 %3810 }
 0x2cc   : > { %v1962_v0 = vsel %vm1961_vm0, %v1960_v49, %v1955_v50  ;;  %v3939_v1 = vadd.f32 %v11714_v47, %v3811_v58  ;;  %3886 = vadd.xlane.f32.xlu1 %v3784_v43  ;;  %v4074_v40 = vrot.slane %v3940_v51, %v11688_v31  ;;  %v9802_v43 = vpop.eup %9801  ;;  %v8992_v49 = vpop.f32.mrf.mxu0  ;;  %v3605_v51 = vadd.f32 %v11661_v39, %v11691_v61 }
 0x2cd   : > { %v1708_v6 = vpop.xlane.xlu1 %1707  ;;  %v11757_v21 = vpop.f32.mrf.mxu1 }
 0x2ce   : > { %v4070_v12 = vrot.slane %v3939_v1, %v11695_v63  ;;  %3888 = vadd.xlane.f32.xlu0 %v3785_v2  ;;  %v1830_v58 = vadd.f32 %v11685_v29, %v1708_v6  ;;  %v11769_v1 = vpop.f32.mrf.mxu0  ;;  %v1485_v2 = vadd.f32 %v11674_v19, %v11721_v55  ;;  %v9804_v61 = vpop.eup %9803  ;;  %v1673_v6 = vmul.f32 %v11704_v38, %v9802_v43 }
 0x2cf   : > { %v1702_v20 = vpop.xlane.xlu0 %1701  ;;  %v11776_v46 = vpop.f32.mrf.mxu1  ;;  %9819 = vtanh.f32 %v3605_v51  ;;  %v3788_v59 = vmul.f32 %v11710_v42, %v9804_v61 }
 0x2d0   : > { %v4075_v22 = vsel %vm1961_vm0, %v4074_v40, %v4070_v12  ;;  %v1827_v7 = vadd.f32 %v11685_v29, %v1702_v20  ;;  %1767 = vadd.xlane.f32.xlu1 %v1667_v14  ;;  %v9806_v8 = vpop.eup %9805  ;;  %v1984_v12 = vrot.slane %v1830_v58, %v11695_v63  ;;  %v11784_v15 = vpop.f32.mrf.mxu0  ;;  %9821 = vtanh.f32 %v1485_v2 }
 0x2d1   : > { %v3823_v25 = vpop.xlane.xlu1 %3822  ;;  %v3600_v20 = vadd.f32 %v11661_v39, %v3599_v35  ;;  %v9072_v28 = vpop.f32.mrf.mxu1  ;;  %9823 = vtanh.f32 %v1482_v16 }
 0x2d2   : > { %v1970_v33 = vrot.slane %v1827_v7, %v11688_v31  ;;  %1769 = vadd.xlane.f32.xlu0 %v1668_v23  ;;  %v3945_v55 = vadd.f32 %v11714_v47, %v3823_v25  ;;  %v9808_v7 = vpop.eup %9807  ;;  %v11801_v43 = vpop.f32.mrf.mxu0 }
 0x2d3   : > { %v3817_v41 = vpop.xlane.xlu0 %3816  ;;  %v9810_v32 = vpop.eup %9809  ;;  %9825 = vtanh.f32 %v3600_v20  ;;  %v1671_v58 = vmul.f32 %v11704_v38, %v9808_v7 }
 0x2d4   : > { %v1971_v45 = vsel %vm1961_vm0, %v1970_v33, %v1966_v30  ;;  %v3942_v48 = vadd.f32 %v11714_v47, %v3817_v41  ;;  %3882 = vadd.xlane.f32.xlu1 %v3782_v27  ;;  %v1672_v27 = vmul.f32 %v11704_v38, %v9806_v8  ;;  %v5209_v30 = vld [vmem:[%s11312_s12 + $0xf8] sm:$0xff]   ;;  %v1509_v33 = vadd.f32 %v11674_v19, %v8992_v49  ;;  %v11803_v44 = vpop.f32.mrf.mxu1 }
 0x2d5   : > { %v11760_v50 = vsel %vm2242_vm1, %v1971_v45, %v1962_v0  ;;  %v1704_v56 = vpop.xlane.xlu1 %1703  ;;  %v4097_v35 = vrot.slane %v3945_v55, %v11695_v63  ;;  %v3597_v45 = vadd.f32 %v11661_v39, %v11719_v52  ;;  %v1506_v8 = vadd.f32 %v11674_v19, %v11730_v3 }
 0x2d6   : > { %v4083_v60 = vrot.slane %v3942_v48, %v11688_v31  ;;  %1781 = vadd.xlane.f32.xlu0 %v1674_v34  ;;  %v9812_v34 = vpop.eup %9811  ;;  %v1828_v37 = vadd.f32 %v11685_v29, %v1704_v56  ;;  %v3787_v56 = vmul.f32 %v11710_v42, %v9810_v32  ;;  %9827 = vtanh.f32 %v1509_v33 }
 0x2d7   : > { %v1710_v0 = vpop.xlane.xlu0 %1709  ;;  %v1678_v61 = vmul.f32 %v11704_v38, %v9812_v34  ;;  %9829 = vtanh.f32 %v3597_v45  ;;  %v3621_v55 = vadd.f32 %v11661_v39, %v11757_v21  ;;  %v1501_v32 = vadd.f32 %v11674_v19, %v11769_v1 }
 0x2d8   : > { %v4084_v4 = vsel %vm1961_vm0, %v4083_v60, %v4079_v11  ;;  %v1831_v5 = vadd.f32 %v11685_v29, %v1710_v0  ;;  %3884 = vadd.xlane.f32.xlu1 %v3783_v57  ;;  %v9814_v57 = vpop.eup %9813  ;;  %v3624_v60 = vadd.f32 %v11661_v39, %v9072_v28 }
 0x2d9   : > { %v11779_v9 = vsel %vm2242_vm1, %v4084_v4, %v4075_v22  ;;  %v3819_v40 = vpop.xlane.xlu1 %3818  ;;  %v5207_v22 = vld [vmem:[%s11312_s12 + $0xf0] sm:$0xff]   ;;  %v9816_v52 = vpop.eup %9815 }
 0x2da   : > { %v1988_v14 = vrot.slane %v1831_v5, %v11688_v31  ;;  %3896 = vadd.xlane.f32.xlu0 %v3789_v62  ;;  %9161 = vmatprep.mubr.bf16.mxu0 %v5207_v22  ;;  %v1975_v62 = vrot.slane %v1828_v37, %v11695_v63  ;;  %v3943_v0 = vadd.f32 %v11714_v47, %v3819_v40  ;;  %v8996_v4 = vpop.f32.mrf.mxu0  ;;  %v11816_v5 = vpop.f32.mrf.mxu1  ;;  %9831 = vtanh.f32 %v3624_v60 }
 0x2db   : > { %v3825_v17 = vpop.xlane.xlu0 %3824  ;;  %9162 = vmatmul.mubr.bf16.gmra.mxu0 %v5209_v30  ;;  %v9818_v16 = vpop.eup %9817  ;;  %v3786_v22 = vmul.f32 %v11710_v42, %v9814_v57  ;;  %v3793_v3 = vmul.f32 %v11710_v42, %v9816_v52  ;;  %9833 = vtanh.f32 %v1506_v8 }
 0x2dc   : > { %v11791_v23 = vsel %vm1961_vm0, %v1988_v14, %v1984_v12  ;;  %v3946_v25 = vadd.f32 %v11714_v47, %v3825_v17  ;;  %1779 = vadd.xlane.f32.xlu1 %v1673_v6  ;;  %v11824_v14 = vpop.f32.mrf.mxu0  ;;  %v4088_v7 = vrot.slane %v3943_v0, %v11695_v63  ;;  %v9820_v28 = vpop.eup %9819  ;;  %9835 = vtanh.f32 %v3621_v55 }
 0x2dd   : > { %v1716_v26 = vpop.xlane.xlu1 %1715  ;;  %v9822_v33 = vpop.eup %9821  ;;  %9837 = vtanh.f32 %v1501_v32  ;;  %v3792_v0 = vmul.f32 %v11710_v42, %v9820_v28  ;;  %v3613_v55 = vadd.f32 %v11661_v39, %v11776_v46  ;;  %v1517_v46 = vadd.f32 %v11674_v19, %v11824_v14 }
 0x2de   : > { %v4101_v41 = vrot.slane %v3946_v25, %v11688_v31  ;;  %1777 = vadd.xlane.f32.xlu0 %v1672_v27  ;;  %v1834_v25 = vadd.f32 %v11685_v29, %v1716_v26  ;;  %v11833_v27 = vpop.f32.mrf.mxu1  ;;  %v9824_v60 = vpop.eup %9823  ;;  %v3616_v14 = vadd.f32 %v11661_v39, %v11803_v44 }
 0x2df   : > { %v1706_v48 = vpop.xlane.xlu0 %1705 }
 0x2e0   : > { %v4102_v49 = vsel %vm1961_vm0, %v4101_v41, %v4097_v35  ;;  %v1829_v51 = vadd.f32 %v11685_v29, %v1706_v48  ;;  %3894 = vadd.xlane.f32.xlu1 %v3788_v59  ;;  %v11835_v59 = vpop.f32.mrf.mxu0  ;;  %v1677_v35 = vmul.f32 %v11704_v38, %v9818_v16  ;;  %v1525_v41 = vadd.f32 %v11674_v19, %v8996_v4 }
 0x2e1   : > { %v3831_v11 = vpop.xlane.xlu1 %3830  ;;  %v2002_v45 = vrot.slane %v1834_v25, %v11695_v63 }
 0x2e2   : > { %v1979_v2 = vrot.slane %v1829_v51, %v11688_v31  ;;  %3892 = vadd.xlane.f32.xlu0 %v3787_v56  ;;  %v3949_v1 = vadd.f32 %v11714_v47, %v3831_v11  ;;  %v9076_v51 = vpop.f32.mrf.mxu1  ;;  %v11852_v56 = vpop.f32.mrf.mxu0  ;;  %v1676_v11 = vmul.f32 %v11704_v38, %v9822_v33  ;;  %9839 = vtanh.f32 %v1525_v41 }
 0x2e3   : > { %v3821_v6 = vpop.xlane.xlu0 %3820 }
 0x2e4   : > { %v1980_v12 = vsel %vm1961_vm0, %v1979_v2, %v1975_v62  ;;  %v3944_v40 = vadd.f32 %v11714_v47, %v3821_v6  ;;  %1775 = vadd.xlane.f32.xlu1 %v1671_v58  ;;  %v1498_v58 = vadd.f32 %v11674_v19, %v11744_v24  ;;  %v9826_v2 = vpop.eup %9825  ;;  %v4115_v24 = vrot.slane %v3949_v1, %v11695_v63 }
 0x2e5   : > { %v2245_v17 = vsel %vm2244_vm2, %v1980_v12, %v11760_v50  ;;  %v1712_v20 = vpop.xlane.xlu1 %1711  ;;  %v9828_v4 = vpop.eup %9827 }
 0x2e6   : > { %v4092_v21 = vrot.slane %v3944_v40, %v11688_v31  ;;  %1789 = vadd.xlane.f32.xlu0 %v1678_v61  ;;  %v11839_v50 = vsel %vm2246_vm3, %v11791_v23, %v2245_v17  ;;  %v1832_v6 = vadd.f32 %v11685_v29, %v1712_v20  ;;  %v9000_v12 = vpop.f32.mrf.mxu0  ;;  %v9830_v16 = vpop.eup %9829  ;;  %9841 = vtanh.f32 %v1498_v58 }
 0x2e7   : > { %v1718_v30 = vpop.xlane.xlu0 %1717  ;;  %v9832_v28 = vpop.eup %9831 }
 0x2e8   : > { %v4093_v26 = vsel %vm1961_vm0, %v4092_v21, %v4088_v7  ;;  %v1835_v34 = vadd.f32 %v11685_v29, %v1718_v30  ;;  %3890 = vadd.xlane.f32.xlu1 %v3786_v22  ;;  %v3631_v7 = vpop.f32.mrf.mxu1  ;;  %v11874_v20 = vpop.f32.mrf.mxu0  ;;  %v1675_v21 = vmul.f32 %v11704_v38, %v9824_v60  ;;  %v1993_v30 = vrot.slane %v1832_v6, %v11695_v63 }
 0x2e9   : > { %v4356_v37 = vsel %vm2244_vm2, %v4093_v26, %v11779_v9  ;;  %v3827_v23 = vpop.xlane.xlu1 %3826  ;;  %v1682_v26 = vmul.f32 %v11704_v38, %v9828_v4 }
 0x2ea   : > { %v2006_v48 = vrot.slane %v1835_v34, %v11688_v31  ;;  %3904 = vadd.xlane.f32.xlu0 %v3793_v3  ;;  %v11855_v57 = vsel %vm2246_vm3, %v4102_v49, %v4356_v37  ;;  %v3640_v49 = vadd.f32 %v11661_v39, %v9076_v51  ;;  %v3791_v3 = vmul.f32 %v11710_v42, %v9826_v2  ;;  %v11885_v34 = vpop.f32.mrf.mxu1 }
 0x2eb   : > { %v3833_v9 = vpop.xlane.xlu0 %3832  ;;  %v3947_v32 = vadd.f32 %v11714_v47, %v3827_v23  ;;  %v9834_v23 = vpop.eup %9833  ;;  %v3632_v51 = vadd.f32 %v11661_v39, %v3631_v7  ;;  %v3637_v7 = vadd.f32 %v11661_v39, %v11816_v5 }
 0x2ec   : > { %v2007_v52 = vsel %vm1961_vm0, %v2006_v48, %v2002_v45  ;;  %v3950_v62 = vadd.f32 %v11714_v47, %v3833_v9  ;;  %1787 = vadd.xlane.f32.xlu1 %v1677_v35  ;;  %9843 = vtanh.f32 %v3640_v49  ;;  %v11887_v35 = vpop.f32.mrf.mxu0  ;;  %v3790_v48 = vmul.f32 %v11710_v42, %v9830_v16  ;;  %v9836_v9 = vpop.eup %9835 }
 0x2ed   : > { %v11863_v61 = vpop.xlane.xlu1 %1723  ;;  %9845 = vtanh.f32 %v3613_v55  ;;  %v4106_v60 = vrot.slane %v3947_v32, %v11695_v63  ;;  %v9838_v4 = vpop.eup %9837  ;;  %v1681_v6 = vmul.f32 %v11704_v38, %v9834_v23 }
 0x2ee   : > { %v4119_v8 = vrot.slane %v3950_v62, %v11688_v31  ;;  %1785 = vadd.xlane.f32.xlu0 %v1676_v11  ;;  %9847 = vtanh.f32 %v1517_v46  ;;  %v3797_v62 = vmul.f32 %v11710_v42, %v9832_v28  ;;  %v11900_v11 = vpop.f32.mrf.mxu1 }
 0x2ef   : > { %v1714_v40 = vpop.xlane.xlu0 %1713  ;;  %9849 = vtanh.f32 %v3616_v14  ;;  %v1838_v14 = vadd.f32 %v11685_v29, %v11863_v61 }
 0x2f0   : > { %v4120_v17 = vsel %vm1961_vm0, %v4119_v8, %v4115_v24  ;;  %v1833_v22 = vadd.f32 %v11685_v29, %v1714_v40  ;;  %3902 = vadd.xlane.f32.xlu1 %v3792_v0  ;;  %v11902_v0 = vpop.f32.mrf.mxu0  ;;  %9851 = vtanh.f32 %v3632_v51  ;;  %v9080_v40 = vpop.f32.mrf.mxu1 }
 0x2f1   : > { %v11876_v25 = vpop.xlane.xlu1 %3838 }
 0x2f2   : > { %v1997_v33 = vrot.slane %v1833_v22, %v11688_v31  ;;  %3900 = vadd.xlane.f32.xlu0 %v3791_v3  ;;  %v11914_v16 = vpop.f32.mrf.mxu0  ;;  %v3647_v61 = vpop.f32.mrf.mxu1 }
 0x2f3   : > { %v3829_v37 = vpop.xlane.xlu0 %3828 }
 0x2f4   : > { %v1998_v41 = vsel %vm1961_vm0, %v1997_v33, %v1993_v30  ;;  %v3948_v45 = vadd.f32 %v11714_v47, %v3829_v37  ;;  %1783 = vadd.xlane.f32.xlu1 %v1675_v21  ;;  %v1680_v21 = vmul.f32 %v11704_v38, %v9838_v4  ;;  %v11923_v46 = vpop.f32.mrf.mxu0  ;;  %v1514_v37 = vadd.f32 %v11674_v19, %v11801_v43 }
 0x2f5   : > { %v1720_v1 = vpop.xlane.xlu1 %1719  ;;  %v2249_v58 = vsel %vm2248_vm4, %v1998_v41, %v11839_v50  ;;  %v1522_v50 = vadd.f32 %v11674_v19, %v11784_v15  ;;  %v9840_v15 = vpop.eup %9839  ;;  %v1533_v43 = vadd.f32 %v11674_v19, %v11874_v20  ;;  %v3953_v20 = vadd.f32 %v11714_v47, %v11876_v25 }
 0x2f6   : > { %v4110_v44 = vrot.slane %v3948_v45, %v11688_v31  ;;  %1797 = vadd.xlane.f32.xlu0 %v1682_v26  ;;  %v11905_v2 = vsel %vm2250_vm5, %v2007_v52, %v2249_v58  ;;  %v1541_v52 = vadd.f32 %v11674_v19, %v9000_v12  ;;  %v9842_v12 = vpop.eup %9841  ;;  %v1836_v33 = vadd.f32 %v11685_v29, %v1720_v1  ;;  %v11931_v26 = vpop.f32.mrf.mxu0 }
 0x2f7   : > { %v1726_v49 = vpop.xlane.xlu0 %1725  ;;  %9853 = vtanh.f32 %v1522_v50  ;;  %v1686_v5 = vmul.f32 %v11704_v38, %v9840_v15  ;;  %v1679_v23 = vmul.f32 %v11704_v38, %v9842_v12  ;;  %v2020_v50 = vrot.slane %v1838_v14, %v11695_v63 }
 0x2f8   : > { %v4111_v24 = vsel %vm1961_vm0, %v4110_v44, %v4106_v60  ;;  %3898 = vadd.xlane.f32.xlu1 %v3790_v48  ;;  %v1839_v28 = vadd.f32 %v11685_v29, %v1726_v49  ;;  %9855 = vtanh.f32 %v1541_v52  ;;  %v2011_v60 = vrot.slane %v1836_v33, %v11695_v63  ;;  %v11949_v4 = vpop.f32.mrf.mxu0 }
 0x2f9   : > { %v3835_v8 = vpop.xlane.xlu1 %3834  ;;  %v4358_v55 = vsel %vm2248_vm4, %v4111_v24, %v11855_v57  ;;  %v3796_v57 = vmul.f32 %v11710_v42, %v9836_v9  ;;  %v9844_v32 = vpop.eup %9843  ;;  %9857 = vtanh.f32 %v3637_v7  ;;  %v3629_v24 = vadd.f32 %v11661_v39, %v11833_v27 }
 0x2fa   : > { %3912 = vadd.xlane.f32.xlu0 %v3797_v62  ;;  %v11917_v22 = vsel %vm2250_vm5, %v4120_v17, %v4358_v55  ;;  %v3656_v17 = vadd.f32 %v11661_v39, %v9080_v40  ;;  %v9846_v1 = vpop.eup %9845  ;;  %v2024_v48 = vrot.slane %v1839_v28, %v11688_v31  ;;  %v3951_v44 = vadd.f32 %v11714_v47, %v3835_v8  ;;  %v11956_v55 = vpop.f32.mrf.mxu1 }
 0x2fb   : > { %v3841_v3 = vpop.xlane.xlu0 %3840  ;;  %v9848_v9 = vpop.eup %9847  ;;  %v3801_v49 = vmul.f32 %v11710_v42, %v9844_v32  ;;  %v3794_v52 = vmul.f32 %v11710_v42, %v9846_v1  ;;  %v3648_v40 = vadd.f32 %v11661_v39, %v3647_v61 }
 0x2fc   : > { %1795 = vadd.xlane.f32.xlu1 %v1681_v6  ;;  %v3954_v51 = vadd.f32 %v11714_v47, %v3841_v3  ;;  %9859 = vtanh.f32 %v3656_v17  ;;  %v2025_v27 = vsel %vm1961_vm0, %v2024_v48, %v2020_v50  ;;  %v1684_v28 = vmul.f32 %v11704_v38, %v9848_v9  ;;  %v11971_v17 = vpop.f32.mrf.mxu0  ;;  %v11979_v14 = vpop.f32.mrf.mxu1 }
 0x2fd   : > { %v11926_v30 = vpop.xlane.xlu1 %1731  ;;  %9861 = vtanh.f32 %v1514_v37 }
 0x2fe   : > { %1793 = vadd.xlane.f32.xlu0 %v1680_v21  ;;  %v4137_v3 = vrot.slane %v3954_v51, %v11688_v31  ;;  %9863 = vtanh.f32 %v1533_v43  ;;  %v9850_v21 = vpop.eup %9849  ;;  %v11993_v61 = vpop.f32.mrf.mxu0 }
 0x2ff   : > { %v1722_v41 = vpop.xlane.xlu0 %1721  ;;  %v9852_v33 = vpop.eup %9851  ;;  %9865 = vtanh.f32 %v3629_v24  ;;  %v3795_v1 = vmul.f32 %v11710_v42, %v9850_v21  ;;  %v1549_v21 = vadd.f32 %v11674_v19, %v11923_v46 }
 0x300   : > { %v1837_v45 = vadd.f32 %v11685_v29, %v1722_v41  ;;  %3910 = vadd.xlane.f32.xlu1 %v3796_v57  ;;  %v4124_v57 = vrot.slane %v3951_v44, %v11695_v63  ;;  %9867 = vtanh.f32 %v3648_v40  ;;  %v3799_v43 = vmul.f32 %v11710_v42, %v9852_v33 }
 0x301   : > { %v11941_v58 = vpop.xlane.xlu1 %3846 }
 0x302   : > { %v2015_v62 = vrot.slane %v1837_v45, %v11688_v31  ;;  %1805 = vadd.xlane.f32.xlu0 %v1686_v5  ;;  %v4133_v5 = vrot.slane %v3953_v20, %v11695_v63 }
 0x303   : > { %v3837_v6 = vpop.xlane.xlu0 %3836 }
 0x304   : > { %v3952_v8 = vadd.f32 %v11714_v47, %v3837_v6  ;;  %1791 = vadd.xlane.f32.xlu1 %v1679_v23  ;;  %v2016_v15 = vsel %vm1961_vm0, %v2015_v62, %v2011_v60  ;;  %v9854_v45 = vpop.eup %9853  ;;  %v4138_v48 = vsel %vm1961_vm0, %v4137_v3, %v4133_v5  ;;  %v9084_v62 = vpop.f32.mrf.mxu1 }
 0x305   : > { %v11963_v7 = vpop.xlane.xlu1 %1727  ;;  %v2253_v25 = vsel %vm15758_vm6, %v2016_v15, %v11905_v2  ;;  %v1538_v2 = vadd.f32 %v11674_v19, %v11835_v59  ;;  %v1557_v59 = vadd.f32 %v11674_v19, %v11914_v16  ;;  %v9856_v60 = vpop.eup %9855  ;;  %v3672_v6 = vadd.f32 %v11661_v39, %v9084_v62 }
 0x306   : > { %v4128_v12 = vrot.slane %v3952_v8, %v11688_v31  ;;  %3920 = vadd.xlane.f32.xlu0 %v3801_v49  ;;  %v11974_v32 = vsel %vm2254_vm7, %v2025_v27, %v2253_v25  ;;  %v1685_v49 = vmul.f32 %v11704_v38, %v9854_v45  ;;  %v9858_v50 = vpop.eup %9857  ;;  %v1690_v20 = vmul.f32 %v11704_v38, %v9856_v60  ;;  %v12007_v8 = vpop.f32.mrf.mxu0 }
 0x307   : > { %v11977_v37 = vpop.xlane.xlu0 %1733  ;;  %9869 = vtanh.f32 %v1538_v2  ;;  %v1530_v15 = vadd.f32 %v11674_v19, %v11852_v56  ;;  %v3645_v56 = vadd.f32 %v11661_v39, %v11900_v11 }
 0x308   : > { %3906 = vadd.xlane.f32.xlu1 %v3794_v52  ;;  %v4129_v41 = vsel %vm1961_vm0, %v4128_v12, %v4124_v57  ;;  %9871 = vtanh.f32 %v1557_v59  ;;  %v12019_v57 = vpop.f32.mrf.mxu0 }
 0x309   : > { %v11984_v23 = vpop.xlane.xlu1 %3842  ;;  %v4360_v51 = vsel %vm15758_vm6, %v4129_v41, %v11917_v22  ;;  %v3653_v22 = vadd.f32 %v11661_v39, %v11885_v34  ;;  %v9860_v16 = vpop.eup %9859  ;;  %v3800_v34 = vmul.f32 %v11710_v42, %v9858_v50 }
 0x30a   : > { %1801 = vadd.xlane.f32.xlu0 %v1684_v28  ;;  %v11996_v9 = vsel %vm2254_vm7, %v4138_v48, %v4360_v51  ;;  %v9862_v40 = vpop.eup %9861  ;;  %v3805_v25 = vmul.f32 %v11710_v42, %v9860_v16  ;;  %v3663_v28 = vpop.f32.mrf.mxu1  ;;  %v1554_v51 = vadd.f32 %v11674_v19, %v11887_v35  ;;  %v3669_v35 = vadd.f32 %v11661_v39, %v11956_v55 }
 0x30b   : > { %15913 = vst [vmem:[#allocation46_spill] sm:$0xff] %v11996_v9  ;;  %v11998_v44 = vpop.xlane.xlu0 %3848  ;;  %9873 = vtanh.f32 %v3653_v22  ;;  %v9864_v27 = vpop.eup %9863  ;;  %v1683_v2 = vmul.f32 %v11704_v38, %v9862_v40  ;;  %v3664_v46 = vadd.f32 %v11661_v39, %v3663_v28  ;;  %v10354_v9 = vld [vmem:[%s11371_s13 + $0x18] sm:$0xff] }
 0x30c   : > { %3908 = vadd.xlane.f32.xlu1 %v3795_v1  ;;  %9875 = vtanh.f32 %v3672_v6  ;;  %v9866_v5 = vpop.eup %9865  ;;  %v1688_v41 = vmul.f32 %v11704_v38, %v9864_v27  ;;  %v12030_v45 = vpop.f32.mrf.mxu0 }
 0x30d   : > { %v12003_v24 = vpop.xlane.xlu1 %1739  ;;  %9877 = vtanh.f32 %v1530_v15  ;;  %v9868_v1 = vpop.eup %9867  ;;  %v3798_v59 = vmul.f32 %v11710_v42, %v9866_v5 }
 0x30e   : > { %3916 = vadd.xlane.f32.xlu0 %v3799_v43  ;;  %9879 = vtanh.f32 %v1549_v21  ;;  %v3803_v60 = vmul.f32 %v11710_v42, %v9868_v1  ;;  %v12040_v62 = vpop.f32.mrf.mxu0  ;;  %v1546_v21 = vadd.f32 %v11674_v19, %v11902_v0  ;;  %v3661_v1 = vadd.f32 %v11661_v39, %v11979_v14 }
 0x30f   : > { %v12009_v52 = vpop.xlane.xlu0 %1729  ;;  %9881 = vtanh.f32 %v3645_v56 }
 0x310   : > { %1803 = vadd.xlane.f32.xlu1 %v1685_v49  ;;  %9883 = vtanh.f32 %v3664_v46  ;;  %v12050_v40 = vpop.f32.mrf.mxu0 }
 0x311   : > { %v12014_v3 = vpop.xlane.xlu1 %3854  ;;  %9885 = vtanh.f32 %v1554_v51 }
 0x312   : > { %1813 = vadd.xlane.f32.xlu0 %v1690_v20  ;;  %9887 = vtanh.f32 %v3669_v35  ;;  %v12060_v56 = vpop.f32.mrf.mxu0 }
 0x313   : > { %v12021_v12 = vpop.xlane.xlu0 %3844  ;;  %9889 = vtanh.f32 %v1546_v21 }
 0x314   : > { %3918 = vadd.xlane.f32.xlu1 %v3800_v34  ;;  %v9870_v11 = vpop.eup %9869  ;;  %v12070_v0 = vpop.f32.mrf.mxu0  ;;  %9891 = vtanh.f32 %v3661_v1 }
 0x315   : > { %v12025_v33 = vpop.xlane.xlu1 %1735  ;;  %v9872_v22 = vpop.eup %9871  ;;  %v1689_v50 = vmul.f32 %v11704_v38, %v9870_v11 }
 0x316   : > { %3928 = vadd.xlane.f32.xlu0 %v3805_v25  ;;  %v1694_v6 = vmul.f32 %v11704_v38, %v9872_v22  ;;  %v12078_v14 = vpop.f32.mrf.mxu0 }
 0x317   : > { %v12032_v48 = vpop.xlane.xlu0 %1741 }
 0x318   : > { %1799 = vadd.xlane.f32.xlu1 %v1683_v2  ;;  %v9874_v16 = vpop.eup %9873 }
 0x319   : > { %v12036_v43 = vpop.xlane.xlu1 %3850  ;;  %v9876_v34 = vpop.eup %9875  ;;  %v3804_v27 = vmul.f32 %v11710_v42, %v9874_v16 }
 0x31a   : > { %1809 = vadd.xlane.f32.xlu0 %v1688_v41  ;;  %v9878_v55 = vpop.eup %9877  ;;  %v3809_v28 = vmul.f32 %v11710_v42, %v9876_v34 }
 0x31b   : > { %v12042_v49 = vpop.xlane.xlu0 %3856  ;;  %v9880_v5 = vpop.eup %9879  ;;  %v1687_v51 = vmul.f32 %v11704_v38, %v9878_v55 }
 0x31c   : > { %3914 = vadd.xlane.f32.xlu1 %v3798_v59  ;;  %v9882_v46 = vpop.eup %9881  ;;  %v1692_v19 = vmul.f32 %v11704_v38, %v9880_v5 }
 0x31d   : > { %v12047_v20 = vpop.xlane.xlu1 %1747  ;;  %v9884_v11 = vpop.eup %9883  ;;  %v3802_v35 = vmul.f32 %v11710_v42, %v9882_v46 }
 0x31e   : > { %3924 = vadd.xlane.f32.xlu0 %v3803_v60  ;;  %v9886_v60 = vpop.eup %9885  ;;  %v3807_v39 = vmul.f32 %v11710_v42, %v9884_v11 }
 0x31f   : > { %v12052_v15 = vpop.xlane.xlu0 %1737  ;;  %v1693_v16 = vmul.f32 %v11704_v38, %v9886_v60 }
 0x320   : > { %1811 = vadd.xlane.f32.xlu1 %v1689_v50 }
 0x321   : > { %v12055_v25 = vpop.xlane.xlu1 %3862 }
 0x322   : > { %15914 = vst [vmem:[#allocation47_spill] sm:$0xff] %v12055_v25  ;;  %1821 = vadd.xlane.f32.xlu0 %v1694_v6  ;;  %v9888_v6 = vpop.eup %9887 }
 0x323   : > { %v12062_v2 = vpop.xlane.xlu0 %3852  ;;  %v3808_v21 = vmul.f32 %v11710_v42, %v9888_v6  ;;  %v9890_v46 = vpop.eup %9889 }
 0x324   : > { %3926 = vadd.xlane.f32.xlu1 %v3804_v27  ;;  %v12085_v27 = vpop.f32.mrf.mxu0  ;;  %v9892_v60 = vpop.eup %9891 }
 0x325   : > { %v12064_v41 = vpop.xlane.xlu1 %1743  ;;  %15915 = vst [vmem:[#allocation48_spill] sm:$0xff] %v12085_v27 }
 0x326   : > { %3936 = vadd.xlane.f32.xlu0 %v3809_v28  ;;  %v12092_v5 = vpop.f32.mrf.mxu0 }
 0x327   : > { %v12072_v59 = vpop.xlane.xlu0 %1749  ;;  %15917 = vst [vmem:[#allocation50_spill] sm:$0xff] %v12092_v5 }
 0x328   : > { %1807 = vadd.xlane.f32.xlu1 %v1687_v51  ;;  %v12099_v11 = vpop.f32.mrf.mxu0 }
 0x329   : > { %v12074_v22 = vpop.xlane.xlu1 %3858 }
 0x32a   : > { %1817 = vadd.xlane.f32.xlu0 %v1692_v19  ;;  %v1691_v19 = vmul.f32 %v11704_v38, %v9890_v46  ;;  %v12106_v6 = vpop.f32.mrf.mxu0 }
 0x32b   : > { %v12080_v50 = vpop.xlane.xlu0 %3864 }
 0x32c   : > { %3922 = vadd.xlane.f32.xlu1 %v3802_v35  ;;  %v12112_v38 = vpop.f32.mrf.mxu0 }
 0x32d   : > { %v12083_v34 = vpop.xlane.xlu1 %1755 }
 0x32e   : > { %3932 = vadd.xlane.f32.xlu0 %v3807_v39 }
 0x32f   : > { %v12087_v55 = vpop.xlane.xlu0 %1745 }
 0x330   : > { %1819 = vadd.xlane.f32.xlu1 %v1693_v16  ;;  %v3806_v16 = vmul.f32 %v11710_v42, %v9892_v60 }
 0x331   : > { %v12090_v28 = vpop.xlane.xlu1 %3870 }
 0x332   : > { %15916 = vst [vmem:[#allocation49_spill] sm:$0xff] %v12090_v28  ;;  %v12137_v28 = vld [vmem:[%s15926_s28] ss:$0 sm:$0xff] }
 0x333   : > { %v12094_v1 = vpop.xlane.xlu0 %3860  ;;  %v5537_v25 = vadd.f32 %v11971_v17, %v12137_v28  ;;  %v1845_v17 = vadd.f32 %v11685_v29, %v12052_v15 }
 0x334   : > { %3934 = vadd.xlane.f32.xlu1 %v3808_v21 }
 0x335   : > { %v12096_v51 = vpop.xlane.xlu1 %1751 }
 0x337   : > { %v12101_v35 = vpop.xlane.xlu0 %1757 }
 0x338   : > { %1815 = vadd.xlane.f32.xlu1 %v1691_v19  ;;  %v12118_v19 = vpop.f32.mrf.mxu0 }
 0x339   : > { %v12103_v39 = vpop.xlane.xlu1 %3866 }
 0x33a   : > { %15918 = vst [vmem:[#allocation51_spill] sm:$0xff] %v12103_v39  ;;  %v12125_v60 = vpop.f32.mrf.mxu0 }
 0x33b   : > { %v12108_v18 = vpop.xlane.xlu0 %3872 }
 0x33c   : > { %15919 = vst [vmem:[#allocation52_spill] sm:$0xff] %v12108_v18  ;;  %3930 = vadd.xlane.f32.xlu1 %v3806_v16  ;;  %v5592_v5 = vpop.f32.mrf.mxu0  ;;  %v10355_v18 = vld [vmem:[%s11371_s13] sm:$0xff] }
 0x33d   : > { %v12110_v21 = vpop.xlane.xlu1 %1763 }
 0x33e   : > { %15920 = vst [vmem:[#allocation53_spill] sm:$0xff] %v12110_v21 }
 0x33f   : > { %v12114_v46 = vpop.xlane.xlu0 %1753 }
 0x341   : > { %v12116_v27 = vpop.xlane.xlu1 %3878 }
 0x342   : > { %15921 = vst [vmem:[#allocation54_spill] sm:$0xff] %v12116_v27 }
 0x343   : > { %v12120_v13 = vpop.xlane.xlu0 %3868 }
 0x344   : > { %3110 = vperm.xlu0 %9418, %v10353_v54   ;;  %v12139_v54 = vpop.f32.mrf.mxu0 }
 0x345   : > { %v12123_v42 = vpop.xlane.xlu1 %1759  ;;  %15927 = vst [vmem:[#allocation59_spill] sm:$0xff] %v12139_v54 }
 0x346   : > { %15922 = vst [vmem:[#allocation55_spill] sm:$0xff] %v12123_v42 }
 0x347   : > { %v12127_v16 = vpop.xlane.xlu0 %1765 }
 0x348   : > { %15923 = vst [vmem:[#allocation56_spill] sm:$0xff] %v12127_v16  ;;  %3116 = vperm.xlu0 %9418, %v10354_v9   ;;  %v5529_v16 = vadd.f32 %v12137_v28, %v11993_v61  ;;  %v5545_v61 = vadd.f32 %v12137_v28, %v12040_v62 }
 0x349   : > { %v12130_v21 = vpop.xlane.xlu1 %3874 }
 0x34a   : > { %15924 = vst [vmem:[#allocation57_spill] sm:$0xff] %v12130_v21  ;;  %v12148_v21 = vpop.f32.mrf.mxu0  ;;  %9893 = vtanh.f32 %v5529_v16  ;;  %v1840_v16 = vadd.f32 %v11685_v29, %v11963_v7  ;;  %v2051_v7 = vrot.slane %v1845_v17, %v11688_v31 }
 0x34b   : > { %v12132_v27 = vpop.xlane.xlu0 %1761  ;;  %15930 = vst [vmem:[#allocation62_spill] sm:$0xff] %v12148_v21  ;;  %9895 = vtanh.f32 %v5537_v25  ;;  %v1843_v25 = vadd.f32 %v11685_v29, %v11977_v37  ;;  %v1849_v37 = vadd.f32 %v11685_v29, %v12087_v55  ;;  %v12204_v55 = vld [vmem:[%s15941_s22] ss:$0 sm:$0xff] }
 0x34c   : > { %15925 = vst [vmem:[#allocation58_spill] sm:$0xff] %v12132_v27  ;;  %v10356_v27 = vld [vmem:[%s11371_s13 + $0x10] sm:$0xff]  ;;  %9897 = vtanh.f32 %v5545_v61  ;;  %v2029_v61 = vrot.slane %v1840_v16, %v11695_v63 }
 0x34d   : > { %v12141_v42 = vpop.xlane.xlu1 %3880  ;;  %3107 = vperm.xlu1 %9417, %v10355_v18  }
 0x34e   : > { %15928 = vst [vmem:[#allocation60_spill] sm:$0xff] %v12141_v42  ;;  %v12157_v42 = vpop.f32.mrf.mxu0 }
 0x34f   : > { %v12146_v9 = vpop.xlane.xlu0 %3876  ;;  %15933 = vst [vmem:[#allocation65_spill] sm:$0xff] %v12157_v42 }
 0x350   : > { %15929 = vst [vmem:[#allocation61_spill] sm:$0xff] %v12146_v9  ;;  %v12165_v21 = vpop.f32.mrf.mxu0 }
 0x351   : > { %v12150_v39 = vpop.xlane.xlu1 %1771  ;;  %3113 = vperm.xlu1 %9417, %v10356_v27   ;;  %v1841_v27 = vadd.f32 %v11685_v29, %v12009_v52 }
 0x352   : > { %15931 = vst [vmem:[#allocation63_spill] sm:$0xff] %v12150_v39  ;;  %v12182_v52 = vpop.f32.mrf.mxu0 }
 0x353   : > { %v12155_v54 = vpop.xlane.xlu0 %1773  ;;  %15938 = vst [vmem:[#allocation70_spill] sm:$0xff] %v12182_v52  ;;  %v2033_v15 = vrot.slane %v1841_v27, %v11688_v31 }
 0x354   : > { %15932 = vst [vmem:[#allocation64_spill] sm:$0xff] %v12155_v54  ;;  %v12206_v17 = vpop.f32.mrf.mxu0 }
 0x355   : > { %v12159_v18 = vpop.xlane.xlu1 %3886  ;;  %15943 = vst [vmem:[#allocation73_spill] sm:$0xff] %v12206_v17 }
 0x356   : > { %15934 = vst [vmem:[#allocation66_spill] sm:$0xff] %v12159_v18  ;;  %v5593_v18 = vadd.f32 %v12137_v28, %v5592_v5  ;;  %v2042_v5 = vrot.slane %v1843_v25, %v11688_v31 }
 0x357   : > { %v12163_v9 = vpop.xlane.xlu0 %3888 }
 0x358   : > { %15935 = vst [vmem:[#allocation67_spill] sm:$0xff] %v12163_v9  ;;  %v1844_v9 = vadd.f32 %v11685_v29, %v12025_v33  ;;  %v1847_v33 = vadd.f32 %v11685_v29, %v12032_v48  ;;  %9899 = vtanh.f32 %v5593_v18  ;;  %v1846_v48 = vadd.f32 %v11685_v29, %v12003_v24 }
 0x359   : > { %v12169_v39 = vpop.xlane.xlu1 %1767  ;;  %v2034_v18 = vsel %vm1961_vm0, %v2033_v15, %v2029_v61 }
 0x35a   : > { %15936 = vst [vmem:[#allocation68_spill] sm:$0xff] %v12169_v39  ;;  %v1842_v39 = vadd.f32 %v11685_v29, %v11926_v30  ;;  %v9894_v30 = vpop.eup %9893  ;;  %v2047_v27 = vrot.slane %v1844_v9, %v11695_v63  ;;  %v2060_v17 = vrot.slane %v1847_v33, %v11688_v31  ;;  %v1850_v33 = vadd.f32 %v11685_v29, %v12047_v20 }
 0x35b   : > { %v12177_v62 = vpop.xlane.xlu0 %1769  ;;  %v5852_v24 = vmul.f32 %v9894_v30, %v12204_v55  ;;  %v9896_v15 = vpop.eup %9895 }
 0x35c   : > { %15937 = vst [vmem:[#allocation69_spill] sm:$0xff] %v12177_v62  ;;  %v2038_v16 = vrot.slane %v1842_v39, %v11695_v63  ;;  %v2052_v9 = vsel %vm1961_vm0, %v2051_v7, %v2047_v27  ;;  %v1851_v39 = vadd.f32 %v11685_v29, %v12072_v59  ;;  %v5854_v20 = vmul.f32 %v9896_v15, %v12204_v55 }
 0x35d   : > { %v12187_v54 = vpop.xlane.xlu1 %3882 }
 0x35e   : > { %15939 = vst [vmem:[#allocation71_spill] sm:$0xff] %v12187_v54  ;;  %v1848_v54 = vadd.f32 %v11685_v29, %v12064_v41  ;;  %v2069_v41 = vrot.slane %v1849_v37, %v11688_v31  ;;  %v2043_v62 = vsel %vm1961_vm0, %v2042_v5, %v2038_v16  ;;  %v1852_v37 = vadd.f32 %v11685_v29, %v12096_v51 }
 0x35f   : > { %v12196_v52 = vpop.xlane.xlu0 %1781  ;;  %v2256_v61 = vsel %vm2242_vm1, %v2043_v62, %v2034_v18  ;;  %v2056_v5 = vrot.slane %v1846_v48, %v11695_v63  ;;  %v2078_v16 = vrot.slane %v1851_v39, %v11688_v31  ;;  %v1855_v51 = vadd.f32 %v11685_v29, %v12101_v35  ;;  %v9898_v18 = vpop.eup %9897 }
 0x360   : > { %15940 = vst [vmem:[#allocation72_spill] sm:$0xff] %v12196_v52  ;;  %v1853_v52 = vadd.f32 %v11685_v29, %v12114_v46  ;;  %v2065_v7 = vrot.slane %v1848_v54, %v11695_v63  ;;  %v12229_v46 = vpop.f32.mrf.mxu0  ;;  %v2257_v59 = vsel %vm2244_vm2, %v2052_v9, %v2256_v61  ;;  %v2083_v9 = vrot.slane %v1852_v37, %v11695_v63 }
 0x361   : > { %v12212_v25 = vpop.xlane.xlu1 %3884  ;;  %v2061_v54 = vsel %vm1961_vm0, %v2060_v17, %v2056_v5  ;;  %v1854_v17 = vadd.f32 %v11685_v29, %v12083_v34  ;;  %v5856_v5 = vmul.f32 %v9898_v18, %v12204_v55 }
 0x362   : > { %v2070_v30 = vsel %vm1961_vm0, %v2069_v41, %v2065_v7  ;;  %v2087_v62 = vrot.slane %v1853_v52, %v11688_v31  ;;  %v2258_v61 = vsel %vm2246_vm3, %v2061_v54, %v2257_v59  ;;  %v12248_v41 = vpop.f32.mrf.mxu0  ;;  %v2074_v52 = vrot.slane %v1850_v33, %v11695_v63 }
 0x363   : > { %v12222_v42 = vpop.xlane.xlu0 %3896  ;;  %v2259_v35 = vsel %vm2248_vm4, %v2070_v30, %v2258_v61  ;;  %v2096_v7 = vrot.slane %v1855_v51, %v11688_v31  ;;  %v2092_v34 = vrot.slane %v1854_v17, %v11695_v63  ;;  %v12284_v61 = vsel %vm1003_vm8, %v11974_v32, -1e+30 }
 0x364   : > { %v2079_v15 = vsel %vm1961_vm0, %v2078_v16, %v2074_v52  ;;  %v12263_v54 = vpop.f32.mrf.mxu0  ;;  %15947 = vst [vmem:[#allocation77_spill] sm:$0xff] %v12284_v61 }
 0x365   : > { %v12235_v27 = vpop.xlane.xlu1 %1779  ;;  %v9900_v59 = vpop.eup %9899  ;;  %v2260_v33 = vsel %vm2250_vm5, %v2079_v15, %v2259_v35  ;;  %15945 = vst [vmem:[#allocation75_spill] sm:$0xff] %v12263_v54  ;;  %v2097_v51 = vsel %vm1961_vm0, %v2096_v7, %v2092_v34  ;;  %v2286_v35 = vsel %vm2285_vm9, %v12284_v61, -inf }
 0x366   : > { %v5868_v16 = vmul.f32 %v9900_v59, %v12204_v55  ;;  %v12276_v18 = vpop.f32.mrf.mxu0 }
 0x367   : > { %5917 = vadd.xlane.f32.xlu0 %v5852_v24  ;;  %v12243_v48 = vpop.xlane.xlu0 %1777  ;;  %v2088_v24 = vsel %vm1961_vm0, %v2087_v62, %v2083_v9  ;;  %15946 = vst [vmem:[#allocation76_spill] sm:$0xff] %v12276_v18 }
 0x368   : > { %v2261_v30 = vsel %vm15758_vm6, %v2088_v24, %v2260_v33  ;;  %v12297_v24 = vpop.f32.mrf.mxu0 }
 0x369   : > { %v12253_v39 = vpop.xlane.xlu1 %3894  ;;  %15949 = vst [vmem:[#allocation79_spill] sm:$0xff] %v12297_v24 }
 0x36a   : > { %15944 = vst [vmem:[#allocation74_spill] sm:$0xff] %v12253_v39 }
 0x36b   : > { %5921 = vadd.xlane.f32.xlu0 %v5854_v20  ;;  %v12259_v37 = vpop.xlane.xlu0 %3892  ;;  %v2262_v20 = vsel %vm2254_vm7, %v2097_v51, %v2261_v30 }
 0x36c   : > { %v12293_v17 = vsel %vm1004_vm10, %v2262_v20, -1e+30 }
 0x36d   : > { %v12266_v39 = vpop.xlane.xlu1 %1775  ;;  %15948 = vst [vmem:[#allocation78_spill] sm:$0xff] %v12293_v17  ;;  %v2289_v32 = vsel %vm2285_vm9, %v12293_v17, -inf }
 0x36f   : > { %5925 = vadd.xlane.f32.xlu0 %v5856_v5  ;;  %v12269_v62 = vpop.xlane.xlu0 %1789  ;;  %v12305_v5 = vpop.f32.mrf.mxu0 }
 0x371   : > { %v12278_v9 = vpop.xlane.xlu1 %3890  ;;  %v12311_v34 = vpop.f32.mrf.mxu0 }
 0x373   : > { %5949 = vadd.xlane.f32.xlu0 %v5868_v16  ;;  %v12288_v52 = vpop.xlane.xlu0 %3904  ;;  %v12317_v51 = vpop.f32.mrf.mxu0 }
 0x375   : > { %v12299_v15 = vpop.xlane.xlu1 %1787  ;;  %2287 = vmax.xlane.f32.xlu1 %v2286_v35 }
 0x377   : > { %2290 = vmax.xlane.f32.xlu0 %v2289_v32  ;;  %v12303_v7 = vpop.xlane.xlu0 %1785  ;;  %v12323_v32 = vpop.f32.mrf.mxu0 }
 0x379   : > { %v12307_v59 = vpop.xlane.xlu1 %3902  ;;  %v12329_v53 = vpop.f32.mrf.mxu0 }
 0x37a   : > { %15950 = vst [vmem:[#allocation80_spill] sm:$0xff] %v12307_v59 }
 0x37b   : > { %v12309_v33 = vpop.xlane.xlu0 %3900  ;;  %v12335_v18 = vpop.f32.mrf.mxu0 }
 0x37c   : > { %15951 = vst [vmem:[#allocation81_spill] sm:$0xff] %v12309_v33  ;;  %15959 = vst [vmem:[#allocation89_spill] sm:$0xff] %v12335_v18 }
 0x37d   : > { %v12313_v30 = vpop.xlane.xlu1 %1783 }
 0x37f   : > { %v12315_v16 = vpop.xlane.xlu0 %1797 }
 0x380   : > { %15952 = vst [vmem:[#allocation82_spill] sm:$0xff] %v12315_v16 }
 0x381   : > { %v12319_v20 = vpop.xlane.xlu1 %3898 }
 0x382   : > { %15953 = vst [vmem:[#allocation83_spill] sm:$0xff] %v12319_v20  ;;  %v12341_v20 = vpop.f32.mrf.mxu0 }
 0x383   : > { %v12321_v35 = vpop.xlane.xlu0 %3912  ;;  %15962 = vst [vmem:[#allocation92_spill] sm:$0xff] %v12341_v20 }
 0x384   : > { %15954 = vst [vmem:[#allocation84_spill] sm:$0xff] %v12321_v35 }
 0x385   : > { %v12325_v36 = vpop.xlane.xlu1 %1795 }
 0x386   : > { %15955 = vst [vmem:[#allocation85_spill] sm:$0xff] %v12325_v36  ;;  %v12347_v36 = vpop.f32.mrf.mxu0 }
 0x387   : > { %v12327_v61 = vpop.xlane.xlu0 %1793  ;;  %15965 = vst [vmem:[#allocation95_spill] sm:$0xff] %v12347_v36  ;;  %v5534_v36 = vadd.f32 %v11931_v26, %v12137_v28  ;;  %v5566_v26 = vadd.f32 %v12050_v40, %v12137_v28  ;;  %v3960_v40 = vadd.f32 %v11714_v47, %v12062_v2  ;;  %v5585_v2 = vadd.f32 %v12099_v11, %v12137_v28 }
 0x388   : > { %15956 = vst [vmem:[#allocation86_spill] sm:$0xff] %v12327_v61 }
 0x389   : > { %v12331_v17 = vpop.xlane.xlu1 %3910  ;;  %9901 = vtanh.f32 %v5534_v36  ;;  %v5569_v36 = vadd.f32 %v12070_v0, %v12137_v28  ;;  %v3959_v0 = vadd.f32 %v11714_v47, %v12036_v43  ;;  %v3964_v43 = vadd.f32 %v11714_v47, %v12094_v1 }
 0x38a   : > { %15957 = vst [vmem:[#allocation87_spill] sm:$0xff] %v12331_v17  ;;  %v12353_v17 = vpop.f32.mrf.mxu0  ;;  %v5598_v1 = vadd.f32 %v12112_v38, %v12137_v28  ;;  %v5590_v38 = vadd.f32 %v12137_v28, %v12118_v19 }
 0x38b   : > { %v12333_v54 = vpop.xlane.xlu0 %1805 }
 0x38c   : > { %15958 = vst [vmem:[#allocation88_spill] sm:$0xff] %v12333_v54 }
 0x38d   : > { %v12337_v24 = vpop.xlane.xlu1 %1791 }
 0x38e   : > { %15960 = vst [vmem:[#allocation90_spill] sm:$0xff] %v12337_v24  ;;  %v12359_v24 = vpop.f32.mrf.mxu0 }
 0x38f   : > { %v12339_v33 = vpop.xlane.xlu0 %3920  ;;  %15969 = vst [vmem:[#allocation99_spill] sm:$0xff] %v12359_v24 }
 0x390   : > { %15961 = vst [vmem:[#allocation91_spill] sm:$0xff] %v12339_v33 }
 0x391   : > { %v12343_v59 = vpop.xlane.xlu1 %3906 }
 0x392   : > { %15963 = vst [vmem:[#allocation93_spill] sm:$0xff] %v12343_v59  ;;  %v12365_v59 = vpop.f32.mrf.mxu0 }
 0x393   : > { %v12345_v35 = vpop.xlane.xlu0 %1801  ;;  %15972 = vst [vmem:[#allocation102_spill] sm:$0xff] %v12365_v59  ;;  %v5553_v59 = vadd.f32 %v12030_v45, %v12137_v28 }
 0x394   : > { %15964 = vst [vmem:[#allocation94_spill] sm:$0xff] %v12345_v35  ;;  %v12377_v24 = vpop.f32.mrf.mxu0 }
 0x395   : > { %v12349_v61 = vpop.xlane.xlu1 %3908  ;;  %15973 = vst [vmem:[#allocation103_spill] sm:$0xff] %v12377_v24 }
 0x396   : > { %15966 = vst [vmem:[#allocation96_spill] sm:$0xff] %v12349_v61  ;;  %v12391_v24 = vpop.f32.mrf.mxu0 }
 0x397   : > { %v12351_v16 = vpop.xlane.xlu0 %3916  ;;  %15975 = vst [vmem:[#allocation105_spill] sm:$0xff] %v12391_v24 }
 0x398   : > { %15967 = vst [vmem:[#allocation97_spill] sm:$0xff] %v12351_v16  ;;  %v5526_v16 = vadd.f32 %v12137_v28, %v11949_v4 }
 0x399   : > { %v12355_v54 = vpop.xlane.xlu1 %1803 }
 0x39a   : > { %9903 = vtanh.f32 %v5526_v16  ;;  %v3958_v16 = vadd.f32 %v11714_v47, %v11998_v44  ;;  %v5577_v44 = vadd.f32 %v12137_v28, %v12106_v6  ;;  %v4160_v6 = vrot.slane %v3959_v0, %v11695_v63 }
 0x39b   : > { %v12357_v18 = vpop.xlane.xlu0 %1813 }
 0x39c   : > { %15968 = vst [vmem:[#allocation98_spill] sm:$0xff] %v12357_v18  ;;  %v5550_v18 = vadd.f32 %v12007_v8, %v12137_v28  ;;  %v5558_v8 = vadd.f32 %v12137_v28, %v12060_v56  ;;  %v3955_v56 = vadd.f32 %v11714_v47, %v11984_v23 }
 0x39d   : > { %v12361_v33 = vpop.xlane.xlu1 %3918 }
 0x39e   : > { %15970 = vst [vmem:[#allocation100_spill] sm:$0xff] %v12361_v33  ;;  %9905 = vtanh.f32 %v5550_v18  ;;  %v5561_v18 = vadd.f32 %v12137_v28, %v12078_v14  ;;  %v3957_v14 = vadd.f32 %v11714_v47, %v11941_v58  ;;  %v4142_v11 = vrot.slane %v3955_v56, %v11695_v63 }
 0x39f   : > { %v12363_v20 = vpop.xlane.xlu0 %3928  ;;  %v3962_v58 = vadd.f32 %v11714_v47, %v12042_v49  ;;  %v3961_v49 = vadd.f32 %v11714_v47, %v12014_v3 }
 0x3a0   : > { %15971 = vst [vmem:[#allocation101_spill] sm:$0xff] %v12363_v20  ;;  %v5542_v20 = vadd.f32 %v12137_v28, %v12019_v57  ;;  %v3956_v57 = vadd.f32 %v11714_v47, %v12021_v12  ;;  %v4151_v56 = vrot.slane %v3957_v14, %v11695_v63 }
 0x3a1   : > { %v12367_v35 = vpop.xlane.xlu1 %1799  ;;  %v4173_v3 = vrot.slane %v3962_v58, %v11688_v31 }
 0x3a2   : > { %9907 = vtanh.f32 %v5542_v20  ;;  %v4146_v23 = vrot.slane %v3956_v57, %v11688_v31  ;;  %v5601_v57 = vadd.f32 %v12125_v60, %v12137_v28 }
 0x3a3   : > { %v12373_v61 = vpop.xlane.xlu0 %1809  ;;  %9909 = vtanh.f32 %v5553_v59  ;;  %v12413_v59 = vpop.f32.mrf.mxu0 }
 0x3a4   : > { %9911 = vtanh.f32 %v5566_v26  ;;  %15977 = vst [vmem:[#allocation107_spill] sm:$0xff] %v12413_v59  ;;  %v4164_v26 = vrot.slane %v3960_v40, %v11688_v31  ;;  %v3963_v40 = vadd.f32 %v11714_v47, %v12074_v22  ;;  %v4147_v60 = vsel %vm1961_vm0, %v4146_v23, %v4142_v11  ;;  %v12452_v59 = vpop.eup %9901  ;;  %v15982_v11 = vld [vmem:[#allocation47_spill] sm:$0xff] }
 0x3a5   : > { %v12381_v33 = vpop.xlane.xlu1 %3914  ;;  %9913 = vtanh.f32 %v5558_v8  ;;  %v4155_v8 = vrot.slane %v3958_v16, %v11688_v31  ;;  %v4182_v22 = vrot.slane %v3964_v43, %v11688_v31  ;;  %v3966_v23 = vadd.f32 %v11714_v47, %v12080_v50 }
 0x3a6   : > { %9915 = vtanh.f32 %v5569_v36  ;;  %v4165_v0 = vsel %vm1961_vm0, %v4164_v26, %v4160_v6  ;;  %v4178_v19 = vrot.slane %v3963_v40, %v11695_v63  ;;  %v15983_v6 = vld [vmem:[#allocation51_spill] sm:$0xff]  ;;  %v4169_v50 = vrot.slane %v3961_v49, %v11695_v63 }
 0x3a7   : > { %v12387_v4 = vpop.xlane.xlu0 %3924  ;;  %9917 = vtanh.f32 %v5561_v18  ;;  %v12438_v18 = vpop.f32.mrf.mxu0  ;;  %v4156_v14 = vsel %vm1961_vm0, %v4155_v8, %v4151_v56  ;;  %v5609_v56 = vadd.f32 %v12137_v28, %v12165_v21 }
 0x3a8   : > { %15974 = vst [vmem:[#allocation104_spill] sm:$0xff] %v12387_v4  ;;  %9919 = vtanh.f32 %v5585_v2  ;;  %15980 = vst [vmem:[#allocation110_spill] sm:$0xff] %v12438_v18  ;;  %v3968_v2 = vadd.f32 %v11714_v47, %v12120_v13  ;;  %v9904_v26 = vpop.eup %9903  ;;  %v4362_v43 = vsel %vm2242_vm1, %v4156_v14, %v4147_v60  ;;  %v3965_v13 = vadd.f32 %v11714_v47, %v15982_v11  ;;  %v16022_v4 = vld [vmem:[#allocation68_spill] sm:$0xff] }
 0x3a9   : > { %v12397_v45 = vpop.xlane.xlu1 %1811  ;;  %9921 = vtanh.f32 %v5577_v44  ;;  %v3967_v18 = vadd.f32 %v11714_v47, %v15983_v6  ;;  %v12466_v8 = vpop.f32.mrf.mxu0  ;;  %v4183_v40 = vsel %vm1961_vm0, %v4182_v22, %v4178_v19  ;;  %v15985_v6 = vld [vmem:[#allocation59_spill] sm:$0xff]  ;;  %v4174_v49 = vsel %vm1961_vm0, %v4173_v3, %v4169_v50  ;;  %v15990_v50 = vld [vmem:[#allocation49_spill] sm:$0xff] }
 0x3aa   : > { %9923 = vtanh.f32 %v5601_v57  ;;  %15984 = vst [vmem:[#allocation47_spill] sm:$0xff] %v12466_v8  ;;  %v4363_v57 = vsel %vm2244_vm2, %v4165_v0, %v4362_v43  ;;  %v4200_v11 = vrot.slane %v3968_v2, %v11688_v31  ;;  %v5614_v8 = vadd.f32 %v15985_v6, %v12137_v28  ;;  %v15986_v0 = vld [vmem:[#allocation52_spill] sm:$0xff]  ;;  %v15987_v43 = vld [vmem:[#allocation62_spill] sm:$0xff] }
 0x3ab   : > { %v12407_v12 = vpop.xlane.xlu0 %1821  ;;  %v12468_v58 = vpop.eup %9905  ;;  %9925 = vtanh.f32 %v5598_v1  ;;  %v4191_v1 = vrot.slane %v3966_v23, %v11688_v31  ;;  %v3970_v21 = vadd.f32 %v11714_v47, %v15986_v0  ;;  %v4187_v22 = vrot.slane %v3965_v13, %v11695_v63 }
 0x3ac   : > { %15976 = vst [vmem:[#allocation106_spill] sm:$0xff] %v12407_v12  ;;  %9927 = vtanh.f32 %v5590_v38  ;;  %v4196_v2 = vrot.slane %v3967_v18, %v11695_v63  ;;  %v15988_v38 = vld [vmem:[#allocation65_spill] sm:$0xff]  ;;  %v4364_v6 = vsel %vm2246_vm3, %v4174_v49, %v4363_v57  ;;  %v12495_v3 = vpop.f32.mrf.mxu0  ;;  %v3969_v0 = vadd.f32 %v11714_v47, %v15990_v50 }
 0x3ad   : > { %v12420_v20 = vpop.xlane.xlu1 %3926  ;;  %v5617_v19 = vadd.f32 %v15988_v38, %v12137_v28  ;;  %15989 = vst [vmem:[#allocation51_spill] sm:$0xff] %v12495_v3  ;;  %9929 = vtanh.f32 %v5609_v56  ;;  %v4365_v18 = vsel %vm2248_vm4, %v4183_v40, %v4364_v6  ;;  %v5633_v57 = vadd.f32 %v12229_v46, %v12137_v28 }
 0x3ae   : > { %15978 = vst [vmem:[#allocation108_spill] sm:$0xff] %v12420_v20  ;;  %9931 = vtanh.f32 %v5614_v8  ;;  %v4201_v49 = vsel %vm1961_vm0, %v4200_v11, %v4196_v2  ;;  %v4192_v56 = vsel %vm1961_vm0, %v4191_v1, %v4187_v22  ;;  %v4209_v50 = vrot.slane %v3970_v21, %v11688_v31  ;;  %v12518_v6 = vpop.f32.mrf.mxu0  ;;  %v15999_v2 = vld [vmem:[#allocation53_spill] sm:$0xff] }
 0x3af   : > { %v12431_v36 = vpop.xlane.xlu0 %3936  ;;  %v12476_v14 = vpop.eup %9907  ;;  %v4366_v40 = vsel %vm2250_vm5, %v4192_v56, %v4365_v18  ;;  %15994 = vst [vmem:[#allocation62_spill] sm:$0xff] %v12518_v6  ;;  %v4205_v46 = vrot.slane %v3969_v0, %v11695_v63  ;;  %v12542_v18 = vmul.f32 %v12452_v59, %v12204_v55  ;;  %v16001_v56 = vld [vmem:[#allocation56_spill] sm:$0xff] }
 0x3b0   : > { %15979 = vst [vmem:[#allocation109_spill] sm:$0xff] %v12431_v36  ;;  %v9910_v24 = vpop.eup %9909  ;;  %v5606_v36 = vadd.f32 %v12137_v28, %v15987_v43  ;;  %v15991_v43 = vld [vmem:[#allocation73_spill] sm:$0xff]  ;;  %v4367_v1 = vsel %vm15758_vm6, %v4201_v49, %v4366_v40  ;;  %v1859_v40 = vadd.f32 %v11685_v29, %v16001_v56  ;;  %v16006_v56 = vld [vmem:[#allocation58_spill] sm:$0xff] }
 0x3b1   : > { %v12444_v16 = vpop.xlane.xlu1 %1807  ;;  %v12488_v12 = vpop.eup %9911  ;;  %v5622_v20 = vadd.f32 %v12137_v28, %v15991_v43  ;;  %v5625_v43 = vadd.f32 %v12137_v28, %v12248_v41  ;;  %v12533_v41 = vmul.f32 %v9904_v26, %v12204_v55  ;;  %v5654_v26 = vadd.f32 %v12137_v28, %v12317_v51 }
 0x3b2   : > { %v12497_v23 = vpop.eup %9913  ;;  %9933 = vtanh.f32 %v5606_v36  ;;  %v15997_v36 = vld [vmem:[#allocation50_spill] sm:$0xff]  ;;  %v5858_v51 = vmul.f32 %v9910_v24, %v12204_v55  ;;  %v16008_v24 = vld [vmem:[#allocation61_spill] sm:$0xff] }
 0x3b3   : > { %v12458_v44 = vpop.xlane.xlu0 %1817  ;;  %v12508_v38 = vpop.eup %9915  ;;  %9935 = vtanh.f32 %v5617_v19  ;;  %v12530_v21 = vadd.f32 %v12137_v28, %v15997_v36  ;;  %v1858_v19 = vadd.f32 %v11685_v29, %v15999_v2 }
 0x3b4   : > { %15981 = vst [vmem:[#allocation111_spill] sm:$0xff] %v12458_v44  ;;  %v9918_v3 = vpop.eup %9917  ;;  %9937 = vtanh.f32 %v5622_v20  ;;  %v4210_v20 = vsel %vm1961_vm0, %v4209_v50, %v4205_v46  ;;  %v12555_v50 = vadd.f32 %v12137_v28, %v12305_v5  ;;  %v5665_v46 = vadd.f32 %v12323_v32, %v12137_v28 }
 0x3b5   : > { %v12474_v60 = vpop.xlane.xlu1 %3922  ;;  %v12520_v8 = vpop.eup %9919  ;;  %15998 = vst [vmem:[#allocation73_spill] sm:$0xff] %v12530_v21  ;;  %9939 = vtanh.f32 %v5633_v57  ;;  %v4368_v57 = vsel %vm2254_vm7, %v4210_v20, %v4367_v1  ;;  %v16005_v1 = vld [vmem:[#allocation54_spill] sm:$0xff]  ;;  %v1857_v5 = vadd.f32 %v11685_v29, %v16006_v56  ;;  %v5657_v32 = vadd.f32 %v12137_v28, %v12329_v53  ;;  %v16009_v21 = vld [vmem:[#allocation57_spill] sm:$0xff] }
 0x3b6   : > { %15995 = vst [vmem:[#allocation65_spill] sm:$0xff] %v12520_v8  ;;  %v12526_v22 = vpop.eup %9921  ;;  %9941 = vtanh.f32 %v5625_v43  ;;  %v12551_v43 = vpop.f32.mrf.mxu0  ;;  %16003 = vst [vmem:[#allocation56_spill] sm:$0xff] %v12555_v50  ;;  %v3973_v20 = vadd.f32 %v11714_v47, %v16005_v1  ;;  %v12586_v56 = vmul.f32 %v12476_v14, %v12204_v55  ;;  %v3971_v53 = vadd.f32 %v11714_v47, %v16009_v21 }
 0x3b7   : > { %v12505_v13 = vpop.xlane.xlu0 %3932  ;;  %v9924_v49 = vpop.eup %9923  ;;  %16002 = vst [vmem:[#allocation53_spill] sm:$0xff] %v12551_v43  ;;  %v3972_v43 = vadd.f32 %v11714_v47, %v16008_v24  ;;  %9943 = vtanh.f32 %v5654_v26  ;;  %v2110_v24 = vrot.slane %v1858_v19, %v11695_v63  ;;  %v12600_v14 = vadd.f32 %v12311_v34, %v12137_v28 }
 0x3b8   : > { %15993 = vst [vmem:[#allocation52_spill] sm:$0xff] %v12505_v13  ;;  %v12567_v2 = vpop.eup %9925  ;;  %v5870_v1 = vmul.f32 %v9924_v49, %v12204_v55  ;;  %v9152_v50 = vpop.f32.mrf.mxu0  ;;  %9945 = vtanh.f32 %v5665_v46  ;;  %v4223_v21 = vrot.slane %v3973_v20, %v11695_v63  ;;  %v2105_v26 = vrot.slane %v1857_v5, %v11688_v31 }
 0x3b9   : > { %v12503_v44 = vpop.xlane.xlu1 %1819  ;;  %v12577_v8 = vpop.eup %9927  ;;  %16011 = vst [vmem:[#allocation54_spill] sm:$0xff] %v12600_v14  ;;  %9947 = vtanh.f32 %v5657_v32  ;;  %v4218_v13 = vrot.slane %v3972_v43, %v11688_v31  ;;  %v5673_v34 = vadd.f32 %v12137_v28, %v12353_v17  ;;  %v12617_v46 = vmul.f32 %v12508_v38, %v12204_v55  ;;  %v16015_v38 = vld [vmem:[#allocation64_spill] sm:$0xff] }
 0x3ba   : > { %15992 = vst [vmem:[#allocation59_spill] sm:$0xff] %v12503_v44  ;;  %v5720_v32 = vpop.f32.mrf.mxu0  ;;  %v12629_v43 = vmul.f32 %v12488_v12, %v12204_v55  ;;  %v1863_v14 = vadd.f32 %v11685_v29, %v16015_v38  ;;  %v16018_v12 = vld [vmem:[#allocation63_spill] sm:$0xff] }
 0x3bb   : > { %9949 = vtanh.f32 %v5673_v34 }
 0x3bc   : > { %16014 = vst [vmem:[#allocation61_spill] sm:$0xff] %v12629_v43  ;;  %v1862_v43 = vadd.f32 %v11685_v29, %v16018_v12 }
 0x3bd   : > { %v12523_v11 = vpop.xlane.xlu1 %3934 }
 0x3be   : > { %15996 = vst [vmem:[#allocation49_spill] sm:$0xff] %v12523_v11  ;;  %v9930_v11 = vpop.eup %9929 }
 0x3bf   : > { %v12537_v0 = vpop.permute.xlu0 %3110  ;;  %v12609_v19 = vpop.eup %9931 }
 0x3c0   : > { %16000 = vst [vmem:[#allocation50_spill] sm:$0xff] %v12537_v0  ;;  %vm3119_vm11 = vcmp.lt.s32.totalorder %v11651_v10, %v12537_v0  ;;  %v12619_v20 = vpop.eup %9933 }
 0x3c1   : > { %v12557_v59 = vpop.xlane.xlu1 %1815  ;;  %v12564_v36 = vsel %vm3119_vm11, %v4368_v57, -1e+30  ;;  %v16007_v57 = vld [vmem:[#allocation55_spill] sm:$0xff]  ;;  %v9936_v17 = vpop.eup %9935 }
 0x3c2   : > { %16004 = vst [vmem:[#allocation112_spill] sm:$0xff] %v12564_v36  ;;  %v4394_v6 = vsel %vm2285_vm9, %v12564_v36, -inf  ;;  %v1856_v0 = vadd.f32 %v11685_v29, %v16007_v57  ;;  %v2114_v36 = vrot.slane %v1859_v40, %v11688_v31  ;;  %v12593_v57 = vmul.f32 %v12468_v58, %v12204_v55 }
 0x3c3   : > { %4395 = vmax.xlane.f32.xlu0 %v4394_v6  ;;  %v16010_v6 = vld [vmem:[#allocation60_spill] sm:$0xff]  ;;  %v12607_v58 = vmul.f32 %v9918_v3, %v12204_v55  ;;  %v4214_v3 = vrot.slane %v3971_v53, %v11695_v63  ;;  %v12639_v53 = vmul.f32 %v12526_v22, %v12204_v55  ;;  %v16020_v22 = vld [vmem:[#allocation46_spill] sm:$0xff] }
 0x3c4   : > { %v3974_v49 = vadd.f32 %v11714_v47, %v16010_v6  ;;  %v2101_v6 = vrot.slane %v1856_v0, %v11695_v63  ;;  %v2115_v5 = vsel %vm1961_vm0, %v2114_v36, %v2110_v24  ;;  %v12625_v0 = vmul.f32 %v12497_v23, %v12204_v55  ;;  %v12641_v23 = vpop.eup %9937 }
 0x3c5   : > { %v12602_v40 = vpop.xlane.xlu1 %3930  ;;  %v5872_v36 = vmul.f32 %v9930_v11, %v12204_v55  ;;  %16017 = vst [vmem:[#allocation60_spill] sm:$0xff] %v12639_v53  ;;  %v12650_v38 = vpop.eup %9939  ;;  %v4219_v11 = vsel %vm1961_vm0, %v4218_v13, %v4214_v3  ;;  %v1860_v53 = vadd.f32 %v11685_v29, %v16022_v4 }
 0x3c6   : > { %16012 = vst [vmem:[#allocation58_spill] sm:$0xff] %v12602_v40  ;;  %16013 = vst [vmem:[#allocation55_spill] sm:$0xff] %v12625_v0  ;;  %v2106_v24 = vsel %vm1961_vm0, %v2105_v26, %v2101_v6  ;;  %v16019_v40 = vld [vmem:[#allocation69_spill] sm:$0xff]  ;;  %v5721_v6 = vadd.f32 %v12137_v28, %v5720_v32  ;;  %v9942_v12 = vpop.eup %9941  ;;  %v16021_v0 = vld [vmem:[#allocation67_spill] sm:$0xff]  ;;  %v3976_v32 = vadd.f32 %v11714_v47, %v12212_v25 }
 0x3c7   : > { %5953 = vadd.xlane.f32.xlu0 %v5870_v1  ;;  %v4227_v1 = vrot.slane %v3974_v49, %v11688_v31  ;;  %v1861_v49 = vadd.f32 %v11685_v29, %v16019_v40  ;;  %v3978_v40 = vadd.f32 %v11714_v47, %v16021_v0  ;;  %v2263_v34 = vsel %vm2242_vm1, %v2115_v5, %v2106_v24  ;;  %v16024_v5 = vld [vmem:[#allocation71_spill] sm:$0xff] }
 0x3c8   : > { %v2128_v0 = vrot.slane %v1862_v43, %v11695_v63  ;;  %9951 = vtanh.f32 %v5721_v6  ;;  %v2119_v43 = vrot.slane %v1860_v53, %v11695_v63  ;;  %v4236_v24 = vrot.slane %v3976_v32, %v11688_v31 }
 0x3c9   : > { %v12634_v44 = vpop.permute.xlu1 %3107  ;;  %v4228_v3 = vsel %vm1961_vm0, %v4227_v1, %v4223_v21  ;;  %v3975_v21 = vadd.f32 %v11714_v47, %v16024_v5  ;;  %v4245_v25 = vrot.slane %v3978_v40, %v11688_v31  ;;  %v12686_v1 = vpop.eup %9943  ;;  %v3979_v32 = vadd.f32 %v11714_v47, %v12278_v9 }
 0x3ca   : > { %16016 = vst [vmem:[#allocation57_spill] sm:$0xff] %v12634_v44  ;;  %vm3118_vm12 = vcmp.lt.s32.totalorder %v11651_v10, %v12634_v44  ;;  %v16023_v44 = vld [vmem:[#allocation66_spill] sm:$0xff]  ;;  %v2123_v10 = vrot.slane %v1861_v49, %v11688_v31  ;;  %v9946_v53 = vpop.eup %9945  ;;  %v3980_v9 = vadd.f32 %v11714_v47, %v12259_v37  ;;  %v1868_v37 = vadd.f32 %v11685_v29, %v12313_v30 }
 0x3cb   : > { %5929 = vadd.xlane.f32.xlu0 %v5858_v51  ;;  %v12657_v26 = vsel %vm3118_vm12, %v16020_v22, -1e+30  ;;  %v5729_v51 = vadd.f32 %v9152_v50, %v12137_v28  ;;  %v2132_v22 = vrot.slane %v1863_v14, %v11688_v31  ;;  %v3977_v4 = vadd.f32 %v11714_v47, %v16023_v44 }
 0x3cc   : > { %v4391_v13 = vsel %vm2285_vm9, %v12657_v26, -inf  ;;  %v1864_v28 = vadd.f32 %v11685_v29, %v12266_v39  ;;  %v4369_v50 = vsel %vm2242_vm1, %v4228_v3, %v4219_v11  ;;  %v5874_v14 = vmul.f32 %v9936_v17, %v12204_v55  ;;  %v16025_v11 = vld [vmem:[#allocation72_spill] sm:$0xff] }
 0x3cd   : > { %4392 = vmax.xlane.f32.xlu1 %v4391_v13  ;;  %v1865_v44 = vadd.f32 %v11685_v29, %v12243_v48  ;;  %9953 = vtanh.f32 %v5729_v51  ;;  %v2133_v39 = vsel %vm1961_vm0, %v2132_v22, %v2128_v0  ;;  %v5867_v17 = vmul.f32 %v12577_v8, %v12204_v55  ;;  %v9948_v13 = vpop.eup %9947  ;;  %v16026_v51 = vld [vmem:[#allocation74_spill] sm:$0xff] }
 0x3ce   : > { %v4241_v49 = vrot.slane %v3977_v4, %v11695_v63  ;;  %v2124_v48 = vsel %vm1961_vm0, %v2123_v10, %v2119_v43  ;;  %v1867_v6 = vadd.f32 %v11685_v29, %v16025_v11  ;;  %v2137_v40 = vrot.slane %v1864_v28, %v11695_v63 }
 0x3cf   : > { %5957 = vadd.xlane.f32.xlu0 %v5872_v36  ;;  %v12695_v36 = vmul.f32 %v12567_v2, %v12204_v55  ;;  %v3982_v8 = vadd.f32 %v11714_v47, %v12222_v42  ;;  %v1866_v2 = vadd.f32 %v11685_v29, %v12235_v27  ;;  %v3981_v3 = vadd.f32 %v11714_v47, %v16026_v51 }
 0x3d0   : > { %v4246_v10 = vsel %vm1961_vm0, %v4245_v25, %v4241_v49  ;;  %v2141_v22 = vrot.slane %v1865_v44, %v11688_v31  ;;  %v5876_v0 = vmul.f32 %v9942_v12, %v12204_v55  ;;  %v2264_v4 = vsel %vm2244_vm2, %v2124_v48, %v2263_v34 }
 0x3d1   : > { %5915 = vadd.xlane.f32.xlu1 %v12533_v41  ;;  %v4232_v41 = vrot.slane %v3975_v21, %v11695_v63  ;;  %v12720_v27 = vmul.f32 %v12619_v20, %v12204_v55  ;;  %v2150_v28 = vrot.slane %v1867_v6, %v11688_v31  ;;  %v5884_v34 = vmul.f32 %v9948_v13, %v12204_v55  ;;  %v16027_v13 = vld [vmem:[#allocation82_spill] sm:$0xff] }
 0x3d2   : > { %v2142_v12 = vsel %vm1961_vm0, %v2141_v22, %v2137_v40  ;;  %v4263_v5 = vrot.slane %v3982_v8, %v11688_v31  ;;  %v4259_v20 = vrot.slane %v3981_v3, %v11695_v63  ;;  %v1871_v21 = vadd.f32 %v11685_v29, %v12269_v62  ;;  %v16028_v8 = vld [vmem:[#allocation84_spill] sm:$0xff]  ;;  %v16030_v3 = vld [vmem:[#allocation87_spill] sm:$0xff] }
 0x3d3   : > { %5933 = vadd.xlane.f32.xlu0 %v12607_v58  ;;  %v4237_v42 = vsel %vm1961_vm0, %v4236_v24, %v4232_v41  ;;  %v12724_v58 = vmul.f32 %v12609_v19, %v12204_v55  ;;  %v9950_v19 = vpop.eup %9949  ;;  %v4250_v43 = vrot.slane %v3979_v32, %v11695_v63  ;;  %v2265_v44 = vsel %vm2246_vm3, %v2133_v39, %v2264_v4 }
 0x3d4   : > { %v4370_v25 = vsel %vm2244_vm2, %v4237_v42, %v4369_v50  ;;  %v12743_v24 = vmul.f32 %v9946_v53, %v12204_v55  ;;  %v12747_v49 = vmul.f32 %v12650_v38, %v12204_v55  ;;  %v12751_v62 = vmul.f32 %v12641_v23, %v12204_v55  ;;  %v16031_v42 = vld [vmem:[#allocation90_spill] sm:$0xff] }
 0x3d5   : > { %5919 = vadd.xlane.f32.xlu1 %v12542_v18  ;;  %v2146_v18 = vrot.slane %v1866_v2, %v11695_v63  ;;  %v2266_v50 = vsel %vm2248_vm4, %v2142_v12, %v2265_v44  ;;  %v12757_v30 = vadd.f32 %v11714_v47, %v12288_v52  ;;  %v1869_v39 = vadd.f32 %v11685_v29, %v12303_v7  ;;  %v9952_v11 = vpop.eup %9951 }
 0x3d6   : > { %v12765_v53 = vsel %vm1961_vm0, %v4263_v5, %v4259_v20  ;;  %v2168_v23 = vrot.slane %v1871_v21, %v11688_v31  ;;  %v4371_v48 = vsel %vm2246_vm3, %v4246_v10, %v4370_v25  ;;  %v2155_v6 = vrot.slane %v1868_v37, %v11695_v63  ;;  %v16033_v5 = vld [vmem:[#allocation83_spill] sm:$0xff]  ;;  %v16034_v21 = vld [vmem:[#allocation86_spill] sm:$0xff]  ;;  %v16035_v25 = vld [vmem:[#allocation96_spill] sm:$0xff] }
 0x3d7   : > { %5961 = vadd.xlane.f32.xlu0 %v5874_v14  ;;  %v4254_v14 = vrot.slane %v3980_v9, %v11688_v31  ;;  %v2151_v38 = vsel %vm1961_vm0, %v2150_v28, %v2146_v18  ;;  %v1875_v41 = vadd.f32 %v11685_v29, %v16027_v13  ;;  %v3990_v2 = vadd.f32 %v11714_v47, %v16028_v8  ;;  %v16032_v9 = vld [vmem:[#allocation80_spill] sm:$0xff] }
 0x3d8   : > { %v2267_v7 = vsel %vm2250_vm5, %v2151_v38, %v2266_v50  ;;  %v3989_v10 = vadd.f32 %v11714_v47, %v16030_v3  ;;  %v4281_v22 = vrot.slane %v12757_v30, %v11688_v31  ;;  %v2159_v4 = vrot.slane %v1869_v39, %v11688_v31  ;;  %v16036_v38 = vld [vmem:[#allocation93_spill] sm:$0xff]  ;;  %v16038_v13 = vld [vmem:[#allocation88_spill] sm:$0xff] }
 0x3d9   : > { %5923 = vadd.xlane.f32.xlu1 %v12586_v56  ;;  %v1870_v56 = vadd.f32 %v11685_v29, %v12299_v15  ;;  %v4255_v52 = vsel %vm1961_vm0, %v4254_v14, %v4250_v43  ;;  %v12773_v15 = vmul.f32 %v9950_v19, %v12204_v55  ;;  %v1872_v28 = vadd.f32 %v11685_v29, %v16031_v42 }
 0x3da   : > { %v9954_v40 = vpop.eup %9953  ;;  %v12792_v12 = vadd.f32 %v11714_v47, %v16032_v9  ;;  %v12796_v18 = vadd.f32 %v11714_v47, %v16033_v5  ;;  %v12802_v20 = vsel %vm2248_vm4, %v4255_v52, %v4371_v48  ;;  %v1873_v19 = vadd.f32 %v11685_v29, %v16034_v21  ;;  %v16037_v52 = vld [vmem:[#allocation81_spill] sm:$0xff] }
 0x3db   : > { %5937 = vadd.xlane.f32.xlu0 %v12617_v46  ;;  %v16029_v46 = vld [vmem:[#allocation85_spill] sm:$0xff]  ;;  %v2164_v32 = vrot.slane %v1870_v56, %v11695_v63  ;;  %v3988_v43 = vadd.f32 %v11714_v47, %v16035_v25  ;;  %v12809_v37 = vmul.f32 %v9954_v40, %v12204_v55  ;;  %v2160_v44 = vsel %vm1961_vm0, %v2159_v4, %v2155_v6 }
 0x3dc   : > { %v1874_v51 = vadd.f32 %v11685_v29, %v16029_v46  ;;  %v2186_v50 = vrot.slane %v1875_v41, %v11688_v31  ;;  %v4295_v56 = vrot.slane %v3989_v10, %v11695_v63  ;;  %v2173_v39 = vrot.slane %v1872_v28, %v11695_v63  ;;  %v16040_v46 = vld [vmem:[#allocation94_spill] sm:$0xff] }
 0x3dd   : > { %5947 = vadd.xlane.f32.xlu1 %v5867_v17  ;;  %v12799_v17 = vmul.f32 %v9952_v11, %v12204_v55  ;;  %v3987_v48 = vadd.f32 %v11714_v47, %v16036_v38  ;;  %v1876_v55 = vadd.f32 %v11685_v29, %v12367_v35  ;;  %v12823_v11 = vsel %vm1961_vm0, %v2168_v23, %v2164_v32  ;;  %v16039_v35 = vld [vmem:[#allocation91_spill] sm:$0xff]  ;;  %v16041_v32 = vld [vmem:[#allocation97_spill] sm:$0xff] }
 0x3de   : > { %v2182_v14 = vrot.slane %v1874_v51, %v11695_v63  ;;  %v12827_v6 = vadd.f32 %v11714_v47, %v16037_v52  ;;  %v4268_v40 = vrot.slane %v12796_v18, %v11695_v63  ;;  %v12834_v41 = vsel %vm15758_vm6, %v2160_v44, %v2267_v7 }
 0x3df   : > { %5965 = vadd.xlane.f32.xlu0 %v5876_v0  ;;  %v4299_v0 = vrot.slane %v3990_v2, %v11688_v31  ;;  %v2177_v8 = vrot.slane %v1873_v19, %v11688_v31  ;;  %v3994_v23 = vadd.f32 %v11714_v47, %v16039_v35  ;;  %v4290_v2 = vrot.slane %v3988_v43, %v11688_v31  ;;  %v16042_v19 = vld [vmem:[#allocation100_spill] sm:$0xff] }
 0x3e0   : > { %v1877_v51 = vadd.f32 %v11685_v29, %v16040_v46  ;;  %v2187_v3 = vsel %vm1961_vm0, %v2186_v50, %v2182_v14  ;;  %v3991_v7 = vadd.f32 %v11714_v47, %v12381_v33  ;;  %v4286_v42 = vrot.slane %v3987_v48, %v11695_v63  ;;  %v16043_v33 = vld [vmem:[#allocation98_spill] sm:$0xff]  ;;  %v16046_v35 = vld [vmem:[#allocation104_spill] sm:$0xff] }
 0x3e1   : > { %5951 = vadd.xlane.f32.xlu1 %v12695_v36  ;;  %v1879_v36 = vadd.f32 %v11685_v29, %v16038_v13  ;;  %v4300_v10 = vsel %vm1961_vm0, %v4299_v0, %v4295_v56  ;;  %v2178_v4 = vsel %vm1961_vm0, %v2177_v8, %v2173_v39  ;;  %v2191_v28 = vrot.slane %v1876_v55, %v11695_v63  ;;  %v16044_v13 = vld [vmem:[#allocation60_spill] sm:$0xff] }
 0x3e2   : > { %v1880_v9 = vadd.f32 %v11685_v29, %v12444_v16  ;;  %v1878_v21 = vadd.f32 %v11685_v29, %v12355_v54  ;;  %v3993_v25 = vadd.f32 %v11714_v47, %v16042_v19  ;;  %v4317_v43 = vrot.slane %v3994_v23, %v11688_v31  ;;  %v16047_v23 = vld [vmem:[#allocation111_spill] sm:$0xff] }
 0x3e3   : > { %5981 = vadd.xlane.f32.xlu0 %v5884_v34  ;;  %v3992_v34 = vadd.f32 %v11714_v47, %v16041_v32  ;;  %v2204_v5 = vrot.slane %v1879_v36, %v11688_v31  ;;  %v4291_v44 = vsel %vm1961_vm0, %v4290_v2, %v4286_v42  ;;  %v2195_v50 = vrot.slane %v1877_v51, %v11688_v31  ;;  %v12891_v2 = vpop.f32.mrf.mxu0 }
 0x3e4   : > { %v1881_v16 = vadd.f32 %v11685_v29, %v12373_v61  ;;  %v2270_v0 = vsel %vm2242_vm1, %v2187_v3, %v2178_v4  ;;  %v4304_v14 = vrot.slane %v3991_v7, %v11695_v63  ;;  %v1882_v56 = vadd.f32 %v11685_v29, %v12397_v45 }
 0x3e5   : > { %5927 = vadd.xlane.f32.xlu1 %v12593_v57  ;;  %v1883_v57 = vadd.f32 %v11685_v29, %v16043_v33  ;;  %v4308_v54 = vrot.slane %v3992_v34, %v11688_v31  ;;  %v2209_v39 = vrot.slane %v1880_v9, %v11695_v63  ;;  %v3995_v38 = vadd.f32 %v11714_v47, %v12474_v60  ;;  %v16049_v34 = vld [vmem:[#allocation55_spill] sm:$0xff] }
 0x3e6   : > { %v1884_v61 = vadd.f32 %v11685_v29, %v12557_v59  ;;  %v4376_v48 = vsel %vm2242_vm1, %v4300_v10, %v4291_v44  ;;  %v2200_v55 = vrot.slane %v1878_v21, %v11695_v63  ;;  %v4313_v52 = vrot.slane %v3993_v25, %v11695_v63  ;;  %v16048_v10 = vld [vmem:[#allocation108_spill] sm:$0xff]  ;;  %v16051_v25 = vld [vmem:[#allocation106_spill] sm:$0xff] }
 0x3e7   : > { %5985 = vadd.xlane.f32.xlu0 %v12743_v24  ;;  %v2196_v24 = vsel %vm1961_vm0, %v2195_v50, %v2191_v28  ;;  %v2222_v45 = vrot.slane %v1883_v57, %v11688_v31  ;;  %v2213_v8 = vrot.slane %v1881_v16, %v11688_v31  ;;  %v3996_v60 = vadd.f32 %v11714_v47, %v16046_v35  ;;  %v16050_v28 = vld [vmem:[#allocation58_spill] sm:$0xff]  ;;  %v16052_v57 = vld [vmem:[#allocation59_spill] sm:$0xff] }
 0x3e8   : > { %v1885_v59 = vadd.f32 %v11685_v29, %v16047_v23  ;;  %v2271_v46 = vsel %vm2244_vm2, %v2196_v24, %v2270_v0  ;;  %v4309_v51 = vsel %vm1961_vm0, %v4308_v54, %v4304_v14  ;;  %v2218_v3 = vrot.slane %v1882_v56, %v11695_v63  ;;  %v16053_v50 = vld [vmem:[#allocation42_spill] sm:$0xff]  ;;  %v16054_v16 = vld [vmem:[#allocation43_spill] sm:$0xff]  ;;  %v16055_v14 = vld [vmem:[#allocation52_spill] sm:$0xff]  ;;  %v12917_v56 = vpop.f32.mrf.mxu0 }
 0x3e9   : > { %5955 = vadd.xlane.f32.xlu1 %v12720_v27  ;;  %v16045_v27 = vld [vmem:[#allocation101_spill] sm:$0xff]  ;;  %v3997_v32 = vadd.f32 %v11714_v47, %v16048_v10  ;;  %v2214_v7 = vsel %vm1961_vm0, %v2213_v8, %v2209_v39  ;;  %v4322_v4 = vrot.slane %v3995_v38, %v11695_v63  ;;  %v2227_v42 = vrot.slane %v1884_v61, %v11695_v63 }
 0x3ea   : > { %v3998_v36 = vadd.f32 %v11714_v47, %v16045_v27  ;;  %v3999_v9 = vadd.f32 %v11714_v47, %v16050_v28  ;;  %v2205_v21 = vsel %vm1961_vm0, %v2204_v5, %v2200_v55  ;;  %v4318_v19 = vsel %vm1961_vm0, %v4317_v43, %v4313_v52  ;;  %v16056_v27 = vld [vmem:[#allocation109_spill] sm:$0xff] }
 0x3eb   : > { %5941 = vadd.xlane.f32.xlu0 %v16044_v13  ;;  %v1887_v33 = vadd.f32 %v11685_v29, %v16051_v25  ;;  %v1886_v44 = vadd.f32 %v11685_v29, %v16052_v57  ;;  %vm1005_vm13 = vcmp.lt.s32.totalorder %v16054_v16, %v16053_v50  ;;  %v4326_v0 = vrot.slane %v3996_v60, %v11688_v31  ;;  %v12939_v60 = vpop.f32.mrf.mxu0  ;;  %v12977_v25 = vpop.permute.xlu0 %3116  ;;  %v16062_v57 = vld [vmem:[#allocation44_spill] sm:$0xff] }
 0x3ec   : > { %v2231_v54 = vrot.slane %v1885_v59, %v11688_v31  ;;  %v4000_v5 = vadd.f32 %v11714_v47, %v16055_v14  ;;  %v2272_v43 = vsel %vm2246_vm3, %v2205_v21, %v2271_v46  ;;  %v4335_v24 = vrot.slane %v3998_v36, %v11688_v31  ;;  %v16061_v21 = vld [vmem:[#allocation95_spill] sm:$0xff] }
 0x3ed   : > { %5931 = vadd.xlane.f32.xlu1 %v16049_v34  ;;  %v4377_v29 = vsel %vm2244_vm2, %v4309_v51, %v4376_v48  ;;  %v2273_v39 = vsel %vm2248_vm4, %v2214_v7, %v2272_v43  ;;  %v4331_v38 = vrot.slane %v3997_v32, %v11695_v63  ;;  %v4327_v61 = vsel %vm1961_vm0, %v4326_v0, %v4322_v4  ;;  %v16058_v51 = vld [vmem:[#allocation61_spill] sm:$0xff]  ;;  %v16059_v7 = vld [vmem:[#allocation54_spill] sm:$0xff] }
 0x3ee   : > { %v4340_v55 = vrot.slane %v3999_v9, %v11695_v63  ;;  %v2232_v52 = vsel %vm1961_vm0, %v2231_v54, %v2227_v42  ;;  %v2240_v13 = vrot.slane %v1887_v33, %v11688_v31  ;;  %v4002_v36 = vadd.f32 %v11714_v47, %v16056_v27  ;;  %v16060_v42 = vld [vmem:[#allocation56_spill] sm:$0xff]  ;;  %v16064_v0 = vld [vmem:[#allocation70_spill] sm:$0xff] }
 0x3ef   : > { %5969 = vadd.xlane.f32.xlu0 %v12747_v49  ;;  %v2223_v49 = vsel %vm1961_vm0, %v2222_v45, %v2218_v3  ;;  %v2236_v48 = vrot.slane %v1886_v44, %v11695_v63  ;;  %v16057_v45 = vld [vmem:[#allocation49_spill] sm:$0xff]  ;;  %v4272_v8 = vrot.slane %v12827_v6, %v11688_v31  ;;  %v4344_v35 = vrot.slane %v4000_v5, %v11688_v31 }
 0x3f0   : > { %v2274_v23 = vsel %vm2250_vm5, %v2223_v49, %v2273_v39  ;;  %v4378_v59 = vsel %vm2246_vm3, %v4318_v19, %v4377_v29  ;;  %v4277_v46 = vrot.slane %v12792_v12, %v11695_v63  ;;  %v4336_v3 = vsel %vm1961_vm0, %v4335_v24, %v4331_v38  ;;  %v16063_v44 = vld [vmem:[#allocation73_spill] sm:$0xff]  ;;  %v16065_v49 = vld [vmem:[#allocation92_spill] sm:$0xff] }
 0x3f1   : > { %5959 = vadd.xlane.f32.xlu1 %v12724_v58  ;;  %v4001_v58 = vadd.f32 %v11714_v47, %v16057_v45  ;;  %v2269_v47 = vsel %vm2254_vm7, %v12823_v11, %v12834_v41  ;;  %v4379_v6 = vsel %vm2248_vm4, %v4327_v61, %v4378_v59  ;;  %v4273_v10 = vsel %vm1961_vm0, %v4272_v8, %v4268_v40  ;;  %v12960_v11 = vpop.permute.xlu1 %3113  ;;  %v5736_v40 = vpop.f32.mrf.mxu0  ;;  %v13039_v45 = vld [vmem:[%s15942_s21] ss:$0 sm:$0xff]  ;;  %v16068_v59 = vld [vmem:[#allocation105_spill] sm:$0xff] }
 0x3f2   : > { %v4345_v32 = vsel %vm1961_vm0, %v4344_v35, %v4340_v55  ;;  %v4353_v12 = vrot.slane %v4002_v36, %v11688_v31  ;;  %9955 = vtanh.f32 %v16059_v7  ;;  %v2241_v41 = vsel %vm1961_vm0, %v2240_v13, %v2236_v48  ;;  %v16067_v36 = vld [vmem:[#allocation53_spill] sm:$0xff] }
 0x3f3   : > { %5989 = vadd.xlane.f32.xlu0 %v12773_v15  ;;  %v2275_v15 = vsel %vm15758_vm6, %v2232_v52, %v2274_v23  ;;  %v4349_v34 = vrot.slane %v4001_v58, %v11695_v63  ;;  %v10851_v4 = vmov 2   ;;  %9957 = vtanh.f32 %v16060_v42  ;;  %v13028_v55 = vpop.f32.mrf.mxu0  ;;  %v16066_v52 = vld [vmem:[#allocation79_spill] sm:$0xff] }
 0x3f4   : > { %9419 = vset.pattern.permute.xlu1 %v10851_v4  ;;  %v2276_v18 = vsel %vm2254_vm7, %v2241_v41, %v2275_v15  ;;  %v4373_v28 = vsel %vm2250_vm5, %v12765_v53, %v12802_v20  ;;  %v4380_v9 = vsel %vm2250_vm5, %v4336_v3, %v4379_v6  ;;  %9420 = vset.pattern.permute.xlu0 %v10851_v4  ;;  %v12983_v33 = vsel %vm1005_vm13, %v2269_v47, -1e+30  ;;  %v16070_v15 = vld [vmem:[#allocation62_spill] sm:$0xff]  ;;  %v16071_v4 = vld [vmem:[#allocation48_spill] sm:$0xff] }
 0x3f5   : > { %5935 = vadd.xlane.f32.xlu1 %v16058_v51  ;;  %v4374_v53 = vsel %vm15758_vm6, %v4273_v10, %v4373_v28  ;;  %v4381_v20 = vsel %vm15758_vm6, %v4345_v32, %v4380_v9  ;;  %vm1006_vm14 = vcmp.lt.s32.totalorder %v16054_v16, %v16062_v57  ;;  %9959 = vtanh.f32 %v16063_v44  ;;  %v13043_v35 = vpop.f32.mrf.mxu0  ;;  %v16069_v51 = vld [vmem:[#allocation65_spill] sm:$0xff]  ;;  %v13054_v32 = vpop.xlane.xlu0 %5917  ;;  %v16072_v28 = vld [vmem:[#allocation103_spill] sm:$0xff] }
 0x3f6   : > { %vm3120_vm15 = vcmp.lt.s32.totalorder %v16054_v16, %v12960_v11  ;;  %v4282_v5 = vsel %vm1961_vm0, %v4281_v22, %v4277_v46  ;;  %v4354_v43 = vsel %vm1961_vm0, %v4353_v12, %v4349_v34  ;;  %vm3121_vm6 = vcmp.lt.s32.totalorder %v16054_v16, %v12977_v25 }
 0x3f7   : > { %6013 = vadd.xlane.f32.xlu0 %v12799_v17  ;;  %v12973_v17 = vld [vmem:[%s15926_s28] ss:$0 sm:$0xff]  ;;  %v4375_v24 = vsel %vm2254_vm7, %v4282_v5, %v4374_v53  ;;  %v4382_v29 = vsel %vm2254_vm7, %v4354_v43, %v4381_v20  ;;  %v5883_v58 = vmul.f32 %v13039_v45, %v12686_v1  ;;  %v5866_v47 = vmul.f32 %v13039_v45, %v16069_v51  ;;  %v9160_v12 = vpop.f32.mrf.mxu0 }
 0x3f8   : > { %v5681_v19 = vadd.f32 %v12973_v17, %v16061_v21  ;;  %v5630_v54 = vadd.f32 %v12973_v17, %v16064_v0  ;;  %v5737_v14 = vadd.f32 %v12973_v17, %v5736_v40  ;;  %v13015_v30 = vsel %vm3120_vm15, %v4375_v24, -1e+30 }
 0x3f9   : > { %5963 = vadd.xlane.f32.xlu1 %v12751_v62  ;;  %v12998_v62 = vsel %vm1006_vm14, %v2276_v18, -1e+30  ;;  %v5670_v39 = vadd.f32 %v12973_v17, %v16065_v49  ;;  %v13024_v38 = vsel %vm3121_vm6, %v4382_v29, -1e+30  ;;  %v4397_v61 = vsel %vm2285_vm9, %v13015_v30, -inf  ;;  %v5752_v40 = vpop.f32.mrf.mxu0  ;;  %v13065_v20 = vpop.xlane.xlu0 %5921 }
 0x3fa   : > { %9961 = vtanh.f32 %v5681_v19  ;;  %v2295_v22 = vsel %vm2285_vm9, %v12998_v62, -inf  ;;  %v5649_v13 = vadd.f32 %v12973_v17, %v16066_v52  ;;  %v4400_v27 = vsel %vm2285_vm9, %v13024_v38, -inf  ;;  %v16073_v19 = vld [vmem:[#allocation76_spill] sm:$0xff] }
 0x3fb   : > { %6017 = vadd.xlane.f32.xlu0 %v12809_v37  ;;  %v2292_v37 = vsel %vm2285_vm9, %v12983_v33, -inf  ;;  %9963 = vtanh.f32 %v5630_v54  ;;  %v5718_v48 = vadd.f32 %v12973_v17, %v16067_v36  ;;  %v5689_v46 = vadd.f32 %v12973_v17, %v16068_v59  ;;  %v13070_v5 = vpop.f32.mrf.mxu0 }
 0x3fc   : > { %9965 = vtanh.f32 %v5737_v14  ;;  %v5726_v6 = vadd.f32 %v12973_v17, %v16070_v15  ;;  %v5745_v1 = vadd.f32 %v12973_v17, %v12939_v60  ;;  %v5582_v42 = vadd.f32 %v12973_v17, %v16071_v4 }
 0x3fd   : > { %2293 = vmax.xlane.f32.xlu1 %v2292_v37  ;;  %9967 = vtanh.f32 %v5670_v39  ;;  %v5697_v9 = vadd.f32 %v12973_v17, %v16072_v28  ;;  %v5638_v53 = vadd.f32 %v12973_v17, %v16073_v19  ;;  %v5753_v54 = vadd.f32 %v12973_v17, %v5752_v40  ;;  %v16074_v37 = vld [vmem:[#allocation89_spill] sm:$0xff]  ;;  %v13075_v49 = vpop.xlane.xlu0 %5925  ;;  %v13077_v39 = vpop.f32.mrf.mxu0  ;;  %v16079_v19 = vld [vmem:[#allocation78_spill] sm:$0xff] }
 0x3fe   : > { %9969 = vtanh.f32 %v5649_v13  ;;  %v5678_v24 = vadd.f32 %v12973_v17, %v16074_v37  ;;  %v5734_v36 = vadd.f32 %v12973_v17, %v12917_v56 }
 0x3ff   : > { %2296 = vmax.xlane.f32.xlu0 %v2295_v22  ;;  %v9956_v8 = vpop.eup %9955  ;;  %9971 = vtanh.f32 %v5718_v48  ;;  %v9164_v59 = vpop.f32.mrf.mxu0 }
 0x400   : > { %v9958_v23 = vpop.eup %9957  ;;  %v5885_v10 = vmul.f32 %v13039_v45, %v9956_v8  ;;  %9973 = vtanh.f32 %v5689_v46 }
 0x401   : > { %4398 = vmax.xlane.f32.xlu1 %v4397_v61  ;;  %v5880_v34 = vmul.f32 %v13039_v45, %v9958_v23  ;;  %9975 = vtanh.f32 %v5726_v6  ;;  %v16075_v61 = vld [vmem:[#allocation51_spill] sm:$0xff]  ;;  %v13087_v51 = vpop.xlane.xlu0 %5949 }
 0x402   : > { %v9960_v3 = vpop.eup %9959  ;;  %9977 = vtanh.f32 %v5745_v1  ;;  %v5705_v52 = vadd.f32 %v12973_v17, %v16075_v61  ;;  %v5768_v1 = vpop.f32.mrf.mxu0 }
 0x403   : > { %4401 = vmax.xlane.f32.xlu0 %v4400_v27  ;;  %v5863_v60 = vmul.f32 %v13039_v45, %v9960_v3  ;;  %9979 = vtanh.f32 %v5582_v42 }
 0x404   : > { %9981 = vtanh.f32 %v5697_v9  ;;  %v5742_v9 = vadd.f32 %v12973_v17, %v12891_v2 }
 0x405   : > { %5979 = vadd.xlane.f32.xlu1 %v5883_v58  ;;  %9983 = vtanh.f32 %v5638_v53  ;;  %v5761_v58 = vadd.f32 %v12973_v17, %v9160_v12  ;;  %v2291_v40 = vpop.xlane.xlu0 %2290 }
 0x406   : > { %9985 = vtanh.f32 %v5753_v54  ;;  %v2299_v53 = vsub.f32 %v16079_v19, %v2291_v40  ;;  %v5774_v19 = vadd.f32 %v12973_v17, %v13070_v5 }
 0x407   : > { %5945 = vadd.xlane.f32.xlu0 %v5866_v47  ;;  %v9962_v7 = vpop.eup %9961  ;;  %9987 = vtanh.f32 %v5678_v24  ;;  %v16076_v47 = vld [vmem:[#allocation75_spill] sm:$0xff] }
 0x408   : > { %v9964_v41 = vpop.eup %9963  ;;  %v5890_v21 = vmul.f32 %v13039_v45, %v9962_v7  ;;  %9989 = vtanh.f32 %v5705_v52  ;;  %v5646_v15 = vadd.f32 %v12973_v17, %v16076_v47  ;;  %v16078_v7 = vld [vmem:[#allocation102_spill] sm:$0xff]  ;;  %v5750_v52 = vadd.f32 %v12973_v17, %v13043_v35 }
 0x409   : > { %5983 = vadd.xlane.f32.xlu1 %v5885_v10  ;;  %v9966_v18 = vpop.eup %9965  ;;  %v5877_v44 = vmul.f32 %v13039_v45, %v9964_v41  ;;  %9991 = vtanh.f32 %v5734_v36  ;;  %v16077_v10 = vld [vmem:[#allocation47_spill] sm:$0xff]  ;;  %v5686_v41 = vadd.f32 %v12973_v17, %v16078_v7 }
 0x40a   : > { %v5904_v0 = vmul.f32 %v13039_v45, %v9966_v18  ;;  %v9968_v14 = vpop.eup %9967  ;;  %9993 = vtanh.f32 %v5761_v58  ;;  %v5713_v12 = vadd.f32 %v12973_v17, %v16077_v10  ;;  %v16082_v10 = vld [vmem:[#allocation107_spill] sm:$0xff] }
 0x40b   : > { %5973 = vadd.xlane.f32.xlu0 %v5880_v34  ;;  %v9970_v43 = vpop.eup %9969  ;;  %v5887_v29 = vmul.f32 %v13039_v45, %v9968_v14  ;;  %9995 = vtanh.f32 %v5646_v15  ;;  %v5758_v15 = vadd.f32 %v12973_v17, %v13028_v55  ;;  %v2288_v55 = vpop.xlane.xlu1 %2287 }
 0x40c   : > { %v9972_v22 = vpop.eup %9971  ;;  %v5882_v13 = vmul.f32 %v13039_v45, %v9970_v43  ;;  %9997 = vtanh.f32 %v5713_v12  ;;  %v16080_v43 = vld [vmem:[#allocation99_spill] sm:$0xff]  ;;  %v5710_v12 = vadd.f32 %v12973_v17, %v16082_v10 }
 0x40d   : > { %5939 = vadd.xlane.f32.xlu1 %v5863_v60  ;;  %v9974_v27 = vpop.eup %9973  ;;  %v5899_v8 = vmul.f32 %v13039_v45, %v9972_v22  ;;  %v5769_v60 = vadd.f32 %v12973_v17, %v5768_v1  ;;  %9999 = vtanh.f32 %v5686_v41  ;;  %v5694_v37 = vadd.f32 %v12973_v17, %v16080_v43 }
 0x40e   : > { %v9976_v48 = vpop.eup %9975  ;;  %v5892_v46 = vmul.f32 %v13039_v45, %v9974_v27 }
 0x40f   : > { %5993 = vadd.xlane.f32.xlu0 %v5890_v21  ;;  %v9978_v23 = vpop.eup %9977  ;;  %v5901_v56 = vmul.f32 %v13039_v45, %v9976_v48  ;;  %10001 = vtanh.f32 %v5769_v60 }
 0x410   : > { %v5906_v6 = vmul.f32 %v13039_v45, %v9978_v23  ;;  %v9980_v3 = vpop.eup %9979  ;;  %10003 = vtanh.f32 %v5742_v9 }
 0x411   : > { %5967 = vadd.xlane.f32.xlu1 %v5877_v44  ;;  %v9982_v34 = vpop.eup %9981  ;;  %v5865_v42 = vmul.f32 %v13039_v45, %v9980_v3  ;;  %v5777_v44 = vadd.f32 %v12973_v17, %v9164_v59 }
 0x412   : > { %v9984_v4 = vpop.eup %9983  ;;  %v5894_v28 = vmul.f32 %v13039_v45, %v9982_v34 }
 0x413   : > { %6021 = vadd.xlane.f32.xlu0 %v5904_v0  ;;  %v9986_v18 = vpop.eup %9985  ;;  %v5879_v21 = vmul.f32 %v13039_v45, %v9984_v4  ;;  %10005 = vtanh.f32 %v5777_v44  ;;  %v5766_v4 = vadd.f32 %v12973_v17, %v13077_v39 }
 0x414   : > { %v5908_v0 = vmul.f32 %v13039_v45, %v9986_v18  ;;  %v9988_v54 = vpop.eup %9987  ;;  %10007 = vtanh.f32 %v5694_v37 }
 0x415   : > { %5987 = vadd.xlane.f32.xlu1 %v5887_v29  ;;  %v9990_v14 = vpop.eup %9989  ;;  %v2304_v29 = vmul.f32 1.442695, %v2299_v53  ;;  %v5889_v2 = vmul.f32 %v13039_v45, %v9988_v54 }
 0x416   : > { %v9992_v24 = vpop.eup %9991  ;;  %v5896_v61 = vmul.f32 %v13039_v45, %v9990_v14 }
 0x417   : > { %5977 = vadd.xlane.f32.xlu0 %v5882_v13  ;;  %v9994_v22 = vpop.eup %9993  ;;  %10009 = vpow2.f32 %v2304_v29  ;;  %v5903_v13 = vmul.f32 %v13039_v45, %v9992_v24  ;;  %v16085_v24 = vld [vmem:[#allocation112_spill] sm:$0xff] }
 0x418   : > { %v5910_v27 = vmul.f32 %v13039_v45, %v9994_v22  ;;  %v9996_v36 = vpop.eup %9995  ;;  %10011 = vtanh.f32 %v5750_v52 }
 0x419   : > { %6011 = vadd.xlane.f32.xlu1 %v5899_v8  ;;  %v9998_v48 = vpop.eup %9997  ;;  %v16081_v8 = vld [vmem:[#allocation110_spill] sm:$0xff]  ;;  %v5881_v59 = vmul.f32 %v13039_v45, %v9996_v36 }
 0x41a   : > { %v10000_v58 = vpop.eup %9999  ;;  %v5702_v23 = vadd.f32 %v12973_v17, %v16081_v8  ;;  %v5898_v35 = vmul.f32 %v13039_v45, %v9998_v48 }
 0x41b   : > { %5997 = vadd.xlane.f32.xlu0 %v5892_v46 }
 0x41c   : > { %v10002_v46 = vpop.eup %10001  ;;  %10013 = vtanh.f32 %v5702_v23 }
 0x41d   : > { %6015 = vadd.xlane.f32.xlu1 %v5901_v56  ;;  %v10004_v47 = vpop.eup %10003  ;;  %v5891_v56 = vmul.f32 %v13039_v45, %v10000_v58  ;;  %10015 = vtanh.f32 %v5758_v15 }
 0x41e   : > { %v5905_v34 = vmul.f32 %v13039_v45, %v10004_v47  ;;  %10017 = vtanh.f32 %v5710_v12 }
 0x41f   : > { %6025 = vadd.xlane.f32.xlu0 %v5906_v6  ;;  %v5912_v6 = vmul.f32 %v13039_v45, %v10002_v46  ;;  %10019 = vtanh.f32 %v5766_v4 }
 0x420   : > { %v10006_v3 = vpop.eup %10005  ;;  %10021 = vtanh.f32 %v5774_v19 }
 0x421   : > { %5943 = vadd.xlane.f32.xlu1 %v5865_v42  ;;  %v10008_v1 = vpop.eup %10007  ;;  %v5914_v7 = vmul.f32 %v13039_v45, %v10006_v3 }
 0x422   : > { %v5893_v42 = vmul.f32 %v13039_v45, %v10008_v1 }
 0x423   : > { %6001 = vadd.xlane.f32.xlu0 %v5894_v28  ;;  %v16084_v28 = vld [vmem:[#allocation77_spill] sm:$0xff] }
 0x424   : > { %v10010_v41 = vpop.eup %10009  ;;  %v2298_v9 = vsub.f32 %v16084_v28, %v2288_v55 }
 0x425   : > { %5971 = vadd.xlane.f32.xlu1 %v5879_v21  ;;  %v13132_v18 = vsel %vm1004_vm10, %v10010_v41, 0.0  ;;  %v10012_v40 = vpop.eup %10011 }
 0x426   : > { %v2317_v21 = vsel %vm2285_vm9, %v13132_v18, 0.0  ;;  %v5907_v39 = vmul.f32 %v13039_v45, %v10012_v40  ;;  %v2302_v44 = vmul.f32 1.442695, %v2298_v9 }
 0x427   : > { %6029 = vadd.xlane.f32.xlu0 %v5908_v0 }
 0x428   : > { %10023 = vpow2.f32 %v2302_v44 }
 0x429   : > { %5991 = vadd.xlane.f32.xlu1 %v5889_v2  ;;  %v10014_v53 = vpop.eup %10013 }
 0x42a   : > { %v5895_v0 = vmul.f32 %v13039_v45, %v10014_v53  ;;  %v10016_v54 = vpop.eup %10015  ;;  %v10359_v53 = vld [vmem:[%s11371_s13 + $0x8] sm:$0xff] }
 0x42b   : > { %6005 = vadd.xlane.f32.xlu0 %v5896_v61  ;;  %v5909_v14 = vmul.f32 %v13039_v45, %v10016_v54  ;;  %v10018_v43 = vpop.eup %10017  ;;  %v10360_v54 = vld [vmem:[%s11371_s13 + $0x18] sm:$0xff] }
 0x42c   : > { %v5897_v37 = vmul.f32 %v13039_v45, %v10018_v43  ;;  %v10020_v17 = vpop.eup %10019 }
 0x42d   : > { %6019 = vadd.xlane.f32.xlu1 %v5903_v13  ;;  %v5911_v22 = vmul.f32 %v13039_v45, %v10020_v17  ;;  %v10022_v61 = vpop.eup %10021  ;;  %v10362_v17 = vld [vmem:[%s11371_s13 + $0x10] sm:$0xff] }
 0x42f   : > { %6033 = vadd.xlane.f32.xlu0 %v5910_v27  ;;  %v5913_v27 = vmul.f32 %v13039_v45, %v10022_v61 }
 0x431   : > { %5975 = vadd.xlane.f32.xlu1 %v5881_v59 }
 0x433   : > { %6009 = vadd.xlane.f32.xlu0 %v5898_v35 }
 0x435   : > { %5995 = vadd.xlane.f32.xlu1 %v5891_v56  ;;  %v10024_v13 = vpop.eup %10023 }
 0x436   : > { %v13153_v58 = vsel %vm1003_vm8, %v10024_v13, 0.0 }
 0x437   : > { %6037 = vadd.xlane.f32.xlu0 %v5912_v6  ;;  %v2314_v46 = vsel %vm2285_vm9, %v13153_v58, 0.0 }
 0x439   : > { %6023 = vadd.xlane.f32.xlu1 %v5905_v34 }
 0x43b   : > { %6041 = vadd.xlane.f32.xlu0 %v5914_v7 }
 0x43d   : > { %5999 = vadd.xlane.f32.xlu1 %v5893_v42 }
 0x43f   : > { %2318 = vadd.xlane.f32.xlu0 %v2317_v21 }
 0x441   : > { %6027 = vadd.xlane.f32.xlu1 %v5907_v39 }
 0x445   : > { %6003 = vadd.xlane.f32.xlu1 %v5895_v0 }
 0x449   : > { %6031 = vadd.xlane.f32.xlu1 %v5909_v14  ;;  %v10361_v14 = vld [vmem:[%s11371_s13] sm:$0xff]  ;;  %s8604_s13 = sld [smem:[#allocation20 + $0x2]] }
 0x44c   : > { %v4396_v5 = vpop.xlane.xlu0 %4395 }
 0x44d   : > { %v4404_v29 = vsub.f32 %v16085_v24, %v4396_v5  ;;  %6007 = vadd.xlane.f32.xlu1 %v5897_v37 }
 0x44f   : > { %v4409_v2 = vmul.f32 1.442695, %v4404_v29 }
 0x450   : > { %v13145_v52 = vpop.xlane.xlu0 %5953 }
 0x451   : > { %10025 = vpow2.f32 %v4409_v2  ;;  %6035 = vadd.xlane.f32.xlu1 %v5911_v22 }
 0x454   : > { %v13148_v36 = vpop.xlane.xlu0 %5929 }
 0x455   : > { %6039 = vadd.xlane.f32.xlu1 %v5913_v27 }
 0x456   : > { %v4393_v8 = vpop.xlane.xlu1 %4392 }
 0x457   : > { %v4403_v23 = vsub.f32 %v12657_v26, %v4393_v8 }
 0x458   : > { %v13156_v59 = vpop.xlane.xlu0 %5957 }
 0x459   : > { %v4407_v35 = vmul.f32 1.442695, %v4403_v23  ;;  %2315 = vadd.xlane.f32.xlu1 %v2314_v46 }
 0x45a   : > { %v13160_v47 = vpop.xlane.xlu1 %5915 }
 0x45b   : > { %10027 = vpow2.f32 %v4407_v35 }
 0x45c   : > { %v13162_v45 = vpop.xlane.xlu0 %5933 }
 0x45e   : > { %v10026_v15 = vpop.eup %10025  ;;  %v13164_v56 = vpop.xlane.xlu1 %5919 }
 0x45f   : > { %v13169_v3 = vsel %vm3119_vm11, %v10026_v15, 0.0 }
 0x460   : > { %v13171_v26 = vpop.xlane.xlu0 %5961  ;;  %v4422_v1 = vsel %vm2285_vm9, %v13169_v3, 0.0 }
 0x461   : > { %4423 = vadd.xlane.f32.xlu0 %v4422_v1 }
 0x462   : > { %v13175_v10 = vpop.xlane.xlu1 %5923 }
 0x464   : > { %v13177_v12 = vpop.xlane.xlu0 %5937 }
 0x466   : > { %v13179_v34 = vpop.xlane.xlu1 %5947 }
 0x468   : > { %v10028_v7 = vpop.eup %10027  ;;  %v13181_v41 = vpop.xlane.xlu0 %5965 }
 0x469   : > { %v13186_v4 = vsel %vm3118_vm12, %v10028_v7, 0.0 }
 0x46a   : > { %v13188_v42 = vpop.xlane.xlu1 %5951  ;;  %v4419_v60 = vsel %vm2285_vm9, %v13186_v4, 0.0 }
 0x46b   : > { %4420 = vadd.xlane.f32.xlu1 %v4419_v60 }
 0x46c   : > { %v13192_v40 = vpop.xlane.xlu0 %5981 }
 0x46e   : > { %v13194_v28 = vpop.xlane.xlu1 %5927 }
 0x470   : > { %v13196_v9 = vpop.xlane.xlu0 %5985 }
 0x472   : > { %v13198_v21 = vpop.xlane.xlu1 %5955 }
 0x474   : > { %v13200_v19 = vpop.xlane.xlu0 %5941 }
 0x476   : > { %v13202_v39 = vpop.xlane.xlu1 %5931 }
 0x477   : > { %5215 = vperm.xlu0 %9420, %v10359_v53  }
 0x478   : > { %v13205_v44 = vpop.xlane.xlu0 %5969 }
 0x47a   : > { %v13207_v0 = vpop.xlane.xlu1 %5959 }
 0x47b   : > { %5221 = vperm.xlu0 %9420, %v10360_v54  }
 0x47c   : > { %5212 = vperm.xlu1 %9419, %v10361_v14   ;;  %v13211_v43 = vpop.xlane.xlu0 %5989 }
 0x47e   : > { %v13213_v37 = vpop.xlane.xlu1 %5935 }
 0x480   : > { %5218 = vperm.xlu1 %9419, %v10362_v17   ;;  %v13216_v5 = vpop.xlane.xlu0 %6013 }
 0x482   : > { %v13218_v24 = vpop.xlane.xlu1 %5963 }
 0x484   : > { %v13220_v29 = vpop.xlane.xlu0 %6017 }
 0x486   : > { %v2294_v2 = vpop.xlane.xlu1 %2293 }
 0x487   : > { %v2300_v22 = vsub.f32 %v12983_v33, %v2294_v2 }
 0x488   : > { %v2297_v61 = vpop.xlane.xlu0 %2296 }
 0x489   : > { %v2301_v13 = vsub.f32 %v12998_v62, %v2297_v61  ;;  %v2306_v8 = vmul.f32 1.442695, %v2300_v22 }
 0x48a   : > { %v4399_v27 = vpop.xlane.xlu1 %4398 }
 0x48b   : > { %v2308_v48 = vmul.f32 1.442695, %v2301_v13  ;;  %v4405_v23 = vsub.f32 %v13015_v30, %v4399_v27 }
 0x48c   : > { %v4402_v46 = vpop.xlane.xlu0 %4401 }
 0x48d   : > { %v4406_v35 = vsub.f32 %v13024_v38, %v4402_v46  ;;  %10029 = vpow2.f32 %v2308_v48  ;;  %v4411_v1 = vmul.f32 1.442695, %v4405_v23 }
 0x48e   : > { %v13226_v15 = vpop.xlane.xlu1 %5979  ;;  %10031 = vpow2.f32 %v2306_v8 }
 0x48f   : > { %v4413_v6 = vmul.f32 1.442695, %v4406_v35 }
 0x490   : > { %v13274_v23 = vpop.xlane.xlu0 %5945 }
 0x491   : > { %10033 = vpow2.f32 %v4413_v6 }
 0x492   : > { %v13228_v7 = vpop.xlane.xlu1 %5983  ;;  %10035 = vpow2.f32 %v4411_v1 }
 0x494   : > { %v13280_v11 = vpop.xlane.xlu0 %5973 }
 0x496   : > { %v13230_v33 = vpop.xlane.xlu1 %5939 }
 0x498   : > { %v13284_v1 = vpop.xlane.xlu0 %5993 }
 0x49a   : > { %v13232_v62 = vpop.xlane.xlu1 %5967  ;;  %v10030_v55 = vpop.eup %10029 }
 0x49b   : > { %v13237_v30 = vsel %vm1006_vm14, %v10030_v55, 0.0  ;;  %v10032_v38 = vpop.eup %10031 }
 0x49c   : > { %16089 = vst [vmem:[#allocation64_spill] sm:$0xff] %v13237_v30  ;;  %v2323_v60 = vsel %vm2285_vm9, %v13237_v30, 0.0  ;;  %v13251_v17 = vsel %vm1005_vm13, %v10032_v38, 0.0 }
 0x49d   : > { %2324 = vadd.xlane.f32.xlu0 %v2323_v60  ;;  %16091 = vst [vmem:[#allocation69_spill] sm:$0xff] %v13251_v17  ;;  %v2320_v61 = vsel %vm2285_vm9, %v13251_v17, 0.0  ;;  %v13290_v60 = vpop.xlane.xlu0 %6021 }
 0x49e   : > { %v13241_v53 = vpop.xlane.xlu1 %5987  ;;  %v10034_v54 = vpop.eup %10033  ;;  %16102 = vst [vmem:[#allocation87_spill] sm:$0xff] %v13290_v60 }
 0x49f   : > { %v13246_v14 = vsel %vm3121_vm6, %v10034_v54, 0.0  ;;  %v10036_v57 = vpop.eup %10035  ;;  %vm16178_vm6 = vcmask 1046534  }
 0x4a0   : > { %16090 = vst [vmem:[#allocation63_spill] sm:$0xff] %v13246_v14  ;;  %v4428_v2 = vsel %vm2285_vm9, %v13246_v14, 0.0  ;;  %v13262_v25 = vsel %vm3120_vm15, %v10036_v57, 0.0  ;;  %vm16200_vm8 = vmmov %vm16178_vm6 }
 0x4a1   : > { %4429 = vadd.xlane.f32.xlu0 %v4428_v2  ;;  %v4425_v50 = vsel %vm2285_vm9, %v13262_v25, 0.0  ;;  %v13294_v57 = vpop.xlane.xlu0 %5977  ;;  %vm16221_vm9 = vmmov %vm16178_vm6 }
 0x4a2   : > { %v13255_v22 = vpop.xlane.xlu1 %6011  ;;  %16104 = vst [vmem:[#allocation80_spill] sm:$0xff] %v13294_v57  ;;  %vm16230_vm12 = vmmov %vm16178_vm6 }
 0x4a3   : > { %16092 = vst [vmem:[#allocation46_spill] sm:$0xff] %v13255_v22 }
 0x4a4   : > { %2321 = vadd.xlane.f32.xlu1 %v2320_v61 }
 0x4a6   : > { %v13264_v13 = vpop.xlane.xlu1 %6015 }
 0x4a7   : > { %16093 = vst [vmem:[#allocation67_spill] sm:$0xff] %v13264_v13 }
 0x4a8   : > { %4426 = vadd.xlane.f32.xlu1 %v4425_v50  ;;  %v13300_v50 = vpop.xlane.xlu0 %5997 }
 0x4a9   : > { %16107 = vst [vmem:[#allocation96_spill] sm:$0xff] %v13300_v50 }
 0x4aa   : > { %v13268_v27 = vpop.xlane.xlu1 %5943 }
 0x4ab   : > { %16094 = vst [vmem:[#allocation68_spill] sm:$0xff] %v13268_v27 }
 0x4ac   : > { %v13304_v30 = vpop.xlane.xlu0 %6025 }
 0x4ad   : > { %16109 = vst [vmem:[#allocation81_spill] sm:$0xff] %v13304_v30 }
 0x4ae   : > { %v13270_v48 = vpop.xlane.xlu1 %5971 }
 0x4af   : > { %16095 = vst [vmem:[#allocation66_spill] sm:$0xff] %v13270_v48 }
 0x4b2   : > { %v13272_v8 = vpop.xlane.xlu1 %5991 }
 0x4b3   : > { %16096 = vst [vmem:[#allocation71_spill] sm:$0xff] %v13272_v8 }
 0x4b6   : > { %v13276_v46 = vpop.xlane.xlu1 %6019 }
 0x4b7   : > { %16097 = vst [vmem:[#allocation72_spill] sm:$0xff] %v13276_v46  ;;  %v16116_v46 = vld [vmem:[#allocation45_spill] sm:$0xff] }
 0x4b8   : > { %v13320_v8 = vsub.s32 0, %v16116_v46 }
 0x4ba   : > { %v13278_v35 = vpop.xlane.xlu1 %5975 }
 0x4bb   : > { %16098 = vst [vmem:[#allocation74_spill] sm:$0xff] %v13278_v35 }
 0x4be   : > { %v13282_v6 = vpop.xlane.xlu1 %5995 }
 0x4bf   : > { %16099 = vst [vmem:[#allocation82_spill] sm:$0xff] %v13282_v6 }
 0x4c2   : > { %v13286_v55 = vpop.xlane.xlu1 %6023 }
 0x4c3   : > { %16100 = vst [vmem:[#allocation84_spill] sm:$0xff] %v13286_v55 }
 0x4c6   : > { %v13288_v38 = vpop.xlane.xlu1 %5999 }
 0x4c7   : > { %16101 = vst [vmem:[#allocation85_spill] sm:$0xff] %v13288_v38  ;;  %v13310_v38 = vpop.xlane.xlu0 %6001 }
 0x4c8   : > { %16112 = vst [vmem:[#allocation94_spill] sm:$0xff] %v13310_v38  ;;  %v13340_v38 = vsub.s32 4, %v16116_v46 }
 0x4ca   : > { %v13292_v54 = vpop.xlane.xlu1 %6027  ;;  %16119 = vst [vmem:[#allocation104_spill] sm:$0xff] %v13340_v38 }
 0x4cb   : > { %16103 = vst [vmem:[#allocation90_spill] sm:$0xff] %v13292_v54  ;;  %v13312_v35 = vpop.xlane.xlu0 %6029 }
 0x4cc   : > { %16113 = vst [vmem:[#allocation97_spill] sm:$0xff] %v13312_v35 }
 0x4ce   : > { %v13296_v2 = vpop.xlane.xlu1 %6003 }
 0x4cf   : > { %16105 = vst [vmem:[#allocation83_spill] sm:$0xff] %v13296_v2  ;;  %v13314_v2 = vpop.xlane.xlu0 %6005 }
 0x4d0   : > { %16114 = vst [vmem:[#allocation100_spill] sm:$0xff] %v13314_v2 }
 0x4d2   : > { %v13298_v61 = vpop.xlane.xlu1 %6031 }
 0x4d3   : > { %16106 = vst [vmem:[#allocation86_spill] sm:$0xff] %v13298_v61  ;;  %v13316_v14 = vpop.xlane.xlu0 %6033 }
 0x4d4   : > { %16115 = vst [vmem:[#allocation98_spill] sm:$0xff] %v13316_v14 }
 0x4d6   : > { %v13302_v16 = vpop.xlane.xlu1 %6007 }
 0x4d7   : > { %16108 = vst [vmem:[#allocation93_spill] sm:$0xff] %v13302_v16  ;;  %v13329_v2 = vpop.xlane.xlu0 %6009 }
 0x4d8   : > { %16117 = vst [vmem:[#allocation60_spill] sm:$0xff] %v13329_v2  ;;  %v13344_v2 = vsub.s32 5, %v16116_v46 }
 0x4da   : > { %v13306_v17 = vpop.xlane.xlu1 %6035  ;;  %16120 = vst [vmem:[#allocation111_spill] sm:$0xff] %v13344_v2 }
 0x4db   : > { %16110 = vst [vmem:[#allocation88_spill] sm:$0xff] %v13306_v17  ;;  %v13337_v48 = vpop.xlane.xlu0 %6037 }
 0x4dc   : > { %16118 = vst [vmem:[#allocation101_spill] sm:$0xff] %v13337_v48  ;;  %v13350_v48 = vsub.s32 6, %v16116_v46 }
 0x4de   : > { %v13308_v55 = vpop.xlane.xlu1 %6039  ;;  %16122 = vst [vmem:[#allocation55_spill] sm:$0xff] %v13350_v48 }
 0x4df   : > { %16111 = vst [vmem:[#allocation91_spill] sm:$0xff] %v13308_v55  ;;  %v13346_v30 = vpop.xlane.xlu0 %6041 }
 0x4e0   : > { %16121 = vst [vmem:[#allocation108_spill] sm:$0xff] %v13346_v30 }
 0x4e2   : > { %v2316_v6 = vpop.xlane.xlu1 %2315 }
 0x4e3   : > { %v2326_v54 = vmax.f32 %v2316_v6, 1e-30  ;;  %v13324_v6 = vsub.s32 1, %v16116_v46  ;;  %v2319_v50 = vpop.xlane.xlu0 %2318 }
 0x4e4   : > { %v2327_v22 = vmax.f32 %v2319_v50, 1e-30 }
 0x4e5   : > { %10037 = vrcp.f32 %v2326_v54  ;;  %v13327_v54 = vsub.s32 2, %v16116_v46 }
 0x4f2   : > { %v10038_v61 = vpop.eup %10037 }
 0x4f3   : > { %v2334_v16 = vmul.f32 %v10038_v61, %v13153_v58  ;;  %v13334_v61 = vsub.s32 3, %v16116_v46 }
 0x4f4   : > { %v4421_v55 = vpop.xlane.xlu1 %4420 }
 0x4f5   : > { %v2341_v17 = vrot.slane %v2334_v16, %v13320_v8  ;;  %v4431_v35 = vmax.f32 %v4421_v55, 1e-30  ;;  %v2352_v14 = vrot.slane %v2334_v16, %v13324_v6  ;;  %v2363_v58 = vrot.slane %v2334_v16, %v13327_v54 }
 0x4f6   : > { %v2385_v55 = vrot.slane %v2334_v16, %v13340_v38 }
 0x4f7   : > { %2343 = vbcast.lane.b32.xlu1 %v2341_v17, 256  ;;  %2347 = vbcast.lane.b32.xlu0 %v2341_v17, 264  ;;  %10039 = vrcp.f32 %v4431_v35  ;;  %v2374_v17 = vrot.slane %v2334_v16, %v13334_v61  ;;  %v2396_v35 = vrot.slane %v2334_v16, %v13344_v2 }
 0x4f8   : > { %10041 = vrcp.f32 %v2327_v22 }
 0x4fb   : > { %2354 = vbcast.lane.b32.xlu1 %v2352_v14, 256  ;;  %2365 = vbcast.lane.b32.xlu0 %v2363_v58, 256 }
 0x4ff   : > { %2358 = vbcast.lane.b32.xlu1 %v2352_v14, 264  ;;  %2376 = vbcast.lane.b32.xlu0 %v2374_v17, 256  ;;  %v2407_v14 = vrot.slane %v2334_v16, %v13350_v48 }
 0x503   : > { %2369 = vbcast.lane.b32.xlu1 %v2363_v58, 264  ;;  %2387 = vbcast.lane.b32.xlu0 %v2385_v55, 256  ;;  %v13354_v58 = vsub.s32 7, %v16116_v46 }
 0x504   : > { %v10040_v27 = vpop.eup %10039 }
 0x505   : > { %16123 = vst [vmem:[#allocation58_spill] sm:$0xff] %v13354_v58  ;;  %v4439_v30 = vmul.f32 %v10040_v27, %v13186_v4  ;;  %v2418_v57 = vrot.slane %v2334_v16, %v13354_v58 }
 0x507   : > { %2380 = vbcast.lane.b32.xlu1 %v2374_v17, 264  ;;  %2398 = vbcast.lane.b32.xlu0 %v2396_v35, 256  ;;  %v13359_v17 = vrot.slane %v4439_v30, %v13334_v61  ;;  %v13365_v46 = vrot.slane %v4439_v30, %v13340_v38  ;;  %v4446_v4 = vrot.slane %v4439_v30, %v13320_v8 }
 0x508   : > { %v13374_v22 = vrot.slane %v4439_v30, %v13344_v2 }
 0x50b   : > { %2391 = vbcast.lane.b32.xlu1 %v2385_v55, 264  ;;  %2409 = vbcast.lane.b32.xlu0 %v2407_v14, 256  ;;  %v13362_v55 = vstv %s8604_s13  ;;  %s10748_s13 = sshll.u32 %s10852_s27, 4  ;;  %s10749_s13 = int_to_ptr.vmem [resolvable:$false] %s10748_s13 }
 0x50c   : > { %v6045_v50 = vadd.f32 %v13362_v55, %v13054_v32  ;;  %v6047_v16 = vadd.f32 %v13362_v55, %v13065_v20  ;;  %v6061_v32 = vadd.f32 %v13362_v55, %v13087_v51  ;;  %v10042_v20 = vpop.eup %10041  ;;  %v6063_v60 = vadd.f32 %v13362_v55, %v13145_v52 }
 0x50d   : > { %v6065_v51 = vadd.f32 %v13362_v55, %v13156_v59  ;;  %v6053_v59 = vadd.f32 %v13362_v55, %v13162_v45  ;;  %v6067_v45 = vadd.f32 %v13362_v55, %v13171_v26 }
 0x50e   : > { %v8648_v27 = vmul.f32 -1.442695, %v6045_v50  ;;  %v6051_v50 = vadd.f32 %v13362_v55, %v13148_v36  ;;  %v8666_v52 = vmul.f32 -1.442695, %v6063_v60 }
 0x50f   : > { %2402 = vbcast.lane.b32.xlu1 %v2396_v35, 264  ;;  %2420 = vbcast.lane.b32.xlu0 %v2418_v57, 256  ;;  %v6049_v35 = vadd.f32 %v13362_v55, %v13075_v49  ;;  %v8664_v49 = vmul.f32 -1.442695, %v6061_v32 }
 0x510   : > { %10043 = vpow2.f32 %v8648_v27  ;;  %v4457_v27 = vrot.slane %v4439_v30, %v13324_v6  ;;  %v8654_v36 = vmul.f32 -1.442695, %v6051_v50 }
 0x511   : > { %v8652_v13 = vmul.f32 -1.442695, %v6049_v35  ;;  %v13396_v35 = vrot.slane %v4439_v30, %v13354_v58 }
 0x513   : > { %2413 = vbcast.lane.b32.xlu1 %v2407_v14, 264  ;;  %4485 = vbcast.lane.b32.xlu0 %v13359_v17, 264  ;;  %v8650_v14 = vmul.f32 -1.442695, %v6047_v16  ;;  %v13392_v16 = vmul.f32 %v10042_v20, %v13132_v18  ;;  %v8656_v20 = vmul.f32 -1.442695, %v6053_v59 }
 0x515   : > { %10045 = vpow2.f32 %v8650_v14  ;;  %v8668_v14 = vmul.f32 -1.442695, %v6065_v51  ;;  %v13403_v18 = vrot.slane %v13392_v16, %v13320_v8  ;;  %v13413_v60 = vrot.slane %v13392_v16, %v13324_v6 }
 0x516   : > { %10047 = vpow2.f32 %v8652_v13  ;;  %v4468_v13 = vrot.slane %v4439_v30, %v13327_v54 }
 0x517   : > { %2424 = vbcast.lane.b32.xlu1 %v2418_v57, 264  ;;  %4496 = vbcast.lane.b32.xlu0 %v13365_v46, 264  ;;  %v13382_v57 = vrot.slane %v4439_v30, %v13350_v48  ;;  %10049 = vpow2.f32 %v8664_v49  ;;  %v4424_v49 = vpop.xlane.xlu0 %4423  ;;  %v13420_v30 = vrot.slane %v13392_v16, %v13327_v54 }
 0x518   : > { %10051 = vpow2.f32 %v8666_v52  ;;  %v6048_v52 = vadd.f32 %v13362_v55, %v13175_v10  ;;  %v6060_v10 = vadd.f32 %v13362_v55, %v13179_v34  ;;  %v6069_v34 = vadd.f32 %v13362_v55, %v13181_v41 }
 0x519   : > { %10053 = vpow2.f32 %v8654_v36 }
 0x51a   : > { %10055 = vpow2.f32 %v8668_v14  ;;  %v8672_v41 = vmul.f32 -1.442695, %v6069_v34 }
 0x51b   : > { %4448 = vbcast.lane.b32.xlu1 %v4446_v4, 256  ;;  %4507 = vbcast.lane.b32.xlu0 %v13374_v22, 264 }
 0x51d   : > { %v10044_v50 = vpop.eup %10043 }
 0x51e   : > { %v6301_v36 = vadd.f32 1.0, %v10044_v50 }
 0x51f   : > { %4452 = vbcast.lane.b32.xlu1 %v4446_v4, 264  ;;  %4518 = vbcast.lane.b32.xlu0 %v13382_v57, 264  ;;  %v6044_v4 = vadd.f32 %v13362_v55, %v13160_v47  ;;  %v6046_v47 = vadd.f32 %v13362_v55, %v13164_v56  ;;  %v4432_v56 = vmax.f32 %v4424_v49, 1e-30 }
 0x521   : > { %v8647_v32 = vmul.f32 -1.442695, %v6044_v4  ;;  %v8649_v51 = vmul.f32 -1.442695, %v6046_v47  ;;  %v8670_v4 = vmul.f32 -1.442695, %v6067_v45  ;;  %v13429_v47 = vrot.slane %v13392_v16, %v13334_v61 }
 0x523   : > { %4459 = vbcast.lane.b32.xlu1 %v4457_v27, 256  ;;  %4529 = vbcast.lane.b32.xlu0 %v13396_v35, 264  ;;  %10057 = vpow2.f32 %v8647_v32  ;;  %v6055_v32 = vadd.f32 %v13362_v55, %v13177_v12 }
 0x524   : > { %10059 = vpow2.f32 %v8656_v20  ;;  %v8651_v20 = vmul.f32 -1.442695, %v6048_v52 }
 0x525   : > { %10061 = vpow2.f32 %v8649_v51  ;;  %v8658_v12 = vmul.f32 -1.442695, %v6055_v32  ;;  %v13437_v51 = vrot.slane %v13392_v16, %v13340_v38 }
 0x526   : > { %10063 = vrcp.f32 %v4432_v56  ;;  %v8663_v56 = vmul.f32 -1.442695, %v6060_v10  ;;  %v6050_v10 = vadd.f32 %v13362_v55, %v13194_v28 }
 0x527   : > { %4463 = vbcast.lane.b32.xlu1 %v4457_v27, 264  ;;  %2431 = vbcast.lane.b32.xlu0 %v13403_v18, 256  ;;  %v10046_v27 = vpop.eup %10045  ;;  %10065 = vpow2.f32 %v8670_v4 }
 0x528   : > { %v10048_v26 = vpop.eup %10047  ;;  %v6303_v59 = vadd.f32 1.0, %v10046_v27  ;;  %10067 = vrcp.f32 %v6301_v36  ;;  %v8653_v28 = vmul.f32 -1.442695, %v6050_v10 }
 0x529   : > { %v10050_v14 = vpop.eup %10049 }
 0x52a   : > { %v10052_v49 = vpop.eup %10051  ;;  %v6317_v45 = vadd.f32 1.0, %v10050_v14  ;;  %10069 = vrcp.f32 %v6303_v59  ;;  %v13447_v14 = vrot.slane %v13392_v16, %v13344_v2  ;;  %v13449_v59 = vpop.permute.xlu1 %5212 }
 0x52b   : > { %4470 = vbcast.lane.b32.xlu1 %v4468_v13, 256  ;;  %2442 = vbcast.lane.b32.xlu0 %v13413_v60, 256  ;;  %v10054_v50 = vpop.eup %10053  ;;  %10071 = vpow2.f32 %v8651_v20  ;;  %16124 = vst [vmem:[#allocation106_spill] sm:$0xff] %v13449_v59  ;;  %v6077_v20 = vadd.f32 %v13362_v55, %v13192_v40  ;;  %v6079_v40 = vadd.f32 %v13362_v55, %v13196_v9 }
 0x52c   : > { %v10056_v27 = vpop.eup %10055  ;;  %v6307_v4 = vadd.f32 1.0, %v10054_v50  ;;  %v6057_v9 = vadd.f32 %v13362_v55, %v13200_v19 }
 0x52d   : > { %v6321_v36 = vadd.f32 1.0, %v10056_v27  ;;  %v6064_v27 = vadd.f32 %v13362_v55, %v13198_v21 }
 0x52f   : > { %4474 = vbcast.lane.b32.xlu1 %v4468_v13, 264  ;;  %2453 = vbcast.lane.b32.xlu0 %v13420_v30, 256  ;;  %v6305_v13 = vadd.f32 1.0, %v10048_v26  ;;  %v6062_v26 = vadd.f32 %v13362_v55, %v13188_v42  ;;  %v8667_v19 = vmul.f32 -1.442695, %v6064_v27  ;;  %v6054_v27 = vadd.f32 %v13362_v55, %v13213_v37 }
 0x530   : > { %v10058_v52 = vpop.eup %10057 }
 0x531   : > { %10073 = vrcp.f32 %v6305_v13  ;;  %v10060_v32 = vpop.eup %10059  ;;  %v8665_v42 = vmul.f32 -1.442695, %v6062_v26  ;;  %v8682_v26 = vmul.f32 -1.442695, %v6079_v40  ;;  %v6081_v40 = vadd.f32 %v13362_v55, %v13211_v43 }
 0x532   : > { %10075 = vrcp.f32 %v6317_v45  ;;  %v10062_v13 = vpop.eup %10061  ;;  %v6309_v50 = vadd.f32 1.0, %v10060_v32 }
 0x533   : > { %4481 = vbcast.lane.b32.xlu1 %v13359_v17, 256  ;;  %2464 = vbcast.lane.b32.xlu0 %v13429_v47, 256  ;;  %v6319_v17 = vadd.f32 1.0, %v10052_v49  ;;  %10077 = vpow2.f32 %v8658_v12  ;;  %v13459_v49 = vrot.slane %v13392_v16, %v13350_v48  ;;  %v10064_v45 = vpop.eup %10063 }
 0x534   : > { %10079 = vpow2.f32 %v8663_v56  ;;  %v10066_v12 = vpop.eup %10065  ;;  %v13467_v56 = vpop.permute.xlu1 %5218 }
 0x535   : > { %10081 = vrcp.f32 %v6319_v17  ;;  %16125 = vst [vmem:[#allocation59_spill] sm:$0xff] %v13467_v56  ;;  %v13469_v34 = vpop.eup %10067  ;;  %v6302_v17 = vadd.f32 1.0, %v10062_v13 }
 0x536   : > { %10083 = vrcp.f32 %v6307_v4 }
 0x537   : > { %4492 = vbcast.lane.b32.xlu1 %v13365_v46, 256  ;;  %2475 = vbcast.lane.b32.xlu0 %v13437_v51, 256  ;;  %v6300_v46 = vadd.f32 1.0, %v10058_v52  ;;  %10085 = vrcp.f32 %v6321_v36  ;;  %v13474_v52 = vmul.f32 %v10064_v45, %v13169_v3  ;;  %v13480_v4 = vpop.eup %10069  ;;  %v6323_v36 = vadd.f32 1.0, %v10066_v12 }
 0x538   : > { %10087 = vpow2.f32 %v8672_v41  ;;  %v10072_v21 = vpop.eup %10071  ;;  %v6052_v41 = vadd.f32 %v13362_v55, %v13202_v39  ;;  %v13490_v32 = vpop.xlane.xlu1 %2321  ;;  %v6066_v45 = vadd.f32 %v13362_v55, %v13207_v0 }
 0x539   : > { %10089 = vrcp.f32 %v6300_v46  ;;  %v13496_v39 = vrot.slane %v13474_v52, %v13320_v8  ;;  %v13524_v37 = vrot.slane %v13474_v52, %v13327_v54 }
 0x53a   : > { %10091 = vpow2.f32 %v8665_v42  ;;  %v6304_v42 = vadd.f32 1.0, %v10072_v21  ;;  %v8655_v13 = vmul.f32 -1.442695, %v6052_v41  ;;  %v8684_v21 = vmul.f32 -1.442695, %v6081_v40 }
 0x53b   : > { %4503 = vbcast.lane.b32.xlu1 %v13374_v22, 256  ;;  %2486 = vbcast.lane.b32.xlu0 %v13447_v14, 256  ;;  %v8680_v22 = vmul.f32 -1.442695, %v6077_v20  ;;  %10093 = vrcp.f32 %v6309_v50  ;;  %v8660_v20 = vmul.f32 -1.442695, %v6057_v9 }
 0x53d   : > { %10095 = vpow2.f32 %v8680_v22 }
 0x53e   : > { %v13486_v3 = vpop.eup %10073  ;;  %10097 = vpow2.f32 %v8653_v28  ;;  %v13510_v28 = vrot.slane %v13474_v52, %v13324_v6 }
 0x53f   : > { %4514 = vbcast.lane.b32.xlu1 %v13382_v57, 256  ;;  %2497 = vbcast.lane.b32.xlu0 %v13459_v49, 256  ;;  %v13478_v57 = vrot.slane %v13392_v16, %v13354_v58  ;;  %v6071_v16 = vadd.f32 %v13362_v55, %v13205_v44  ;;  %v13492_v46 = vpop.eup %10075  ;;  %10099 = vrcp.f32 %v6302_v17  ;;  %v4427_v17 = vpop.xlane.xlu1 %4426 }
 0x540   : > { %10101 = vpow2.f32 %v8682_v26  ;;  %v8669_v26 = vmul.f32 -1.442695, %v6066_v45  ;;  %v6095_v45 = vadd.f32 %v13362_v55, %v13220_v29 }
 0x541   : > { %10103 = vrcp.f32 %v6323_v36  ;;  %v8674_v50 = vmul.f32 -1.442695, %v6071_v16  ;;  %v6093_v36 = vadd.f32 %v13362_v55, %v13216_v5  ;;  %v8657_v16 = vmul.f32 -1.442695, %v6054_v27 }
 0x542   : > { %10105 = vpow2.f32 %v8667_v19  ;;  %v4433_v19 = vmax.f32 %v4427_v17, 1e-30 }
 0x543   : > { %4525 = vbcast.lane.b32.xlu1 %v13396_v35, 256  ;;  %2508 = vbcast.lane.b32.xlu0 %v13478_v57, 256  ;;  %v10078_v35 = vpop.eup %10077  ;;  %10107 = vpow2.f32 %v8660_v20 }
 0x544   : > { %v10080_v10 = vpop.eup %10079  ;;  %v6311_v12 = vadd.f32 1.0, %v10078_v35  ;;  %10109 = vrcp.f32 %v6304_v42  ;;  %v8696_v42 = vmul.f32 -1.442695, %v6093_v36 }
 0x545   : > { %v13502_v44 = vpop.eup %10081  ;;  %10111 = vpow2.f32 %v8655_v13 }
 0x546   : > { %v13506_v22 = vpop.eup %10083  ;;  %10113 = vpow2.f32 %v8674_v50 }
 0x547   : > { %2435 = vbcast.lane.b32.xlu1 %v13403_v18, 264  ;;  %4536 = vbcast.lane.b32.xlu0 %v13496_v39, 256  ;;  %v13512_v0 = vpop.eup %10085  ;;  %v6316_v18 = vadd.f32 1.0, %v10080_v10  ;;  %10115 = vrcp.f32 %v6311_v12 }
 0x548   : > { %v10088_v9 = vpop.eup %10087 }
 0x549   : > { %v13518_v43 = vpop.eup %10089  ;;  %10117 = vrcp.f32 %v6316_v18  ;;  %v6325_v35 = vadd.f32 1.0, %v10088_v9  ;;  %v6076_v18 = vadd.f32 %v13362_v55, %v13226_v15  ;;  %v8698_v9 = vmul.f32 -1.442695, %v6095_v45 }
 0x54a   : > { %v10092_v41 = vpop.eup %10091  ;;  %10119 = vpow2.f32 %v8669_v26  ;;  %v13548_v26 = vrot.slane %v13474_v52, %v13340_v38  ;;  %v6059_v15 = vadd.f32 %v13362_v55, %v13274_v23 }
 0x54b   : > { %2446 = vbcast.lane.b32.xlu1 %v13413_v60, 264  ;;  %4547 = vbcast.lane.b32.xlu0 %v13510_v28, 256  ;;  %v6068_v60 = vadd.f32 %v13362_v55, %v13218_v24  ;;  %v13528_v20 = vpop.eup %10093  ;;  %10121 = vpow2.f32 %v8684_v21  ;;  %v6318_v13 = vadd.f32 1.0, %v10092_v41  ;;  %v13536_v24 = vrot.slane %v13474_v52, %v13334_v61 }
 0x54c   : > { %v10096_v5 = vpop.eup %10095  ;;  %10123 = vrcp.f32 %v4433_v19  ;;  %v8679_v41 = vmul.f32 -1.442695, %v6076_v18  ;;  %v13554_v19 = vpop.permute.xlu0 %5215 }
 0x54d   : > { %v10098_v10 = vpop.eup %10097  ;;  %10125 = vpow2.f32 %v8657_v16  ;;  %v8671_v40 = vmul.f32 -1.442695, %v6068_v60  ;;  %v6333_v12 = vadd.f32 1.0, %v10096_v5  ;;  %16126 = vst [vmem:[#allocation42_spill] sm:$0xff] %v13554_v19 }
 0x54e   : > { %v13538_v50 = vpop.eup %10099  ;;  %10127 = vrcp.f32 %v6325_v35  ;;  %v6306_v27 = vadd.f32 1.0, %v10098_v10  ;;  %v8662_v10 = vmul.f32 -1.442695, %v6059_v15 }
 0x54f   : > { %2457 = vbcast.lane.b32.xlu1 %v13420_v30, 264  ;;  %4562 = vbcast.lane.b32.xlu0 %v13524_v37, 264  ;;  %v10102_v30 = vpop.eup %10101  ;;  %10129 = vpow2.f32 %v8696_v42  ;;  %v13560_v42 = vrot.slane %v13474_v52, %v13344_v2 }
 0x550   : > { %v13544_v29 = vpop.eup %10103  ;;  %10131 = vrcp.f32 %v6318_v13  ;;  %v6335_v36 = vadd.f32 1.0, %v10102_v30  ;;  %v6078_v13 = vadd.f32 %v13362_v55, %v13228_v7  ;;  %v13576_v7 = vrot.slane %v13474_v52, %v13350_v48 }
 0x551   : > { %v10106_v17 = vpop.eup %10105  ;;  %10133 = vpow2.f32 %v8671_v40  ;;  %v13568_v40 = vpop.permute.xlu0 %5221 }
 0x552   : > { %v10108_v21 = vpop.eup %10107  ;;  %10135 = vrcp.f32 %v6333_v12  ;;  %v6320_v60 = vadd.f32 1.0, %v10106_v17  ;;  %16127 = vst [vmem:[#allocation52_spill] sm:$0xff] %v13568_v40  ;;  %v16138_v40 = vld [vmem:[#allocation68_spill] sm:$0xff] }
 0x553   : > { %2468 = vbcast.lane.b32.xlu1 %v13429_v47, 264  ;;  %4573 = vbcast.lane.b32.xlu0 %v13536_v24, 264  ;;  %v13552_v47 = vpop.eup %10109  ;;  %10137 = vrcp.f32 %v6306_v27  ;;  %v6313_v5 = vadd.f32 1.0, %v10108_v21  ;;  %v6056_v27 = vadd.f32 %v13362_v55, %v13230_v33  ;;  %v6058_v59 = vadd.f32 %v13362_v55, %v16138_v40 }
 0x554   : > { %v10112_v16 = vpop.eup %10111  ;;  %10139 = vpow2.f32 %v8698_v9  ;;  %v8681_v9 = vmul.f32 -1.442695, %v6078_v13 }
 0x555   : > { %v10114_v35 = vpop.eup %10113  ;;  %10141 = vrcp.f32 %v6335_v36  ;;  %v6308_v45 = vadd.f32 1.0, %v10112_v16  ;;  %v6073_v36 = vadd.f32 %v13362_v55, %v13280_v11  ;;  %v13580_v15 = vpop.xlane.xlu0 %2324  ;;  %v6083_v11 = vadd.f32 %v13362_v55, %v13284_v1 }
 0x556   : > { %v13562_v23 = vpop.eup %10115  ;;  %10143 = vpow2.f32 %v8679_v41  ;;  %v6327_v12 = vadd.f32 1.0, %v10114_v35  ;;  %v13587_v41 = vld [vmem:[%s11305_s14] sm:$0xff]  }
 0x557   : > { %2479 = vbcast.lane.b32.xlu1 %v13437_v51, 264  ;;  %4584 = vbcast.lane.b32.xlu0 %v13548_v26, 264  ;;  %v13566_v51 = vpop.eup %10117  ;;  %10145 = vrcp.f32 %v6320_v60 }
 0x558   : > { %v10120_v30 = vpop.eup %10119  ;;  %10147 = vrcp.f32 %v6313_v5 }
 0x559   : > { %v10122_v18 = vpop.eup %10121  ;;  %10149 = vpow2.f32 %v8662_v10  ;;  %v8659_v10 = vmul.f32 -1.442695, %v6056_v27 }
 0x55a   : > { %v10124_v17 = vpop.eup %10123  ;;  %10151 = vrcp.f32 %v6308_v45  ;;  %v6337_v35 = vadd.f32 1.0, %v10122_v18 }
 0x55b   : > { %2490 = vbcast.lane.b32.xlu1 %v13447_v14, 264  ;;  %4595 = vbcast.lane.b32.xlu0 %v13560_v42, 264  ;;  %v10126_v21 = vpop.eup %10125  ;;  %v6322_v14 = vadd.f32 1.0, %v10120_v30  ;;  %10153 = vrcp.f32 %v6327_v12  ;;  %v13594_v13 = vmul.f32 %v10124_v17, %v13262_v25  ;;  %v6563_v30 = vrot.slane %v13469_v34, %v11688_v31 }
 0x55c   : > { %v13584_v33 = vpop.eup %10127  ;;  %v6572_v12 = vrot.slane %v13480_v4, %v11688_v31  ;;  %v6310_v18 = vadd.f32 1.0, %v10126_v21  ;;  %10155 = vpow2.f32 %v8681_v9  ;;  %v8676_v25 = vmul.f32 -1.442695, %v6073_v36 }
 0x55d   : > { %v10130_v5 = vpop.eup %10129  ;;  %10157 = vrcp.f32 %v6322_v14  ;;  %v6080_v9 = vadd.f32 %v13362_v55, %v13241_v53  ;;  %v6559_v14 = vrot.slane %v13518_v43, %v11695_v63  ;;  %v13626_v36 = vrot.slane %v13594_v13, %v13320_v8  ;;  %v16128_v53 = vld [vmem:[#allocation87_spill] sm:$0xff] }
 0x55e   : > { %v13600_v45 = vpop.eup %10131  ;;  %10159 = vrcp.f32 %v6337_v35  ;;  %v6349_v4 = vadd.f32 1.0, %v10130_v5  ;;  %v6097_v60 = vadd.f32 %v13362_v55, %v16128_v53  ;;  %v6568_v43 = vrot.slane %v13538_v50, %v11695_v63  ;;  %v16129_v53 = vld [vmem:[#allocation67_spill] sm:$0xff] }
 0x55f   : > { %2501 = vbcast.lane.b32.xlu1 %v13459_v49, 264  ;;  %4606 = vbcast.lane.b32.xlu0 %v13576_v7, 264  ;;  %v13598_v49 = vrot.slane %v13474_v52, %v13354_v58  ;;  %v10134_v27 = vpop.eup %10133  ;;  %v6070_v52 = vadd.f32 %v13362_v55, %v13232_v62  ;;  %10161 = vpow2.f32 %v8659_v10  ;;  %v8686_v62 = vmul.f32 -1.442695, %v6083_v11 }
 0x560   : > { %v13612_v17 = vpop.eup %10135  ;;  %10163 = vrcp.f32 %v6310_v18  ;;  %v6324_v5 = vadd.f32 1.0, %v10134_v27  ;;  %v8683_v27 = vmul.f32 -1.442695, %v6080_v9  ;;  %v6094_v1 = vadd.f32 %v13362_v55, %v16129_v53 }
 0x561   : > { %v13618_v21 = vpop.eup %10137  ;;  %10165 = vpow2.f32 %v8676_v25  ;;  %v8673_v10 = vmul.f32 -1.442695, %v6070_v52  ;;  %v6564_v25 = vsel %vm1961_vm0, %v6563_v30, %v6559_v14  ;;  %v13653_v11 = vrot.slane %v13594_v13, %v13324_v6  ;;  %v16132_v14 = vld [vmem:[#allocation80_spill] sm:$0xff] }
 0x562   : > { %v10140_v16 = vpop.eup %10139  ;;  %10167 = vrcp.f32 %v6349_v4  ;;  %v6577_v4 = vrot.slane %v13552_v47, %v11695_v63  ;;  %v8700_v9 = vmul.f32 -1.442695, %v6097_v60  ;;  %v6075_v53 = vadd.f32 %v13362_v55, %v16132_v14  ;;  %v16133_v47 = vld [vmem:[#allocation46_spill] sm:$0xff]  ;;  %v16134_v14 = vld [vmem:[#allocation96_spill] sm:$0xff] }
 0x563   : > { %2512 = vbcast.lane.b32.xlu1 %v13478_v57, 264  ;;  %4617 = vbcast.lane.b32.xlu0 %v13598_v49, 264  ;;  %v13622_v57 = vpop.xlane.xlu0 %4429  ;;  %v13632_v34 = vpop.eup %10141  ;;  %v6351_v50 = vadd.f32 1.0, %v10140_v16  ;;  %10169 = vpow2.f32 %v8686_v62  ;;  %v6092_v60 = vadd.f32 %v13362_v55, %v16133_v47  ;;  %v6640_v40 = vrot.slane %v13600_v45, %v11695_v63 }
 0x564   : > { %v10144_v35 = vpop.eup %10143  ;;  %10171 = vrcp.f32 %v6324_v5  ;;  %v8697_v5 = vmul.f32 -1.442695, %v6094_v1  ;;  %v7615_v1 = vld [vmem:[#allocation17 + $0x78] sm:$0xff]  ;;  %v6586_v19 = vrot.slane %v13618_v21, %v11695_v63 }
 0x565   : > { %v13644_v56 = vpop.eup %10145  ;;  %v6332_v30 = vadd.f32 1.0, %v10144_v35  ;;  %10173 = vpow2.f32 %v8673_v10  ;;  %v16137_v35 = vrot.slane %v13486_v3, %v11688_v31  ;;  %9165 = vmatprep.subr.mxu1 %v7615_v1 }
 0x566   : > { %v13655_v18 = vpop.eup %10147  ;;  %10175 = vpow2.f32 %v8683_v27  ;;  %v13683_v27 = vrot.slane %v13594_v13, %v13327_v54  ;;  %9166 = vmatpush3.msra.mxu1 %v7615_v1 }
 0x567   : > { %4540 = vbcast.lane.b32.xlu1 %v13496_v39, 264  ;;  %4628 = vbcast.lane.b32.xlu0 %v13626_v36, 264  ;;  %v10150_v62 = vpop.eup %10149  ;;  %10177 = vrcp.f32 %v6351_v50  ;;  %v6582_v50 = vsel %vm1961_vm0, %v16137_v35, %v6577_v4  ;;  %v8695_v4 = vmul.f32 -1.442695, %v6092_v60  ;;  %v13712_v60 = vrot.slane %v13594_v13, %v13334_v61 }
 0x568   : > { %v6315_v47 = vadd.f32 1.0, %v10150_v62  ;;  %10179 = vpow2.f32 %v8700_v9  ;;  %v7614_v9 = vld [vmem:[#allocation17 + $0x70] sm:$0xff] }
 0x569   : > { %v13647_v52 = vpop.permute.xlu1 %2343  ;;  %v13649_v39 = vpop.permute.xlu0 %2347  ;;  %10181 = vrcp.f32 %v6332_v30  ;;  %9167 = vmatprep.subr.mxu1 %v7614_v9 }
 0x56a   : > { %16130 = vst [vmem:[#allocation109_spill] sm:$0xff] %v13647_v52  ;;  %16131 = vst [vmem:[#allocation49_spill] sm:$0xff] %v13649_v39  ;;  %v6573_v39 = vsel %vm1961_vm0, %v6572_v12, %v6568_v43  ;;  %v13666_v52 = vpop.eup %10151  ;;  %v6085_v12 = vadd.f32 %v13362_v55, %v16134_v14  ;;  %10183 = vpow2.f32 %v8697_v5  ;;  %v7613_v5 = vld [vmem:[#allocation17 + $0x68] sm:$0xff]  ;;  %9168 = vmatpush3.msra.mxu1 %v7614_v9 }
 0x56b   : > { %4551 = vbcast.lane.b32.xlu1 %v13510_v28, 264  ;;  %4639 = vbcast.lane.b32.xlu0 %v13653_v11, 264  ;;  %v13672_v10 = vpop.eup %10153  ;;  %v4434_v28 = vmax.f32 %v13622_v57, 1e-30  ;;  %v6844_v14 = vsel %vm2242_vm1, %v6573_v39, %v6564_v25  ;;  %v16139_v25 = vld [vmem:[#allocation81_spill] sm:$0xff] }
 0x56c   : > { %v10156_v57 = vpop.eup %10155  ;;  %v6099_v39 = vadd.f32 %v13362_v55, %v16139_v25  ;;  %v16142_v25 = vld [vmem:[#allocation94_spill] sm:$0xff]  ;;  %v6845_v45 = vsel %vm2244_vm2, %v6582_v50, %v6844_v14  ;;  %9169 = vmatprep.subr.mxu1 %v7613_v5 }
 0x56d   : > { %v13677_v43 = vpop.permute.xlu1 %2354  ;;  %v13679_v16 = vpop.permute.xlu0 %2365  ;;  %10185 = vrcp.f32 %v4434_v28  ;;  %v6334_v1 = vadd.f32 1.0, %v10156_v57  ;;  %v8661_v28 = vmul.f32 -1.442695, %v6058_v59  ;;  %v16144_v14 = vld [vmem:[#allocation66_spill] sm:$0xff]  ;;  %9170 = vmatpush3.msra.mxu1 %v7613_v5  ;;  %v16149_v5 = vrot.slane %v13506_v22, %v11688_v31 }
 0x56e   : > { %16135 = vst [vmem:[#allocation61_spill] sm:$0xff] %v13677_v43  ;;  %16136 = vst [vmem:[#allocation54_spill] sm:$0xff] %v13679_v16  ;;  %v6631_v43 = vrot.slane %v13566_v51, %v11695_v63  ;;  %v8678_v16 = vmul.f32 -1.442695, %v6075_v53  ;;  %v13696_v3 = vpop.eup %10157  ;;  %10187 = vrcp.f32 %v6315_v47  ;;  %v6087_v51 = vadd.f32 %v13362_v55, %v16142_v25  ;;  %v7612_v47 = vld [vmem:[#allocation17 + $0x60] sm:$0xff] }
 0x56f   : > { %4558 = vbcast.lane.b32.xlu1 %v13524_v37, 256  ;;  %4650 = vbcast.lane.b32.xlu0 %v13683_v27, 264  ;;  %v13702_v62 = vpop.eup %10159  ;;  %v8688_v37 = vmul.f32 -1.442695, %v6085_v12  ;;  %v8702_v50 = vmul.f32 -1.442695, %v6099_v39  ;;  %v13743_v39 = vrot.slane %v13594_v13, %v13340_v38 }
 0x570   : > { %v10162_v35 = vpop.eup %10161  ;;  %10189 = vpow2.f32 %v8678_v16  ;;  %v6072_v16 = vadd.f32 %v13362_v55, %v16144_v14  ;;  %9171 = vmatprep.subr.mxu1 %v7612_v47 }
 0x571   : > { %v13706_v30 = vpop.permute.xlu1 %2358  ;;  %v13708_v53 = vpop.permute.xlu0 %2376  ;;  %10191 = vpow2.f32 %v8695_v4  ;;  %9172 = vmatpush3.msra.mxu1 %v7612_v47  ;;  %v16153_v47 = vld [vmem:[#allocation100_spill] sm:$0xff] }
 0x572   : > { %16140 = vst [vmem:[#allocation56_spill] sm:$0xff] %v13706_v30  ;;  %16141 = vst [vmem:[#allocation95_spill] sm:$0xff] %v13708_v53  ;;  %v13717_v12 = vpop.eup %10163  ;;  %v16143_v53 = vrot.slane %v13492_v46, %v11688_v31  ;;  %10193 = vpow2.f32 %v8688_v37  ;;  %v8690_v37 = vmul.f32 -1.442695, %v6087_v51 }
 0x573   : > { %4569 = vbcast.lane.b32.xlu1 %v13536_v24, 256  ;;  %4661 = vbcast.lane.b32.xlu0 %v13712_v60, 264  ;;  %v10166_v57 = vpop.eup %10165  ;;  %v16145_v24 = vrot.slane %v13502_v44, %v11688_v31  ;;  %10195 = vrcp.f32 %v6334_v1  ;;  %v16154_v1 = vrot.slane %v13512_v0, %v11688_v31  ;;  %v6658_v0 = vrot.slane %v13696_v3, %v11695_v63  ;;  %v16158_v3 = vld [vmem:[#allocation98_spill] sm:$0xff] }
 0x574   : > { %v6636_v30 = vsel %vm1961_vm0, %v16143_v53, %v6631_v43  ;;  %v13731_v46 = vpop.eup %10167  ;;  %v6312_v43 = vadd.f32 1.0, %v10162_v35  ;;  %v16148_v35 = vld [vmem:[#allocation97_spill] sm:$0xff]  ;;  %v6329_v59 = vadd.f32 1.0, %v10166_v57  ;;  %10197 = vpow2.f32 %v8661_v28  ;;  %v16150_v57 = vld [vmem:[#allocation71_spill] sm:$0xff] }
 0x575   : > { %v6645_v21 = vsel %vm1961_vm0, %v16145_v24, %v6640_v40  ;;  %v13737_v9 = vpop.permute.xlu1 %2369  ;;  %v13739_v4 = vpop.permute.xlu0 %2387  ;;  %v6101_v44 = vadd.f32 %v13362_v55, %v16148_v35  ;;  %v7611_v40 = vld [vmem:[#allocation17 + $0x58] sm:$0xff]  ;;  %v6649_v24 = vrot.slane %v13644_v56, %v11695_v63  ;;  %10199 = vpow2.f32 %v8702_v50  ;;  %v7610_v50 = vld [vmem:[#allocation17 + $0x50] sm:$0xff] }
 0x576   : > { %16146 = vst [vmem:[#allocation44_spill] sm:$0xff] %v13737_v9  ;;  %16147 = vst [vmem:[#allocation73_spill] sm:$0xff] %v13739_v4  ;;  %v10170_v53 = vpop.eup %10169  ;;  %v6591_v4 = vsel %vm1961_vm0, %v16149_v5, %v6586_v19  ;;  %v8675_v35 = vmul.f32 -1.442695, %v6072_v16  ;;  %v6851_v25 = vsel %vm2242_vm1, %v6645_v21, %v6636_v30  ;;  %10201 = vrcp.f32 %v6312_v43  ;;  %9173 = vmatprep.subr.mxu1 %v7611_v40 }
 0x577   : > { %v13749_v14 = vpop.eup %10171  ;;  %4580 = vbcast.lane.b32.xlu1 %v13548_v26, 256  ;;  %4672 = vbcast.lane.b32.xlu0 %v13743_v39, 264  ;;  %v6339_v28 = vadd.f32 1.0, %v10170_v53  ;;  %v6082_v22 = vadd.f32 %v13362_v55, %v16150_v57  ;;  %v13770_v5 = vrot.slane %v13594_v13, %v13344_v2  ;;  %10203 = vpow2.f32 %v8690_v37  ;;  %v7609_v37 = vld [vmem:[#allocation17 + $0x48] sm:$0xff] }
 0x578   : > { %v10174_v51 = vpop.eup %10173  ;;  %v8704_v30 = vmul.f32 -1.442695, %v6101_v44  ;;  %v6089_v43 = vadd.f32 %v13362_v55, %v16153_v47  ;;  %v6846_v21 = vsel %vm2246_vm3, %v6591_v4, %v6845_v45  ;;  %9174 = vmatpush3.msra.mxu1 %v7611_v40  ;;  %10205 = vrcp.f32 %v6329_v59  ;;  %v16155_v4 = vld [vmem:[#allocation72_spill] sm:$0xff] }
 0x579   : > { %v10176_v56 = vpop.eup %10175  ;;  %v13764_v19 = vpop.permute.xlu1 %2380  ;;  %v6326_v57 = vadd.f32 1.0, %v10174_v51  ;;  %10207 = vpow2.f32 %v8675_v35  ;;  %v6096_v59 = vadd.f32 %v13362_v55, %v16155_v4  ;;  %9175 = vmatprep.subr.mxu1 %v7610_v50  ;;  %v6103_v47 = vadd.f32 %v13362_v55, %v16158_v3 }
 0x57a   : > { %16151 = vst [vmem:[#allocation70_spill] sm:$0xff] %v13764_v19  ;;  %v13766_v26 = vpop.permute.xlu0 %2398  ;;  %v13772_v16 = vpop.eup %10177  ;;  %v6595_v19 = vrot.slane %v13666_v52, %v11695_v63  ;;  %v6336_v45 = vadd.f32 1.0, %v10176_v56  ;;  %10209 = vrcp.f32 %v6339_v28  ;;  %9176 = vmatpush3.msra.mxu1 %v7610_v50  ;;  %v8692_v56 = vmul.f32 -1.442695, %v6089_v43 }
 0x57b   : > { %16152 = vst [vmem:[#allocation92_spill] sm:$0xff] %v13766_v26  ;;  %v10180_v53 = vpop.eup %10179  ;;  %v6654_v26 = vsel %vm1961_vm0, %v16154_v1, %v6649_v24  ;;  %4591 = vbcast.lane.b32.xlu1 %v13560_v42, 256  ;;  %4683 = vbcast.lane.b32.xlu0 %v13770_v5, 264  ;;  %v8685_v24 = vmul.f32 -1.442695, %v6082_v22  ;;  %v13799_v1 = vrot.slane %v13594_v13, %v13350_v48  ;;  %10211 = vpow2.f32 %v8704_v30  ;;  %v7608_v22 = vld [vmem:[#allocation17 + $0x40] sm:$0xff] }
 0x57c   : > { %v13785_v44 = vpop.eup %10181  ;;  %v6852_v28 = vsel %vm2244_vm2, %v6654_v26, %v6851_v25  ;;  %9177 = vmatprep.subr.mxu1 %v7609_v37  ;;  %10213 = vrcp.f32 %v6326_v57  ;;  %v6353_v42 = vadd.f32 1.0, %v10180_v53  ;;  %v16159_v50 = vrot.slane %v13528_v20, %v11688_v31 }
 0x57d   : > { %v10184_v40 = vpop.eup %10183  ;;  %v13793_v52 = vpop.permute.xlu1 %2391  ;;  %10215 = vrcp.f32 %v6336_v45  ;;  %v8699_v25 = vmul.f32 -1.442695, %v6096_v59  ;;  %v16160_v26 = vrot.slane %v13544_v29, %v11688_v31  ;;  %9178 = vmatpush3.msra.mxu1 %v7609_v37  ;;  %v13829_v45 = vrot.slane %v13594_v13, %v13354_v58  ;;  %v7607_v29 = vld [vmem:[#allocation17 + $0x38] sm:$0xff]  ;;  %v16164_v37 = vld [vmem:[#allocation74_spill] sm:$0xff] }
 0x57e   : > { %16156 = vst [vmem:[#allocation79_spill] sm:$0xff] %v13793_v52  ;;  %v13795_v51 = vpop.permute.xlu0 %2409  ;;  %v10186_v35 = vpop.eup %10185  ;;  %v6600_v30 = vsel %vm1961_vm0, %v16159_v50, %v6595_v19  ;;  %v6350_v20 = vadd.f32 1.0, %v10184_v40  ;;  %10217 = vpow2.f32 %v8685_v24  ;;  %v16161_v19 = vld [vmem:[#allocation63_spill] sm:$0xff]  ;;  %9179 = vmatprep.subr.mxu1 %v7608_v22  ;;  %v6074_v40 = vadd.f32 %v13362_v55, %v16164_v37 }
 0x57f   : > { %16157 = vst [vmem:[#allocation53_spill] sm:$0xff] %v13795_v51  ;;  %v13804_v4 = vpop.eup %10187  ;;  %v6604_v51 = vrot.slane %v13717_v12, %v11695_v63  ;;  %4602 = vbcast.lane.b32.xlu1 %v13576_v7, 256  ;;  %4694 = vbcast.lane.b32.xlu0 %v13799_v1, 264  ;;  %v6663_v53 = vsel %vm1961_vm0, %v16160_v26, %v6658_v0  ;;  %10219 = vpow2.f32 %v8692_v56  ;;  %v8706_v0 = vmul.f32 -1.442695, %v6103_v47  ;;  %v7606_v56 = vld [vmem:[#allocation17 + $0x30] sm:$0xff] }
 0x580   : > { %v10190_v43 = vpop.eup %10189  ;;  %v13821_v3 = vmul.f32 %v10186_v35, %v16161_v19  ;;  %v6847_v24 = vsel %vm2248_vm4, %v6600_v30, %v6846_v21  ;;  %9180 = vmatpush3.msra.mxu1 %v7608_v22  ;;  %10221 = vrcp.f32 %v6353_v42  ;;  %v6667_v19 = vrot.slane %v13749_v14, %v11695_v63 }
 0x581   : > { %v10192_v57 = vpop.eup %10191  ;;  %v13823_v7 = vpop.permute.xlu1 %2402  ;;  %v6331_v26 = vadd.f32 1.0, %v10190_v43  ;;  %v16165_v13 = vrot.slane %v13562_v23, %v11688_v31  ;;  %10223 = vpow2.f32 %v8699_v25  ;;  %v6853_v42 = vsel %vm2246_vm3, %v6663_v53, %v6852_v28  ;;  %9181 = vmatprep.subr.mxu1 %v7607_v29  ;;  %v16166_v23 = vld [vmem:[#allocation60_spill] sm:$0xff] }
 0x582   : > { %16162 = vst [vmem:[#allocation105_spill] sm:$0xff] %v13823_v7  ;;  %v13825_v50 = vpop.permute.xlu0 %2420  ;;  %v10194_v59 = vpop.eup %10193  ;;  %v6348_v22 = vadd.f32 1.0, %v10192_v57  ;;  %10225 = vrcp.f32 %v6350_v20  ;;  %v13855_v37 = vrot.slane %v13821_v3, %v13320_v8  ;;  %9182 = vmatpush3.msra.mxu1 %v7607_v29  ;;  %v8677_v25 = vmul.f32 -1.442695, %v6074_v40  ;;  %v7605_v20 = vld [vmem:[#allocation17 + $0x28] sm:$0xff] }
 0x583   : > { %16163 = vst [vmem:[#allocation65_spill] sm:$0xff] %v13825_v50  ;;  %v13834_v35 = vpop.eup %10195  ;;  %v6609_v12 = vsel %vm1961_vm0, %v16165_v13, %v6604_v51  ;;  %4613 = vbcast.lane.b32.xlu1 %v13598_v49, 256  ;;  %4705 = vbcast.lane.b32.xlu0 %v13829_v45, 264  ;;  %v6341_v30 = vadd.f32 1.0, %v10194_v59  ;;  %v6091_v51 = vadd.f32 %v13362_v55, %v16166_v23  ;;  %10227 = vpow2.f32 %v8706_v0  ;;  %v16168_v23 = vld [vmem:[#allocation82_spill] sm:$0xff] }
 0x584   : > { %v10198_v47 = vpop.eup %10197  ;;  %v13862_v53 = vsel %vm2250_vm5, %v6609_v12, %v6847_v24  ;;  %9183 = vmatprep.subr.mxu1 %v7606_v56  ;;  %10229 = vrcp.f32 %v6331_v26  ;;  %v6084_v21 = vadd.f32 %v13362_v55, %v16168_v23  ;;  %v16169_v29 = vrot.slane %v13584_v33, %v11688_v31 }
 0x585   : > { %v10200_v14 = vpop.eup %10199  ;;  %v13849_v43 = vpop.permute.xlu1 %2413  ;;  %v6314_v13 = vadd.f32 1.0, %v10198_v47  ;;  %v6703_v40 = vrot.slane %v13785_v44, %v11695_v63  ;;  %10231 = vrcp.f32 %v6348_v22  ;;  %9184 = vmatpush3.msra.mxu1 %v7606_v56  ;;  %v6712_v33 = vrot.slane %v13834_v35, %v11695_v63 }
 0x586   : > { %16167 = vst [vmem:[#allocation62_spill] sm:$0xff] %v13849_v43  ;;  %v13851_v49 = vpop.permute.xlu0 %4485  ;;  %v13857_v57 = vpop.eup %10201  ;;  %v6672_v50 = vsel %vm1961_vm0, %v16169_v29, %v6667_v19  ;;  %v6355_v24 = vadd.f32 1.0, %v10200_v14  ;;  %10233 = vrcp.f32 %v6341_v30  ;;  %v8694_v19 = vmul.f32 -1.442695, %v6091_v51  ;;  %9185 = vmatprep.subr.mxu1 %v7605_v20  ;;  %v7604_v29 = vld [vmem:[#allocation17 + $0x20] sm:$0xff]  ;;  %v16171_v51 = vld [vmem:[#allocation101_spill] sm:$0xff] }
 0x587   : > { %v10204_v59 = vpop.eup %10203  ;;  %4624 = vbcast.lane.b32.xlu1 %v13626_v36, 256  ;;  %4716 = vbcast.lane.b32.xlu0 %v13855_v37, 264  ;;  %v13886_v23 = vrot.slane %v13821_v3, %v13324_v6  ;;  %10235 = vpow2.f32 %v8677_v25  ;;  %v13891_v56 = vsel %vm2248_vm4, %v6672_v50, %v6853_v42  ;;  %v6613_v35 = vrot.slane %v13857_v57, %v11695_v63  ;;  %v7603_v25 = vld [vmem:[#allocation17 + $0x18] sm:$0xff] }
 0x588   : > { %v13872_v0 = vpop.eup %10205  ;;  %v6343_v22 = vadd.f32 1.0, %v10204_v59  ;;  %9186 = vmatpush3.msra.mxu1 %v7605_v20  ;;  %10237 = vrcp.f32 %v6314_v13  ;;  %v8687_v30 = vmul.f32 -1.442695, %v6084_v21  ;;  %v6105_v28 = vadd.f32 %v13362_v55, %v16171_v51  ;;  %v16172_v59 = vld [vmem:[#allocation84_spill] sm:$0xff] }
 0x589   : > { %v10208_v26 = vpop.eup %10207  ;;  %v13880_v36 = vpop.permute.xlu1 %2424  ;;  %10239 = vrcp.f32 %v6355_v24  ;;  %v6098_v57 = vadd.f32 %v13362_v55, %v16172_v59  ;;  %v16173_v21 = vrot.slane %v13612_v17, %v11688_v31  ;;  %9187 = vmatprep.subr.mxu1 %v7604_v29  ;;  %v2328_v12 = vmax.f32 %v13490_v32, 1e-30 }
 0x58a   : > { %16170 = vst [vmem:[#allocation48_spill] sm:$0xff] %v13880_v36  ;;  %v13882_v47 = vpop.permute.xlu0 %4496  ;;  %v13888_v44 = vpop.eup %10209  ;;  %v6328_v42 = vadd.f32 1.0, %v10208_v26  ;;  %10241 = vpow2.f32 %v8694_v19  ;;  %v13918_v59 = vrot.slane %v13821_v3, %v13327_v54  ;;  %9188 = vmatpush3.msra.mxu1 %v7604_v29  ;;  %v16176_v36 = vld [vmem:[#allocation108_spill] sm:$0xff]  ;;  %v13943_v19 = vrot.slane %v13821_v3, %v13334_v61 }
 0x58b   : > { %v10212_v14 = vpop.eup %10211  ;;  %4635 = vbcast.lane.b32.xlu1 %v13653_v11, 256  ;;  %4727 = vbcast.lane.b32.xlu0 %v13886_v23, 264  ;;  %v6708_v20 = vsel %vm1961_vm0, %v16173_v21, %v6703_v40  ;;  %v16174_v11 = vrot.slane %v13632_v34, %v11688_v31  ;;  %10243 = vrcp.f32 %v6343_v22  ;;  %v16175_v34 = vrot.slane %v13655_v18, %v11688_v31 }
 0x58c   : > { %v10214_v50 = vpop.eup %10213  ;;  %v6357_v40 = vadd.f32 1.0, %v10212_v14  ;;  %9189 = vmatprep.subr.mxu1 %v7603_v25  ;;  %10245 = vpow2.f32 %v8687_v30  ;;  %v6107_v43 = vadd.f32 %v13362_v55, %v16176_v36  ;;  %v8701_v18 = vmul.f32 -1.442695, %v6098_v57  ;;  %v16177_v14 = vld [vmem:[#allocation85_spill] sm:$0xff] }
 0x58d   : > { %v10216_v13 = vpop.eup %10215  ;;  %v6717_v51 = vsel %vm1961_vm0, %v16174_v11, %v6712_v33  ;;  %v13912_v24 = vpop.permute.xlu1 %4448  ;;  %v6618_v32 = vsel %vm1961_vm0, %v16175_v34, %v6613_v35  ;;  %v7602_v33 = vld [vmem:[#allocation17 + $0x10] sm:$0xff]  ;;  %v8708_v11 = vmul.f32 -1.442695, %v6105_v28  ;;  %v6676_v29 = vrot.slane %v10214_v50, %v11695_v63  ;;  %9190 = vmatpush3.msra.mxu1 %v7603_v25 }
 0x58e   : > { %v13914_v26 = vpop.permute.xlu0 %4507  ;;  %v10218_v17 = vpop.eup %10217  ;;  %10247 = vrcp.f32 %v6328_v42  ;;  %v6086_v35 = vadd.f32 %v13362_v55, %v16177_v14  ;;  %v6858_v34 = vsel %vm2242_vm1, %v6717_v51, %v6708_v20  ;;  %v6721_v30 = vrot.slane %v10216_v13, %v11695_v63  ;;  %9191 = vmatprep.subr.mxu1 %v7602_v33  ;;  %v7601_v42 = vld [vmem:[#allocation17 + $0x8] sm:$0xff]  ;;  %v16179_v51 = vld [vmem:[#allocation90_spill] sm:$0xff] }
 0x58f   : > { %v10220_v21 = vpop.eup %10219  ;;  %4646 = vbcast.lane.b32.xlu1 %v13683_v27, 256  ;;  %4738 = vbcast.lane.b32.xlu0 %v13918_v59, 264  ;;  %v6338_v36 = vadd.f32 1.0, %v10218_v17  ;;  %10249 = vrcp.f32 %v2328_v12  ;;  %v13947_v25 = vsel %vm16178_vm6, %v6618_v32, %v13862_v53  ;;  %v8710_v13 = vmul.f32 -1.442695, %v6107_v43  ;;  %v7600_v53 = vld [vmem:[#allocation17] sm:$0xff] }
 0x590   : > { %v13931_v22 = vpop.eup %10221  ;;  %10251 = vrcp.f32 %v6357_v40  ;;  %v6345_v14 = vadd.f32 1.0, %v10220_v21  ;;  %9192 = vmatpush3.msra.mxu1 %v7602_v33  ;;  %v6100_v17 = vadd.f32 %v13362_v55, %v16179_v51  ;;  %v16180_v7 = vrot.slane %v13672_v10, %v11688_v31  ;;  %v16181_v21 = vld [vmem:[#allocation83_spill] sm:$0xff] }
 0x591   : > { %v10224_v28 = vpop.eup %10223  ;;  %v13937_v50 = vpop.permute.xlu1 %4452  ;;  %10253 = vpow2.f32 %v8708_v11  ;;  %v8689_v43 = vmul.f32 -1.442695, %v6086_v35  ;;  %v6088_v11 = vadd.f32 %v13362_v55, %v16181_v21  ;;  %9193 = vmatprep.subr.mxu1 %v7601_v42 }
 0x592   : > { %v13939_v27 = vpop.permute.xlu0 %4518  ;;  %v10226_v57 = vpop.eup %10225  ;;  %v6681_v40 = vsel %vm1961_vm0, %v16180_v7, %v6676_v29  ;;  %10255 = vpow2.f32 %v8701_v18  ;;  %v6352_v10 = vadd.f32 1.0, %v10224_v28  ;;  %v13975_v18 = vrot.slane %v13821_v3, %v13340_v38  ;;  %9194 = vmatpush3.msra.mxu1 %v7601_v42  ;;  %v16188_v42 = vld [vmem:[#allocation88_spill] sm:$0xff] }
 0x593   : > { %v10228_v20 = vpop.eup %10227  ;;  %4657 = vbcast.lane.b32.xlu1 %v13712_v60, 256  ;;  %4749 = vbcast.lane.b32.xlu0 %v13943_v19, 264  ;;  %10257 = vrcp.f32 %v6338_v36  ;;  %v16182_v60 = vrot.slane %v13702_v62, %v11688_v31  ;;  %v6784_v21 = vrot.slane %v10226_v57, %v11695_v63  ;;  %v13982_v62 = vsel %vm2250_vm5, %v6681_v40, %v13891_v56 }
 0x594   : > { %v13959_v32 = vpop.eup %10229  ;;  %10259 = vrcp.f32 %v6345_v14  ;;  %v6359_v28 = vadd.f32 1.0, %v10228_v20  ;;  %9195 = vmatprep.subr.mxu1 %v7600_v53  ;;  %v8703_v36 = vmul.f32 -1.442695, %v6100_v17  ;;  %v8691_v56 = vmul.f32 -1.442695, %v6088_v11  ;;  %v16186_v11 = vld [vmem:[#allocation86_spill] sm:$0xff] }
 0x595   : > { %v10232_v51 = vpop.eup %10231  ;;  %v6726_v7 = vsel %vm1961_vm0, %v16182_v60, %v6721_v30  ;;  %v13969_v29 = vpop.permute.xlu1 %4459  ;;  %10261 = vpow2.f32 %v8710_v13  ;;  %v16183_v60 = vld [vmem:[#allocation93_spill] sm:$0xff]  ;;  %9196 = vmatpush3.msra.mxu1 %v7600_v53  ;;  %v2329_v40 = vmax.f32 %v13580_v15, 1e-30  ;;  %v6102_v53 = vadd.f32 %v13362_v55, %v16186_v11 }
 0x596   : > { %v13971_v12 = vpop.permute.xlu0 %4529  ;;  %v13977_v35 = vpop.eup %10233  ;;  %v6090_v33 = vadd.f32 %v13362_v55, %v16183_v60  ;;  %v6775_v14 = vrot.slane %v10232_v51, %v11695_v63  ;;  %10263 = vpow2.f32 %v8689_v43  ;;  %v13992_v20 = vsel %vm2244_vm2, %v6726_v7, %v6858_v34 }
 0x597   : > { %v10236_v30 = vpop.eup %10235  ;;  %4668 = vbcast.lane.b32.xlu1 %v13743_v39, 256  ;;  %4760 = vbcast.lane.b32.xlu0 %v13975_v18, 264  ;;  %10265 = vrcp.f32 %v6352_v10  ;;  %v14003_v51 = vrot.slane %v13821_v3, %v13344_v2  ;;  %v16187_v10 = vrot.slane %v13772_v16, %v11688_v31 }
 0x598   : > { %v10238_v57 = vpop.eup %10237  ;;  %10267 = vrcp.f32 %v6359_v28  ;;  %v6330_v34 = vadd.f32 1.0, %v10236_v30  ;;  %v8693_v17 = vmul.f32 -1.442695, %v6090_v33  ;;  %v16189_v30 = vld [vmem:[#allocation91_spill] sm:$0xff] }
 0x599   : > { %v13994_v13 = vpop.eup %10239  ;;  %v4464_v39 = vpop.permute.xlu1 %4463  ;;  %v6789_v7 = vsel %vm1961_vm0, %v16187_v10, %v6784_v21  ;;  %10269 = vpow2.f32 %v8703_v36  ;;  %v6622_v52 = vrot.slane %v10238_v57, %v11695_v63  ;;  %v6106_v16 = vadd.f32 %v13362_v55, %v16189_v30  ;;  %v10365_v30 = vld [vmem:[%s11305_s14 + $0x10] sm:$0xff]  }
 0x59a   : > { %16184 = vst [vmem:[#allocation103_spill] sm:$0xff] %v13994_v13  ;;  %v13999_v60 = vpop.permute.xlu0 %2431  ;;  %v10242_v43 = vpop.eup %10241  ;;  %10271 = vpow2.f32 %v8691_v56  ;;  %v16190_v21 = vrot.slane %v13731_v46, %v11688_v31  ;;  %v14031_v56 = vrot.slane %v13821_v3, %v13350_v48  ;;  %v8705_v46 = vmul.f32 -1.442695, %v6102_v53  ;;  %v16193_v48 = vld [vmem:[#allocation69_spill] sm:$0xff] }
 0x59b   : > { %16185 = vst [vmem:[#allocation76_spill] sm:$0xff] %v13999_v60  ;;  %v14011_v15 = vpop.eup %10243  ;;  %v6104_v60 = vadd.f32 %v13362_v55, %v16188_v42  ;;  %4679 = vbcast.lane.b32.xlu1 %v13770_v5, 256  ;;  %4771 = vbcast.lane.b32.xlu0 %v14003_v51, 264  ;;  %v6347_v57 = vadd.f32 1.0, %v10242_v43  ;;  %10273 = vrcp.f32 %v2329_v40  ;;  %v10364_v5 = vld [vmem:[%s11305_s14 + $0x8] sm:$0xff]   ;;  %v16192_v43 = vrot.slane %v13804_v4, %v11688_v31 }
 0x59c   : > { %v10246_v28 = vpop.eup %10245  ;;  %v6780_v33 = vsel %vm1961_vm0, %v16190_v21, %v6775_v14  ;;  %v4798_v11 = vunpack.c.h.bf16 %v10364_v5  ;;  %10275 = vrcp.f32 %v6330_v34  ;;  %v4800_v21 = vunpack.c.h.bf16 %v10365_v30 }
 0x59d   : > { %v10248_v42 = vpop.eup %10247  ;;  %v4471_v10 = vpop.permute.xlu1 %4470  ;;  %v14034_v14 = vsel %vm2242_vm1, %v6789_v7, %v6780_v33  ;;  %10277 = vpow2.f32 %v8693_v17  ;;  %v8707_v40 = vmul.f32 -1.442695, %v6104_v60  ;;  %v4797_v2 = vunpack.c.l.bf16 %v10364_v5 }
 0x59e   : > { %v14027_v9 = vpop.permute.xlu0 %2442  ;;  %v10250_v55 = vpop.eup %10249  ;;  %v8709_v53 = vmul.f32 -1.442695, %v6106_v16  ;;  %v6685_v7 = vrot.slane %v10248_v42, %v11695_v63  ;;  %v4799_v17 = vunpack.c.l.bf16 %v10365_v30  ;;  %10279 = vrcp.f32 %v6347_v57  ;;  %v10366_v42 = vld [vmem:[%s11305_s14 + $0x18] sm:$0xff]  }
 0x59f   : > { %16191 = vst [vmem:[#allocation89_spill] sm:$0xff] %v14027_v9  ;;  %v14037_v36 = vpop.eup %10251  ;;  %v6627_v9 = vsel %vm1961_vm0, %v16192_v43, %v6622_v52  ;;  %4690 = vbcast.lane.b32.xlu1 %v13799_v1, 256  ;;  %4782 = vbcast.lane.b32.xlu0 %v14031_v56, 264  ;;  %v14049_v4 = vmul.f32 %v10250_v55, %v16193_v48  ;;  %10281 = vpow2.f32 %v8705_v46  ;;  %v4802_v13 = vunpack.c.h.bf16 %v10366_v42 }
 0x5a0   : > { %v10254_v34 = vpop.eup %10253  ;;  %v4862_v52 = vmul.f32 %v4798_v11, %v4464_v39  ;;  %v14055_v1 = vrot.slane %v13821_v3, %v13354_v58  ;;  %v4801_v33 = vunpack.c.l.bf16 %v10366_v42  ;;  %v6340_v48 = vadd.f32 1.0, %v10246_v28  ;;  %v10367_v42 = vld [vmem:[%s11305_s14 + $0x20] sm:$0xff]  }
 0x5a1   : > { %v10256_v60 = vpop.eup %10255  ;;  %v4475_v5 = vpop.permute.xlu1 %4474  ;;  %10283 = vpow2.f32 %v8707_v40  ;;  %v16195_v39 = vunpack.c.h.bf16 %v13587_v41  ;;  %v4861_v55 = vmul.f32 %v4797_v2, %v13969_v29  ;;  %v6361_v46 = vadd.f32 1.0, %v10254_v34 }
 0x5a2   : > { %v14051_v43 = vpop.permute.xlu0 %2453  ;;  %v14057_v16 = vpop.eup %10257  ;;  %v4864_v30 = vmul.f32 %v4800_v21, %v4475_v5  ;;  %10285 = vpow2.f32 %v8709_v53  ;;  %v16196_v21 = vrot.slane %v13872_v0, %v11688_v31  ;;  %v4863_v40 = vmul.f32 %v4799_v17, %v4471_v10 }
 0x5a3   : > { %16194 = vst [vmem:[#allocation51_spill] sm:$0xff] %v14051_v43  ;;  %v14060_v57 = vpop.eup %10259  ;;  %v4860_v11 = vmul.f32 %v16195_v39, %v13937_v50  ;;  %4701 = vbcast.lane.b32.xlu1 %v13829_v45, 256  ;;  %4793 = vbcast.lane.b32.xlu0 %v14055_v1, 264  ;;  %v4804_v43 = vunpack.c.h.bf16 %v10367_v42  ;;  %v16197_v2 = vunpack.c.l.bf16 %v13587_v41  ;;  %v4930_v45 = vadd.f32 %v4862_v52, %v4861_v55 }
 0x5a4   : > { %v14068_v3 = vpop.eup %10261  ;;  %v6690_v28 = vsel %vm1961_vm0, %v16196_v21, %v6685_v7  ;;  %v2517_v34 = vrot.slane %v14049_v4, %v13320_v8  ;;  %v4866_v0 = vmul.f32 %v4802_v13, %v13851_v49  ;;  %v4937_v7 = vadd.f32 %v4864_v30, %v4863_v40 }
 0x5a5   : > { %v10264_v5 = vpop.eup %10263  ;;  %v4859_v50 = vmul.f32 %v16197_v2, %v13912_v24  ;;  %v4482_v29 = vpop.permute.xlu1 %4481  ;;  %v4803_v17 = vunpack.c.l.bf16 %v10367_v42  ;;  %10287 = vrcp.f32 %v6340_v48  ;;  %v6354_v41 = vadd.f32 1.0, %v10256_v60  ;;  %v10368_v60 = vld [vmem:[%s11305_s14 + $0x28] sm:$0xff]  }
 0x5a6   : > { %v14078_v39 = vpop.permute.xlu0 %2464  ;;  %v14082_v53 = vpop.eup %10265  ;;  %v4865_v10 = vmul.f32 %v4801_v33, %v4482_v29  ;;  %v14089_v24 = vsel %vm2254_vm7, %v6627_v9, %v13947_v25  ;;  %v6342_v2 = vadd.f32 1.0, %v10264_v5  ;;  %v14093_v49 = vsel %vm16200_vm8, %v6690_v28, %v13982_v62 }
 0x5a7   : > { %16198 = vst [vmem:[#allocation75_spill] sm:$0xff] %v14078_v39  ;;  %v14085_v21 = vpop.eup %10267  ;;  %16199 = vst [vmem:[#allocation47_spill] sm:$0xff] %v14089_v24  ;;  %v4923_v52 = vadd.f32 %v4860_v11, %v4859_v50  ;;  %2519 = vbcast.lane.b32.xlu1 %v2517_v34, 256  ;;  %2523 = vbcast.lane.b32.xlu0 %v2517_v34, 264  ;;  %10289 = vrcp.f32 %v6361_v46  ;;  %v4806_v48 = vunpack.c.h.bf16 %v10368_v60  ;;  %v4931_v40 = vrot.slane %v4930_v45, 4 }
 0x5a8   : > { %v10270_v55 = vpop.eup %10269  ;;  %v4944_v33 = vadd.f32 %v4866_v0, %v4865_v10  ;;  %v14102_v11 = vrot.slane %v14049_v4, %v13324_v6  ;;  %v4868_v62 = vmul.f32 %v4804_v43, %v13882_v47  ;;  %v4938_v28 = vrot.slane %v4937_v7, 4  ;;  %v16203_v47 = vld [vmem:[#allocation64_spill] sm:$0xff] }
 0x5a9   : > { %v10272_v30 = vpop.eup %10271  ;;  %v4493_v9 = vpop.permute.xlu1 %4492  ;;  %v4805_v50 = vunpack.c.l.bf16 %v10368_v60  ;;  %10291 = vrcp.f32 %v6354_v41  ;;  %v6356_v46 = vadd.f32 1.0, %v10270_v55  ;;  %v4924_v34 = vrot.slane %v4923_v52, 4 }
 0x5aa   : > { %v14098_v25 = vpop.permute.xlu0 %2475  ;;  %16202 = vst [vmem:[#allocation78_spill] sm:$0xff] %v14102_v11  ;;  %v10274_v5 = vpop.eup %10273  ;;  %v4867_v42 = vmul.f32 %v4803_v17, %v4493_v9  ;;  %v4945_v0 = vrot.slane %v4944_v33, 4  ;;  %10293 = vrcp.f32 %v6342_v2  ;;  %v6344_v13 = vadd.f32 1.0, %v10272_v30 }
 0x5ab   : > { %16201 = vst [vmem:[#allocation102_spill] sm:$0xff] %v14098_v25  ;;  %v14105_v29 = vpop.eup %10275  ;;  %2534 = vbcast.lane.b32.xlu0 %v14102_v11, 264  ;;  %4712 = vbcast.lane.b32.xlu1 %v13855_v37, 256  ;;  %v10369_v25 = vld [vmem:[%s11305_s14 + $0x30] sm:$0xff]   ;;  %v14111_v43 = vmul.f32 %v10274_v5, %v16203_v47  ;;  %v4932_v17 = vadd.f32 %v4931_v40, %v4930_v45  ;;  %10295 = vrcp.f32 %v6356_v46 }
 0x5ac   : > { %v10278_v10 = vpop.eup %10277  ;;  %v4808_v39 = vunpack.c.h.bf16 %v10369_v25  ;;  %v4951_v58 = vadd.f32 %v4868_v62, %v4867_v42  ;;  %v14117_v41 = vrot.slane %v14049_v4, %v13327_v54  ;;  %v4807_v55 = vunpack.c.l.bf16 %v10369_v25 }
 0x5ad   : > { %v4504_v60 = vpop.permute.xlu1 %4503  ;;  %v14119_v24 = vpop.eup %10279  ;;  %v4870_v37 = vmul.f32 %v4806_v48, %v13914_v26  ;;  %v4939_v2 = vadd.f32 %v4938_v28, %v4937_v7  ;;  %v6346_v5 = vadd.f32 1.0, %v10278_v10  ;;  %v4925_v45 = vadd.f32 %v4924_v34, %v4923_v52  ;;  %v10370_v7 = vld [vmem:[%s11305_s14 + $0x38] sm:$0xff]  }
 0x5ae   : > { %v14113_v9 = vpop.permute.xlu0 %2486  ;;  %16205 = vst [vmem:[#allocation110_spill] sm:$0xff] %v14117_v41  ;;  %v4952_v30 = vrot.slane %v4951_v58, 4  ;;  %v4869_v62 = vmul.f32 %v4805_v50, %v4504_v60  ;;  %v10282_v42 = vpop.eup %10281  ;;  %v4946_v40 = vadd.f32 %v4945_v0, %v4944_v33  ;;  %v6363_v25 = vadd.f32 1.0, %v14068_v3 }
 0x5af   : > { %16204 = vst [vmem:[#allocation99_spill] sm:$0xff] %v14113_v9  ;;  %2545 = vbcast.lane.b32.xlu0 %v14117_v41, 264  ;;  %4723 = vbcast.lane.b32.xlu1 %v13886_v23, 256  ;;  %v10284_v47 = vpop.eup %10283  ;;  %10297 = vrcp.f32 %v6344_v13  ;;  %v4810_v48 = vunpack.c.h.bf16 %v10370_v7  ;;  %v4933_v28 = vrot.slane %v4932_v17, 2  ;;  %v14130_v52 = vrot.slane %v14111_v43, %v13320_v8 }
 0x5b0   : > { %v4953_v9 = vadd.f32 %v4952_v30, %v4951_v58  ;;  %v4958_v11 = vadd.f32 %v4870_v37, %v4869_v62  ;;  %v10286_v26 = vpop.eup %10285  ;;  %v4809_v33 = vunpack.c.l.bf16 %v10370_v7  ;;  %v4872_v23 = vmul.f32 %v4808_v39, %v13939_v27 }
 0x5b1   : > { %v4515_v50 = vpop.permute.xlu1 %4514  ;;  %16207 = vst [vmem:[#allocation41_spill] sm:$0xff] %v14130_v52  ;;  %v4940_v46 = vrot.slane %v4939_v2, 2  ;;  %v6358_v13 = vadd.f32 1.0, %v10282_v42  ;;  %10299 = vrcp.f32 %v6346_v5  ;;  %v4926_v58 = vrot.slane %v4925_v45, 2 }
 0x5b2   : > { %v14126_v60 = vpop.permute.xlu0 %2497  ;;  %v4959_v34 = vrot.slane %v4958_v11, 4  ;;  %v4871_v3 = vmul.f32 %v4807_v55, %v4515_v50  ;;  %v4947_v0 = vrot.slane %v4946_v40, 2  ;;  %v14135_v10 = vpop.eup %10287  ;;  %v6360_v37 = vadd.f32 1.0, %v10284_v47 }
 0x5b3   : > { %16206 = vst [vmem:[#allocation107_spill] sm:$0xff] %v14126_v60  ;;  %2611 = vbcast.lane.b32.xlu0 %v14130_v52, 264  ;;  %4734 = vbcast.lane.b32.xlu1 %v13918_v59, 256  ;;  %v4954_v30 = vrot.slane %v4953_v9, 2  ;;  %v6362_v7 = vadd.f32 1.0, %v10286_v26  ;;  %v4874_v27 = vmul.f32 %v4810_v48, %v13971_v12  ;;  %v4934_v39 = vadd.f32 %v4933_v28, %v4932_v17 }
 0x5b4   : > { %v4960_v62 = vadd.f32 %v4959_v34, %v4958_v11  ;;  %v4965_v60 = vadd.f32 %v4872_v23, %v4871_v3  ;;  %v14142_v42 = vrot.slane %v14111_v43, %v13324_v6  ;;  %v14144_v5 = vpop.eup %10289  ;;  %v4941_v59 = vadd.f32 %v4940_v46, %v4939_v2 }
 0x5b5   : > { %v4526_v41 = vpop.permute.xlu1 %4525  ;;  %10301 = vrcp.f32 %v6358_v13  ;;  %v6730_v11 = vrot.slane %v14057_v16, %v11695_v63  ;;  %v4927_v26 = vadd.f32 %v4926_v58, %v4925_v45  ;;  %v4948_v12 = vadd.f32 %v4947_v0, %v4946_v40  ;;  %v14170_v13 = vld [vmem:[#allocation15 + $0x78] sm:$0xff] }
 0x5b6   : > { %v14138_v55 = vpop.permute.xlu0 %2508  ;;  %v4961_v50 = vrot.slane %v4960_v62, 2  ;;  %v4966_v52 = vrot.slane %v4965_v60, 4  ;;  %v4873_v47 = vmul.f32 %v4809_v33, %v4526_v41  ;;  %v14150_v17 = vpop.eup %10291  ;;  %10303 = vrcp.f32 %v6363_v25  ;;  %16211 = vst [vmem:[#allocation40_spill] sm:$0xff] %v14170_v13  ;;  %9203 = vmatprep.subr.mxu1 %v14170_v13 }
 0x5b7   : > { %16208 = vst [vmem:[#allocation77_spill] sm:$0xff] %v14138_v55  ;;  %2622 = vbcast.lane.b32.xlu0 %v14142_v42, 264  ;;  %4745 = vbcast.lane.b32.xlu1 %v13943_v19, 256  ;;  %v4955_v48 = vadd.f32 %v4954_v30, %v4953_v9  ;;  %v14152_v2 = vpop.eup %10293  ;;  %10305 = vrcp.f32 %v6360_v37  ;;  %v4935_v41 = vrot.slane %v4934_v39, 1  ;;  %v14160_v45 = vrot.slane %v14049_v4, %v13334_v61 }
 0x5b8   : > { %v4967_v28 = vadd.f32 %v4966_v52, %v4965_v60  ;;  %v4972_v23 = vadd.f32 %v4874_v27, %v4873_v47  ;;  %v4962_v33 = vadd.f32 %v4961_v50, %v4960_v62  ;;  %10307 = vrcp.f32 %v6362_v7  ;;  %v14172_v58 = vpop.eup %10295 }
 0x5b9   : > { %v14154_v46 = vpop.permute.xlu1 %2435  ;;  %v4942_v19 = vrot.slane %v4941_v59, 1  ;;  %v6793_v9 = vrot.slane %v14082_v53, %v11695_v63  ;;  %v16210_v60 = vrot.slane %v13888_v44, %v11688_v31  ;;  %v4928_v34 = vrot.slane %v4927_v26, 1 }
 0x5ba   : > { %16209 = vst [vmem:[#allocation112_spill] sm:$0xff] %v14154_v46  ;;  %v14156_v16 = vpop.permute.xlu0 %4536  ;;  %v4968_v40 = vrot.slane %v4967_v28, 2  ;;  %v4973_v25 = vrot.slane %v4972_v23, 4  ;;  %v4949_v3 = vrot.slane %v4948_v12, 1  ;;  %v4956_v53 = vrot.slane %v4955_v48, 1 }
 0x5bb   : > { %v6735_v52 = vsel %vm1961_vm0, %v16210_v60, %v6730_v11  ;;  %4756 = vbcast.lane.b32.xlu1 %v13975_v18, 256  ;;  %2556 = vbcast.lane.b32.xlu0 %v14160_v45, 264  ;;  %v6694_v18 = vrot.slane %v14105_v29, %v11695_v63  ;;  %v4936_v62 = vadd.f32 %v4935_v41, %v4934_v39  ;;  %v4963_v7 = vrot.slane %v4962_v33, 1 }
 0x5bc   : > { %v4969_v37 = vadd.f32 %v4968_v40, %v4967_v28  ;;  %v4974_v30 = vadd.f32 %v4973_v25, %v4972_v23  ;;  %v14177_v44 = vpop.eup %10297  ;;  %v14187_v47 = vrot.slane %v14111_v43, %v13327_v54  ;;  %v6860_v11 = vsel %vm2246_vm3, %v6735_v52, %v13992_v20  ;;  %v14192_v25 = vld [vmem:[%s11298_s6] sm:$0xff]  }
 0x5bd   : > { %v14181_v27 = vpop.permute.xlu1 %2446  ;;  %v4943_v28 = vadd.f32 %v4942_v19, %v4941_v59  ;;  %v2690_v29 = vunpack.c.l.bf16 %v14192_v25  ;;  %v16213_v39 = vrot.slane %v13931_v22, %v11688_v31  ;;  %v4929_v60 = vadd.f32 %v4928_v34, %v4927_v26 }
 0x5be   : > { %16212 = vst [vmem:[#allocation50_spill] sm:$0xff] %v14181_v27  ;;  %v14183_v50 = vpop.permute.xlu0 %4547  ;;  %v4970_v23 = vrot.slane %v4969_v37, 1  ;;  %v4975_v40 = vrot.slane %v4974_v30, 2  ;;  %v4950_v0 = vadd.f32 %v4949_v3, %v4948_v12  ;;  %v10300_v55 = vpop.eup %10299  ;;  %v6739_v20 = vrot.slane %v14135_v10, %v11695_v63 }
 0x5bf   : > { %v6798_v41 = vsel %vm1961_vm0, %v16213_v39, %v6793_v9  ;;  %4767 = vbcast.lane.b32.xlu1 %v14003_v51, 256  ;;  %2633 = vbcast.lane.b32.xlu0 %v14187_v47, 264  ;;  %v6824_v59 = vrot.slane %v14085_v21, %v11688_v31  ;;  %v4957_v19 = vadd.f32 %v4956_v53, %v4955_v48 }
 0x5c0   : > { %v4976_v52 = vadd.f32 %v4975_v40, %v4974_v30  ;;  %v16214_v22 = vrot.slane %v13959_v32, %v11688_v31  ;;  %v7648_v26 = vsel %vm2242_vm1, %v4936_v62, %v4929_v60  ;;  %v4964_v12 = vadd.f32 %v4963_v7, %v4962_v33 }
 0x5c1   : > { %v14210_v51 = vpop.permute.xlu1 %2457  ;;  %v14216_v10 = vrot.slane %v14049_v4, %v13340_v38  ;;  %v6748_v21 = vrot.slane %v14152_v2, %v11695_v63  ;;  %v6802_v48 = vrot.slane %v14150_v17, %v11695_v63  ;;  %v4971_v32 = vadd.f32 %v4970_v23, %v4969_v37 }
 0x5c2   : > { %v6699_v9 = vsel %vm1961_vm0, %v16214_v22, %v6694_v18  ;;  %16215 = vst [vmem:[#allocation57_spill] sm:$0xff] %v14210_v51  ;;  %v14212_v34 = vpop.permute.xlu0 %4562  ;;  %v7649_v3 = vsel %vm2244_vm2, %v4943_v28, %v7648_v26  ;;  %v6811_v33 = vrot.slane %v14172_v58, %v11695_v63  ;;  %v6866_v53 = vsel %vm2244_vm2, %v6798_v41, %v14034_v14  ;;  %v10302_v2 = vpop.eup %10301 }
 0x5c3   : > { %4778 = vbcast.lane.b32.xlu1 %v14031_v56, 256  ;;  %2567 = vbcast.lane.b32.xlu0 %v14216_v10, 264  ;;  %v4977_v30 = vrot.slane %v4976_v52, 1  ;;  %v7650_v18 = vsel %vm2246_vm3, %v4950_v0, %v7649_v3  ;;  %v6857_v17 = vsel %vm2254_vm7, %v6699_v9, %v14093_v49  ;;  %v16216_v37 = vrot.slane %v13977_v35, %v11688_v31  ;;  %v10304_v56 = vpop.eup %10303 }
 0x5c4   : > { %v6770_v58 = vrot.slane %v14119_v24, %v11688_v31  ;;  %v7651_v14 = vsel %vm2248_vm4, %v4957_v19, %v7650_v18  ;;  %v6757_v7 = vrot.slane %v14177_v44, %v11695_v63  ;;  %v14247_v49 = vrot.slane %v14111_v43, %v13334_v61  ;;  %v10306_v40 = vpop.eup %10305  ;;  %v16219_v44 = vld [vmem:[#allocation103_spill] sm:$0xff] }
 0x5c5   : > { %v6744_v62 = vsel %vm1961_vm0, %v16216_v37, %v6739_v20  ;;  %v14241_v28 = vpop.permute.xlu1 %2468  ;;  %v4978_v35 = vadd.f32 %v4977_v30, %v4976_v52  ;;  %v7652_v23 = vsel %vm2250_vm5, %v4964_v12, %v7651_v14  ;;  %v6766_v24 = vrot.slane %v10300_v55, %v11695_v63  ;;  %v10308_v22 = vpop.eup %10307  ;;  %v16223_v12 = vld [vmem:[#allocation42_spill] sm:$0xff] }
 0x5c6   : > { %16217 = vst [vmem:[#allocation45_spill] sm:$0xff] %v14241_v28  ;;  %v14243_v0 = vpop.permute.xlu0 %4573  ;;  %v16218_v39 = vrot.slane %v14011_v15, %v11688_v31  ;;  %v16220_v60 = vrot.slane %v16219_v44, %v11688_v31  ;;  %v7653_v19 = vsel %vm16221_vm9, %v4971_v32, %v7652_v23  ;;  %v2691_v52 = vunpack.c.h.bf16 %v14192_v25  ;;  %v16229_v23 = vld [vmem:[#allocation78_spill] sm:$0xff] }
 0x5c7   : > { %v16222_v9 = vrot.slane %v14037_v36, %v11688_v31  ;;  %v6820_v26 = vrot.slane %v10302_v2, %v11695_v63  ;;  %4789 = vbcast.lane.b32.xlu1 %v14055_v1, 256  ;;  %2644 = vbcast.lane.b32.xlu0 %v14247_v49, 264  ;;  %v7654_v15 = vsel %vm2254_vm7, %v4978_v35, %v7653_v19  ;;  %v16227_v2 = vld [vmem:[#allocation111_spill] sm:$0xff]  ;;  %v16255_v25 = vld [vmem:[#allocation58_spill] sm:$0xff] }
 0x5c8   : > { %v6753_v41 = vsel %vm1961_vm0, %v16218_v39, %v6748_v21  ;;  %v6807_v20 = vsel %vm1961_vm0, %v16220_v60, %v6802_v48  ;;  %v16224_v21 = vld [vmem:[#allocation43_spill] sm:$0xff]  ;;  %v6861_v48 = vsel %vm2248_vm4, %v6744_v62, %v6860_v11  ;;  %v6833_v32 = vrot.slane %v14144_v5, %v11688_v31  ;;  %9197 = vmatprep.mubr.f32.mxu1 %v7654_v15  ;;  %v14520_v28 = vld [vmem:[%s11298_s6 + $0x70] sm:$0xff]  }
 0x5c9   : > { %v6816_v55 = vsel %vm1961_vm0, %v16222_v9, %v6811_v33  ;;  %vm5224_vm10 = vcmp.lt.s32.totalorder %v16224_v21, %v16223_v12  ;;  %v6842_v36 = vrot.slane %v10304_v56, %v11688_v31  ;;  %v16225_v3 = vrot.slane %v14060_v57, %v11688_v31  ;;  %v14281_v18 = vpop.permute.xlu1 %2479  ;;  %v16234_v19 = vld [vmem:[#allocation47_spill] sm:$0xff] }
 0x5ca   : > { %v6829_v33 = vrot.slane %v10306_v40, %v11695_v63  ;;  %v6867_v30 = vsel %vm2246_vm3, %v6807_v20, %v6866_v53  ;;  %16226 = vst [vmem:[#allocation87_spill] sm:$0xff] %v14281_v18  ;;  %v14283_v11 = vpop.permute.xlu0 %4584  ;;  %v14287_v5 = vrot.slane %v14049_v4, %v16227_v2  ;;  %v6771_v37 = vsel %vm1961_vm0, %v6770_v58, %v6766_v24  ;;  %v16228_v53 = vld [vmem:[#allocation106_spill] sm:$0xff]  ;;  %v16231_v58 = vld [vmem:[#allocation52_spill] sm:$0xff]  ;;  %v16232_v24 = vld [vmem:[#allocation59_spill] sm:$0xff] }
 0x5cb   : > { %v6762_v1 = vsel %vm1961_vm0, %v16225_v3, %v6757_v7  ;;  %v6862_v62 = vsel %vm2250_vm5, %v6753_v41, %v6861_v48  ;;  %v6838_v31 = vrot.slane %v10308_v22, %v11695_v63  ;;  %v6868_v57 = vsel %vm2248_vm4, %v6816_v55, %v6867_v30  ;;  %v14299_v7 = vld [vmem:[%s11298_s6 + $0x8] sm:$0xff]   ;;  %2530 = vbcast.lane.b32.xlu1 %v16229_v23, 256  ;;  %v14335_v15 = vld [vmem:[%s11298_s6 + $0x18] sm:$0xff]   ;;  %v16236_v48 = vld [vmem:[#allocation110_spill] sm:$0xff] }
 0x5cc   : > { %v14293_v14 = vsel %vm5224_vm10, %v6857_v17, 0.0  ;;  %vm5223_vm11 = vcmp.lt.s32.totalorder %v16224_v21, %v16228_v53  ;;  %v6825_v56 = vsel %vm1961_vm0, %v6824_v59, %v6820_v26  ;;  %2578 = vbcast.lane.b32.xlu0 %v14287_v5, 264  ;;  %v6863_v63 = vsel %vm16230_vm12, %v6762_v1, %v6862_v62  ;;  %v14308_v17 = vld [vmem:[%s11298_s6 + $0x10] sm:$0xff]   ;;  %v16249_v40 = vld [vmem:[#allocation49_spill] sm:$0xff]  ;;  %v16250_v35 = vld [vmem:[#allocation55_spill] sm:$0xff]  ;;  %16275 = vst [vmem:[#allocation106_spill] sm:$0xff] %v14520_v28 }
 0x5cd   : > { %vm5226_vm13 = vcmp.lt.s32.totalorder %v16224_v21, %v16231_v58  ;;  %vm5225_vm14 = vcmp.lt.s32.totalorder %v16224_v21, %v16232_v24  ;;  %v6864_v39 = vsel %vm2254_vm7, %v6771_v37, %v6863_v63  ;;  %v6834_v41 = vsel %vm1961_vm0, %v6833_v32, %v6829_v33  ;;  %v14316_v44 = vpop.permute.xlu1 %2490  ;;  %v14360_v37 = vld [vmem:[%s11298_s6 + $0x20] sm:$0xff]  }
 0x5ce   : > { %16233 = vst [vmem:[#allocation67_spill] sm:$0xff] %v14316_v44  ;;  %v14318_v60 = vpop.permute.xlu0 %4595  ;;  %v14322_v20 = vrot.slane %v14111_v43, %v13340_v38  ;;  %v6876_v22 = vsel %vm5223_vm11, %v16234_v19, 0.0  ;;  %v6843_v9 = vsel %vm1961_vm0, %v6842_v36, %v6838_v31  ;;  %v6869_v55 = vsel %vm2250_vm5, %v6825_v56, %v6868_v57  ;;  %vm16240_vm0 = vmmov %vm16178_vm6 }
 0x5cf   : > { %v14332_v26 = vrot.slane %v14293_v14, %v13320_v8  ;;  %2541 = vbcast.lane.b32.xlu1 %v16236_v48, 256  ;;  %v14342_v32 = vrot.slane %v14293_v14, %v13324_v6  ;;  %v14346_v36 = vrot.slane %v14293_v14, %v13327_v54  ;;  %v14350_v3 = vrot.slane %v14293_v14, %v13334_v61  ;;  %v16243_v48 = vld [vmem:[#allocation41_spill] sm:$0xff]  ;;  %vm16311_vm15 = vmmov %vm16240_vm0 }
 0x5d0   : > { %2655 = vbcast.lane.b32.xlu0 %v14322_v20, 264  ;;  %v14355_v1 = vsel %vm5225_vm14, %v6864_v39, 0.0  ;;  %v6870_v33 = vsel %vm16240_vm0, %v6834_v41, %v6869_v55  ;;  %v14369_v56 = vrot.slane %v6876_v22, %v13320_v8  ;;  %v14372_v23 = vrot.slane %v6876_v22, %v13324_v6  ;;  %vm16365_vm6 = vmmov %vm16240_vm0 }
 0x5d1   : > { %16235 = vst [vmem:[#allocation80_spill] sm:$0xff] %v14332_v26  ;;  %16237 = vst [vmem:[#allocation46_spill] sm:$0xff] %v14342_v32  ;;  %v6871_v31 = vsel %vm2254_vm7, %v6843_v9, %v6870_v33  ;;  %v14364_v57 = vpop.permute.xlu1 %2501  ;;  %v14375_v63 = vrot.slane %v6876_v22, %v13327_v54  ;;  %v14379_v39 = vrot.slane %v6876_v22, %v13334_v61  ;;  %v14388_v9 = vld [vmem:[%s11298_s6 + $0x28] sm:$0xff]  }
 0x5d2   : > { %16238 = vst [vmem:[#allocation96_spill] sm:$0xff] %v14350_v3  ;;  %16239 = vst [vmem:[#allocation68_spill] sm:$0xff] %v14355_v1  ;;  %v14366_v53 = vpop.permute.xlu0 %4606  ;;  %v14382_v41 = vrot.slane %v6876_v22, %v13340_v38  ;;  %v14385_v19 = vrot.slane %v6876_v22, %v16227_v2  ;;  %v14395_v33 = vrot.slane %v14293_v14, %v13340_v38  ;;  %v14408_v55 = vsel %vm5226_vm13, %v6871_v31, 0.0 }
 0x5d3   : > { %16241 = vst [vmem:[#allocation81_spill] sm:$0xff] %v14364_v57  ;;  %2607 = vbcast.lane.b32.xlu1 %v16243_v48, 256  ;;  %v14399_v62 = vrot.slane %v14355_v1, %v13320_v8  ;;  %v14403_v12 = vrot.slane %v14355_v1, %v13324_v6  ;;  %16247 = vst [vmem:[#allocation100_spill] sm:$0xff] %v14408_v55  ;;  %v16248_v48 = vld [vmem:[#allocation109_spill] sm:$0xff]  ;;  %v2755_v30 = vmul.f32 %v2691_v52, %v16249_v40  ;;  %v14452_v57 = vld [vmem:[%s11298_s6 + $0x30] sm:$0xff]  }
 0x5d4   : > { %16242 = vst [vmem:[#allocation94_spill] sm:$0xff] %v14385_v19  ;;  %6889 = vbcast.lane.b32.xlu0 %v14369_v56, 264  ;;  %16244 = vst [vmem:[#allocation66_spill] sm:$0xff] %v14395_v33  ;;  %v2754_v24 = vmul.f32 %v2690_v29, %v16248_v48  ;;  %v14417_v59 = vrot.slane %v6876_v22, %v16250_v35  ;;  %v14426_v21 = vrot.slane %v14293_v14, %v16227_v2  ;;  %v10390_v19 = vld [vmem:[%s11305_s14 + $0x58] sm:$0xff]  }
 0x5d5   : > { %16245 = vst [vmem:[#allocation97_spill] sm:$0xff] %v14399_v62  ;;  %16246 = vst [vmem:[#allocation71_spill] sm:$0xff] %v14403_v12  ;;  %v14420_v44 = vpop.permute.xlu1 %2512  ;;  %v14430_v29 = vrot.slane %v14355_v1, %v13327_v54  ;;  %v14433_v52 = vrot.slane %v6876_v22, %v16255_v25  ;;  %v14437_v58 = vrot.slane %v14293_v14, %v16250_v35  ;;  %v14471_v22 = vld [vmem:[%s11298_s6 + $0x38] sm:$0xff]   ;;  %v4818_v13 = vunpack.c.h.bf16 %v10390_v19 }
 0x5d6   : > { %16251 = vst [vmem:[#allocation72_spill] sm:$0xff] %v14417_v59  ;;  %16252 = vst [vmem:[#allocation98_spill] sm:$0xff] %v14420_v44  ;;  %v14422_v18 = vpop.permute.xlu0 %4617  ;;  %v14441_v40 = vrot.slane %v14355_v1, %v13334_v61  ;;  %v14445_v31 = vrot.slane %v14293_v14, %v16255_v25  ;;  %v14449_v48 = vrot.slane %v14355_v1, %v13340_v38 }
 0x5d7   : > { %16253 = vst [vmem:[#allocation63_spill] sm:$0xff] %v14426_v21  ;;  %16254 = vst [vmem:[#allocation74_spill] sm:$0xff] %v14430_v29  ;;  %2618 = vbcast.lane.b32.xlu1 %v14142_v42, 256  ;;  %v14463_v14 = vrot.slane %v14408_v55, %v13324_v6  ;;  %v14467_v38 = vrot.slane %v14408_v55, %v13327_v54  ;;  %v16268_v42 = vunpack.c.h.bf16 %v14299_v7  ;;  %v10387_v21 = vld [vmem:[%s11305_s14 + $0x48] sm:$0xff]  }
 0x5d8   : > { %16256 = vst [vmem:[#allocation60_spill] sm:$0xff] %v14433_v52  ;;  %16257 = vst [vmem:[#allocation82_spill] sm:$0xff] %v14437_v58  ;;  %6900 = vbcast.lane.b32.xlu0 %v14372_v23, 264  ;;  %v14504_v52 = vld [vmem:[%s11298_s6 + $0x50] sm:$0xff]   ;;  %v14534_v58 = vrot.slane %v14111_v43, %v16227_v2  ;;  %v14542_v46 = vrot.slane %v14111_v43, %v16250_v35  ;;  %v4813_v62 = vunpack.c.l.bf16 %v10387_v21 }
 0x5d9   : > { %16258 = vst [vmem:[#allocation101_spill] sm:$0xff] %v14441_v40  ;;  %16259 = vst [vmem:[#allocation84_spill] sm:$0xff] %v14445_v31  ;;  %v14459_v40 = vrot.slane %v14408_v55, %v13320_v8  ;;  %v14476_v8 = vrot.slane %v14408_v55, %v13334_v61  ;;  %v14480_v54 = vpop.permute.xlu1 %4540  ;;  %v14490_v31 = vrot.slane %v14355_v1, %v16227_v2  ;;  %v16267_v61 = vld [vmem:[#allocation56_spill] sm:$0xff]  ;;  %v16276_v1 = vld [vmem:[#allocation61_spill] sm:$0xff] }
 0x5da   : > { %16260 = vst [vmem:[#allocation108_spill] sm:$0xff] %v14449_v48  ;;  %16262 = vst [vmem:[#allocation90_spill] sm:$0xff] %v14463_v14  ;;  %v2818_v48 = vadd.f32 %v2755_v30, %v2754_v24  ;;  %v14482_v30 = vpop.permute.xlu0 %4628  ;;  %v14486_v24 = vrot.slane %v14049_v4, %v16250_v35  ;;  %v2757_v6 = vmul.f32 %v16268_v42, %v16267_v61  ;;  %v14496_v55 = vld [vmem:[%s11298_s6 + $0x40] sm:$0xff]   ;;  %v14508_v14 = vld [vmem:[%s11298_s6 + $0x58] sm:$0xff]  }
 0x5db   : > { %16261 = vst [vmem:[#allocation85_spill] sm:$0xff] %v14459_v40  ;;  %16263 = vst [vmem:[#allocation83_spill] sm:$0xff] %v14467_v38  ;;  %v14516_v61 = vld [vmem:[%s11298_s6 + $0x68] sm:$0xff]   ;;  %2552 = vbcast.lane.b32.xlu1 %v14160_v45, 256  ;;  %v16277_v40 = vunpack.c.l.bf16 %v14299_v7  ;;  %v14529_v42 = vld [vmem:[%s11298_s6 + $0x78] sm:$0xff]   ;;  %v4814_v45 = vunpack.c.h.bf16 %v10387_v21  ;;  %v14546_v7 = vrot.slane %v14111_v43, %v16255_v25 }
 0x5dc   : > { %16264 = vst [vmem:[#allocation93_spill] sm:$0xff] %v14471_v22  ;;  %16265 = vst [vmem:[#allocation86_spill] sm:$0xff] %v14476_v8  ;;  %v14500_v8 = vld [vmem:[%s11298_s6 + $0x48] sm:$0xff]   ;;  %2589 = vbcast.lane.b32.xlu0 %v14486_v24, 264  ;;  %v2819_v44 = vrot.slane %v2818_v48, 4  ;;  %v10389_v2 = vld [vmem:[%s11305_s14 + $0x50] sm:$0xff]  }
 0x5dd   : > { %16266 = vst [vmem:[#allocation88_spill] sm:$0xff] %v14490_v31  ;;  %16269 = vst [vmem:[#allocation91_spill] sm:$0xff] %v14496_v55  ;;  %v14512_v31 = vld [vmem:[%s11298_s6 + $0x60] sm:$0xff]   ;;  %v2756_v51 = vmul.f32 %v16277_v40, %v16276_v1  ;;  %v4552_v27 = vpop.permute.xlu1 %4551  ;;  %v4815_v38 = vunpack.c.l.bf16 %v10389_v2  ;;  %v14552_v55 = vrot.slane %v14049_v4, %v16255_v25  ;;  %v14572_v4 = vld [vmem:[%s11305_s14 + $0x70] sm:$0xff]  }
 0x5de   : > { %16270 = vst [vmem:[#allocation69_spill] sm:$0xff] %v14500_v8  ;;  %16271 = vst [vmem:[#allocation64_spill] sm:$0xff] %v14504_v52  ;;  %v14538_v59 = vpop.permute.xlu0 %4639  ;;  %v10388_v40 = vld [vmem:[%s11305_s14 + $0x40] sm:$0xff]   ;;  %v2820_v43 = vadd.f32 %v2819_v44, %v2818_v48  ;;  %v4878_v35 = vmul.f32 %v4814_v45, %v4552_v27  ;;  %v14566_v8 = vld [vmem:[%s11305_s14 + $0x68] sm:$0xff]   ;;  %v4817_v48 = vunpack.c.l.bf16 %v10390_v19 }
 0x5df   : > { %16272 = vst [vmem:[#allocation103_spill] sm:$0xff] %v14508_v14  ;;  %16273 = vst [vmem:[#allocation42_spill] sm:$0xff] %v14512_v31  ;;  %v2825_v1 = vadd.f32 %v2757_v6, %v2756_v51  ;;  %v4811_v29 = vunpack.c.l.bf16 %v10388_v40  ;;  %v4812_v33 = vunpack.c.h.bf16 %v10388_v40  ;;  %2629 = vbcast.lane.b32.xlu1 %v14187_v47, 256  ;;  %v4816_v51 = vunpack.c.h.bf16 %v10389_v2  ;;  %v10391_v25 = vld [vmem:[%s11305_s14 + $0x60] sm:$0xff]  }
 0x5e0   : > { %16274 = vst [vmem:[#allocation43_spill] sm:$0xff] %v14516_v61  ;;  %16278 = vst [vmem:[#allocation78_spill] sm:$0xff] %v14529_v42  ;;  %2666 = vbcast.lane.b32.xlu0 %v14534_v58, 264  ;;  %v4820_v12 = vunpack.c.h.bf16 %v10391_v25  ;;  %v4877_v6 = vmul.f32 %v4813_v62, %v14183_v50  ;;  %v2821_v45 = vrot.slane %v2820_v43, 2  ;;  %v16280_v21 = vld [vmem:[#allocation44_spill] sm:$0xff]  ;;  %v16283_v14 = vunpack.c.l.bf16 %v14308_v17  ;;  %v14629_v42 = vld [vmem:[%s11305_s14 + $0xa8] sm:$0xff]  }
 0x5e1   : > { %16279 = vst [vmem:[#allocation52_spill] sm:$0xff] %v14542_v46  ;;  %v4559_v40 = vpop.permute.xlu1 %4558  ;;  %v2826_v47 = vrot.slane %v2825_v1, 4  ;;  %v4876_v27 = vmul.f32 %v4812_v33, %v14480_v54  ;;  %v4880_v50 = vmul.f32 %v4816_v51, %v14212_v34  ;;  %v4819_v28 = vunpack.c.l.bf16 %v10391_v25  ;;  %v14591_v51 = vld [vmem:[%s11305_s14 + $0x78] sm:$0xff]   ;;  %v14605_v25 = vld [vmem:[%s11305_s14 + $0x90] sm:$0xff]   ;;  %16289 = vst [vmem:[#allocation47_spill] sm:$0xff] %v14629_v42 }
 0x5e2   : > { %v14563_v52 = vpop.permute.xlu0 %4650  ;;  %v4879_v44 = vmul.f32 %v4815_v38, %v4559_v40  ;;  %v16281_v38 = vunpack.c.h.bf16 %v14308_v17  ;;  %v16282_v40 = vld [vmem:[#allocation54_spill] sm:$0xff]  ;;  %v4986_v54 = vadd.f32 %v4878_v35, %v4877_v6  ;;  %v14599_v35 = vld [vmem:[%s11305_s14 + $0x88] sm:$0xff]   ;;  %vm16401_vm8 = vmmov %vm16240_vm0 }
 0x5e3   : > { %2563 = vbcast.lane.b32.xlu1 %v14216_v10, 256  ;;  %v2758_v33 = vmul.f32 %v16283_v14, %v16282_v40  ;;  %v4875_v10 = vmul.f32 %v4811_v29, %v14156_v16  ;;  %v2827_v61 = vadd.f32 %v2826_v47, %v2825_v1  ;;  %v14595_v14 = vld [vmem:[%s11305_s14 + $0x80] sm:$0xff]   ;;  %v16284_v6 = vld [vmem:[#allocation70_spill] sm:$0xff]  ;;  %v16285_v47 = vunpack.c.h.bf16 %v14335_v15  ;;  %vm16402_vm9 = vmmov %vm16240_vm0 }
 0x5e4   : > { %6911 = vbcast.lane.b32.xlu0 %v14375_v63, 264  ;;  %v2759_v19 = vmul.f32 %v16281_v38, %v16280_v21  ;;  %v4882_v21 = vmul.f32 %v4818_v13, %v14243_v0  ;;  %v4993_v38 = vadd.f32 %v4880_v50, %v4879_v44  ;;  %v2822_v13 = vadd.f32 %v2821_v45, %v2820_v43  ;;  %vm16406_vm10 = vmmov %vm16240_vm0 }
 0x5e5   : > { %v4570_v31 = vpop.permute.xlu1 %4569  ;;  %v4979_v62 = vadd.f32 %v4876_v27, %v4875_v10  ;;  %v2761_v44 = vmul.f32 %v16285_v47, %v16284_v6  ;;  %v14612_v27 = vld [vmem:[%s11305_s14 + $0x98] sm:$0xff]   ;;  %v16288_v6 = vunpack.c.l.bf16 %v14335_v15  ;;  %v4821_v50 = vunpack.c.l.bf16 %v14566_v8  ;;  %vm16459_vm11 = vmmov %vm16240_vm0 }
 0x5e6   : > { %v14587_v2 = vpop.permute.xlu0 %4661  ;;  %v4881_v34 = vmul.f32 %v4817_v48, %v4570_v31  ;;  %v2832_v0 = vadd.f32 %v2759_v19, %v2758_v33  ;;  %v4987_v48 = vrot.slane %v4986_v54, 4  ;;  %v2828_v19 = vrot.slane %v2827_v61, 2  ;;  %vm16460_vm12 = vmmov %vm16240_vm0 }
 0x5e7   : > { %2640 = vbcast.lane.b32.xlu1 %v14247_v49, 256  ;;  %v14616_v49 = vld [vmem:[%s11305_s14 + $0xa0] sm:$0xff]   ;;  %v4884_v33 = vmul.f32 %v4820_v12, %v14283_v11  ;;  %v4994_v10 = vrot.slane %v4993_v38, 4  ;;  %v4980_v16 = vrot.slane %v4979_v62, 4  ;;  %v2823_v43 = vrot.slane %v2822_v13, 1  ;;  %vm16462_vm13 = vmmov %vm16240_vm0 }
 0x5e8   : > { %6977 = vbcast.lane.b32.xlu0 %v14332_v26, 264  ;;  %v5000_v1 = vadd.f32 %v4882_v21, %v4881_v34  ;;  %v16287_v34 = vld [vmem:[#allocation95_spill] sm:$0xff]  ;;  %v2833_v29 = vrot.slane %v2832_v0, 4  ;;  %v16291_v12 = vunpack.c.l.bf16 %v14360_v37  ;;  %vm16470_vm14 = vmmov %vm16240_vm0 }
 0x5e9   : > { %v4581_v40 = vpop.permute.xlu1 %4580  ;;  %v2760_v47 = vmul.f32 %v16288_v6, %v16287_v34  ;;  %v4988_v34 = vadd.f32 %v4987_v48, %v4986_v54  ;;  %v4995_v3 = vadd.f32 %v4994_v10, %v4993_v38  ;;  %v4981_v11 = vadd.f32 %v4980_v16, %v4979_v62  ;;  %v14644_v54 = vld [vmem:[%s11305_s14 + $0xb0] sm:$0xff]  }
 0x5ea   : > { %v14619_v45 = vpop.permute.xlu0 %4672  ;;  %v4883_v21 = vmul.f32 %v4819_v28, %v4581_v40  ;;  %v5001_v31 = vrot.slane %v5000_v1, 4  ;;  %v16290_v28 = vld [vmem:[#allocation73_spill] sm:$0xff]  ;;  %v2824_v48 = vadd.f32 %v2823_v43, %v2822_v13  ;;  %v16296_v10 = vunpack.c.h.bf16 %v14572_v4 }
 0x5eb   : > { %16286 = vst [vmem:[#allocation59_spill] sm:$0xff] %v14619_v45  ;;  %2574 = vbcast.lane.b32.xlu1 %v14287_v5, 256  ;;  %v2762_v15 = vmul.f32 %v16291_v12, %v16290_v28  ;;  %v2839_v40 = vadd.f32 %v2761_v44, %v2760_v47  ;;  %v2829_v45 = vadd.f32 %v2828_v19, %v2827_v61  ;;  %v16293_v19 = vld [vmem:[#allocation92_spill] sm:$0xff]  ;;  %v4989_v16 = vrot.slane %v4988_v34, 2 }
 0x5ec   : > { %6988 = vbcast.lane.b32.xlu0 %v14342_v32, 264  ;;  %v5007_v17 = vadd.f32 %v4884_v33, %v4883_v21  ;;  %v4823_v32 = vunpack.c.l.bf16 %v14572_v4  ;;  %v16292_v33 = vunpack.c.h.bf16 %v14566_v8  ;;  %v5002_v42 = vadd.f32 %v5001_v31, %v5000_v1 }
 0x5ed   : > { %v4592_v6 = vpop.permute.xlu1 %4591  ;;  %v2834_v61 = vadd.f32 %v2833_v29, %v2832_v0  ;;  %v16294_v8 = vunpack.c.l.bf16 %v14388_v9  ;;  %v2840_v62 = vrot.slane %v2839_v40, 4  ;;  %v4888_v47 = vmul.f32 %v16296_v10, %v14366_v53  ;;  %v14659_v0 = vld [vmem:[%s11305_s14 + $0xb8] sm:$0xff]  }
 0x5ee   : > { %v14635_v5 = vpop.permute.xlu0 %4683  ;;  %v4886_v21 = vmul.f32 %v16292_v33, %v14318_v60  ;;  %v5008_v26 = vrot.slane %v5007_v17, 4  ;;  %v4885_v22 = vmul.f32 %v4821_v50, %v4592_v6  ;;  %v4825_v50 = vunpack.c.l.bf16 %v14591_v51  ;;  %16297 = vst [vmem:[#allocation41_spill] sm:$0xff] %v14659_v0  ;;  %v16298_v6 = vld [vmem:[#allocation79_spill] sm:$0xff] }
 0x5ef   : > { %2651 = vbcast.lane.b32.xlu1 %v14322_v20, 256  ;;  %v14650_v60 = vmul.f32 %v16294_v8, %v16293_v19  ;;  %v4996_v13 = vrot.slane %v4995_v3, 2  ;;  %v2830_v28 = vrot.slane %v2829_v45, 1  ;;  %v16299_v33 = vunpack.c.h.bf16 %v14360_v37  ;;  %v16300_v19 = vld [vmem:[#allocation53_spill] sm:$0xff] }
 0x5f0   : > { %2600 = vbcast.lane.b32.xlu0 %v14552_v55, 264  ;;  %v5009_v38 = vadd.f32 %v5008_v26, %v5007_v17  ;;  %v5014_v31 = vadd.f32 %v4886_v21, %v4885_v22  ;;  %v4982_v26 = vrot.slane %v4981_v11, 2  ;;  %v5003_v17 = vrot.slane %v5002_v42, 2 }
 0x5f1   : > { %v4603_v1 = vpop.permute.xlu1 %4602  ;;  %v2835_v22 = vrot.slane %v2834_v61, 2  ;;  %v2763_v4 = vmul.f32 %v16299_v33, %v16298_v6  ;;  %v16301_v8 = vunpack.c.l.bf16 %v14452_v57  ;;  %v4990_v10 = vadd.f32 %v4989_v16, %v4988_v34 }
 0x5f2   : > { %v14652_v20 = vpop.permute.xlu0 %4694  ;;  %v4887_v29 = vmul.f32 %v4823_v32, %v4603_v1  ;;  %v5015_v12 = vrot.slane %v5014_v31, 4  ;;  %v5010_v53 = vrot.slane %v5009_v38, 2  ;;  %v2841_v32 = vadd.f32 %v2840_v62, %v2839_v40 }
 0x5f3   : > { %16295 = vst [vmem:[#allocation110_spill] sm:$0xff] %v14652_v20  ;;  %6885 = vbcast.lane.b32.xlu1 %v14369_v56, 256  ;;  %v14670_v1 = vmul.f32 %v16301_v8, %v16300_v19  ;;  %v16302_v56 = vunpack.c.h.bf16 %v14591_v51  ;;  %v4997_v20 = vadd.f32 %v4996_v13, %v4995_v3  ;;  %v2831_v33 = vadd.f32 %v2830_v28, %v2829_v45 }
 0x5f4   : > { %2677 = vbcast.lane.b32.xlu0 %v14542_v46, 264  ;;  %v5021_v21 = vadd.f32 %v4888_v47, %v4887_v29  ;;  %v5016_v43 = vadd.f32 %v5015_v12, %v5014_v31  ;;  %v4983_v47 = vadd.f32 %v4982_v26, %v4981_v11  ;;  %v5004_v40 = vadd.f32 %v5003_v17, %v5002_v42 }
 0x5f5   : > { %v4614_v44 = vpop.permute.xlu1 %4613  ;;  %v4890_v46 = vmul.f32 %v16302_v56, %v14422_v18  ;;  %v2846_v34 = vadd.f32 %v2763_v4, %v2762_v15  ;;  %v5011_v16 = vadd.f32 %v5010_v53, %v5009_v38  ;;  %v2842_v12 = vrot.slane %v2841_v32, 2  ;;  %v16303_v15 = vld [vmem:[#allocation105_spill] sm:$0xff] }
 0x5f6   : > { %v14672_v0 = vpop.permute.xlu0 %4705  ;;  %v5022_v37 = vrot.slane %v5021_v21, 4  ;;  %v4889_v6 = vmul.f32 %v4825_v50, %v4614_v44  ;;  %v5017_v62 = vrot.slane %v5016_v43, 2  ;;  %v4991_v19 = vrot.slane %v4990_v10, 1 }
 0x5f7   : > { %6896 = vbcast.lane.b32.xlu1 %v14372_v23, 256  ;;  %v4827_v18 = vunpack.c.l.bf16 %v14595_v14  ;;  %v14682_v45 = vadd.f32 %v2835_v22, %v2834_v61  ;;  %v4998_v42 = vrot.slane %v4997_v20, 1  ;;  %v14685_v23 = vsel %vm2242_vm1, %v2831_v33, %v2824_v48 }
 0x5f8   : > { %6922 = vbcast.lane.b32.xlu0 %v14379_v39, 264  ;;  %v5023_v31 = vadd.f32 %v5022_v37, %v5021_v21  ;;  %v5028_v29 = vadd.f32 %v4890_v46, %v4889_v6  ;;  %v5018_v8 = vadd.f32 %v5017_v62, %v5016_v43  ;;  %v16304_v38 = vunpack.c.h.bf16 %v14388_v9 }
 0x5f9   : > { %v4625_v3 = vpop.permute.xlu1 %4624  ;;  %v4984_v50 = vrot.slane %v4983_v47, 1  ;;  %v5005_v13 = vrot.slane %v5004_v40, 1  ;;  %v2847_v43 = vrot.slane %v2846_v34, 4  ;;  %v5012_v28 = vrot.slane %v5011_v16, 1 }
 0x5fa   : > { %v14680_v51 = vpop.permute.xlu0 %4716  ;;  %v5024_v11 = vrot.slane %v5023_v31, 2  ;;  %v5029_v44 = vrot.slane %v5028_v29, 4  ;;  %v2765_v46 = vmul.f32 %v16304_v38, %v16303_v15  ;;  %v14692_v17 = vadd.f32 %v2842_v12, %v2841_v32 }
 0x5fb   : > { %2585 = vbcast.lane.b32.xlu1 %v14486_v24, 256  ;;  %v4992_v22 = vadd.f32 %v4991_v19, %v4990_v10  ;;  %v5019_v4 = vrot.slane %v5018_v8, 1  ;;  %v4829_v48 = vunpack.c.l.bf16 %v14599_v35  ;;  %v4999_v9 = vadd.f32 %v4998_v42, %v4997_v20  ;;  %v16305_v10 = vld [vmem:[#allocation62_spill] sm:$0xff] }
 0x5fc   : > { %6999 = vbcast.lane.b32.xlu0 %v14346_v36, 264  ;;  %v5025_v61 = vadd.f32 %v5024_v11, %v5023_v31  ;;  %v5030_v26 = vadd.f32 %v5029_v44, %v5028_v29  ;;  %v4831_v24 = vunpack.c.l.bf16 %v14605_v25  ;;  %v2837_v6 = vrot.slane %v14682_v45, 1 }
 0x5fd   : > { %v4636_v53 = vpop.permute.xlu1 %4635  ;;  %v2853_v33 = vadd.f32 %v2765_v46, %v14650_v60  ;;  %v4985_v62 = vadd.f32 %v4984_v50, %v4983_v47  ;;  %v5006_v31 = vadd.f32 %v5005_v13, %v5004_v40  ;;  %v14702_v32 = vadd.f32 %v2847_v43, %v2846_v34 }
 0x5fe   : > { %v14695_v21 = vpop.permute.xlu0 %4727  ;;  %v5026_v56 = vrot.slane %v5025_v61, 1  ;;  %v5031_v37 = vrot.slane %v5030_v26, 2  ;;  %v16306_v29 = vunpack.c.h.bf16 %v14452_v57  ;;  %v5013_v12 = vadd.f32 %v5012_v28, %v5011_v16 }
 0x5ff   : > { %2662 = vbcast.lane.b32.xlu1 %v14534_v58, 256  ;;  %v7655_v42 = vsel %vm2242_vm1, %v4992_v22, %v4985_v62  ;;  %v5020_v11 = vadd.f32 %v5019_v4, %v5018_v8  ;;  %v4893_v44 = vmul.f32 %v4829_v48, %v4636_v53  ;;  %v4833_v47 = vunpack.c.l.bf16 %v14612_v27 }
 0x600   : > { %2688 = vbcast.lane.b32.xlu0 %v14546_v7, 264  ;;  %v2767_v20 = vmul.f32 %v16306_v29, %v16305_v10  ;;  %v5032_v19 = vadd.f32 %v5031_v37, %v5030_v26  ;;  %v7656_v58 = vsel %vm2244_vm2, %v4999_v9, %v7655_v42  ;;  %v5027_v40 = vadd.f32 %v5026_v56, %v5025_v61  ;;  %v16312_v9 = vld [vmem:[#allocation48_spill] sm:$0xff]  ;;  %v16313_v56 = vld [vmem:[#allocation93_spill] sm:$0xff] }
 0x601   : > { %v4647_v15 = vpop.permute.xlu1 %4646  ;;  %v2854_v46 = vrot.slane %v2853_v33, 4  ;;  %v16307_v57 = vunpack.c.h.bf16 %v14599_v35  ;;  %v7657_v50 = vsel %vm2246_vm3, %v5006_v31, %v7656_v58  ;;  %v4891_v13 = vmul.f32 %v4827_v18, %v4625_v3  ;;  %v16315_v31 = vld [vmem:[#allocation80_spill] sm:$0xff] }
 0x602   : > { %v14708_v60 = vpop.permute.xlu0 %4738  ;;  %v5033_v34 = vrot.slane %v5032_v19, 1  ;;  %v4895_v38 = vmul.f32 %v4831_v24, %v4647_v15  ;;  %v2860_v8 = vadd.f32 %v2767_v20, %v14670_v1  ;;  %v16308_v43 = vunpack.c.h.bf16 %v14605_v25  ;;  %v14738_v24 = vld [vmem:[%s11305_s14 + $0xc0] sm:$0xff]  }
 0x603   : > { %v4894_v16 = vmul.f32 %v16307_v57, %v14538_v59  ;;  %6907 = vbcast.lane.b32.xlu1 %v14375_v63, 256  ;;  %v7658_v26 = vsel %vm2248_vm4, %v5013_v12, %v7657_v50  ;;  %v16309_v59 = vunpack.c.h.bf16 %v14595_v14  ;;  %v4835_v1 = vunpack.c.l.bf16 %v14616_v49  ;;  %v16316_v10 = vld [vmem:[#allocation96_spill] sm:$0xff]  ;;  %v16317_v12 = vld [vmem:[#allocation65_spill] sm:$0xff]  ;;  %v16320_v57 = vld [vmem:[#allocation59_spill] sm:$0xff] }
 0x604   : > { %6933 = vbcast.lane.b32.xlu0 %v14382_v41, 264  ;;  %v4896_v28 = vmul.f32 %v16308_v43, %v14563_v52  ;;  %v5034_v61 = vadd.f32 %v5033_v34, %v5032_v19  ;;  %v7659_v63 = vsel %vm2250_vm5, %v5020_v11, %v7658_v26  ;;  %v16310_v25 = vunpack.c.h.bf16 %v14612_v27  ;;  %v7598_v27 = vld [vmem:[#allocation15 + $0x70] sm:$0xff] }
 0x605   : > { %v4892_v35 = vmul.f32 %v16309_v59, %v14482_v30  ;;  %v5042_v22 = vadd.f32 %v4894_v16, %v4893_v44  ;;  %v4658_v18 = vpop.permute.xlu1 %4657  ;;  %v7660_v53 = vsel %vm16311_vm15, %v5027_v40, %v7659_v63  ;;  %v16314_v14 = vunpack.c.h.bf16 %v16313_v56  ;;  %v14757_v16 = vld [vmem:[%s11305_s14 + $0xc8] sm:$0xff]   ;;  %v16322_v26 = vld [vmem:[#allocation46_spill] sm:$0xff]  ;;  %vm16476_vm15 = vmmov %vm16240_vm0 }
 0x606   : > { %v14726_v3 = vpop.permute.xlu0 %4749  ;;  %v4898_v4 = vmul.f32 %v16310_v25, %v14587_v2  ;;  %v5049_v52 = vadd.f32 %v4896_v28, %v4895_v38  ;;  %v4897_v48 = vmul.f32 %v4833_v47, %v4658_v18  ;;  %v7661_v2 = vsel %vm2254_vm7, %v5034_v61, %v7660_v53  ;;  %v16319_v38 = vld [vmem:[#allocation40_spill] sm:$0xff]  ;;  %v16323_v59 = vld [vmem:[#allocation94_spill] sm:$0xff] }
 0x607   : > { %v2769_v30 = vmul.f32 %v16314_v14, %v16312_v9  ;;  %v5035_v37 = vadd.f32 %v4892_v35, %v4891_v13  ;;  %6973 = vbcast.lane.b32.xlu1 %v16315_v31, 256  ;;  %v2849_v29 = vrot.slane %v14702_v32, 2  ;;  %v2855_v20 = vadd.f32 %v2854_v46, %v2853_v33  ;;  %9198 = vmatmul.mubr.f32.vlgmr.msra.gmra.mxu1 %v7661_v2  ;;  %v16324_v35 = vld [vmem:[#allocation47_spill] sm:$0xff]  ;;  %v14765_v25 = vld [vmem:[%s11305_s14 + $0xd0] sm:$0xff]  }
 0x608   : > { %7010 = vbcast.lane.b32.xlu0 %v16316_v10, 264  ;;  %v16318_v19 = vunpack.c.l.bf16 %v16313_v56  ;;  %v5056_v11 = vadd.f32 %v4898_v4, %v4897_v48  ;;  %v2838_v44 = vadd.f32 %v2837_v6, %v14682_v45  ;;  %v2844_v15 = vrot.slane %v14692_v17, 1  ;;  %9204 = vmatpush3.msra.mxu1 %v16319_v38  ;;  %v7597_v6 = vld [vmem:[#allocation15 + $0x68] sm:$0xff]  ;;  %v14844_v4 = vld [vmem:[%s11305_s14 + $0xf0] sm:$0xff]  }
 0x609   : > { %v2861_v47 = vrot.slane %v2860_v8, 4  ;;  %v5043_v58 = vrot.slane %v5042_v22, 4  ;;  %v4669_v40 = vpop.permute.xlu1 %4668  ;;  %v16321_v33 = vunpack.c.h.bf16 %v14616_v49  ;;  %v5050_v13 = vrot.slane %v5049_v52, 4  ;;  %9205 = vmatprep.subr.mxu1 %v7598_v27 }
 0x60a   : > { %v2768_v42 = vmul.f32 %v16318_v19, %v16317_v12  ;;  %v14750_v34 = vpop.permute.xlu0 %4760  ;;  %v4899_v45 = vmul.f32 %v4835_v1, %v4669_v40  ;;  %v5036_v28 = vrot.slane %v5035_v37, 4  ;;  %v5057_v61 = vrot.slane %v5056_v11, 4  ;;  %9206 = vmatpush3.msra.mxu1 %v7598_v27 }
 0x60b   : > { %v4900_v46 = vmul.f32 %v16321_v33, %v16320_v57  ;;  %6984 = vbcast.lane.b32.xlu1 %v16322_v26, 256  ;;  %v4837_v18 = vunpack.c.l.bf16 %v16324_v35  ;;  %v2850_v49 = vadd.f32 %v2849_v29, %v14702_v32  ;;  %v2856_v63 = vrot.slane %v2855_v20, 2  ;;  %9207 = vmatprep.subr.mxu1 %v7597_v6 }
 0x60c   : > { %v2867_v43 = vadd.f32 %v2769_v30, %v2768_v42  ;;  %6944 = vbcast.lane.b32.xlu0 %v16323_v59, 264  ;;  %v2845_v1 = vadd.f32 %v2844_v15, %v14692_v17  ;;  %v2862_v53 = vadd.f32 %v2861_v47, %v2860_v8  ;;  %v5044_v9 = vadd.f32 %v5043_v58, %v5042_v22  ;;  %v7596_v30 = vld [vmem:[#allocation15 + $0x60] sm:$0xff]  ;;  %v16326_v42 = vld [vmem:[#allocation66_spill] sm:$0xff]  ;;  %v7595_v15 = vld [vmem:[#allocation15 + $0x58] sm:$0xff] }
 0x60d   : > { %v5063_v48 = vadd.f32 %v4900_v46, %v4899_v45  ;;  %v4680_v56 = vpop.permute.xlu1 %4679  ;;  %v7798_v32 = vsel %vm2244_vm2, %v2838_v44, %v14685_v23  ;;  %v16325_v31 = vunpack.c.h.bf16 %v16324_v35  ;;  %v5051_v29 = vadd.f32 %v5050_v13, %v5049_v52  ;;  %9208 = vmatpush3.msra.mxu1 %v7597_v6  ;;  %v14780_v44 = vld [vmem:[%s11305_s14 + $0xd8] sm:$0xff]   ;;  %v16329_v45 = vld [vmem:[#allocation41_spill] sm:$0xff] }
 0x60e   : > { %v14769_v14 = vpop.permute.xlu0 %4771  ;;  %v4839_v27 = vunpack.c.l.bf16 %v14644_v54  ;;  %v2868_v17 = vrot.slane %v2867_v43, 4  ;;  %v5037_v8 = vadd.f32 %v5036_v28, %v5035_v37  ;;  %v5058_v22 = vadd.f32 %v5057_v61, %v5056_v11  ;;  %9209 = vmatprep.subr.mxu1 %v7596_v30  ;;  %v16327_v11 = vld [vmem:[#allocation110_spill] sm:$0xff] }
 0x60f   : > { %v4902_v2 = vmul.f32 %v16325_v31, %v14635_v5  ;;  %v5064_v12 = vrot.slane %v5063_v48, 4  ;;  %v4901_v19 = vmul.f32 %v4837_v18, %v4680_v56  ;;  %2596 = vbcast.lane.b32.xlu1 %v14552_v55, 256  ;;  %v2851_v47 = vrot.slane %v2850_v49, 1  ;;  %9210 = vmatpush3.msra.mxu1 %v7596_v30  ;;  %v7594_v28 = vld [vmem:[#allocation15 + $0x50] sm:$0xff] }
 0x610   : > { %7021 = vbcast.lane.b32.xlu0 %v16326_v42, 264  ;;  %v2857_v23 = vadd.f32 %v2856_v63, %v2855_v20  ;;  %v2863_v58 = vrot.slane %v2862_v53, 2  ;;  %v5045_v40 = vrot.slane %v5044_v9, 2  ;;  %v7799_v55 = vsel %vm2246_vm3, %v2845_v1, %v7798_v32  ;;  %9211 = vmatprep.subr.mxu1 %v7595_v15  ;;  %v16330_v63 = vld [vmem:[#allocation52_spill] sm:$0xff] }
 0x611   : > { %v5065_v52 = vadd.f32 %v5064_v12, %v5063_v48  ;;  %v5070_v38 = vadd.f32 %v4902_v2, %v4901_v19  ;;  %v4691_v57 = vpop.permute.xlu1 %4690  ;;  %v16328_v33 = vunpack.c.h.bf16 %v14644_v54  ;;  %v5052_v20 = vrot.slane %v5051_v29, 2  ;;  %v16331_v48 = vld [vmem:[#allocation97_spill] sm:$0xff]  ;;  %9212 = vmatpush3.msra.mxu1 %v7595_v15  ;;  %v14795_v2 = vld [vmem:[%s11305_s14 + $0xe0] sm:$0xff]  }
 0x612   : > { %v14783_v37 = vpop.permute.xlu0 %4782  ;;  %v4903_v13 = vmul.f32 %v4839_v27, %v4691_v57  ;;  %v4841_v6 = vunpack.c.l.bf16 %v16329_v45  ;;  %v2869_v61 = vadd.f32 %v2868_v17, %v2867_v43  ;;  %v5038_v26 = vrot.slane %v5037_v8, 2  ;;  %9213 = vmatprep.subr.mxu1 %v7594_v28  ;;  %v7593_v19 = vld [vmem:[#allocation15 + $0x48] sm:$0xff] }
 0x613   : > { %v4904_v46 = vmul.f32 %v16328_v33, %v16327_v11  ;;  %v5059_v35 = vrot.slane %v5058_v22, 2  ;;  %v5071_v18 = vrot.slane %v5070_v38, 4  ;;  %2673 = vbcast.lane.b32.xlu1 %v16330_v63, 256  ;;  %v2852_v1 = vadd.f32 %v2851_v47, %v2850_v49  ;;  %9214 = vmatpush3.msra.mxu1 %v7594_v28  ;;  %v7592_v33 = vld [vmem:[#allocation15 + $0x40] sm:$0xff]  ;;  %v16337_v28 = vld [vmem:[#allocation91_spill] sm:$0xff] }
 0x614   : > { %7065 = vbcast.lane.b32.xlu0 %v16331_v48, 264  ;;  %v2858_v56 = vrot.slane %v2857_v23, 1  ;;  %v5066_v30 = vrot.slane %v5065_v52, 2  ;;  %v14792_v32 = vadd.f32 %v2863_v58, %v2862_v53  ;;  %v5046_v31 = vadd.f32 %v5045_v40, %v5044_v9  ;;  %9215 = vmatprep.subr.mxu1 %v7593_v19 }
 0x615   : > { %v5077_v54 = vadd.f32 %v4904_v46, %v4903_v13  ;;  %v5072_v43 = vadd.f32 %v5071_v18, %v5070_v38  ;;  %v4702_v27 = vpop.permute.xlu1 %4701  ;;  %v16332_v49 = vunpack.c.h.bf16 %v16329_v45  ;;  %v5053_v57 = vadd.f32 %v5052_v20, %v5051_v29  ;;  %v16333_v38 = vld [vmem:[#allocation71_spill] sm:$0xff]  ;;  %9216 = vmatpush3.msra.mxu1 %v7593_v19  ;;  %v16341_v19 = vld [vmem:[#allocation72_spill] sm:$0xff] }
 0x616   : > { %v14798_v17 = vpop.permute.xlu0 %4793  ;;  %v4905_v15 = vmul.f32 %v4841_v6, %v4702_v27  ;;  %v2870_v53 = vrot.slane %v2869_v61, 2  ;;  %v5039_v9 = vadd.f32 %v5038_v26, %v5037_v8  ;;  %v5060_v58 = vadd.f32 %v5059_v35, %v5058_v22  ;;  %9217 = vmatprep.subr.mxu1 %v7592_v33 }
 0x617   : > { %v4906_v47 = vmul.f32 %v16332_v49, %v14672_v0  ;;  %v5078_v11 = vrot.slane %v5077_v54, 4  ;;  %v5073_v40 = vrot.slane %v5072_v43, 2  ;;  %6918 = vbcast.lane.b32.xlu1 %v14379_v39, 256  ;;  %v5067_v46 = vadd.f32 %v5066_v30, %v5065_v52  ;;  %v16336_v39 = vld [vmem:[#allocation112_spill] sm:$0xff]  ;;  %v16342_v49 = vld [vmem:[#allocation50_spill] sm:$0xff]  ;;  %9218 = vmatpush3.msra.mxu1 %v7592_v33 }
 0x618   : > { %7076 = vbcast.lane.b32.xlu0 %v16333_v38, 264  ;;  %v14806_v45 = vsel %vm2248_vm4, %v2852_v1, %v7799_v55  ;;  %v14808_v0 = vadd.f32 %v2858_v56, %v2857_v23  ;;  %v2865_v29 = vrot.slane %v14792_v32, 1  ;;  %v5047_v20 = vrot.slane %v5046_v31, 1  ;;  %v7591_v23 = vld [vmem:[#allocation15 + $0x38] sm:$0xff]  ;;  %v16339_v1 = vld [vmem:[#allocation76_spill] sm:$0xff] }
 0x619   : > { %v5079_v13 = vadd.f32 %v5078_v11, %v5077_v54  ;;  %v5084_v18 = vadd.f32 %v4906_v47, %v4905_v15  ;;  %v5074_v8 = vadd.f32 %v5073_v40, %v5072_v43  ;;  %v14811_v22 = vpop.permute.xlu1 %2519  ;;  %v16338_v52 = vunpack.c.h.bf16 %v16337_v28  ;;  %v16343_v47 = vld [vmem:[#allocation69_spill] sm:$0xff]  ;;  %9219 = vmatprep.subr.mxu1 %v7591_v23 }
 0x61a   : > { %16334 = vst [vmem:[#allocation109_spill] sm:$0xff] %v14811_v22  ;;  %v14813_v6 = vpop.permute.xlu0 %2523  ;;  %v5054_v35 = vrot.slane %v5053_v57, 1  ;;  %v14818_v55 = vadd.f32 %v2870_v53, %v2869_v61  ;;  %v16340_v56 = vunpack.c.l.bf16 %v16337_v28  ;;  %v5040_v43 = vrot.slane %v5039_v9, 1  ;;  %v16345_v61 = vld [vmem:[#allocation89_spill] sm:$0xff]  ;;  %9220 = vmatpush3.msra.mxu1 %v7591_v23 }
 0x61b   : > { %16335 = vst [vmem:[#allocation49_spill] sm:$0xff] %v14813_v6  ;;  %v2771_v26 = vmul.f32 %v16338_v52, %v16336_v39  ;;  %v5080_v63 = vrot.slane %v5079_v13, 2  ;;  %v5085_v30 = vrot.slane %v5084_v18, 4  ;;  %v5061_v27 = vrot.slane %v5060_v58, 1  ;;  %6995 = vbcast.lane.b32.xlu1 %v14346_v36, 256 }
 0x61c   : > { %v2770_v54 = vmul.f32 %v16340_v56, %v16339_v1  ;;  %6955 = vbcast.lane.b32.xlu0 %v16341_v19, 264  ;;  %v16344_v11 = vunpack.c.h.bf16 %v16343_v47  ;;  %v5068_v40 = vrot.slane %v5067_v46, 1  ;;  %v16346_v53 = vunpack.c.l.bf16 %v16343_v47  ;;  %v14832_v56 = vld [vmem:[%s11305_s14 + $0xe8] sm:$0xff]  }
 0x61d   : > { %v5081_v39 = vadd.f32 %v5080_v63, %v5079_v13  ;;  %v5086_v52 = vadd.f32 %v5085_v30, %v5084_v18  ;;  %v5048_v28 = vadd.f32 %v5047_v20, %v5046_v31  ;;  %v5075_v1 = vrot.slane %v5074_v8, 1  ;;  %v4713_v5 = vpop.permute.xlu1 %4712  ;;  %v16348_v31 = vld [vmem:[#allocation63_spill] sm:$0xff]  ;;  %v7589_v20 = vld [vmem:[#allocation15 + $0x28] sm:$0xff] }
 0x61e   : > { %v2773_v15 = vmul.f32 %v16344_v11, %v16342_v49  ;;  %v2772_v12 = vmul.f32 %v16346_v53, %v16345_v61  ;;  %v14835_v62 = vpop.permute.xlu0 %2534  ;;  %v7590_v49 = vld [vmem:[#allocation15 + $0x30] sm:$0xff]  ;;  %v2874_v11 = vadd.f32 %v2771_v26, %v2770_v54  ;;  %v5055_v13 = vadd.f32 %v5054_v35, %v5053_v57 }
 0x61f   : > { %16347 = vst [vmem:[#allocation56_spill] sm:$0xff] %v14835_v62  ;;  %v5082_v18 = vrot.slane %v5081_v39, 1  ;;  %v5087_v33 = vrot.slane %v5086_v52, 2  ;;  %v5041_v63 = vadd.f32 %v5040_v43, %v5039_v9  ;;  %v5062_v30 = vadd.f32 %v5061_v27, %v5060_v58  ;;  %2684 = vbcast.lane.b32.xlu1 %v14546_v7, 256  ;;  %9221 = vmatprep.subr.mxu1 %v7590_v49  ;;  %v16349_v9 = vld [vmem:[#allocation51_spill] sm:$0xff]  ;;  %v16350_v58 = vld [vmem:[#allocation64_spill] sm:$0xff] }
 0x620   : > { %7032 = vbcast.lane.b32.xlu0 %v16348_v31, 264  ;;  %v14840_v47 = vadd.f32 %v2865_v29, %v14792_v32  ;;  %v2881_v53 = vadd.f32 %v2773_v15, %v2772_v12  ;;  %v5069_v36 = vadd.f32 %v5068_v40, %v5067_v46  ;;  %v16351_v35 = vunpack.c.l.bf16 %v16350_v58  ;;  %9222 = vmatpush3.msra.mxu1 %v7590_v49  ;;  %v7588_v40 = vld [vmem:[#allocation15 + $0x20] sm:$0xff]  ;;  %v16358_v61 = vld [vmem:[#allocation42_spill] sm:$0xff] }
 0x621   : > { %v5088_v26 = vadd.f32 %v5087_v33, %v5086_v52  ;;  %v7662_v23 = vsel %vm2242_vm1, %v5048_v28, %v5041_v63  ;;  %v5076_v54 = vadd.f32 %v5075_v1, %v5074_v8  ;;  %v4845_v32 = vunpack.c.l.bf16 %v14757_v16  ;;  %v4724_v29 = vpop.permute.xlu1 %4723  ;;  %9223 = vmatprep.subr.mxu1 %v7589_v20  ;;  %v16353_v52 = vld [vmem:[#allocation75_spill] sm:$0xff]  ;;  %v16356_v28 = vld [vmem:[#allocation74_spill] sm:$0xff] }
 0x622   : > { %v2774_v7 = vmul.f32 %v16351_v35, %v16349_v9  ;;  %v14852_v43 = vpop.permute.xlu0 %2545  ;;  %v2875_v12 = vrot.slane %v2874_v11, 4  ;;  %v4847_v46 = vunpack.c.l.bf16 %v14765_v25  ;;  %v5083_v27 = vadd.f32 %v5082_v18, %v5081_v39  ;;  %v16354_v33 = vld [vmem:[#allocation103_spill] sm:$0xff]  ;;  %v16357_v63 = vld [vmem:[#allocation102_spill] sm:$0xff]  ;;  %9224 = vmatpush3.msra.mxu1 %v7589_v20 }
 0x623   : > { %16352 = vst [vmem:[#allocation61_spill] sm:$0xff] %v14852_v43  ;;  %v7663_v15 = vsel %vm2244_vm2, %v5055_v13, %v7662_v23  ;;  %v16355_v9 = vunpack.c.l.bf16 %v16354_v33  ;;  %v4843_v8 = vunpack.c.l.bf16 %v14738_v24  ;;  %6929 = vbcast.lane.b32.xlu1 %v14382_v41, 256  ;;  %v5089_v1 = vrot.slane %v5088_v26, 1  ;;  %v16360_v13 = vld [vmem:[#allocation99_spill] sm:$0xff]  ;;  %v16363_v41 = vld [vmem:[#allocation57_spill] sm:$0xff]  ;;  %9225 = vmatprep.subr.mxu1 %v7588_v40 }
 0x624   : > { %7087 = vbcast.lane.b32.xlu0 %v16356_v28, 264  ;;  %v7664_v49 = vsel %vm2246_vm3, %v5062_v30, %v7663_v15  ;;  %v16359_v39 = vunpack.c.l.bf16 %v16358_v61  ;;  %v16361_v23 = vld [vmem:[#allocation43_spill] sm:$0xff]  ;;  %v16364_v43 = vunpack.c.h.bf16 %v16350_v58  ;;  %v4909_v30 = vmul.f32 %v4845_v32, %v4724_v29  ;;  %9226 = vmatpush3.msra.mxu1 %v7588_v40 }
 0x625   : > { %v2776_v35 = vmul.f32 %v16355_v9, %v16353_v52  ;;  %v16362_v57 = vunpack.c.l.bf16 %v16361_v23  ;;  %v2882_v52 = vrot.slane %v2881_v53, 4  ;;  %v7665_v9 = vsel %vm2248_vm4, %v5069_v36, %v7664_v49  ;;  %v4735_v15 = vpop.permute.xlu1 %4734  ;;  %v7587_v20 = vld [vmem:[#allocation15 + $0x18] sm:$0xff]  ;;  %v16371_v49 = vld [vmem:[#allocation45_spill] sm:$0xff] }
 0x626   : > { %v14866_v18 = vmul.f32 %v16359_v39, %v16357_v63  ;;  %v2775_v62 = vmul.f32 %v16364_v43, %v16363_v41  ;;  %v14877_v6 = vpop.permute.xlu0 %2611  ;;  %v5090_v63 = vadd.f32 %v5089_v1, %v5088_v26  ;;  %v7666_v39 = vsel %vm2250_vm5, %v5076_v54, %v7665_v9  ;;  %v14886_v32 = vld [vmem:[%s11305_s14 + $0xf8] sm:$0xff]   ;;  %v16367_v54 = vld [vmem:[#allocation85_spill] sm:$0xff]  ;;  %9227 = vmatprep.subr.mxu1 %v7587_v20 }
 0x627   : > { %v14871_v50 = vmul.f32 %v16362_v57, %v16360_v13  ;;  %v2876_v22 = vadd.f32 %v2875_v12, %v2874_v11  ;;  %v4911_v57 = vmul.f32 %v4847_v46, %v4735_v15  ;;  %v7667_v13 = vsel %vm16365_vm6, %v5083_v27, %v7666_v39  ;;  %7006 = vbcast.lane.b32.xlu1 %v16316_v10, 256  ;;  %v16368_v12 = vld [vmem:[#allocation107_spill] sm:$0xff]  ;;  %v16369_v46 = vld [vmem:[#allocation106_spill] sm:$0xff] }
 0x628   : > { %v4849_v36 = vunpack.c.l.bf16 %v14780_v44  ;;  %v16366_v58 = vunpack.c.h.bf16 %v14757_v16  ;;  %v4858_v29 = vunpack.c.h.bf16 %v14886_v32  ;;  %v4907_v26 = vmul.f32 %v4843_v8, %v4713_v5  ;;  %7153 = vbcast.lane.b32.xlu0 %v16367_v54, 264  ;;  %v16374_v5 = vld [vmem:[#allocation77_spill] sm:$0xff]  ;;  %v16375_v10 = vld [vmem:[#allocation78_spill] sm:$0xff]  ;;  %9228 = vmatpush3.msra.mxu1 %v7587_v20 }
 0x629   : > { %v7668_v11 = vsel %vm2254_vm7, %v5090_v63, %v7667_v13  ;;  %v16370_v27 = vunpack.c.l.bf16 %v16369_v46  ;;  %v2883_v1 = vadd.f32 %v2882_v52, %v2881_v53  ;;  %v16372_v16 = vunpack.c.h.bf16 %v16354_v33  ;;  %v4746_v53 = vpop.permute.xlu1 %4745  ;;  %v7586_v33 = vld [vmem:[#allocation15 + $0x10] sm:$0xff] }
 0x62a   : > { %v4910_v43 = vmul.f32 %v16366_v58, %v14695_v21  ;;  %v16373_v9 = vunpack.c.h.bf16 %v14765_v25  ;;  %9200 = vmatprep.mubr.f32.mxu1 %v7668_v11  ;;  %v16376_v8 = vunpack.c.l.bf16 %v16375_v10  ;;  %v2888_v39 = vadd.f32 %v2775_v62, %v2774_v7  ;;  %v14907_v52 = vpop.permute.xlu0 %2622  ;;  %9229 = vmatprep.subr.mxu1 %v7586_v33 }
 0x62b   : > { %v2782_v40 = vmul.f32 %v16370_v27, %v16368_v12  ;;  %v2777_v21 = vmul.f32 %v16372_v16, %v16371_v49  ;;  %v16377_v63 = vunpack.c.h.bf16 %v14738_v24  ;;  %v16378_v25 = vunpack.c.h.bf16 %v14780_v44  ;;  %6940 = vbcast.lane.b32.xlu1 %v16323_v59, 256  ;;  %v16380_v44 = vld [vmem:[#allocation87_spill] sm:$0xff]  ;;  %9230 = vmatpush3.msra.mxu1 %v7586_v33 }
 0x62c   : > { %v4912_v41 = vmul.f32 %v16373_v9, %v14708_v60  ;;  %v2784_v15 = vmul.f32 %v16376_v8, %v16374_v5  ;;  %v5098_v58 = vadd.f32 %v4910_v43, %v4909_v30  ;;  %v4913_v12 = vmul.f32 %v4849_v36, %v4746_v53  ;;  %v7585_v43 = vld [vmem:[#allocation15 + $0x8] sm:$0xff]  ;;  %v16382_v9 = vld [vmem:[#allocation67_spill] sm:$0xff] }
 0x62d   : > { %v4908_v13 = vmul.f32 %v16377_v63, %v14680_v51  ;;  %v4914_v60 = vmul.f32 %v16378_v25, %v14726_v3  ;;  %v4851_v27 = vunpack.c.l.bf16 %v14795_v2  ;;  %v2877_v62 = vrot.slane %v2876_v22, 2  ;;  %v16379_v51 = vld [vmem:[#allocation90_spill] sm:$0xff]  ;;  %9231 = vmatprep.subr.mxu1 %v7585_v43 }
 0x62e   : > { %v5105_v11 = vadd.f32 %v4912_v41, %v4911_v57  ;;  %7164 = vbcast.lane.b32.xlu0 %v16379_v51, 264  ;;  %v4853_v24 = vunpack.c.l.bf16 %v14832_v56  ;;  %v4855_v30 = vunpack.c.l.bf16 %v14844_v4  ;;  %v2884_v49 = vrot.slane %v2883_v1, 2  ;;  %v16384_v41 = vld [vmem:[#allocation81_spill] sm:$0xff]  ;;  %v14926_v53 = vpop.permute.xlu0 %2556  ;;  %9232 = vmatpush3.msra.mxu1 %v7585_v43 }
 0x62f   : > { %v5091_v7 = vadd.f32 %v4908_v13, %v4907_v26  ;;  %v2895_v16 = vadd.f32 %v2777_v21, %v2776_v35  ;;  %v16381_v3 = vunpack.c.h.bf16 %v16358_v61  ;;  %v5112_v36 = vadd.f32 %v4914_v60, %v4913_v12  ;;  %v4757_v13 = vpop.permute.xlu1 %4756  ;;  %v16386_v35 = vld [vmem:[#allocation98_spill] sm:$0xff]  ;;  %7017 = vbcast.lane.b32.xlu1 %v16326_v42, 256 }
 0x630   : > { %v2889_v20 = vrot.slane %v2888_v39, 4  ;;  %v16383_v26 = vunpack.c.h.bf16 %v16361_v23  ;;  %v16385_v5 = vunpack.c.h.bf16 %v16369_v46  ;;  %v5099_v63 = vrot.slane %v5098_v58, 4 }
 0x631   : > { %v2779_v57 = vmul.f32 %v16381_v3, %v16380_v44  ;;  %v16387_v61 = vunpack.c.h.bf16 %v16375_v10  ;;  %v16388_v25 = vunpack.c.h.bf16 %v14795_v2  ;;  %v5106_v12 = vrot.slane %v5105_v11, 4  ;;  %v7584_v44 = vld [vmem:[#allocation15] sm:$0xff] }
 0x632   : > { %v2781_v59 = vmul.f32 %v16383_v26, %v16382_v9  ;;  %v2783_v8 = vmul.f32 %v16385_v5, %v16384_v41  ;;  %v4915_v23 = vmul.f32 %v4851_v27, %v4757_v13  ;;  %v14934_v3 = vadd.f32 %v2877_v62, %v2876_v22  ;;  %v16389_v26 = vld [vmem:[#allocation60_spill] sm:$0xff]  ;;  %9233 = vmatprep.subr.mxu1 %v7584_v44 }
 0x633   : > { %v2785_v21 = vmul.f32 %v16387_v61, %v16386_v35  ;;  %v4916_v60 = vmul.f32 %v16388_v25, %v14750_v34  ;;  %v5092_v46 = vrot.slane %v5091_v7, 4  ;;  %v5113_v9 = vrot.slane %v5112_v36, 4  ;;  %6966 = vbcast.lane.b32.xlu0 %v16389_v26, 264  ;;  %v4768_v13 = vpop.permute.xlu1 %4767  ;;  %v14943_v35 = vpop.permute.xlu0 %2633  ;;  %9234 = vmatpush3.msra.mxu1 %v7584_v44  ;;  %v16393_v44 = vld [vmem:[#allocation101_spill] sm:$0xff] }
 0x634   : > { %v4857_v33 = vunpack.c.l.bf16 %v14886_v32  ;;  %v14939_v10 = vadd.f32 %v2884_v49, %v2883_v1  ;;  %v2896_v41 = vrot.slane %v2895_v16, 4  ;;  %v2902_v2 = vadd.f32 %v2779_v57, %v14866_v18  ;;  %7061 = vbcast.lane.b32.xlu1 %v16331_v48, 256 }
 0x635   : > { %v5119_v34 = vadd.f32 %v4916_v60, %v4915_v23  ;;  %v2890_v27 = vadd.f32 %v2889_v20, %v2888_v39  ;;  %v2909_v5 = vadd.f32 %v2781_v59, %v14871_v50  ;;  %v2916_v22 = vadd.f32 %v2783_v8, %v2782_v40  ;;  %v16391_v50 = vld [vmem:[#allocation82_spill] sm:$0xff] }
 0x636   : > { %v5100_v62 = vadd.f32 %v5099_v63, %v5098_v58  ;;  %v2923_v42 = vadd.f32 %v2785_v21, %v2784_v15  ;;  %v16390_v61 = vunpack.c.h.bf16 %v14832_v56  ;;  %v5107_v49 = vadd.f32 %v5106_v12, %v5105_v11 }
 0x637   : > { %v5120_v25 = vrot.slane %v5119_v34, 4  ;;  %v5093_v43 = vadd.f32 %v5092_v46, %v5091_v7  ;;  %v5114_v39 = vadd.f32 %v5113_v9, %v5112_v36  ;;  %v4917_v57 = vmul.f32 %v4853_v24, %v4768_v13  ;;  %7043 = vbcast.lane.b32.xlu0 %v16391_v50, 264  ;;  %v4779_v8 = vpop.permute.xlu1 %4778  ;;  %v14952_v63 = vpop.permute.xlu0 %2567 }
 0x638   : > { %v4918_v1 = vmul.f32 %v16390_v61, %v14769_v14  ;;  %v2897_v58 = vadd.f32 %v2896_v41, %v2895_v16  ;;  %v2903_v15 = vrot.slane %v2902_v2, 4  ;;  %v2910_v59 = vrot.slane %v2909_v5, 4  ;;  %7072 = vbcast.lane.b32.xlu1 %v16333_v38, 256 }
 0x639   : > { %v5121_v20 = vadd.f32 %v5120_v25, %v5119_v34  ;;  %v2917_v56 = vrot.slane %v2916_v22, 4  ;;  %v5101_v14 = vrot.slane %v5100_v62, 2  ;;  %v2891_v21 = vrot.slane %v2890_v27, 2 }
 0x63a   : > { %v5126_v11 = vadd.f32 %v4918_v1, %v4917_v57  ;;  %v16392_v7 = vunpack.c.h.bf16 %v14844_v4  ;;  %v5108_v48 = vrot.slane %v5107_v49, 2  ;;  %v4919_v36 = vmul.f32 %v4855_v30, %v4779_v8 }
 0x63b   : > { %v2924_v60 = vrot.slane %v2923_v42, 4  ;;  %v5094_v12 = vrot.slane %v5093_v43, 2  ;;  %v5115_v23 = vrot.slane %v5114_v39, 2  ;;  %7098 = vbcast.lane.b32.xlu0 %v16393_v44, 264  ;;  %v2898_v46 = vrot.slane %v2897_v58, 2  ;;  %v4790_v4 = vpop.permute.xlu1 %4789 }
 0x63c   : > { %v4920_v24 = vmul.f32 %v16392_v7, %v14783_v37  ;;  %v5127_v16 = vrot.slane %v5126_v11, 4  ;;  %v2904_v9 = vadd.f32 %v2903_v15, %v2902_v2  ;;  %v5122_v41 = vrot.slane %v5121_v20, 2  ;;  %v14959_v37 = vpop.permute.xlu0 %2644  ;;  %6951 = vbcast.lane.b32.xlu1 %v16341_v19, 256 }
 0x63d   : > { %v2911_v13 = vadd.f32 %v2910_v59, %v2909_v5  ;;  %v2918_v61 = vadd.f32 %v2917_v56, %v2916_v22  ;;  %v5102_v1 = vadd.f32 %v5101_v14, %v5100_v62  ;;  %v4922_v30 = vmul.f32 %v4858_v29, %v14798_v17  ;;  %v16394_v5 = vld [vmem:[#allocation83_spill] sm:$0xff] }
 0x63e   : > { %v5133_v34 = vadd.f32 %v4920_v24, %v4919_v36  ;;  %v5128_v25 = vadd.f32 %v5127_v16, %v5126_v11  ;;  %v5109_v57 = vadd.f32 %v5108_v48, %v5107_v49  ;;  %v4921_v38 = vmul.f32 %v4857_v33, %v4790_v4 }
 0x63f   : > { %v2925_v7 = vadd.f32 %v2924_v60, %v2923_v42  ;;  %v5095_v40 = vadd.f32 %v5094_v12, %v5093_v43  ;;  %v5116_v18 = vadd.f32 %v5115_v23, %v5114_v39  ;;  %7175 = vbcast.lane.b32.xlu0 %v16394_v5, 264  ;;  %v2905_v22 = vrot.slane %v2904_v9, 2  ;;  %v14966_v17 = vpop.permute.xlu1 %2530 }
 0x640   : > { %v5134_v8 = vrot.slane %v5133_v34, 4  ;;  %v5129_v2 = vrot.slane %v5128_v25, 2  ;;  %v5123_v62 = vadd.f32 %v5122_v41, %v5121_v20  ;;  %v5140_v59 = vadd.f32 %v4922_v30, %v4921_v38  ;;  %v14968_v29 = vpop.permute.xlu0 %2578  ;;  %7028 = vbcast.lane.b32.xlu1 %v16348_v31, 256  ;;  %v16395_v20 = vld [vmem:[#allocation84_spill] sm:$0xff] }
 0x641   : > { %v2892_v56 = vadd.f32 %v2891_v21, %v2890_v27  ;;  %v2912_v14 = vrot.slane %v2911_v13, 2  ;;  %v5103_v11 = vrot.slane %v5102_v1, 1  ;;  %v2919_v33 = vrot.slane %v2918_v61, 2 }
 0x642   : > { %v5135_v15 = vadd.f32 %v5134_v8, %v5133_v34  ;;  %v5130_v32 = vadd.f32 %v5129_v2, %v5128_v25  ;;  %v5110_v42 = vrot.slane %v5109_v57, 1  ;;  %v5141_v43 = vrot.slane %v5140_v59, 4 }
 0x643   : > { %v2899_v39 = vadd.f32 %v2898_v46, %v2897_v58  ;;  %v2926_v19 = vrot.slane %v2925_v7, 2  ;;  %v5096_v24 = vrot.slane %v5095_v40, 1  ;;  %v5117_v48 = vrot.slane %v5116_v18, 1  ;;  %7054 = vbcast.lane.b32.xlu0 %v16395_v20, 264  ;;  %v14972_v34 = vpop.permute.xlu1 %2541 }
 0x644   : > { %v5136_v49 = vrot.slane %v5135_v15, 2  ;;  %v2906_v27 = vadd.f32 %v2905_v22, %v2904_v9  ;;  %v5124_v21 = vrot.slane %v5123_v62, 1  ;;  %v5142_v60 = vadd.f32 %v5141_v43, %v5140_v59  ;;  %v14974_v25 = vpop.permute.xlu0 %2655  ;;  %7083 = vbcast.lane.b32.xlu1 %v16356_v28, 256  ;;  %v16396_v9 = vld [vmem:[#allocation108_spill] sm:$0xff]  ;;  %v16399_v43 = vld [vmem:[#allocation86_spill] sm:$0xff] }
 0x645   : > { %v2893_v12 = vrot.slane %v2892_v56, 1  ;;  %v2913_v23 = vadd.f32 %v2912_v14, %v2911_v13  ;;  %v5104_v16 = vadd.f32 %v5103_v11, %v5102_v1  ;;  %v5131_v41 = vrot.slane %v5130_v32, 1 }
 0x646   : > { %v5137_v36 = vadd.f32 %v5136_v49, %v5135_v15  ;;  %v2920_v58 = vadd.f32 %v2919_v33, %v2918_v61  ;;  %v5111_v46 = vadd.f32 %v5110_v42, %v5109_v57  ;;  %v5143_v30 = vrot.slane %v5142_v60, 2 }
 0x647   : > { %v2900_v8 = vrot.slane %v2899_v39, 1  ;;  %v2927_v31 = vadd.f32 %v2926_v19, %v2925_v7  ;;  %v5097_v38 = vadd.f32 %v5096_v24, %v5095_v40  ;;  %v5118_v2 = vadd.f32 %v5117_v48, %v5116_v18  ;;  %7109 = vbcast.lane.b32.xlu0 %v16396_v9, 264  ;;  %v14985_v18 = vpop.permute.xlu1 %2607 }
 0x648   : > { %v5138_v4 = vrot.slane %v5137_v36, 1  ;;  %v16397_v13 = vrot.slane %v14934_v3, 1  ;;  %v2907_v22 = vrot.slane %v2906_v27, 1  ;;  %v5125_v15 = vadd.f32 %v5124_v21, %v5123_v62  ;;  %v14987_v28 = vpop.permute.xlu0 %6889  ;;  %7149 = vbcast.lane.b32.xlu1 %v16367_v54, 256 }
 0x649   : > { %v5144_v59 = vadd.f32 %v5143_v30, %v5142_v60  ;;  %v16398_v61 = vrot.slane %v14939_v10, 1  ;;  %v2914_v14 = vrot.slane %v2913_v23, 1  ;;  %v7669_v7 = vsel %vm2242_vm1, %v5104_v16, %v5097_v38 }
 0x64a   : > { %v2880_v1 = vadd.f32 %v16397_v13, %v14934_v3  ;;  %v5132_v40 = vadd.f32 %v5131_v41, %v5130_v32  ;;  %v2894_v11 = vadd.f32 %v2893_v12, %v2892_v56  ;;  %v2921_v33 = vrot.slane %v2920_v58, 1 }
 0x64b   : > { %v2887_v57 = vadd.f32 %v16398_v61, %v14939_v10  ;;  %v5139_v42 = vadd.f32 %v5138_v4, %v5137_v36  ;;  %v7670_v3 = vsel %vm2244_vm2, %v5111_v46, %v7669_v7  ;;  %v2901_v49 = vadd.f32 %v2900_v8, %v2899_v39  ;;  %7186 = vbcast.lane.b32.xlu0 %v16399_v43, 264  ;;  %v15001_v54 = vpop.permute.xlu1 %2618  ;;  %v16407_v7 = vld [vmem:[#allocation55_spill] sm:$0xff] }
 0x64c   : > { %v2928_v62 = vrot.slane %v2927_v31, 1  ;;  %v5145_v10 = vrot.slane %v5144_v59, 1  ;;  %v7671_v19 = vsel %vm2246_vm3, %v5118_v2, %v7670_v3  ;;  %v2908_v24 = vadd.f32 %v2907_v22, %v2906_v27  ;;  %v15003_v60 = vpop.permute.xlu0 %6900  ;;  %7160 = vbcast.lane.b32.xlu1 %v16379_v51, 256  ;;  %v16405_v2 = vld [vmem:[#allocation100_spill] sm:$0xff] }
 0x64d   : > { %v7672_v32 = vsel %vm2248_vm4, %v5125_v15, %v7671_v19  ;;  %v16400_v48 = vrot.slane %v14818_v55, 1  ;;  %v7801_v21 = vsel %vm2250_vm5, %v14808_v0, %v14806_v45  ;;  %v7804_v39 = vsel %vm2242_vm1, %v2887_v57, %v2880_v1  ;;  %v7929_v1 = vld [vmem:[#allocation18 + $0x78] sm:$0xff]  ;;  %v10411_v15 = vld [vmem:[%s11298_s6 + $0x80] sm:$0xff]  }
 0x64e   : > { %v2915_v36 = vadd.f32 %v2914_v14, %v2913_v23  ;;  %v5146_v12 = vadd.f32 %v5145_v10, %v5144_v59  ;;  %v7673_v27 = vsel %vm2250_vm5, %v5132_v40, %v7672_v32  ;;  %v7805_v16 = vsel %vm2244_vm2, %v2894_v11, %v7804_v39  ;;  %v16403_v23 = vld [vmem:[#allocation88_spill] sm:$0xff]  ;;  %9241 = vmatprep.subr.mxu1 %v7929_v1  ;;  %v16411_v32 = vld [vmem:[#allocation111_spill] sm:$0xff] }
 0x64f   : > { %v2873_v56 = vadd.f32 %v16400_v48, %v14818_v55  ;;  %v2922_v41 = vadd.f32 %v2921_v33, %v2920_v58  ;;  %v7674_v46 = vsel %vm16401_vm8, %v5139_v42, %v7673_v27  ;;  %v7802_v55 = vsel %vm16402_vm9, %v14840_v47, %v7801_v21  ;;  %7120 = vbcast.lane.b32.xlu0 %v16403_v23, 264  ;;  %v15016_v8 = vpop.permute.xlu1 %2552  ;;  %v16404_v47 = vld [vmem:[#allocation104_spill] sm:$0xff]  ;;  %v16410_v42 = vld [vmem:[#allocation49_spill] sm:$0xff] }
 0x650   : > { %v7806_v45 = vsel %vm2246_vm3, %v2901_v49, %v7805_v16  ;;  %v2929_v0 = vadd.f32 %v2928_v62, %v2927_v31  ;;  %v7675_v4 = vsel %vm2254_vm7, %v5146_v12, %v7674_v46  ;;  %v15018_v38 = vpop.permute.xlu0 %2589  ;;  %v15022_v31 = vrot.slane %v16405_v2, %v16404_v47  ;;  %6962 = vbcast.lane.b32.xlu1 %v16389_v26, 256  ;;  %v16408_v40 = vld [vmem:[#allocation68_spill] sm:$0xff]  ;;  %v16409_v26 = vld [vmem:[#allocation109_spill] sm:$0xff]  ;;  %v7928_v49 = vld [vmem:[#allocation18 + $0x70] sm:$0xff] }
 0x651   : > { %9201 = vmatmul.mubr.f32.gmra.mxu1 %v7675_v4  ;;  %v7803_v30 = vsel %vm2254_vm7, %v2873_v56, %v7802_v55  ;;  %v7807_v58 = vsel %vm2248_vm4, %v2908_v24, %v7806_v45  ;;  %v2722_v59 = vunpack.c.l.bf16 %v10411_v15  ;;  %v2723_v61 = vunpack.c.h.bf16 %v10411_v15  ;;  %v10412_v62 = vld [vmem:[%s11298_s6 + $0x88] sm:$0xff]   ;;  %v7926_v39 = vld [vmem:[#allocation18 + $0x60] sm:$0xff]  ;;  %v16413_v16 = vld [vmem:[#allocation58_spill] sm:$0xff] }
 0x652   : > { %9235 = vmatprep.mubr.f32.mxu1 %v7803_v30  ;;  %v7808_v51 = vsel %vm2250_vm5, %v2915_v36, %v7807_v58  ;;  %v15036_v11 = vrot.slane %v16408_v40, %v16407_v7  ;;  %v2724_v10 = vunpack.c.l.bf16 %v10412_v62  ;;  %v15049_v48 = vrot.slane %v16405_v2, %v16411_v32  ;;  %v7927_v56 = vld [vmem:[#allocation18 + $0x68] sm:$0xff]  ;;  %v7925_v46 = vld [vmem:[#allocation18 + $0x58] sm:$0xff]  ;;  %v7924_v58 = vld [vmem:[#allocation18 + $0x50] sm:$0xff] }
 0x653   : > { %v7809_v13 = vsel %vm16406_vm10, %v2922_v41, %v7808_v51  ;;  %7197 = vbcast.lane.b32.xlu0 %v15022_v31, 264  ;;  %v15030_v57 = vpop.permute.xlu1 %2629  ;;  %v2786_v33 = vmul.f32 %v2722_v59, %v16409_v26  ;;  %v2787_v3 = vmul.f32 %v2723_v61, %v16410_v42  ;;  %v15060_v41 = vrot.slane %v16408_v40, %v16413_v16  ;;  %v10413_v47 = vld [vmem:[%s11298_s6 + $0x90] sm:$0xff]   ;;  %v15087_v59 = vld [vmem:[%s11298_s6 + $0x98] sm:$0xff]   ;;  %v15097_v42 = vld [vmem:[%s11298_s6 + $0xa0] sm:$0xff]  }
 0x654   : > { %v7810_v22 = vsel %vm2254_vm7, %v2929_v0, %v7809_v13  ;;  %v15032_v14 = vpop.permute.xlu0 %2666  ;;  %7039 = vbcast.lane.b32.xlu1 %v16391_v50, 256  ;;  %v2725_v50 = vunpack.c.h.bf16 %v10412_v62  ;;  %v2788_v36 = vmul.f32 %v2724_v10, %v14966_v17  ;;  %v15071_v30 = vrot.slane %v16405_v2, %v16407_v7  ;;  %v15079_v13 = vld [vmem:[%s11298_s6 + $0xc0] sm:$0xff]   ;;  %v15093_v26 = vld [vmem:[%s11298_s6 + $0xd0] sm:$0xff]   ;;  %v15105_v10 = vld [vmem:[%s11298_s6 + $0xa8] sm:$0xff]  }
 0x655   : > { %9236 = vmatmul.mubr.f32.vlgmr.msra.gmra.mxu1 %v7810_v22  ;;  %v2930_v21 = vadd.f32 %v2787_v3, %v2786_v33  ;;  %v15076_v51 = vrot.slane %v16405_v2, %v16413_v16  ;;  %v15083_v22 = vld [vmem:[%s11298_s6 + $0xc8] sm:$0xff]   ;;  %v2726_v7 = vunpack.c.l.bf16 %v10413_v47  ;;  %v10422_v16 = vld [vmem:[%s11312_s12] sm:$0xff]   ;;  %v15123_v32 = vld [vmem:[%s11298_s6 + $0xb0] sm:$0xff]  }
 0x656   : > { %9242 = vmatpush3.msra.mxu1 %v7929_v1  ;;  %16415 = vst [vmem:[#allocation54_spill] sm:$0xff] %v15071_v30  ;;  %v7923_v2 = vld [vmem:[#allocation18 + $0x48] sm:$0xff]  ;;  %v7922_v62 = vld [vmem:[#allocation18 + $0x40] sm:$0xff]  ;;  %v7921_v1 = vld [vmem:[#allocation18 + $0x38] sm:$0xff] }
 0x657   : > { %7131 = vbcast.lane.b32.xlu0 %v15036_v11, 264  ;;  %v15043_v19 = vpop.permute.xlu1 %2563  ;;  %9243 = vmatprep.subr.mxu1 %v7928_v49  ;;  %v2931_v17 = vrot.slane %v2930_v21, 4  ;;  %16416 = vst [vmem:[#allocation70_spill] sm:$0xff] %v15076_v51  ;;  %v15130_v3 = vld [vmem:[%s11298_s6 + $0xe8] sm:$0xff]  }
 0x658   : > { %v15045_v24 = vpop.permute.xlu0 %6911  ;;  %9244 = vmatpush3.msra.mxu1 %v7928_v49  ;;  %7094 = vbcast.lane.b32.xlu1 %v16393_v44, 256  ;;  %v16414_v44 = vld [vmem:[#allocation56_spill] sm:$0xff]  ;;  %v15101_v49 = vld [vmem:[%s11298_s6 + $0xd8] sm:$0xff]  }
 0x659   : > { %9245 = vmatprep.subr.mxu1 %v7927_v56  ;;  %v2789_v55 = vmul.f32 %v2725_v50, %v16414_v44  ;;  %v2932_v40 = vadd.f32 %v2931_v17, %v2930_v21  ;;  %v2790_v50 = vmul.f32 %v2726_v7, %v14972_v34  ;;  %v15135_v7 = vld [vmem:[%s11312_s12 + $0x10] sm:$0xff]   ;;  %v15141_v21 = vld [vmem:[%s11312_s12 + $0x40] sm:$0xff]  }
 0x65a   : > { %9246 = vmatpush3.msra.mxu1 %v7927_v56  ;;  %v15109_v56 = vld [vmem:[%s11298_s6 + $0xe0] sm:$0xff]  }
 0x65b   : > { %7208 = vbcast.lane.b32.xlu0 %v15049_v48, 264  ;;  %v15054_v12 = vpop.permute.xlu1 %2640  ;;  %9247 = vmatprep.subr.mxu1 %v7926_v39  ;;  %v2937_v45 = vadd.f32 %v2789_v55, %v2788_v36  ;;  %v10423_v55 = vld [vmem:[%s11312_s12 + $0x8] sm:$0xff]   ;;  %v2933_v44 = vrot.slane %v2932_v40, 2 }
 0x65c   : > { %16412 = vst [vmem:[#allocation44_spill] sm:$0xff] %v15054_v12  ;;  %v15056_v27 = vpop.permute.xlu0 %6977  ;;  %7171 = vbcast.lane.b32.xlu1 %v16394_v5, 256  ;;  %9248 = vmatpush3.msra.mxu1 %v7926_v39  ;;  %v2727_v5 = vunpack.c.h.bf16 %v10413_v47  ;;  %v7235_v17 = vunpack.c.h.bf16 %v10423_v55  ;;  %v7232_v47 = vunpack.c.l.bf16 %v10422_v16 }
 0x65d   : > { %9249 = vmatprep.subr.mxu1 %v7925_v46 }
 0x65e   : > { %9250 = vmatpush3.msra.mxu1 %v7925_v46  ;;  %v7233_v46 = vunpack.c.h.bf16 %v10422_v16 }
 0x65f   : > { %7142 = vbcast.lane.b32.xlu0 %v15060_v41, 264  ;;  %v15065_v0 = vpop.permute.xlu1 %2574  ;;  %9251 = vmatprep.subr.mxu1 %v7924_v58 }
 0x660   : > { %v15067_v4 = vpop.permute.xlu0 %6988  ;;  %7050 = vbcast.lane.b32.xlu1 %v16395_v20, 256  ;;  %v2938_v20 = vrot.slane %v2937_v45, 4  ;;  %9252 = vmatpush3.msra.mxu1 %v7924_v58  ;;  %v16419_v58 = vld [vmem:[#allocation61_spill] sm:$0xff]  ;;  %v7297_v34 = vmul.f32 %v7233_v46, %v14987_v28  ;;  %v2934_v28 = vadd.f32 %v2933_v44, %v2932_v40  ;;  %v15171_v40 = vld [vmem:[%s11298_s6 + $0xf8] sm:$0xff]   ;;  %v7299_v44 = vmul.f32 %v7235_v17, %v15003_v60 }
 0x661   : > { %9253 = vmatprep.subr.mxu1 %v7923_v2  ;;  %v2791_v15 = vmul.f32 %v2727_v5, %v16419_v58  ;;  %v15166_v58 = vld [vmem:[%s11312_s12 + $0x50] sm:$0xff]   ;;  %v16423_v60 = vunpack.c.l.bf16 %v15087_v59 }
 0x662   : > { %9254 = vmatpush3.msra.mxu1 %v7923_v2  ;;  %v2939_v33 = vadd.f32 %v2938_v20, %v2937_v45  ;;  %v7920_v45 = vld [vmem:[#allocation18 + $0x30] sm:$0xff]  ;;  %v15149_v20 = vld [vmem:[%s11312_s12 + $0x48] sm:$0xff]  }
 0x663   : > { %7219 = vbcast.lane.b32.xlu0 %v15071_v30, 264  ;;  %v15113_v39 = vpop.permute.xlu1 %2651  ;;  %9255 = vmatprep.subr.mxu1 %v7922_v62  ;;  %v7234_v30 = vunpack.c.l.bf16 %v10423_v55  ;;  %v2944_v5 = vadd.f32 %v2791_v15, %v2790_v50  ;;  %v7919_v55 = vld [vmem:[#allocation18 + $0x28] sm:$0xff]  ;;  %v7918_v50 = vld [vmem:[#allocation18 + $0x20] sm:$0xff]  ;;  %v16424_v15 = vunpack.c.h.bf16 %v15079_v13 }
 0x664   : > { %16417 = vst [vmem:[#allocation95_spill] sm:$0xff] %v15113_v39  ;;  %v15115_v36 = vpop.permute.xlu0 %2600  ;;  %7105 = vbcast.lane.b32.xlu1 %v16396_v9, 256  ;;  %9256 = vmatpush3.msra.mxu1 %v7922_v62  ;;  %v15159_v62 = vld [vmem:[%s11298_s6 + $0xf0] sm:$0xff]   ;;  %v2935_v39 = vrot.slane %v2934_v28, 1 }
 0x665   : > { %16418 = vst [vmem:[#allocation73_spill] sm:$0xff] %v15115_v36  ;;  %9257 = vmatprep.subr.mxu1 %v7921_v1  ;;  %v2945_v2 = vrot.slane %v2944_v5, 4 }
 0x666   : > { %9258 = vmatpush3.msra.mxu1 %v7921_v1 }
 0x667   : > { %7230 = vbcast.lane.b32.xlu0 %v15076_v51, 264  ;;  %v6886_v16 = vpop.permute.xlu1 %6885  ;;  %v15154_v51 = vld [vmem:[%s11298_s6 + $0xb8] sm:$0xff]   ;;  %9259 = vmatprep.subr.mxu1 %v7920_v45  ;;  %s10750_s6 = scalar_lea.vmem %s10749_s13, 1024 }
 0x668   : > { %v15144_v36 = vpop.permute.xlu0 %2677  ;;  %v7296_v61 = vmul.f32 %v7232_v47, %v6886_v16  ;;  %7182 = vbcast.lane.b32.xlu1 %v16399_v43, 256  ;;  %v2940_v47 = vrot.slane %v2939_v33, 2  ;;  %9260 = vmatpush3.msra.mxu1 %v7920_v45  ;;  %v7915_v43 = vld [vmem:[#allocation18 + $0x8] sm:$0xff] }
 0x669   : > { %16420 = vst [vmem:[#allocation92_spill] sm:$0xff] %v15144_v36  ;;  %9261 = vmatprep.subr.mxu1 %v7919_v55 }
 0x66a   : > { %v7360_v46 = vadd.f32 %v7297_v34, %v7296_v61  ;;  %9262 = vmatpush3.msra.mxu1 %v7919_v55  ;;  %v2736_v61 = vunpack.c.l.bf16 %v15154_v51 }
 0x66b   : > { %v6897_v16 = vpop.permute.xlu1 %6896  ;;  %9263 = vmatprep.subr.mxu1 %v7918_v50 }
 0x66c   : > { %v15163_v9 = vpop.permute.xlu0 %6922  ;;  %v7361_v34 = vrot.slane %v7360_v46, 4  ;;  %v7298_v1 = vmul.f32 %v7234_v30, %v6897_v16  ;;  %7116 = vbcast.lane.b32.xlu1 %v16403_v23, 256  ;;  %v2792_v30 = vmul.f32 %v16423_v60, %v15016_v8  ;;  %v7917_v16 = vld [vmem:[#allocation18 + $0x18] sm:$0xff]  ;;  %v16425_v8 = vunpack.c.h.bf16 %v15087_v59  ;;  %9264 = vmatpush3.msra.mxu1 %v7918_v50 }
 0x66d   : > { %16421 = vst [vmem:[#allocation79_spill] sm:$0xff] %v15163_v9  ;;  %v16422_v9 = vunpack.c.l.bf16 %v15079_v13  ;;  %v7916_v13 = vld [vmem:[#allocation18 + $0x10] sm:$0xff]  ;;  %9265 = vmatprep.subr.mxu1 %v7917_v16  ;;  %v2936_v60 = vadd.f32 %v2935_v39, %v2934_v28  ;;  %v16427_v50 = vunpack.c.h.bf16 %v15097_v42  ;;  %v16430_v28 = vunpack.c.h.bf16 %v15083_v22 }
 0x66e   : > { %v7362_v17 = vadd.f32 %v7361_v34, %v7360_v46  ;;  %v7367_v45 = vadd.f32 %v7299_v44, %v7298_v1  ;;  %v2793_v46 = vmul.f32 %v16425_v8, %v14926_v53  ;;  %v7252_v34 = vunpack.c.l.bf16 %v15166_v58  ;;  %9266 = vmatpush3.msra.mxu1 %v7917_v16  ;;  %v7914_v16 = vld [vmem:[#allocation18] sm:$0xff] }
 0x66f   : > { %v2802_v36 = vmul.f32 %v16422_v9, %v14985_v18  ;;  %v2803_v18 = vmul.f32 %v16424_v15, %v14877_v6  ;;  %v2941_v9 = vadd.f32 %v2940_v47, %v2939_v33  ;;  %v2586_v23 = vpop.permute.xlu1 %2585  ;;  %v2946_v6 = vadd.f32 %v2945_v2, %v2944_v5  ;;  %9267 = vmatprep.subr.mxu1 %v7916_v13 }
 0x670   : > { %v15188_v12 = vpop.permute.xlu0 %6999  ;;  %v7363_v44 = vrot.slane %v7362_v17, 2  ;;  %v7368_v55 = vrot.slane %v7367_v45, 4  ;;  %v16426_v15 = vunpack.c.l.bf16 %v15097_v42  ;;  %7193 = vbcast.lane.b32.xlu1 %v15022_v31, 256  ;;  %v2752_v1 = vunpack.c.l.bf16 %v15171_v40  ;;  %9268 = vmatpush3.msra.mxu1 %v7916_v13 }
 0x671   : > { %v2986_v33 = vadd.f32 %v2803_v18, %v2802_v36  ;;  %v2951_v59 = vadd.f32 %v2793_v46, %v2792_v30  ;;  %v2795_v2 = vmul.f32 %v16427_v50, %v14952_v63  ;;  %v2942_v36 = vrot.slane %v2941_v9, 1  ;;  %9269 = vmatprep.subr.mxu1 %v7915_v43 }
 0x672   : > { %v2794_v47 = vmul.f32 %v16426_v15, %v15043_v19  ;;  %v7364_v53 = vadd.f32 %v7363_v44, %v7362_v17  ;;  %v7369_v8 = vadd.f32 %v7368_v55, %v7367_v45  ;;  %v16428_v5 = vunpack.c.l.bf16 %v15083_v22  ;;  %9270 = vmatpush3.msra.mxu1 %v7915_v43 }
 0x673   : > { %v16429_v31 = vunpack.c.l.bf16 %v15105_v10  ;;  %v15210_v15 = vpop.permute.xlu1 %2662  ;;  %v2805_v30 = vmul.f32 %v16430_v28, %v14907_v52  ;;  %v16431_v63 = vunpack.c.h.bf16 %v15105_v10  ;;  %v2987_v46 = vrot.slane %v2986_v33, 4  ;;  %9271 = vmatprep.subr.mxu1 %v7914_v16 }
 0x674   : > { %v2804_v19 = vmul.f32 %v16428_v5, %v15001_v54  ;;  %v15212_v39 = vpop.permute.xlu0 %2688  ;;  %v7370_v17 = vrot.slane %v7369_v8, 2  ;;  %v16432_v54 = vunpack.c.l.bf16 %v15123_v32  ;;  %v16433_v44 = vunpack.c.l.bf16 %v15093_v26  ;;  %7127 = vbcast.lane.b32.xlu1 %v15036_v11, 256  ;;  %9272 = vmatpush3.msra.mxu1 %v7914_v16 }
 0x675   : > { %v2796_v18 = vmul.f32 %v16429_v31, %v15065_v0  ;;  %v2797_v42 = vmul.f32 %v16431_v63, %v14968_v29  ;;  %v2947_v0 = vrot.slane %v2946_v6, 2  ;;  %v2958_v50 = vadd.f32 %v2795_v2, %v2794_v47 }
 0x676   : > { %v2798_v45 = vmul.f32 %v16432_v54, %v2586_v23  ;;  %v2806_v55 = vmul.f32 %v16433_v44, %v15030_v57  ;;  %v2952_v52 = vrot.slane %v2951_v59, 4  ;;  %v16434_v29 = vunpack.c.h.bf16 %v15123_v32 }
 0x677   : > { %v7365_v10 = vrot.slane %v7364_v53, 1  ;;  %v7371_v5 = vadd.f32 %v7370_v17, %v7369_v8  ;;  %v16435_v23 = vunpack.c.h.bf16 %v15093_v26  ;;  %v2943_v31 = vadd.f32 %v2942_v36, %v2941_v9  ;;  %v6908_v57 = vpop.permute.xlu1 %6907 }
 0x678   : > { %v2799_v22 = vmul.f32 %v16434_v29, %v15018_v38  ;;  %v2993_v28 = vadd.f32 %v2805_v30, %v2804_v19  ;;  %v2965_v63 = vadd.f32 %v2797_v42, %v2796_v18  ;;  %v15232_v47 = vpop.permute.xlu0 %6933  ;;  %v16436_v11 = vunpack.c.h.bf16 %v15135_v7  ;;  %7204 = vbcast.lane.b32.xlu1 %v15049_v48, 256 }
 0x679   : > { %v2807_v13 = vmul.f32 %v16435_v23, %v14943_v35  ;;  %v7372_v32 = vrot.slane %v7371_v5, 1  ;;  %v16437_v8 = vunpack.c.l.bf16 %v15135_v7  ;;  %v15239_v17 = vadd.f32 %v2947_v0, %v2946_v6 }
 0x67a   : > { %v7301_v2 = vmul.f32 %v16436_v11, %v15045_v24  ;;  %v2972_v38 = vadd.f32 %v2799_v22, %v2798_v45  ;;  %v15241_v35 = vadd.f32 %v2987_v46, %v2986_v33  ;;  %v2959_v9 = vrot.slane %v2958_v50, 4 }
 0x67b   : > { %v7300_v43 = vmul.f32 %v16437_v8, %v6908_v57  ;;  %v3000_v26 = vadd.f32 %v2807_v13, %v2806_v55  ;;  %v2953_v36 = vadd.f32 %v2952_v52, %v2951_v59  ;;  %v7366_v19 = vadd.f32 %v7365_v10, %v7364_v53  ;;  %v6974_v33 = vpop.permute.xlu1 %6973 }
 0x67c   : > { %v7373_v18 = vadd.f32 %v7372_v32, %v7371_v5  ;;  %v16438_v24 = vunpack.c.h.bf16 %v15101_v49  ;;  %v16439_v7 = vunpack.c.h.bf16 %v15109_v56  ;;  %v2994_v6 = vrot.slane %v2993_v28, 4  ;;  %v15250_v16 = vpop.permute.xlu0 %7010  ;;  %7138 = vbcast.lane.b32.xlu1 %v15060_v41, 256 }
 0x67d   : > { %v7374_v30 = vadd.f32 %v7301_v2, %v7300_v43  ;;  %v2966_v45 = vrot.slane %v2965_v63, 4  ;;  %v15253_v0 = vsel %vm2242_vm1, %v2943_v31, %v2936_v60  ;;  %v2973_v59 = vrot.slane %v2972_v38, 4  ;;  %v16445_v43 = vld [vmem:[#allocation44_spill] sm:$0xff] }
 0x67e   : > { %v2809_v42 = vmul.f32 %v16438_v24, %v14959_v37  ;;  %v2811_v54 = vmul.f32 %v16439_v7, %v14974_v25  ;;  %v15256_v48 = vsel %vm2242_vm1, %v7373_v18, %v7366_v19  ;;  %v2949_v46 = vrot.slane %v15239_v17, 1  ;;  %v16449_v24 = vld [vmem:[#allocation54_spill] sm:$0xff] }
 0x67f   : > { %v7375_v53 = vrot.slane %v7374_v30, 4  ;;  %v2960_v37 = vadd.f32 %v2959_v9, %v2958_v50  ;;  %v16440_v44 = vunpack.c.h.bf16 %v15141_v21  ;;  %v16441_v55 = vunpack.c.l.bf16 %v15141_v21  ;;  %v6985_v57 = vpop.permute.xlu1 %6984 }
 0x680   : > { %v2989_v60 = vrot.slane %v15241_v35, 2  ;;  %v2954_v29 = vrot.slane %v2953_v36, 2  ;;  %v3001_v22 = vrot.slane %v3000_v26, 4  ;;  %v15266_v5 = vadd.f32 %v2994_v6, %v2993_v28  ;;  %7215 = vbcast.lane.b32.xlu1 %v16449_v24, 256 }
 0x681   : > { %v7313_v25 = vmul.f32 %v16440_v44, %v15056_v27  ;;  %v7312_v52 = vmul.f32 %v16441_v55, %v6974_v33  ;;  %v7376_v10 = vadd.f32 %v7375_v53, %v7374_v30  ;;  %v16442_v23 = vunpack.c.h.bf16 %v15130_v3  ;;  %v15271_v27 = vpop.permute.xlu0 %6944 }
 0x682   : > { %v2967_v13 = vadd.f32 %v2966_v45, %v2965_v63  ;;  %v16443_v21 = vunpack.c.h.bf16 %v15149_v20  ;;  %v2974_v11 = vadd.f32 %v2973_v59, %v2972_v38  ;;  %v16444_v32 = vunpack.c.l.bf16 %v15149_v20  ;;  %v16450_v20 = vld [vmem:[#allocation73_spill] sm:$0xff] }
 0x683   : > { %v2813_v50 = vmul.f32 %v16442_v23, %v15032_v14  ;;  %v7416_v31 = vadd.f32 %v7313_v25, %v7312_v52  ;;  %v7377_v2 = vrot.slane %v7376_v10, 2  ;;  %v2961_v28 = vrot.slane %v2960_v37, 2  ;;  %v16447_v14 = vld [vmem:[#allocation95_spill] sm:$0xff] }
 0x684   : > { %v7315_v41 = vmul.f32 %v16443_v21, %v15067_v4  ;;  %v7314_v8 = vmul.f32 %v16444_v32, %v6985_v57  ;;  %v16446_v9 = vunpack.c.l.bf16 %v15101_v49  ;;  %v16448_v63 = vunpack.c.l.bf16 %v15109_v56  ;;  %v2597_v56 = vpop.permute.xlu1 %2596  ;;  %v16453_v57 = vld [vmem:[#allocation70_spill] sm:$0xff] }
 0x685   : > { %v7417_v30 = vrot.slane %v7416_v31, 4  ;;  %v2955_v7 = vadd.f32 %v2954_v29, %v2953_v36  ;;  %v15285_v6 = vadd.f32 %v3001_v22, %v3000_v26  ;;  %v7378_v4 = vadd.f32 %v7377_v2, %v7376_v10  ;;  %v15293_v25 = vpop.permute.xlu0 %7021  ;;  %7226 = vbcast.lane.b32.xlu1 %v16453_v57, 256  ;;  %v16454_v2 = vld [vmem:[#allocation92_spill] sm:$0xff] }
 0x686   : > { %v2808_v19 = vmul.f32 %v16446_v9, %v16445_v43  ;;  %v2810_v18 = vmul.f32 %v16448_v63, %v16447_v14  ;;  %v7423_v38 = vadd.f32 %v7315_v41, %v7314_v8  ;;  %v2968_v45 = vrot.slane %v2967_v13, 2 }
 0x687   : > { %v16451_v33 = vunpack.c.h.bf16 %v15154_v51  ;;  %v16452_v49 = vunpack.c.l.bf16 %v15130_v3  ;;  %v7418_v44 = vadd.f32 %v7417_v30, %v7416_v31  ;;  %v2975_v55 = vrot.slane %v2974_v11, 2 }
 0x688   : > { %v7379_v52 = vrot.slane %v7378_v4, 1  ;;  %v7424_v36 = vrot.slane %v7423_v38, 4  ;;  %v2800_v26 = vmul.f32 %v2736_v61, %v2597_v56  ;;  %v2962_v29 = vadd.f32 %v2961_v28, %v2960_v37  ;;  %v2674_v14 = vpop.permute.xlu1 %2673 }
 0x689   : > { %v2801_v59 = vmul.f32 %v16451_v33, %v16450_v20  ;;  %v2812_v53 = vmul.f32 %v16452_v49, %v15210_v15  ;;  %v3007_v22 = vadd.f32 %v2809_v42, %v2808_v19  ;;  %v3014_v10 = vadd.f32 %v2811_v54, %v2810_v18  ;;  %v15301_v51 = vpop.permute.xlu0 %7065 }
 0x68a   : > { %v7419_v23 = vrot.slane %v7418_v44, 2  ;;  %v2956_v21 = vrot.slane %v2955_v7, 1  ;;  %v7380_v41 = vadd.f32 %v7379_v52, %v7378_v4  ;;  %v7425_v3 = vadd.f32 %v7424_v36, %v7423_v38 }
 0x68b   : > { %v2979_v15 = vadd.f32 %v2801_v59, %v2800_v26  ;;  %v2969_v31 = vadd.f32 %v2968_v45, %v2967_v13  ;;  %v16455_v32 = vunpack.c.h.bf16 %v15159_v62  ;;  %v3021_v43 = vadd.f32 %v2813_v50, %v2812_v53 }
 0x68c   : > { %v7420_v9 = vadd.f32 %v7419_v23, %v7418_v44  ;;  %v2976_v61 = vadd.f32 %v2975_v55, %v2974_v11  ;;  %v7426_v42 = vrot.slane %v7425_v3, 2  ;;  %v16456_v37 = vunpack.c.l.bf16 %v15159_v62  ;;  %v15313_v20 = vpop.permute.xlu1 %6918 }
 0x68d   : > { %v2815_v8 = vmul.f32 %v16455_v32, %v16454_v2  ;;  %v2980_v54 = vrot.slane %v2979_v15, 4  ;;  %v2963_v19 = vrot.slane %v2962_v29, 1  ;;  %v3008_v63 = vrot.slane %v3007_v22, 4  ;;  %v15315_v33 = vpop.permute.xlu0 %7076 }
 0x68e   : > { %v2814_v28 = vmul.f32 %v16456_v37, %v2674_v14  ;;  %v3015_v18 = vrot.slane %v3014_v10, 4  ;;  %v15307_v13 = vsel %vm2244_vm2, %v7380_v41, %v15256_v48  ;;  %v7421_v30 = vrot.slane %v7420_v9, 1 }
 0x68f   : > { %v7427_v24 = vadd.f32 %v7426_v42, %v7425_v3  ;;  %v2981_v50 = vadd.f32 %v2980_v54, %v2979_v15  ;;  %v2950_v11 = vadd.f32 %v2949_v46, %v15239_v17  ;;  %v2996_v38 = vrot.slane %v15266_v5, 2 }
 0x690   : > { %v3028_v4 = vadd.f32 %v2815_v8, %v2814_v28  ;;  %v2970_v45 = vrot.slane %v2969_v31, 1  ;;  %v3022_v62 = vrot.slane %v3021_v43, 4  ;;  %v2977_v59 = vrot.slane %v2976_v61, 1  ;;  %v6996_v15 = vpop.permute.xlu1 %6995 }
 0x691   : > { %v7428_v49 = vrot.slane %v7427_v24, 1  ;;  %v2982_v48 = vrot.slane %v2981_v50, 2  ;;  %v2957_v44 = vadd.f32 %v2956_v21, %v2955_v7  ;;  %v3003_v56 = vrot.slane %v15285_v6, 2  ;;  %v15321_v2 = vpop.permute.xlu0 %6955 }
 0x692   : > { %v3029_v53 = vrot.slane %v3028_v4, 4  ;;  %v2964_v55 = vadd.f32 %v2963_v19, %v2962_v29  ;;  %v3009_v52 = vadd.f32 %v3008_v63, %v3007_v22  ;;  %v3016_v36 = vadd.f32 %v3015_v18, %v3014_v10 }
 0x693   : > { %v7422_v26 = vadd.f32 %v7421_v30, %v7420_v9  ;;  %v7429_v17 = vadd.f32 %v7428_v49, %v7427_v24  ;;  %v2983_v46 = vadd.f32 %v2982_v48, %v2981_v50  ;;  %v2971_v23 = vadd.f32 %v2970_v45, %v2969_v31 }
 0x694   : > { %v16457_v57 = vunpack.c.h.bf16 %v15166_v58  ;;  %v3023_v3 = vadd.f32 %v3022_v62, %v3021_v43  ;;  %v7812_v7 = vsel %vm2244_vm2, %v2950_v11, %v15253_v0  ;;  %v3030_v29 = vadd.f32 %v3029_v53, %v3028_v4  ;;  %v2685_v58 = vpop.permute.xlu1 %2684 }
 0x695   : > { %v7969_v21 = vsel %vm2242_vm1, %v7429_v17, %v7422_v26  ;;  %v7316_v22 = vmul.f32 %v7252_v34, %v6996_v15  ;;  %v2978_v10 = vadd.f32 %v2977_v59, %v2976_v61  ;;  %v2997_v31 = vadd.f32 %v2996_v38, %v15266_v5  ;;  %v15335_v34 = vpop.permute.xlu0 %7032 }
 0x696   : > { %v7317_v41 = vmul.f32 %v16457_v57, %v15188_v12  ;;  %v3010_v32 = vrot.slane %v3009_v52, 2  ;;  %v2984_v8 = vrot.slane %v2983_v46, 1  ;;  %v7813_v12 = vsel %vm2246_vm3, %v2957_v44, %v7812_v7 }
 0x697   : > { %v3004_v43 = vadd.f32 %v3003_v56, %v15285_v6  ;;  %v3017_v9 = vrot.slane %v3016_v36, 2  ;;  %v7814_v42 = vsel %vm2248_vm4, %v2964_v55, %v7813_v12  ;;  %v3024_v0 = vrot.slane %v3023_v3, 2 }
 0x698   : > { %v7430_v14 = vadd.f32 %v7317_v41, %v7316_v22  ;;  %v16458_v54 = vunpack.c.h.bf16 %v15171_v40  ;;  %v2985_v61 = vadd.f32 %v2984_v8, %v2983_v46  ;;  %v7815_v5 = vsel %vm2250_vm5, %v2971_v23, %v7814_v42  ;;  %v15345_v45 = vpop.permute.xlu1 %6929 }
 0x699   : > { %v3031_v28 = vrot.slane %v3030_v29, 2  ;;  %v2816_v6 = vmul.f32 %v2752_v1, %v2685_v58  ;;  %v7816_v63 = vsel %vm16459_vm11, %v2978_v10, %v7815_v5  ;;  %v2990_v18 = vadd.f32 %v2989_v60, %v15241_v35  ;;  %v15347_v62 = vpop.permute.xlu0 %7087 }
 0x69a   : > { %v2817_v37 = vmul.f32 %v16458_v54, %v15212_v39  ;;  %v7431_v19 = vrot.slane %v7430_v14, 4  ;;  %v3011_v30 = vadd.f32 %v3010_v32, %v3009_v52  ;;  %v7817_v39 = vsel %vm2254_vm7, %v2985_v61, %v7816_v63 }
 0x69b   : > { %v3018_v24 = vadd.f32 %v3017_v9, %v3016_v36  ;;  %9238 = vmatprep.mubr.f32.mxu1 %v7817_v39  ;;  %v2998_v11 = vrot.slane %v2997_v31, 1  ;;  %v3025_v38 = vadd.f32 %v3024_v0, %v3023_v3  ;;  %v3005_v40 = vrot.slane %v3004_v43, 1 }
 0x69c   : > { %v7432_v50 = vadd.f32 %v7431_v19, %v7430_v14  ;;  %v3035_v4 = vadd.f32 %v2817_v37, %v2816_v6  ;;  %v3032_v1 = vadd.f32 %v3031_v28, %v3030_v29  ;;  %v2991_v48 = vrot.slane %v2990_v18, 1  ;;  %v15349_v52 = vpop.permute.xlu1 %7006  ;;  %v10433_v37 = vld [vmem:[%s11312_s12 + $0x80] sm:$0xff]  }
 0x69d   : > { %v3012_v53 = vrot.slane %v3011_v30, 1  ;;  %v3019_v35 = vrot.slane %v3018_v24, 1  ;;  %v2999_v56 = vadd.f32 %v2998_v11, %v2997_v31  ;;  %v3026_v55 = vrot.slane %v3025_v38, 1  ;;  %v15351_v36 = vpop.permute.xlu0 %7153 }
 0x69e   : > { %v7433_v59 = vrot.slane %v7432_v50, 2  ;;  %v3036_v49 = vrot.slane %v3035_v4, 4  ;;  %v3006_v26 = vadd.f32 %v3005_v40, %v3004_v43  ;;  %v3033_v17 = vrot.slane %v3032_v1, 1  ;;  %v10436_v40 = vld [vmem:[%s11312_s12 + $0x28] sm:$0xff]  }
 0x69f   : > { %v2992_v57 = vadd.f32 %v2991_v48, %v2990_v18  ;;  %v3013_v41 = vadd.f32 %v3012_v53, %v3011_v30  ;;  %v3020_v3 = vadd.f32 %v3019_v35, %v3018_v24  ;;  %v3027_v22 = vadd.f32 %v3026_v55, %v3025_v38  ;;  %v10434_v24 = vld [vmem:[%s11312_s12 + $0x18] sm:$0xff]   ;;  %v10437_v48 = vld [vmem:[%s11312_s12 + $0x30] sm:$0xff]  }
 0x6a0   : > { %v7434_v60 = vadd.f32 %v7433_v59, %v7432_v50  ;;  %v3037_v44 = vadd.f32 %v3036_v49, %v3035_v4  ;;  %v6941_v10 = vpop.permute.xlu1 %6940  ;;  %v3034_v8 = vadd.f32 %v3033_v17, %v3032_v1  ;;  %v7265_v58 = vunpack.c.h.bf16 %v10433_v37  ;;  %v10435_v4 = vld [vmem:[%s11312_s12 + $0x20] sm:$0xff]   ;;  %v16461_v55 = vld [vmem:[#allocation79_spill] sm:$0xff] }
 0x6a1   : > { %v7818_v29 = vsel %vm2242_vm1, %v2999_v56, %v2992_v57  ;;  %v15354_v31 = vpop.permute.xlu0 %7164  ;;  %v7264_v61 = vunpack.c.l.bf16 %v10433_v37  ;;  %v7238_v50 = vunpack.c.l.bf16 %v10434_v24  ;;  %v7240_v11 = vunpack.c.l.bf16 %v10435_v4 }
 0x6a2   : > { %v7435_v46 = vrot.slane %v7434_v60, 1  ;;  %v3038_v23 = vrot.slane %v3037_v44, 2  ;;  %v7819_v12 = vsel %vm2244_vm2, %v3006_v26, %v7818_v29  ;;  %v7329_v6 = vmul.f32 %v7265_v58, %v15301_v51  ;;  %v10439_v58 = vld [vmem:[%s11312_s12 + $0x60] sm:$0xff]  }
 0x6a3   : > { %v7820_v9 = vsel %vm2246_vm3, %v3013_v41, %v7819_v12  ;;  %v7239_v38 = vunpack.c.h.bf16 %v10434_v24  ;;  %v7242_v1 = vunpack.c.l.bf16 %v10436_v40  ;;  %v7241_v49 = vunpack.c.h.bf16 %v10435_v4  ;;  %v10438_v12 = vld [vmem:[%s11312_s12 + $0x58] sm:$0xff]  }
 0x6a4   : > { %v7436_v15 = vadd.f32 %v7435_v46, %v7434_v60  ;;  %v3039_v7 = vadd.f32 %v3038_v23, %v3037_v44  ;;  %v7821_v14 = vsel %vm2248_vm4, %v3020_v3, %v7820_v9  ;;  %v15362_v42 = vpop.permute.xlu1 %7017  ;;  %v7244_v53 = vunpack.c.l.bf16 %v10437_v48  ;;  %v10442_v4 = vld [vmem:[%s11312_s12 + $0x38] sm:$0xff]  }
 0x6a5   : > { %v7822_v54 = vsel %vm2250_vm5, %v3027_v22, %v7821_v14  ;;  %v15367_v5 = vpop.permute.xlu0 %6966  ;;  %v7243_v35 = vunpack.c.h.bf16 %v10436_v40  ;;  %v7302_v51 = vmul.f32 %v7238_v50, %v15313_v20  ;;  %v7245_v44 = vunpack.c.h.bf16 %v10437_v48  ;;  %v15405_v50 = vld [vmem:[%s11312_s12 + $0x88] sm:$0xff]  }
 0x6a6   : > { %v15357_v32 = vsel %vm2244_vm2, %v7436_v15, %v7969_v21  ;;  %v3040_v43 = vrot.slane %v3039_v7, 1  ;;  %v7823_v21 = vsel %vm16460_vm12, %v3034_v8, %v7822_v54  ;;  %v7304_v56 = vmul.f32 %v7240_v11, %v15345_v45 }
 0x6a7   : > { %v7303_v26 = vmul.f32 %v7239_v38, %v16461_v55  ;;  %v7306_v17 = vmul.f32 %v7242_v1, %v6941_v10  ;;  %v7305_v23 = vmul.f32 %v7241_v49, %v15232_v47  ;;  %v7307_v41 = vmul.f32 %v7243_v35, %v15271_v27  ;;  %v15414_v35 = vld [vmem:[%s11312_s12 + $0xc0] sm:$0xff]  }
 0x6a8   : > { %v3041_v0 = vadd.f32 %v3040_v43, %v3039_v7  ;;  %v7062_v19 = vpop.permute.xlu1 %7061  ;;  %v7309_v15 = vmul.f32 %v7245_v44, %v15321_v2  ;;  %v7254_v10 = vunpack.c.l.bf16 %v10438_v12  ;;  %v7255_v47 = vunpack.c.h.bf16 %v10438_v12  ;;  %v15418_v44 = vld [vmem:[%s11312_s12 + $0xc8] sm:$0xff]  }
 0x6a9   : > { %v7328_v63 = vmul.f32 %v7264_v61, %v7062_v19  ;;  %v15373_v30 = vpop.permute.xlu0 %7043  ;;  %v7381_v3 = vadd.f32 %v7303_v26, %v7302_v51  ;;  %v7388_v7 = vadd.f32 %v7305_v23, %v7304_v56  ;;  %v7395_v20 = vadd.f32 %v7307_v41, %v7306_v17  ;;  %v10446_v17 = vld [vmem:[%s11312_s12 + $0x70] sm:$0xff]  }
 0x6aa   : > { %v7824_v28 = vsel %vm2254_vm7, %v3041_v0, %v7823_v21  ;;  %v7318_v0 = vmul.f32 %v7254_v10, %v15349_v52  ;;  %v7256_v21 = vunpack.c.l.bf16 %v10439_v58  ;;  %v7319_v61 = vmul.f32 %v7255_v47, %v15250_v16  ;;  %v15410_v16 = vld [vmem:[%s11312_s12 + $0x90] sm:$0xff]  }
 0x6ab   : > { %9239 = vmatmul.mubr.f32.gmra.mxu1 %v7824_v28  ;;  %v15371_v18 = vadd.f32 %v7329_v6, %v7328_v63  ;;  %v7382_v8 = vrot.slane %v7381_v3, 4  ;;  %v7389_v43 = vrot.slane %v7388_v7, 4  ;;  %v7396_v9 = vrot.slane %v7395_v20, 4  ;;  %v10440_v6 = vld [vmem:[%s11312_s12 + $0x68] sm:$0xff]  }
 0x6ac   : > { %v15375_v39 = vpop.permute.xlu1 %7072  ;;  %v7257_v28 = vunpack.c.h.bf16 %v10439_v58  ;;  %v7258_v63 = vunpack.c.l.bf16 %v10440_v6  ;;  %v7267_v52 = vunpack.c.h.bf16 %v15405_v50  ;;  %v7247_v11 = vunpack.c.h.bf16 %v10442_v4  ;;  %v15434_v58 = vld [vmem:[%s11312_s12 + $0xd0] sm:$0xff]  }
 0x6ad   : > { %v15382_v60 = vpop.permute.xlu0 %7098  ;;  %v7383_v14 = vadd.f32 %v7382_v8, %v7381_v3  ;;  %v7390_v37 = vadd.f32 %v7389_v43, %v7388_v7  ;;  %v7397_v19 = vadd.f32 %v7396_v9, %v7395_v20  ;;  %v7246_v40 = vunpack.c.l.bf16 %v10442_v4  ;;  %v15430_v9 = vld [vmem:[%s11312_s12 + $0x98] sm:$0xff]  }
 0x6ae   : > { %v7269_v49 = vunpack.c.h.bf16 %v15410_v16  ;;  %v7437_v48 = vadd.f32 %v7319_v61, %v7318_v0  ;;  %v7281_v51 = vunpack.c.h.bf16 %v15414_v35  ;;  %v7320_v55 = vmul.f32 %v7256_v21, %v15362_v42 }
 0x6af   : > { %v7384_v1 = vrot.slane %v7383_v14, 2  ;;  %v7398_v26 = vrot.slane %v7397_v19, 2  ;;  %v7261_v23 = vunpack.c.h.bf16 %v10446_v17  ;;  %v7321_v7 = vmul.f32 %v7257_v28, %v15293_v25 }
 0x6b0   : > { %v6952_v59 = vpop.permute.xlu1 %6951  ;;  %v7311_v20 = vmul.f32 %v7247_v11, %v15367_v5  ;;  %v7438_v10 = vrot.slane %v7437_v48, 4  ;;  %v7266_v43 = vunpack.c.l.bf16 %v15405_v50  ;;  %v15466_v5 = vld [vmem:[%s11312_s12 + $0xb0] sm:$0xff]  }
 0x6b1   : > { %v7308_v57 = vmul.f32 %v7244_v53, %v6952_v59  ;;  %v15389_v29 = vpop.permute.xlu0 %7175  ;;  %v7259_v59 = vunpack.c.h.bf16 %v10440_v6  ;;  %v7391_v53 = vrot.slane %v7390_v37, 2  ;;  %v7385_v12 = vadd.f32 %v7384_v1, %v7383_v14  ;;  %v15438_v14 = vld [vmem:[%s11312_s12 + $0x78] sm:$0xff]  }
 0x6b2   : > { %v7399_v25 = vadd.f32 %v7398_v26, %v7397_v19  ;;  %v7439_v11 = vadd.f32 %v7438_v10, %v7437_v48  ;;  %v7268_v19 = vunpack.c.l.bf16 %v15410_v16  ;;  %v15458_v10 = vld [vmem:[%s11312_s12 + $0xa8] sm:$0xff]   ;;  %v7345_v16 = vmul.f32 %v7281_v51, %v15351_v36 }
 0x6b3   : > { %v7402_v45 = vadd.f32 %v7309_v15, %v7308_v57  ;;  %v7260_v15 = vunpack.c.l.bf16 %v10446_v17  ;;  %v7323_v42 = vmul.f32 %v7259_v59, %v15335_v34  ;;  %v7392_v47 = vadd.f32 %v7391_v53, %v7390_v37 }
 0x6b4   : > { %v7029_v46 = vpop.permute.xlu1 %7028  ;;  %v7263_v34 = vunpack.c.h.bf16 %v15438_v14  ;;  %v7325_v37 = vmul.f32 %v7261_v23, %v15373_v30  ;;  %v7386_v4 = vrot.slane %v7385_v12, 1  ;;  %v7280_v23 = vunpack.c.l.bf16 %v15414_v35 }
 0x6b5   : > { %v7403_v2 = vrot.slane %v7402_v45, 4  ;;  %v15397_v54 = vpop.permute.xlu0 %7054  ;;  %v7322_v57 = vmul.f32 %v7258_v63, %v7029_v46  ;;  %v7444_v46 = vadd.f32 %v7321_v7, %v7320_v55  ;;  %v7393_v53 = vrot.slane %v7392_v47, 1  ;;  %v15488_v7 = vld [vmem:[%s11312_s12 + $0xf0] sm:$0xff]  }
 0x6b6   : > { %v16464_v35 = vunpack.c.h.bf16 %v15430_v9 }
 0x6b7   : > { %v7404_v38 = vadd.f32 %v7403_v2, %v7402_v45  ;;  %v7451_v21 = vadd.f32 %v7323_v42, %v7322_v57  ;;  %v7445_v55 = vrot.slane %v7444_v46, 4  ;;  %v15451_v57 = vld [vmem:[%s11312_s12 + $0xd8] sm:$0xff]   ;;  %v7440_v42 = vrot.slane %v7439_v11, 2 }
 0x6b8   : > { %v15391_v22 = vpop.permute.xlu1 %7083 }
 0x6b9   : > { %v15423_v41 = vpop.permute.xlu0 %7109  ;;  %v7405_v45 = vrot.slane %v7404_v38, 2  ;;  %v7452_v17 = vrot.slane %v7451_v21, 4 }
 0x6bb   : > { %v7406_v28 = vadd.f32 %v7405_v45, %v7404_v38  ;;  %v7400_v38 = vrot.slane %v7399_v25, 1  ;;  %v7453_v2 = vadd.f32 %v7452_v17, %v7451_v21  ;;  %v7330_v21 = vmul.f32 %v7266_v43, %v15375_v39 }
 0x6bc   : > { %v15394_v27 = vpop.permute.xlu1 %7149 }
 0x6bd   : > { %v15447_v59 = vpop.permute.xlu0 %7186  ;;  %v7401_v1 = vadd.f32 %v7400_v38, %v7399_v25  ;;  %v7441_v25 = vadd.f32 %v7440_v42, %v7439_v11  ;;  %v7454_v39 = vrot.slane %v7453_v2, 2 }
 0x6bf   : > { %v7442_v56 = vrot.slane %v7441_v25, 1 }
 0x6c0   : > { %v15402_v24 = vpop.permute.xlu1 %7160 }
 0x6c4   : > { %v6963_v3 = vpop.permute.xlu1 %6962 }
 0x6c5   : > { %v7310_v8 = vmul.f32 %v7246_v40, %v6963_v3  ;;  %v15444_v40 = vld [vmem:[%s11312_s12 + $0xa0] sm:$0xff]  }
 0x6c7   : > { %v7409_v0 = vadd.f32 %v7311_v20, %v7310_v8  ;;  %v7387_v8 = vadd.f32 %v7386_v4, %v7385_v12  ;;  %v15469_v12 = vpop.permute.xlu0 %7120  ;;  %v7270_v4 = vunpack.c.l.bf16 %v15430_v9 }
 0x6c8   : > { %v7040_v61 = vpop.permute.xlu1 %7039 }
 0x6c9   : > { %v7410_v6 = vrot.slane %v7409_v0, 4  ;;  %v7324_v63 = vmul.f32 %v7260_v15, %v7040_v61  ;;  %v7407_v15 = vrot.slane %v7406_v28, 1  ;;  %v15462_v61 = vld [vmem:[%s11312_s12 + $0xe0] sm:$0xff]   ;;  %v7964_v38 = vsel %vm2246_vm3, %v7387_v8, %v15307_v13 }
 0x6cb   : > { %v7411_v26 = vadd.f32 %v7410_v6, %v7409_v0  ;;  %v7458_v30 = vadd.f32 %v7325_v37, %v7324_v63  ;;  %v7394_v6 = vadd.f32 %v7393_v53, %v7392_v47  ;;  %v7446_v63 = vadd.f32 %v7445_v55, %v7444_v46  ;;  %v15473_v0 = vld [vmem:[%s11312_s12 + $0xe8] sm:$0xff]   ;;  %v15501_v50 = vpop.permute.xlu0 %7197 }
 0x6cc   : > { %v15454_v3 = vpop.permute.xlu1 %7094  ;;  %v7284_v46 = vunpack.c.l.bf16 %v15434_v58  ;;  %v7262_v53 = vunpack.c.l.bf16 %v15438_v14  ;;  %v7408_v55 = vadd.f32 %v7407_v15, %v7406_v28  ;;  %v7331_v28 = vmul.f32 %v7267_v52, %v15315_v33 }
 0x6cd   : > { %v7412_v20 = vrot.slane %v7411_v26, 2  ;;  %v7459_v45 = vrot.slane %v7458_v30, 4  ;;  %v7447_v17 = vrot.slane %v7446_v63, 2  ;;  %v7327_v15 = vmul.f32 %v7263_v34, %v15397_v54 }
 0x6ce   : > { %v7272_v54 = vunpack.c.l.bf16 %v15444_v40  ;;  %v7455_v34 = vadd.f32 %v7454_v39, %v7453_v2 }
 0x6cf   : > { %v7413_v48 = vadd.f32 %v7412_v20, %v7411_v26  ;;  %v7460_v47 = vadd.f32 %v7459_v45, %v7458_v30  ;;  %v15484_v20 = vld [vmem:[%s11312_s12 + $0xb8] sm:$0xff]   ;;  %v7965_v45 = vsel %vm2248_vm4, %v7394_v6, %v7964_v38  ;;  %v7473_v6 = vrot.slane %v15371_v18, 4 }
 0x6d0   : > { %v15476_v37 = vpop.permute.xlu1 %7171  ;;  %v7966_v13 = vsel %vm2250_vm5, %v7401_v1, %v7965_v45  ;;  %v7479_v38 = vadd.f32 %v7331_v28, %v7330_v21  ;;  %v7448_v52 = vadd.f32 %v7447_v17, %v7446_v63  ;;  %v7332_v1 = vmul.f32 %v7268_v19, %v15391_v22 }
 0x6d1   : > { %v7414_v26 = vrot.slane %v7413_v48, 1  ;;  %v7461_v8 = vrot.slane %v7460_v47, 2  ;;  %v7967_v30 = vsel %vm16462_vm13, %v7408_v55, %v7966_v13  ;;  %v7286_v21 = vunpack.c.l.bf16 %v15451_v57 }
 0x6d2   : > { %v7333_v63 = vmul.f32 %v7269_v49, %v15347_v62  ;;  %v7288_v19 = vunpack.c.l.bf16 %v15462_v61  ;;  %v7474_v2 = vadd.f32 %v7473_v6, %v15371_v18  ;;  %v7480_v45 = vrot.slane %v7479_v38, 4 }
 0x6d3   : > { %v7415_v11 = vadd.f32 %v7414_v26, %v7413_v48  ;;  %v7274_v26 = vunpack.c.l.bf16 %v15458_v10  ;;  %v7462_v17 = vadd.f32 %v7461_v8, %v7460_v47  ;;  %v7276_v28 = vunpack.c.l.bf16 %v15466_v5 }
 0x6d4   : > { %v7051_v43 = vpop.permute.xlu1 %7050  ;;  %v7449_v39 = vrot.slane %v7448_v52, 1  ;;  %v7290_v13 = vunpack.c.l.bf16 %v15473_v0  ;;  %v7456_v62 = vrot.slane %v7455_v34, 1  ;;  %v7344_v49 = vmul.f32 %v7280_v23, %v15394_v27 }
 0x6d5   : > { %v7326_v42 = vmul.f32 %v7262_v53, %v7051_v43  ;;  %v7968_v33 = vsel %vm2254_vm7, %v7415_v11, %v7967_v30  ;;  %v15509_v53 = vld [vmem:[%s11312_s12 + $0xf8] sm:$0xff]   ;;  %v7443_v30 = vadd.f32 %v7442_v56, %v7441_v25  ;;  %v7486_v43 = vadd.f32 %v7333_v63, %v7332_v1  ;;  %v7132_v56 = vpop.permute.xlu0 %7131  ;;  %s16477_s12 = sld [smem:[#allocation129_spill]] }
 0x6d6   : > { %9273 = vmatprep.mubr.f32.mxu1 %v7968_v33  ;;  %v7295_v55 = vunpack.c.h.bf16 %v15509_v53  ;;  %v7334_v18 = vmul.f32 %v7270_v4, %v15454_v3  ;;  %v16463_v25 = vunpack.c.h.bf16 %v15418_v44  ;;  %v7463_v8 = vrot.slane %v7462_v17, 1 }
 0x6d7   : > { %v7465_v14 = vadd.f32 %v7327_v15, %v7326_v42  ;;  %v7971_v33 = vsel %vm2246_vm3, %v7443_v30, %v15357_v32  ;;  %v7475_v36 = vrot.slane %v7474_v2, 2  ;;  %v7481_v51 = vadd.f32 %v7480_v45, %v7479_v38 }
 0x6d8   : > { %v7106_v48 = vpop.permute.xlu1 %7105  ;;  %v7347_v15 = vmul.f32 %v16463_v25, %v15354_v31  ;;  %v7335_v27 = vmul.f32 %v16464_v35, %v15382_v60  ;;  %v7450_v23 = vadd.f32 %v7449_v39, %v7448_v52  ;;  %v7487_v1 = vrot.slane %v7486_v43, 4 }
 0x6d9   : > { %v7466_v22 = vrot.slane %v7465_v14, 4  ;;  %v7336_v6 = vmul.f32 %v7272_v54, %v7106_v48  ;;  %v16465_v3 = vunpack.c.h.bf16 %v15444_v40  ;;  %v7457_v31 = vadd.f32 %v7456_v62, %v7455_v34 }
 0x6da   : > { %v7528_v63 = vadd.f32 %v7345_v16, %v7344_v49  ;;  %v16466_v54 = vunpack.c.h.bf16 %v15458_v10  ;;  %v7493_v32 = vadd.f32 %v7335_v27, %v7334_v18  ;;  %v7464_v38 = vadd.f32 %v7463_v8, %v7462_v17 }
 0x6db   : > { %v7467_v11 = vadd.f32 %v7466_v22, %v7465_v14  ;;  %v7337_v4 = vmul.f32 %v16465_v3, %v15423_v41  ;;  %v7476_v60 = vadd.f32 %v7475_v36, %v7474_v2  ;;  %v7482_v52 = vrot.slane %v7481_v51, 2 }
 0x6dc   : > { %v7183_v47 = vpop.permute.xlu1 %7182  ;;  %v7339_v48 = vmul.f32 %v16466_v54, %v15469_v12  ;;  %v16467_v39 = vunpack.c.h.bf16 %v15434_v58  ;;  %v16468_v41 = vunpack.c.l.bf16 %v15418_v44  ;;  %v7488_v16 = vadd.f32 %v7487_v1, %v7486_v43 }
 0x6dd   : > { %v7468_v42 = vrot.slane %v7467_v11, 2  ;;  %v7500_v45 = vadd.f32 %v7337_v4, %v7336_v6  ;;  %v7972_v62 = vsel %vm2248_vm4, %v7450_v23, %v7971_v33  ;;  %v7494_v17 = vrot.slane %v7493_v32, 4 }
 0x6de   : > { %v7349_v40 = vmul.f32 %v16467_v39, %v15389_v29  ;;  %v7346_v34 = vmul.f32 %v16468_v41, %v15402_v24  ;;  %v7350_v2 = vmul.f32 %v7286_v21, %v7183_v47  ;;  %v7973_v18 = vsel %vm2250_vm5, %v7457_v31, %v7972_v62 }
 0x6df   : > { %v7469_v14 = vadd.f32 %v7468_v42, %v7467_v11  ;;  %v7209_v11 = vpop.permute.xlu0 %7208  ;;  %v7529_v29 = vrot.slane %v7528_v63, 4  ;;  %v16469_v44 = vunpack.c.h.bf16 %v15451_v57  ;;  %v7501_v25 = vrot.slane %v7500_v45, 4 }
 0x6e0   : > { %v7117_v22 = vpop.permute.xlu1 %7116  ;;  %v7974_v43 = vsel %vm16470_vm14, %v7464_v38, %v7973_v18  ;;  %v7535_v8 = vadd.f32 %v7347_v15, %v7346_v34  ;;  %v7477_v36 = vrot.slane %v7476_v60, 1  ;;  %v7483_v58 = vadd.f32 %v7482_v52, %v7481_v51 }
 0x6e1   : > { %v7470_v30 = vrot.slane %v7469_v14, 1  ;;  %v7338_v9 = vmul.f32 %v7274_v26, %v7117_v22  ;;  %v7348_v26 = vmul.f32 %v7284_v46, %v15476_v37  ;;  %v7351_v24 = vmul.f32 %v16469_v44, %v15447_v59 }
 0x6e2   : > { %v7489_v37 = vrot.slane %v7488_v16, 2  ;;  %v7278_v46 = vunpack.c.l.bf16 %v15484_v20  ;;  %v16471_v21 = vunpack.c.h.bf16 %v15462_v61  ;;  %v7495_v57 = vadd.f32 %v7494_v17, %v7493_v32 }
 0x6e3   : > { %v7471_v10 = vadd.f32 %v7470_v30, %v7469_v14  ;;  %v7507_v12 = vadd.f32 %v7339_v48, %v7338_v9  ;;  %v7542_v59 = vadd.f32 %v7349_v40, %v7348_v26  ;;  %v7143_v35 = vpop.permute.xlu0 %7142  ;;  %v7549_v27 = vadd.f32 %v7351_v24, %v7350_v2 }
 0x6e4   : > { %v7194_v49 = vpop.permute.xlu1 %7193  ;;  %v7353_v47 = vmul.f32 %v16471_v21, %v15501_v50  ;;  %v16472_v15 = vunpack.c.h.bf16 %v15466_v5  ;;  %v7502_v1 = vadd.f32 %v7501_v25, %v7500_v45  ;;  %v7292_v3 = vunpack.c.l.bf16 %v15488_v7 }
 0x6e5   : > { %v7508_v42 = vrot.slane %v7507_v12, 4  ;;  %v7352_v6 = vmul.f32 %v7288_v19, %v7194_v49  ;;  %v7975_v33 = vsel %vm2254_vm7, %v7471_v10, %v7974_v43  ;;  %v7530_v4 = vadd.f32 %v7529_v29, %v7528_v63 }
 0x6e6   : > { %9274 = vmatmul.mubr.f32.vlgmr.msra.gmra.mxu1 %v7975_v33  ;;  %v7341_v19 = vmul.f32 %v16472_v15, %v7132_v56  ;;  %v7536_v14 = vrot.slane %v7535_v8, 4  ;;  %v7484_v61 = vrot.slane %v7483_v58, 1  ;;  %v7490_v50 = vadd.f32 %v7489_v37, %v7488_v16 }
 0x6e7   : > { %v7509_v31 = vadd.f32 %v7508_v42, %v7507_v12  ;;  %v7556_v54 = vadd.f32 %v7353_v47, %v7352_v6  ;;  %v7294_v32 = vunpack.c.l.bf16 %v15509_v53  ;;  %v7478_v22 = vadd.f32 %v7477_v36, %v7476_v60  ;;  %v7220_v41 = vpop.permute.xlu0 %7219 }
 0x6e8   : > { %v7128_v23 = vpop.permute.xlu1 %7127  ;;  %v7496_v38 = vrot.slane %v7495_v57, 2  ;;  %v7543_v30 = vrot.slane %v7542_v59, 4  ;;  %v7550_v9 = vrot.slane %v7549_v27, 4  ;;  %v16473_v45 = vunpack.c.h.bf16 %v15473_v0 }
 0x6e9   : > { %v7340_v51 = vmul.f32 %v7276_v28, %v7128_v23  ;;  %v7503_v28 = vrot.slane %v7502_v1, 2  ;;  %v7531_v39 = vrot.slane %v7530_v4, 2  ;;  %v7537_v40 = vadd.f32 %v7536_v14, %v7535_v8 }
 0x6ea   : > { %v7355_v5 = vmul.f32 %v16473_v45, %v7209_v11  ;;  %v7510_v34 = vrot.slane %v7509_v31, 2  ;;  %v7557_v16 = vrot.slane %v7556_v54, 4  ;;  %v7485_v10 = vadd.f32 %v7484_v61, %v7483_v58 }
 0x6eb   : > { %v7514_v48 = vadd.f32 %v7341_v19, %v7340_v51  ;;  %v7491_v12 = vrot.slane %v7490_v50, 1  ;;  %v7497_v17 = vadd.f32 %v7496_v38, %v7495_v57  ;;  %v7544_v26 = vadd.f32 %v7543_v30, %v7542_v59  ;;  %v7231_v21 = vpop.permute.xlu0 %7230 }
 0x6ec   : > { %v7205_v56 = vpop.permute.xlu1 %7204  ;;  %v16474_v2 = vunpack.c.h.bf16 %v15484_v20  ;;  %v7551_v11 = vadd.f32 %v7550_v9, %v7549_v27  ;;  %v7504_v29 = vadd.f32 %v7503_v28, %v7502_v1  ;;  %v7532_v24 = vadd.f32 %v7531_v39, %v7530_v4 }
 0x6ed   : > { %v7515_v52 = vrot.slane %v7514_v48, 4  ;;  %v7354_v63 = vmul.f32 %v7290_v13, %v7205_v56  ;;  %v7538_v25 = vrot.slane %v7537_v40, 2  ;;  %v7511_v43 = vadd.f32 %v7510_v34, %v7509_v31 }
 0x6ee   : > { %v7343_v49 = vmul.f32 %v16474_v2, %v7143_v35  ;;  %v7558_v8 = vadd.f32 %v7557_v16, %v7556_v54  ;;  %v7976_v42 = vsel %vm2242_vm1, %v7485_v10, %v7478_v22  ;;  %v7492_v6 = vadd.f32 %v7491_v12, %v7490_v50 }
 0x6ef   : > { %v7516_v60 = vadd.f32 %v7515_v52, %v7514_v48  ;;  %v7563_v62 = vadd.f32 %v7355_v5, %v7354_v63  ;;  %v7498_v58 = vrot.slane %v7497_v17, 1  ;;  %v7545_v37 = vrot.slane %v7544_v26, 2 }
 0x6f0   : > { %v7139_v18 = vpop.permute.xlu1 %7138  ;;  %v7552_v20 = vrot.slane %v7551_v11, 2  ;;  %v16475_v59 = vunpack.c.h.bf16 %v15488_v7  ;;  %v7505_v27 = vrot.slane %v7504_v29, 1  ;;  %v7533_v15 = vrot.slane %v7532_v24, 1 }
 0x6f1   : > { %v7517_v44 = vrot.slane %v7516_v60, 2  ;;  %v7564_v0 = vrot.slane %v7563_v62, 4  ;;  %v7342_v13 = vmul.f32 %v7278_v46, %v7139_v18  ;;  %v7539_v19 = vadd.f32 %v7538_v25, %v7537_v40 }
 0x6f2   : > { %v7357_v35 = vmul.f32 %v16475_v59, %v7220_v41  ;;  %v7512_v1 = vrot.slane %v7511_v43, 1  ;;  %v7559_v51 = vrot.slane %v7558_v8, 2  ;;  %v7359_v4 = vmul.f32 %v7295_v55, %v7231_v21 }
 0x6f3   : > { %v7565_v33 = vadd.f32 %v7564_v0, %v7563_v62  ;;  %v7521_v36 = vadd.f32 %v7343_v49, %v7342_v13  ;;  %v7518_v47 = vadd.f32 %v7517_v44, %v7516_v60  ;;  %v7499_v61 = vadd.f32 %v7498_v58, %v7497_v17 }
 0x6f4   : > { %v7216_v57 = vpop.permute.xlu1 %7215  ;;  %v7546_v50 = vadd.f32 %v7545_v37, %v7544_v26  ;;  %v7553_v48 = vadd.f32 %v7552_v20, %v7551_v11  ;;  %v7506_v7 = vadd.f32 %v7505_v27, %v7504_v29  ;;  %v7513_v45 = vadd.f32 %v7512_v1, %v7511_v43 }
 0x6f5   : > { %v7522_v46 = vrot.slane %v7521_v36, 4  ;;  %v7356_v23 = vmul.f32 %v7292_v3, %v7216_v57  ;;  %v7566_v14 = vrot.slane %v7565_v33, 2  ;;  %v7519_v22 = vrot.slane %v7518_v47, 1 }
 0x6f6   : > { %v7540_v3 = vrot.slane %v7539_v19, 1  ;;  %v7560_v5 = vadd.f32 %v7559_v51, %v7558_v8  ;;  %v7977_v28 = vsel %vm2244_vm2, %v7492_v6, %v7976_v42  ;;  %v7547_v39 = vrot.slane %v7546_v50, 1 }
 0x6f7   : > { %v7523_v31 = vadd.f32 %v7522_v46, %v7521_v36  ;;  %v7570_v54 = vadd.f32 %v7357_v35, %v7356_v23  ;;  %v7567_v52 = vadd.f32 %v7566_v14, %v7565_v33  ;;  %v7554_v40 = vrot.slane %v7553_v48, 1  ;;  %v8728_v35 = vld [vmem:[%s11314_s29] sm:$0xff]   ;;  %v8743_v23 = vld [vmem:[%s11314_s29 + $0x8] sm:$0xff]   ;;  %s8712_s29 = sld [smem:[#allocation20 + $0x3]] }
 0x6f8   : > { %v7227_v38 = vpop.permute.xlu1 %7226  ;;  %v7520_v41 = vadd.f32 %v7519_v22, %v7518_v47  ;;  %v7978_v34 = vsel %vm2246_vm3, %v7499_v61, %v7977_v28  ;;  %v7561_v62 = vrot.slane %v7560_v5, 1  ;;  %v7534_v18 = vadd.f32 %v7533_v15, %v7532_v24  ;;  %v8736_v15 = vld [vmem:[%s11320_s7] sm:$0xff]  }
 0x6f9   : > { %v7524_v30 = vrot.slane %v7523_v31, 2  ;;  %v7571_v9 = vrot.slane %v7570_v54, 4  ;;  %v7358_v56 = vmul.f32 %v7294_v32, %v7227_v38  ;;  %v7979_v60 = vsel %vm2248_vm4, %v7506_v7, %v7978_v34 }
 0x6fa   : > { %v7541_v32 = vadd.f32 %v7540_v3, %v7539_v19  ;;  %v7980_v17 = vsel %vm2250_vm5, %v7513_v45, %v7979_v60  ;;  %v7568_v26 = vrot.slane %v7567_v52, 1  ;;  %v7548_v29 = vadd.f32 %v7547_v39, %v7546_v50  ;;  %v9199_v3 = vpop.f32.mrf.mxu1 }
 0x6fb   : > { %v7525_v53 = vadd.f32 %v7524_v30, %v7523_v31  ;;  %v7572_v55 = vadd.f32 %v7571_v9, %v7570_v54  ;;  %v7577_v63 = vadd.f32 %v7359_v4, %v7358_v56  ;;  %v7981_v44 = vsel %vm16240_vm0, %v7520_v41, %v7980_v17  ;;  %v8711_v41 = vld [vmem:[%s16477_s12] ss:$0 sm:$0xff] }
 0x6fc   : > { %v7555_v0 = vadd.f32 %v7554_v40, %v7553_v48  ;;  %v7562_v8 = vadd.f32 %v7561_v62, %v7560_v5  ;;  %v7983_v42 = vsel %vm2242_vm1, %v7541_v32, %v7534_v18  ;;  %v7569_v6 = vadd.f32 %v7568_v26, %v7567_v52  ;;  %v7746_v45 = vpop.f32.mrf.mxu1 }
 0x6fd   : > { %v7573_v16 = vrot.slane %v7572_v55, 2  ;;  %v7578_v10 = vrot.slane %v7577_v63, 4  ;;  %v7526_v12 = vrot.slane %v7525_v53, 1  ;;  %v7984_v24 = vsel %vm2244_vm2, %v7548_v29, %v7983_v42 }
 0x6fe   : > { %v7985_v37 = vsel %vm2246_vm3, %v7555_v0, %v7984_v24  ;;  %v8729_v27 = vunpack.c.l.bf16 %v8728_v35  ;;  %v8730_v46 = vunpack.c.h.bf16 %v8728_v35  ;;  %v8733_v19 = vunpack.c.l.bf16 %v8743_v23 }
 0x6ff   : > { %v7574_v2 = vadd.f32 %v7573_v16, %v7572_v55  ;;  %v7579_v49 = vadd.f32 %v7578_v10, %v7577_v63  ;;  %v7527_v11 = vadd.f32 %v7526_v12, %v7525_v53  ;;  %v7986_v21 = vsel %vm2248_vm4, %v7562_v8, %v7985_v37 }
 0x700   : > { %v7987_v47 = vsel %vm2250_vm5, %v7569_v6, %v7986_v21  ;;  %10309 = vtanh.f32 %v8729_v27  ;;  %v8734_v1 = vunpack.c.h.bf16 %v8743_v23  ;;  %v8737_v51 = vunpack.c.l.bf16 %v8736_v15 }
 0x701   : > { %v7575_v13 = vrot.slane %v7574_v2, 1  ;;  %v7580_v25 = vrot.slane %v7579_v49, 2  ;;  %v7982_v43 = vsel %vm2254_vm7, %v7527_v11, %v7981_v44  ;;  %10311 = vtanh.f32 %v8730_v46  ;;  %v8744_v11 = vld [vmem:[%s11320_s7 + $0x8] sm:$0xff]   ;;  %s8516_s7 = sshll.u32 %s11294_s20, 5 }
 0x702   : > { %9276 = vmatprep.mubr.f32.mxu1 %v7982_v43  ;;  %v8738_v4 = vunpack.c.h.bf16 %v8736_v15  ;;  %10313 = vtanh.f32 %v8733_v19  ;;  %v8741_v42 = vunpack.c.l.bf16 %v8744_v11  ;;  %s907_s2 = scalar_lea.vmem [#allocation21], %s8516_s7 }
 0x703   : > { %v7581_v33 = vadd.f32 %v7580_v25, %v7579_v49  ;;  %v7576_v36 = vadd.f32 %v7575_v13, %v7574_v2  ;;  %10315 = vtanh.f32 %v8734_v1  ;;  %v8742_v13 = vunpack.c.h.bf16 %v8744_v11  ;;  %s8246_s11 = sshll.u32 %s907_s2, 4  ;;  %s15631_s11 = int_to_ptr.vmem [resolvable:$true] %s8246_s11 }
 0x704   : > { %10317 = vtanh.f32 %v8737_v51  ;;  %s10744_s30 = scalar_lea.vmem %s15631_s11, 512  ;;  %p10751_p9 = scmp.lt.s32.totalorder %s15631_s11, %s10749_s13 }
 0x705   : > { %v7582_v58 = vrot.slane %v7581_v33, 1  ;;  %v7988_v57 = vsel %vm16476_vm15, %v7576_v36, %v7987_v47  ;;  %10319 = vtanh.f32 %v8738_v4  ;;  %p10745_p3 = scmp.ne.s32.totalorder %s15631_s11, %s10744_s30  ;;  %p10752_p2 = scmp.lt.s32.totalorder %s10750_s6, %s10744_s30 }
 0x707   : > { %v7583_v20 = vadd.f32 %v7582_v58, %v7581_v33  ;;  %p10746_p7 = pnand %p10745_p3, %p16480_p4  ;;  %p10753_p13 = por %p10752_p2, %p10751_p9 }
 0x709   : > { %v7989_v59 = vsel %vm2254_vm7, %v7583_v20, %v7988_v57  ;;  %p10747_p5 = pneg %p10746_p7 }
 0x70a   : > { %9277 = vmatmul.mubr.f32.gmra.mxu1 %v7989_v59 }
 0x70b   : > { %p10754_p10 = pnand %p10753_p13, %p10747_p5 }
 0x70d   : > { %v15595_v14 = vpop.eup %10309 }
 0x70e   : > { %v15597_v31 = vpop.eup %10311  ;;  %v8147_v54 = vmul.f32 %v15595_v14, %v15595_v14 }
 0x70f   : > { %v15601_v61 = vpop.eup %10313  ;;  %v8148_v50 = vmul.f32 %v15597_v31, %v15597_v31 }
 0x710   : > { %v15605_v48 = vpop.eup %10315  ;;  %8151 = vadd.xlane.f32.xlu0 %v8147_v54  ;;  %v8149_v22 = vmul.f32 %v15601_v61, %v15601_v61 }
 0x711   : > { %v15609_v38 = vpop.eup %10317  ;;  %8153 = vadd.xlane.f32.xlu1 %v8148_v50  ;;  %v8150_v7 = vmul.f32 %v15605_v48, %v15605_v48  ;;  %v9202_v5 = vpop.f32.mrf.mxu1 }
 0x712   : > { %v15613_v30 = vpop.eup %10319  ;;  %v8192_v9 = vmul.f32 %v15609_v38, %v15609_v38 }
 0x713   : > { %v8193_v56 = vmul.f32 %v15613_v30, %v15613_v30  ;;  %v7756_v28 = vpop.f32.mrf.mxu1 }
 0x714   : > { %8155 = vadd.xlane.f32.xlu0 %v8149_v22 }
 0x715   : > { %8157 = vadd.xlane.f32.xlu1 %v8150_v7  ;;  %v9237_v52 = vpop.f32.mrf.mxu1 }
 0x716   : > { %v7901_v39 = vadd.f32 %v9237_v52, %v9199_v3 }
 0x717   : > { %v7895_v53 = vpop.f32.mrf.mxu1 }
 0x718   : > { %8196 = vadd.xlane.f32.xlu0 %v8192_v9  ;;  %v7896_v34 = vadd.f32 %v7895_v53, %v7746_v45 }
 0x719   : > { %8198 = vadd.xlane.f32.xlu1 %v8193_v56 }
 0x76b   : > { %v9240_v55 = vpop.f32.mrf.mxu1 }
 0x76c   : > { %v7911_v49 = vadd.f32 %v9240_v55, %v9202_v5 }
 0x76d   : > { %v7905_v63 = vpop.f32.mrf.mxu1 }
 0x76e   : > { %v7906_v29 = vadd.f32 %v7905_v63, %v7756_v28 }
 0x799   : > { %v8152_v1 = vpop.xlane.xlu0 %8151 }
 0x79a   : > { %v8154_v19 = vpop.xlane.xlu1 %8153 }
 0x79d   : > { %v8156_v4 = vpop.xlane.xlu0 %8155 }
 0x79e   : > { %v8158_v51 = vpop.xlane.xlu1 %8157 }
 0x7a6   : > { %v9275_v40 = vpop.f32.mrf.mxu1 }
 0x7a7   : > { %v8080_v16 = vadd.f32 %v9275_v40, %v7901_v39 }
 0x7a8   : > { %v8060_v10 = vpop.f32.mrf.mxu1 }
 0x7a9   : > { %v8091_v12 = vadd.f32 %v8711_v41, %v8080_v16  ;;  %v8079_v60 = vadd.f32 %v8060_v10, %v7896_v34 }
 0x7ab   : > { %10321 = vtanh.f32 %v8091_v12  ;;  %v8090_v32 = vadd.f32 %v8711_v41, %v8079_v60 }
 0x7ad   : > { %10323 = vtanh.f32 %v8090_v32 }
 0x7b8   : > { %v10322_v62 = vpop.eup %10321 }
 0x7b9   : > { %v8136_v17 = vmul.f32 %v10322_v62, %v10322_v62  ;;  %v8124_v47 = vmul.f32 %v10322_v62, %v15597_v31  ;;  %v8181_v27 = vmul.f32 %v10322_v62, %v15613_v30  ;;  %v8197_v31 = vpop.xlane.xlu0 %8196 }
 0x7ba   : > { %v10324_v26 = vpop.eup %10323 }
 0x7bb   : > { %8141 = vadd.xlane.f32.xlu0 %v8136_v17  ;;  %v8135_v2 = vmul.f32 %v10324_v26, %v10324_v26  ;;  %v8123_v57 = vmul.f32 %v10324_v26, %v15595_v14  ;;  %v8180_v35 = vmul.f32 %v10324_v26, %v15609_v38  ;;  %v8199_v14 = vpop.xlane.xlu1 %8198 }
 0x7bd   : > { %8139 = vadd.xlane.f32.xlu1 %v8135_v2  ;;  %v8175_v2 = vstv %s8712_s29 }
 0x7ca   : > { %v9278_v18 = vpop.f32.mrf.mxu1 }
 0x7cb   : > { %v8082_v44 = vadd.f32 %v9278_v18, %v7911_v49 }
 0x7cc   : > { %v8070_v0 = vpop.f32.mrf.mxu1 }
 0x7cd   : > { %v8093_v25 = vadd.f32 %v8711_v41, %v8082_v44  ;;  %v8081_v43 = vadd.f32 %v8070_v0, %v7906_v29 }
 0x7cf   : > { %10325 = vtanh.f32 %v8093_v25  ;;  %v8092_v8 = vadd.f32 %v8711_v41, %v8081_v43 }
 0x7d0   : > { %10327 = vtanh.f32 %v8742_v13 }
 0x7d1   : > { %10329 = vtanh.f32 %v8092_v8 }
 0x7d2   : > { %10331 = vtanh.f32 %v8741_v42 }
 0x7dc   : > { %v10326_v6 = vpop.eup %10325 }
 0x7dd   : > { %v10328_v33 = vpop.eup %10327  ;;  %v8138_v36 = vmul.f32 %v10326_v6, %v10326_v6  ;;  %v8126_v59 = vmul.f32 %v10326_v6, %v15605_v48 }
 0x7de   : > { %v10330_v24 = vpop.eup %10329  ;;  %v8195_v37 = vmul.f32 %v10328_v33, %v10328_v33  ;;  %v8183_v23 = vmul.f32 %v10328_v33, %v10326_v6 }
 0x7df   : > { %8145 = vadd.xlane.f32.xlu1 %v8138_v36  ;;  %v8137_v58 = vmul.f32 %v10330_v24, %v10330_v24  ;;  %v10332_v21 = vpop.eup %10331  ;;  %v8125_v46 = vmul.f32 %v10330_v24, %v15601_v61 }
 0x7e0   : > { %v8194_v20 = vmul.f32 %v10332_v21, %v10332_v21  ;;  %v8182_v15 = vmul.f32 %v10332_v21, %v10330_v24 }
 0x7e1   : > { %8143 = vadd.xlane.f32.xlu0 %v8137_v58 }
 0x7e3   : > { %8202 = vadd.xlane.f32.xlu1 %v8195_v37 }
 0x7e5   : > { %8200 = vadd.xlane.f32.xlu0 %v8194_v20 }
 0x7e7   : > { %8129 = vadd.xlane.f32.xlu1 %v8124_v47 }
 0x7e9   : > { %8127 = vadd.xlane.f32.xlu0 %v8123_v57 }
 0x7eb   : > { %8133 = vadd.xlane.f32.xlu1 %v8126_v59 }
 0x7ed   : > { %8184 = vadd.xlane.f32.xlu0 %v8180_v35 }
 0x7ef   : > { %8186 = vadd.xlane.f32.xlu1 %v8181_v27 }
 0x7f1   : > { %8131 = vadd.xlane.f32.xlu0 %v8125_v46 }
 0x7f3   : > { %8190 = vadd.xlane.f32.xlu1 %v8183_v23 }
 0x7f5   : > { %8188 = vadd.xlane.f32.xlu0 %v8182_v15 }
 0x844   : > { %v8142_v50 = vpop.xlane.xlu0 %8141 }
 0x845   : > { %v8160_v22 = vmul.f32 %v8154_v19, %v8142_v50  ;;  %v8205_v9 = vmul.f32 %v8199_v14, %v8142_v50 }
 0x846   : > { %v8140_v54 = vpop.xlane.xlu1 %8139 }
 0x847   : > { %v8159_v48 = vmul.f32 %v8152_v1, %v8140_v54  ;;  %v8204_v7 = vmul.f32 %v8197_v31, %v8140_v54  ;;  %v8164_v30 = vmax.f32 %v8160_v22, 1e-16  ;;  %v8209_v56 = vmax.f32 %v8205_v9, 1e-16 }
 0x849   : > { %v8163_v38 = vmax.f32 %v8159_v48, 1e-16  ;;  %v8208_v61 = vmax.f32 %v8204_v7, 1e-16 }
 0x84b   : > { %10333 = vrsqrt.f32 %v8163_v38 }
 0x84c   : > { %10335 = vrsqrt.f32 %v8164_v30 }
 0x84d   : > { %10337 = vrsqrt.f32 %v8208_v61 }
 0x84e   : > { %10339 = vrsqrt.f32 %v8209_v56 }
 0x858   : > { %v10334_v10 = vpop.eup %10333 }
 0x859   : > { %v10336_v32 = vpop.eup %10335 }
 0x85a   : > { %v10338_v26 = vpop.eup %10337 }
 0x85b   : > { %v10340_v29 = vpop.eup %10339 }
 0x868   : > { %v8146_v3 = vpop.xlane.xlu1 %8145 }
 0x869   : > { %v8162_v45 = vmul.f32 %v8158_v51, %v8146_v3 }
 0x86a   : > { %v8144_v5 = vpop.xlane.xlu0 %8143 }
 0x86b   : > { %v8166_v28 = vmax.f32 %v8162_v45, 1e-16  ;;  %v8161_v52 = vmul.f32 %v8156_v4, %v8144_v5 }
 0x86c   : > { %v8203_v53 = vpop.xlane.xlu1 %8202 }
 0x86d   : > { %10341 = vrsqrt.f32 %v8166_v28  ;;  %v8165_v55 = vmax.f32 %v8161_v52, 1e-16  ;;  %v8207_v63 = vmul.f32 %v8203_v53, %v8146_v3 }
 0x86e   : > { %v8201_v39 = vpop.xlane.xlu0 %8200 }
 0x86f   : > { %10343 = vrsqrt.f32 %v8165_v55  ;;  %v8211_v40 = vmax.f32 %v8207_v63, 1e-16  ;;  %v8206_v41 = vmul.f32 %v8201_v39, %v8144_v5 }
 0x870   : > { %v8130_v34 = vpop.xlane.xlu1 %8129 }
 0x871   : > { %10345 = vrsqrt.f32 %v8211_v40  ;;  %v8210_v16 = vmax.f32 %v8206_v41, 1e-16  ;;  %v8172_v17 = vmul.f32 %v10336_v32, %v8130_v34 }
 0x872   : > { %v8128_v12 = vpop.xlane.xlu0 %8127 }
 0x873   : > { %10347 = vrsqrt.f32 %v8210_v16  ;;  %v8171_v60 = vmul.f32 %v10334_v10, %v8128_v12  ;;  %v8177_v0 = vsub.f32 %v8175_v2, %v8172_v17 }
 0x874   : > { %v8134_v62 = vpop.xlane.xlu1 %8133 }
 0x875   : > { %v8176_v11 = vsub.f32 %v8175_v2, %v8171_v60 }
 0x876   : > { %v8185_v49 = vpop.xlane.xlu0 %8184 }
 0x877   : > { %v8216_v18 = vmul.f32 %v10338_v26, %v8185_v49 }
 0x878   : > { %v8187_v44 = vpop.xlane.xlu1 %8186 }
 0x879   : > { %v8220_v13 = vadd.f32 %v8216_v18, %v8176_v11  ;;  %v8217_v25 = vmul.f32 %v10340_v29, %v8187_v44 }
 0x87a   : > { %v10342_v43 = vpop.eup %10341  ;;  %v8132_v8 = vpop.xlane.xlu0 %8131 }
 0x87b   : > { %v8174_v42 = vmul.f32 %v10342_v43, %v8134_v62  ;;  %v8224_v6 = vmax.f32 %v8220_v13, 1e-06  ;;  %v8221_v33 = vadd.f32 %v8217_v25, %v8177_v0 }
 0x87c   : > { %v10344_v36 = vpop.eup %10343  ;;  %v8191_v21 = vpop.xlane.xlu1 %8190 }
 0x87d   : > { %8228 = vst [vmem:[%s907_s2] sm:$0xff] %v8224_v6  ;;  %v8225_v24 = vmax.f32 %v8221_v33, 1e-06  ;;  %v8173_v58 = vmul.f32 %v10344_v36, %v8132_v8  ;;  %v8179_v20 = vsub.f32 %v8175_v2, %v8174_v42 }
 0x87e   : > { %v10346_v37 = vpop.eup %10345  ;;  %v8189_v59 = vpop.xlane.xlu0 %8188 }
 0x87f   : > { %8229 = vst [vmem:[%s907_s2 + $0x8] sm:$0xff] %v8225_v24  ;;  %v8219_v47 = vmul.f32 %v10346_v37, %v8191_v21  ;;  %v8178_v35 = vsub.f32 %v8175_v2, %v8173_v58 }
 0x880   : > { %v10348_v57 = vpop.eup %10347 }
 0x881   : > { %v8223_v27 = vadd.f32 %v8219_v47, %v8179_v20  ;;  %v8218_v46 = vmul.f32 %v10348_v57, %v8189_v59 }
 0x883   : > { %v8227_v23 = vmax.f32 %v8223_v27, 1e-06  ;;  %v8222_v15 = vadd.f32 %v8218_v46, %v8178_v35 }
 0x885   : > { %8231 = vst [vmem:[%s907_s2 + $0x18] sm:$0xff] %v8227_v23  ;;  %v8226_v19 = vmax.f32 %v8222_v15, 1e-06 }
 0x887   : > { %8230 = vst [vmem:[%s907_s2 + $0x10] sm:$0xff] %v8226_v19 }
 0x888   : > { %10757 = shalt.err (!%p10754_p10)
}
 0x889   : > { %s10758_s14 = scalar_lea.hbm %s15636_s8, 512  ;;  %s10762_s7 = scalar_lea.hbm %s16479_s4, 1024 }
 0x88a   : > { %p10759_p11 = scmp.ne.s32.totalorder %s15636_s8, %s10758_s14  ;;  %p10763_p6 = scmp.lt.s32.totalorder %s15636_s8, %s16479_s4 }
 0x88b   : > { %p10764_p0 = scmp.lt.s32.totalorder %s10762_s7, %s10758_s14 }
 0x88c   : > { %p10760_p8 = pnand %p10759_p11, %p16480_p4 }
 0x88d   : > { %p10765_p1 = por %p10764_p0, %p10763_p6 }
 0x88e   : > { %p10761_p12 = pneg %p10760_p8 }
 0x890   : > { %p10766_p3 = pnand %p10765_p1, %p10761_p12 }
 0x892   : > { %10769 = shalt.err (!%p10766_p3)
}
 0x893   : > { %s10853_s16 = smov 128   ;;  %s10854_s22 = smov 8  }
 0x894   : > { %9313 = dma.vmem_to_hbm [thread:$0]  (%p16480_p4), %s15631_s11, 512, %s15636_s8, %s8233_s23, %s10853_s16, %s10853_s16, %s10854_s22  }
 0x895 PF: > { %s16481_s30 = sld [smem:[#allocation30_spill]]  ;;  %p16484_p5 = scmp.ge.s32.totalorder %s10832_s24, 2 }
 0x896   : > { %s16482_s27 = sld [smem:[#allocation39_spill]] }
 0x89b   : > { %s8261_s13 = sand.u32 1, %s16481_s30  }
 0x89c   : > { %p16483_p7 = scmp.ne.s32.totalorder %s16482_s27, 0  ;;  %s8262_s6 = scalar_lea.sflag [#allocation4], %s8261_s13 }
 0x89e   : > { %p9351_p9 = pnand %p16484_p5, %p16483_p7 }
 0x8a0   : > { %p9352_p2 = pneg %p9351_p9 }
 0x8a2   : > { %10815 = dma.done.wait (%p9352_p2), %s8262_s6, 512  }
 0x8a3   : > { %10817 = vsyncadd (%p9352_p2), %s8262_s6, 4294966784  ;;  %s16485_s24 = sld [smem:[#allocation35_spill]] }
 0x8a4   : > { %s16486_s1 = sld [smem:[#allocation31_spill]] }
 0x8a5   : > { %s16487_s22 = sld [smem:[#allocation32_spill]] }
 0x8a6   : > { %s16488_s23 = sld [smem:[#allocation36_spill]] }
 0x8a9   : > { %p43_p13 = scmp.ge.s32.totalorder %s16485_s24, 4  }
 0x8ab   :  { %45 = sbr.rel (!%p43_p13) target bundleno = 32 (0x20), region = 221 }
 0x8b0   :  { %8267 = vsyncpa [#allocation3], 1 }
 0x8b1   :  { %8269 = vsyncpa [#allocation3 + $0x1], 1 }
 0x8b2   :  { %8270 = vsyncpa [#allocation7], 1 }
 0x8b3   :  { %8272 = vsyncpa [#allocation7 + $0x1], 1 }
 0x8b4   :  { %8273 = vsyncpa [#allocation10], 1 }
 0x8b5   :  { %8275 = vsyncpa [#allocation10 + $0x1], 1 }
 0x8b6   :  { %8276 = vsyncpa [#allocation13], 1 }
 0x8b7   :  { %8277 = vsyncpa [#allocation16], 1 }
 0x8b8   :  { %8278 = vsyncpa [#allocation19], 1 }
 0x8b9   :  { %8279 = vsyncpa [#allocation4], 1 }
 0x8ba   :  { %8281 = vsyncpa [#allocation4 + $0x1], 1 }
 0x8bb   :  { %8282 = vsyncpa [#allocation5], 1 }
 0x8bc   :  { %8284 = vsyncpa [#allocation5 + $0x1], 1 }

</bundles_post_ra>
